<compile_context>
chip_gen: v5e
topology: v5e:2x2
jax: 0.10.0
libtpu: 0.0.40
codegen_flags: <defaults>
</compile_context>

<pallas_src>
import functools

import jax
import jax.numpy as jnp
from jax.experimental import pallas as pl
from jax.experimental.pallas import tpu as pltpu

K_SIZE = 15
BN_EPS = 1e-5
ACT_DTYPE = jnp.bfloat16       # activation dtype between layers
COMPUTE_DTYPE = jnp.bfloat16   # MXU operand dtype (accumulation is always f32)
VMEM_LIMIT = 48 * 1024 * 1024  # fits v5e/v6e (128 MiB phys) and v7x (64 MiB phys)


def _pick_tile(n, candidates=(512, 256, 128)):
    """Largest lane-dense tile that evenly divides n; fall back to full extent."""
    for c in candidates:
        if n >= c and n % c == 0:
            return c
    return n


# ----------------------------- Pallas kernels -----------------------------

def _conv_kernel(*refs, K, stride, relu, has_residual, n_lt):
    """One (batch, length-tile) block of Conv1d + folded BN (+ReLU) (+fused residual).

    x_ref:  [1, stride, Cin, Lph]  poly-phase padded input (resident across length tiles)
    w_ref:  [K, Cout, Cin]         weights, tap-major so w_ref[k] is a clean 2-D block
    s_ref:  [Cout, 1] f32          folded BN scale
    b_ref:  [Cout, 1] f32          folded BN bias
    r_ref:  [1, Cout, TL]          optional residual, added after the ReLU
    o_ref:  [1, Cout, TL]          output tile (length on lanes -> lane-dense stores)
    """
    if has_residual:
        x_ref, w_ref, s_ref, b_ref, r_ref, o_ref = refs
    else:
        x_ref, w_ref, s_ref, b_ref, o_ref = refs
        r_ref = None
    TL = o_ref.shape[2]
    base = 0 if n_lt == 1 else pl.program_id(1) * TL
    acc = jnp.zeros(o_ref.shape[1:], jnp.float32)                     # [Cout, TL]
    # conv as K shifted-slice matmuls (static unroll) -> no im2col traffic, f32 accumulation
    for k in range(K):
        xk = x_ref[0, k % stride, :, pl.ds(base + k // stride, TL)]   # [Cin, TL]
        acc = acc + jnp.dot(w_ref[k], xk, preferred_element_type=jnp.float32)
    acc = acc * s_ref[...] + b_ref[...]
    if relu:
        acc = jnp.maximum(acc, 0.0)
    if r_ref is not None:
        acc = acc + r_ref[0].astype(jnp.float32)
    o_ref[0] = acc.astype(o_ref.dtype)


def _mm_bias_kernel(a_ref, b_ref, c_ref, o_ref):
    acc = jnp.dot(a_ref[...], b_ref[...], preferred_element_type=jnp.float32)
    o_ref[...] = (acc + c_ref[...]).astype(o_ref.dtype)


def _bigru_kernel(xg_ref, whh_ref, bhn_ref, of_ref, ob_ref, h_ref, *, H):
    """Both GRU directions in one sequential kernel (bwd reversed via index math).

    xg_ref:  [T, B, 6H]  precomputed input gates; cols [0:3H]=fwd(r,z,n), [3H:6H]=bwd(r,z,n)
    whh_ref: [2H, 6H]    block-diag [[Whh_fwd.T, 0], [0, Whh_bwd.T]] -> one matmul per step
    bhn_ref: [1, 2H] f32 recurrent n-gate bias [fwd | bwd]
    of_ref:  [T, B, H]   forward hidden states (time order)
    ob_ref:  [T, B, H]   backward hidden states (time order)
    h_ref:   [B, 2H] f32 scratch hidden state [h_fwd | h_bwd]
    """
    T = xg_ref.shape[0]
    h_ref[...] = jnp.zeros_like(h_ref)

    @pl.loop(0, T)
    def _(t):
        h = h_ref[...]
        gh = jnp.dot(h.astype(COMPUTE_DTYPE), whh_ref[...],
                     preferred_element_type=jnp.float32)              # [B, 6H]
        gi_f = xg_ref[t].astype(jnp.float32)                          # fwd uses time t
        gi_b = xg_ref[T - 1 - t].astype(jnp.float32)                  # bwd uses time T-1-t

        def step(gi3, gh3, bhn, hd):
            r = jax.nn.sigmoid(gi3[:, :H] + gh3[:, :H])
            z = jax.nn.sigmoid(gi3[:, H:2 * H] + gh3[:, H:2 * H])
            n = jnp.tanh(gi3[:, 2 * H:] + r * (gh3[:, 2 * H:] + bhn))
            return (1.0 - z) * n + z * hd

        hf = step(gi_f[:, :3 * H], gh[:, :3 * H], bhn_ref[:, :H], h[:, :H])
        hb = step(gi_b[:, 3 * H:], gh[:, 3 * H:], bhn_ref[:, H:], h[:, H:])
        of_ref[t] = hf.astype(of_ref.dtype)
        ob_ref[T - 1 - t] = hb.astype(ob_ref.dtype)
        h_ref[...] = jnp.concatenate([hf, hb], axis=-1)


# ----------------------------- kernel wrappers -----------------------------

def conv1d_fused(x, p, *, stride=1, padding=K_SIZE // 2, relu=True,
                 residual=None, out_dtype=ACT_DTYPE):
    """Conv1d (+ folded BN) (+ ReLU) (+ fused residual).  x: [B, Cin, L] -> [B, Cout, Lout]."""
    w, scale, bias = p["w"], p["scale"], p["bias"]
    B, Cin, L = x.shape
    Cout, _, K = w.shape
    Lout = (L + 2 * padding - K) // stride + 1
    Lph = Lout + (K - 1) // stride                    # per-phase padded length
    right_pad = stride * Lph - L - padding
    x = x.astype(COMPUTE_DTYPE)
    xpad = jnp.pad(x, ((0, 0), (0, 0), (padding, right_pad)))
    if stride == 1:
        xph = xpad[:, None, :, :]                                        # [B, 1, Cin, Lph]
    else:
        # poly-phase split so strided taps become contiguous slices inside the kernel
        xph = xpad.reshape(B, Cin, Lph, stride).transpose(0, 3, 1, 2)    # [B, s, Cin, Lph]
    w_kcc = jnp.transpose(w, (2, 0, 1)).astype(COMPUTE_DTYPE)            # [K, Cout, Cin]

    TL = _pick_tile(Lout)
    n_lt = Lout // TL
    args = [xph, w_kcc,
            scale.reshape(Cout, 1).astype(jnp.float32),
            bias.reshape(Cout, 1).astype(jnp.float32)]
    in_specs = [
        pl.BlockSpec((1, stride, Cin, Lph), lambda b, l: (b, 0, 0, 0)),
        pl.BlockSpec((K, Cout, Cin), lambda b, l: (0, 0, 0)),
        pl.BlockSpec((Cout, 1), lambda b, l: (0, 0)),
        pl.BlockSpec((Cout, 1), lambda b, l: (0, 0)),
    ]
    if residual is not None:
        args.append(residual.astype(COMPUTE_DTYPE))
        in_specs.append(pl.BlockSpec((1, Cout, TL), lambda b, l: (b, 0, l)))
    return pl.pallas_call(
        functools.partial(_conv_kernel, K=K, stride=stride, relu=relu,
                          has_residual=residual is not None, n_lt=n_lt),
        out_shape=jax.ShapeDtypeStruct((B, Cout, Lout), out_dtype),
        grid=(B, n_lt),
        in_specs=in_specs,
        out_specs=pl.BlockSpec((1, Cout, TL), lambda b, l: (b, 0, l)),
        compiler_params=pltpu.CompilerParams(
            dimension_semantics=("parallel", "arbitrary"),
            vmem_limit_bytes=VMEM_LIMIT),
    )(*args)


def matmul_bias(a, b, bias, out_dtype):
    """out = a @ b + bias; a:[M,K], b:[K,N], bias:[N].  M tiled/pipelined, K & N resident."""
    M, Kd = a.shape
    N = b.shape[1]
    tm = _pick_tile(M)
    return pl.pallas_call(
        _mm_bias_kernel,
        out_shape=jax.ShapeDtypeStruct((M, N), out_dtype),
        grid=(M // tm,),
        in_specs=[pl.BlockSpec((tm, Kd), lambda i: (i, 0)),
                  pl.BlockSpec((Kd, N), lambda i: (0, 0)),
                  pl.BlockSpec((1, N), lambda i: (0, 0))],
        out_specs=pl.BlockSpec((tm, N), lambda i: (i, 0)),
        compiler_params=pltpu.CompilerParams(
            dimension_semantics=("parallel",),
            vmem_limit_bytes=VMEM_LIMIT),
    )(a.astype(COMPUTE_DTYPE), b.astype(COMPUTE_DTYPE),
      bias.reshape(1, N).astype(jnp.float32))


# ----------------------------- model blocks -----------------------------

def conv_block(x, p, stride=1):
    out1 = conv1d_fused(x, p["conv1"], stride=stride, padding=K_SIZE // 2, relu=True)
    if "shortcut" in p:
        residual = conv1d_fused(x, p["shortcut"], stride=stride, padding=K_SIZE // 2, relu=True)
    else:
        residual = x
    # residual add fused into conv2's epilogue (after its ReLU), matching the PyTorch block
    return conv1d_fused(out1, p["conv2"], stride=1, padding=K_SIZE // 2, relu=True,
                        residual=residual)


def bigru_block(x, p):
    """Bidirectional GRU + linear projection.  x: [B, C, T] -> [B, C, T]."""
    B, C, T = x.shape
    H = p["Whh_fwd"].shape[1]
    x_tbc = x.transpose(2, 0, 1)                                       # [T, B, C] time-major

    def gate_bias(bih, bhh):   # b_hr / b_hz fold into input gates; b_hn stays inside r*(.)
        return jnp.concatenate([bih[:2 * H] + bhh[:2 * H], bih[2 * H:]])

    wih_t = jnp.concatenate([p["Wih_fwd"].T, p["Wih_bwd"].T], axis=1)  # [C, 6H]
    bias6 = jnp.concatenate([gate_bias(p["bih_fwd"], p["bhh_fwd"]),
                             gate_bias(p["bih_bwd"], p["bhh_bwd"])])   # [6H]
    xg = matmul_bias(x_tbc.reshape(T * B, C), wih_t, bias6, ACT_DTYPE)
    xg = xg.reshape(T, B, 6 * H)

    whh_blk = jnp.zeros((2 * H, 6 * H), jnp.float32)
    whh_blk = whh_blk.at[:H, :3 * H].set(p["Whh_fwd"].T)
    whh_blk = whh_blk.at[H:, 3 * H:].set(p["Whh_bwd"].T)
    bhn2 = jnp.concatenate([p["bhh_fwd"][2 * H:], p["bhh_bwd"][2 * H:]]).reshape(1, 2 * H)

    out_f, out_b = pl.pallas_call(
        functools.partial(_bigru_kernel, H=H),
        out_shape=(jax.ShapeDtypeStruct((T, B, H), jnp.float32),
                   jax.ShapeDtypeStruct((T, B, H), jnp.float32)),
        in_specs=[pl.BlockSpec(memory_space=pltpu.MemorySpace.VMEM)] * 3,
        out_specs=(pl.BlockSpec(memory_space=pltpu.MemorySpace.VMEM),
                   pl.BlockSpec(memory_space=pltpu.MemorySpace.VMEM)),
        scratch_shapes=[pltpu.VMEM((B, 2 * H), jnp.float32)],
        compiler_params=pltpu.CompilerParams(vmem_limit_bytes=VMEM_LIMIT),
    )(xg, whh_blk.astype(COMPUTE_DTYPE), bhn2.astype(jnp.float32))

    gru_out = jnp.concatenate([out_f, out_b], axis=-1)                 # [T, B, 2H]
    proj = matmul_bias(gru_out.reshape(T * B, 2 * H), p["Wproj"].T, p["bproj"], ACT_DTYPE)
    return proj.reshape(T, B, C).transpose(1, 2, 0)                    # [B, C, T]


def upsample_linear2x(x):
    # nn.Upsample(scale_factor=2, mode='linear', align_corners=True)  (glue: gather + lerp)
    B, C, L = x.shape
    Lo = 2 * L
    pos = jnp.arange(Lo, dtype=jnp.float32) * (L - 1) / (Lo - 1)
    lo = jnp.floor(pos).astype(jnp.int32)
    hi = jnp.minimum(lo + 1, L - 1)
    w = pos - lo.astype(jnp.float32)
    return x[:, :, lo] * (1.0 - w) + x[:, :, hi] * w


# ----------------------------- parameters -----------------------------

def _normal(key, shape, scale=0.1):
    return scale * jax.random.normal(key, shape, dtype=jnp.float32)


def init_conv_bn(key, cin, cout, k):
    ks = jax.random.split(key, 4)
    w = _normal(ks[0], (cout, cin, k))
    gamma = 1.0 + _normal(ks[1], (cout,))
    beta = _normal(ks[2], (cout,))
    mean = _normal(ks[3], (cout,))
    var = jnp.ones((cout,), jnp.float32)
    scale = gamma / jnp.sqrt(var + BN_EPS)
    bias = beta - mean * scale
    return {"w": w, "scale": scale, "bias": bias}


def init_convblock(key, cin, cout, with_shortcut):
    ks = jax.random.split(key, 3)
    p = {"conv1": init_conv_bn(ks[0], cin, cout, K_SIZE),
         "conv2": init_conv_bn(ks[1], cout, cout, K_SIZE)}
    if with_shortcut:
        p["shortcut"] = init_conv_bn(ks[2], cin, cout, K_SIZE)
    return p


def init_bigru(key, C, H):
    ks = jax.random.split(key, 10)
    p = {}
    for i, d in enumerate(("fwd", "bwd")):
        o = i * 4
        p[f"Wih_{d}"] = _normal(ks[o + 0], (3 * H, C))
        p[f"Whh_{d}"] = _normal(ks[o + 1], (3 * H, H))
        p[f"bih_{d}"] = _normal(ks[o + 2], (3 * H,))
        p[f"bhh_{d}"] = _normal(ks[o + 3], (3 * H,))
    p["Wproj"] = _normal(ks[8], (C, 2 * H))
    p["bproj"] = _normal(ks[9], (C,))
    return p


def init_freqnet(key, in_chans=1, base=8):
    ks = jax.random.split(key, 16)
    return {
        "encoder1": init_conv_bn(ks[0], in_chans, base, K_SIZE),
        "encoder2": init_convblock(ks[1], base, base, False),
        "down1": init_convblock(ks[2], base, base * 2, True),
        "encoder3": init_convblock(ks[3], base * 2, base * 2, False),
        "down2": init_convblock(ks[4], base * 2, base * 4, True),
        "encoder4": init_convblock(ks[5], base * 4, base * 4, False),
        "bottleneck": init_convblock(ks[6], base * 4, base * 4, False),
        "decoder1": init_convblock(ks[7], base * 4, base * 4, False),
        "gru1": init_bigru(ks[8], base * 4, base * 4),
        "up1": init_conv_bn(ks[9], base * 4, base * 2, K_SIZE),
        "decoder2": init_convblock(ks[10], base * 2, base * 2, False),
        "gru2": init_bigru(ks[11], base * 2, base * 2),
        "up2": init_conv_bn(ks[12], base * 2, base, K_SIZE),
        "decoder3": init_convblock(ks[13], base, base, False),
        "final_w": _normal(ks[14], (in_chans, base, 1)),
        "final_b": _normal(ks[15], (in_chans,)),
    }


# ----------------------------- forward -----------------------------

def freqnet_forward(x, P):
    e1 = conv1d_fused(x, P["encoder1"], stride=1, padding=K_SIZE // 2, relu=True)
    e2 = conv_block(e1, P["encoder2"])
    e3 = conv_block(e2, P["down1"], stride=2)
    e4 = conv_block(e3, P["encoder3"])
    e5 = conv_block(e4, P["down2"], stride=2)
    e6 = conv_block(e5, P["encoder4"])
    b = conv_block(e6, P["bottleneck"])
    d1 = conv_block(b, P["decoder1"])
    d1 = bigru_block(d1, P["gru1"]) + e6
    d2 = conv1d_fused(upsample_linear2x(d1), P["up1"], stride=1, padding=K_SIZE // 2,
                      relu=True, residual=e4)
    d3 = conv_block(d2, P["decoder2"])
    d3 = bigru_block(d3, P["gru2"]) + e3
    d4 = conv1d_fused(upsample_linear2x(d3), P["up2"], stride=1, padding=K_SIZE // 2,
                      relu=True, residual=e1)
    d5 = conv_block(d4, P["decoder3"])
    final_p = {"w": P["final_w"],
               "scale": jnp.ones((P["final_w"].shape[0],), jnp.float32),
               "bias": P["final_b"]}
    return conv1d_fused(d5, final_p, stride=1, padding=0, relu=False,
                        out_dtype=jnp.float32)


if __name__ == "__main__":
    key = jax.random.PRNGKey(0)
    pkey, xkey = jax.random.split(key)
    in_chans, base, B, L = 1, 8, 2, 16          # L divisible by 4 so the U-Net skips align
    params = init_freqnet(pkey, in_chans, base)
    x = jax.random.normal(xkey, (B, in_chans, L), dtype=jnp.float32)
    out = jax.jit(freqnet_forward)(x, params)
    jax.block_until_ready(out)
    assert out.shape == (B, in_chans, L), out.shape
    assert bool(jnp.all(jnp.isfinite(out)))
    print("KERNEL_OK")
</pallas_src>

<mosaic_0001>
module attributes {stable_mosaic.version = 11 : i64} {
  func.func @_conv_kernel(%arg0: i32, %arg1: i32, %arg2: memref<1x1x8x30xbf16, #tpu.memory_space<vmem>>, %arg3: memref<15x8x8xbf16, #tpu.memory_space<vmem>>, %arg4: memref<8x1xf32, #tpu.memory_space<vmem>>, %arg5: memref<8x1xf32, #tpu.memory_space<vmem>>, %arg6: memref<1x8x16xbf16, #tpu.memory_space<vmem>>) attributes {dimension_semantics = [#tpu.dimension_semantics<parallel>, #tpu.dimension_semantics<arbitrary>], iteration_bounds = array<i64: 2, 1>, scalar_prefetch = 0 : i64, scratch_operands = 0 : i64, tpu.core_type = #tpu.core_type<tc>, window_params = [{transform_indices = @transform_0, window_bounds = array<i64: 1, 1, 8, 30>}, {pipeline_mode = #tpu.pipeline_mode<synchronous>, transform_indices = @transform_1, window_bounds = array<i64: 15, 8, 8>}, {pipeline_mode = #tpu.pipeline_mode<synchronous>, transform_indices = @transform_2, window_bounds = array<i64: 8, 1>}, {pipeline_mode = #tpu.pipeline_mode<synchronous>, transform_indices = @transform_3, window_bounds = array<i64: 8, 1>}, {transform_indices = @transform_4, window_bounds = array<i64: 1, 8, 16>}]} {
    %cst = arith.constant 0.000000e+00 : f32
    %0 = vector.broadcast %cst : f32 to vector<8x16xf32>
    %c0 = arith.constant 0 : index
    %c0_0 = arith.constant 0 : index
    %c0_1 = arith.constant 0 : index
    %c0_2 = arith.constant 0 : index
    %1 = vector.load %arg2[%c0, %c0_0, %c0_1, %c0_2] : memref<1x1x8x30xbf16, #tpu.memory_space<vmem>>, vector<1x1x8x16xbf16>
    %2 = vector.shape_cast %1 : vector<1x1x8x16xbf16> to vector<8x16xbf16>
    %c0_3 = arith.constant 0 : index
    %c0_4 = arith.constant 0 : index
    %c0_5 = arith.constant 0 : index
    %3 = vector.load %arg3[%c0_3, %c0_4, %c0_5] : memref<15x8x8xbf16, #tpu.memory_space<vmem>>, vector<1x8x8xbf16>
    %4 = vector.shape_cast %3 : vector<1x8x8xbf16> to vector<8x8xbf16>
    %cst_6 = arith.constant dense<0.000000e+00> : vector<8x16xf32>
    %5 = tpu.matmul %4, %2, %cst_6 {dimension_numbers = #tpu.dot_dimension_numbers<[1], [0], [0], [1], [0, 0, 1, 1], [], []>} : vector<8x8xbf16>, vector<8x16xbf16>, vector<8x16xf32> -> vector<8x16xf32>
    %6 = arith.addf %0, %5 : vector<8x16xf32>
    %c0_7 = arith.constant 0 : index
    %c0_8 = arith.constant 0 : index
    %c0_9 = arith.constant 0 : index
    %c1 = arith.constant 1 : index
    %7 = vector.load %arg2[%c0_7, %c0_8, %c0_9, %c1] : memref<1x1x8x30xbf16, #tpu.memory_space<vmem>>, vector<1x1x8x16xbf16>
    %8 = vector.shape_cast %7 : vector<1x1x8x16xbf16> to vector<8x16xbf16>
    %c1_10 = arith.constant 1 : index
    %c0_11 = arith.constant 0 : index
    %c0_12 = arith.constant 0 : index
    %9 = vector.load %arg3[%c1_10, %c0_11, %c0_12] : memref<15x8x8xbf16, #tpu.memory_space<vmem>>, vector<1x8x8xbf16>
    %10 = vector.shape_cast %9 : vector<1x8x8xbf16> to vector<8x8xbf16>
    %cst_13 = arith.constant dense<0.000000e+00> : vector<8x16xf32>
    %11 = tpu.matmul %10, %8, %cst_13 {dimension_numbers = #tpu.dot_dimension_numbers<[1], [0], [0], [1], [0, 0, 1, 1], [], []>} : vector<8x8xbf16>, vector<8x16xbf16>, vector<8x16xf32> -> vector<8x16xf32>
    %12 = arith.addf %6, %11 : vector<8x16xf32>
    %c0_14 = arith.constant 0 : index
    %c0_15 = arith.constant 0 : index
    %c0_16 = arith.constant 0 : index
    %c2 = arith.constant 2 : index
    %13 = vector.load %arg2[%c0_14, %c0_15, %c0_16, %c2] : memref<1x1x8x30xbf16, #tpu.memory_space<vmem>>, vector<1x1x8x16xbf16>
    %14 = vector.shape_cast %13 : vector<1x1x8x16xbf16> to vector<8x16xbf16>
    %c2_17 = arith.constant 2 : index
    %c0_18 = arith.constant 0 : index
    %c0_19 = arith.constant 0 : index
    %15 = vector.load %arg3[%c2_17, %c0_18, %c0_19] : memref<15x8x8xbf16, #tpu.memory_space<vmem>>, vector<1x8x8xbf16>
    %16 = vector.shape_cast %15 : vector<1x8x8xbf16> to vector<8x8xbf16>
    %cst_20 = arith.constant dense<0.000000e+00> : vector<8x16xf32>
    %17 = tpu.matmul %16, %14, %cst_20 {dimension_numbers = #tpu.dot_dimension_numbers<[1], [0], [0], [1], [0, 0, 1, 1], [], []>} : vector<8x8xbf16>, vector<8x16xbf16>, vector<8x16xf32> -> vector<8x16xf32>
    %18 = arith.addf %12, %17 : vector<8x16xf32>
    %c0_21 = arith.constant 0 : index
    %c0_22 = arith.constant 0 : index
    %c0_23 = arith.constant 0 : index
    %c3 = arith.constant 3 : index
    %19 = vector.load %arg2[%c0_21, %c0_22, %c0_23, %c3] : memref<1x1x8x30xbf16, #tpu.memory_space<vmem>>, vector<1x1x8x16xbf16>
    %20 = vector.shape_cast %19 : vector<1x1x8x16xbf16> to vector<8x16xbf16>
    %c3_24 = arith.constant 3 : index
    %c0_25 = arith.constant 0 : index
    %c0_26 = arith.constant 0 : index
    %21 = vector.load %arg3[%c3_24, %c0_25, %c0_26] : memref<15x8x8xbf16, #tpu.memory_space<vmem>>, vector<1x8x8xbf16>
    %22 = vector.shape_cast %21 : vector<1x8x8xbf16> to vector<8x8xbf16>
    %cst_27 = arith.constant dense<0.000000e+00> : vector<8x16xf32>
    %23 = tpu.matmul %22, %20, %cst_27 {dimension_numbers = #tpu.dot_dimension_numbers<[1], [0], [0], [1], [0, 0, 1, 1], [], []>} : vector<8x8xbf16>, vector<8x16xbf16>, vector<8x16xf32> -> vector<8x16xf32>
    %24 = arith.addf %18, %23 : vector<8x16xf32>
    %c0_28 = arith.constant 0 : index
    %c0_29 = arith.constant 0 : index
    %c0_30 = arith.constant 0 : index
    %c4 = arith.constant 4 : index
    %25 = vector.load %arg2[%c0_28, %c0_29, %c0_30, %c4] : memref<1x1x8x30xbf16, #tpu.memory_space<vmem>>, vector<1x1x8x16xbf16>
    %26 = vector.shape_cast %25 : vector<1x1x8x16xbf16> to vector<8x16xbf16>
    %c4_31 = arith.constant 4 : index
    %c0_32 = arith.constant 0 : index
    %c0_33 = arith.constant 0 : index
    %27 = vector.load %arg3[%c4_31, %c0_32, %c0_33] : memref<15x8x8xbf16, #tpu.memory_space<vmem>>, vector<1x8x8xbf16>
    %28 = vector.shape_cast %27 : vector<1x8x8xbf16> to vector<8x8xbf16>
    %cst_34 = arith.constant dense<0.000000e+00> : vector<8x16xf32>
    %29 = tpu.matmul %28, %26, %cst_34 {dimension_numbers = #tpu.dot_dimension_numbers<[1], [0], [0], [1], [0, 0, 1, 1], [], []>} : vector<8x8xbf16>, vector<8x16xbf16>, vector<8x16xf32> -> vector<8x16xf32>
    %30 = arith.addf %24, %29 : vector<8x16xf32>
    %c0_35 = arith.constant 0 : index
    %c0_36 = arith.constant 0 : index
    %c0_37 = arith.constant 0 : index
    %c5 = arith.constant 5 : index
    %31 = vector.load %arg2[%c0_35, %c0_36, %c0_37, %c5] : memref<1x1x8x30xbf16, #tpu.memory_space<vmem>>, vector<1x1x8x16xbf16>
    %32 = vector.shape_cast %31 : vector<1x1x8x16xbf16> to vector<8x16xbf16>
    %c5_38 = arith.constant 5 : index
    %c0_39 = arith.constant 0 : index
    %c0_40 = arith.constant 0 : index
    %33 = vector.load %arg3[%c5_38, %c0_39, %c0_40] : memref<15x8x8xbf16, #tpu.memory_space<vmem>>, vector<1x8x8xbf16>
    %34 = vector.shape_cast %33 : vector<1x8x8xbf16> to vector<8x8xbf16>
    %cst_41 = arith.constant dense<0.000000e+00> : vector<8x16xf32>
    %35 = tpu.matmul %34, %32, %cst_41 {dimension_numbers = #tpu.dot_dimension_numbers<[1], [0], [0], [1], [0, 0, 1, 1], [], []>} : vector<8x8xbf16>, vector<8x16xbf16>, vector<8x16xf32> -> vector<8x16xf32>
    %36 = arith.addf %30, %35 : vector<8x16xf32>
    %c0_42 = arith.constant 0 : index
    %c0_43 = arith.constant 0 : index
    %c0_44 = arith.constant 0 : index
    %c6 = arith.constant 6 : index
    %37 = vector.load %arg2[%c0_42, %c0_43, %c0_44, %c6] : memref<1x1x8x30xbf16, #tpu.memory_space<vmem>>, vector<1x1x8x16xbf16>
    %38 = vector.shape_cast %37 : vector<1x1x8x16xbf16> to vector<8x16xbf16>
    %c6_45 = arith.constant 6 : index
    %c0_46 = arith.constant 0 : index
    %c0_47 = arith.constant 0 : index
    %39 = vector.load %arg3[%c6_45, %c0_46, %c0_47] : memref<15x8x8xbf16, #tpu.memory_space<vmem>>, vector<1x8x8xbf16>
    %40 = vector.shape_cast %39 : vector<1x8x8xbf16> to vector<8x8xbf16>
    %cst_48 = arith.constant dense<0.000000e+00> : vector<8x16xf32>
    %41 = tpu.matmul %40, %38, %cst_48 {dimension_numbers = #tpu.dot_dimension_numbers<[1], [0], [0], [1], [0, 0, 1, 1], [], []>} : vector<8x8xbf16>, vector<8x16xbf16>, vector<8x16xf32> -> vector<8x16xf32>
    %42 = arith.addf %36, %41 : vector<8x16xf32>
    %c0_49 = arith.constant 0 : index
    %c0_50 = arith.constant 0 : index
    %c0_51 = arith.constant 0 : index
    %c7 = arith.constant 7 : index
    %43 = vector.load %arg2[%c0_49, %c0_50, %c0_51, %c7] : memref<1x1x8x30xbf16, #tpu.memory_space<vmem>>, vector<1x1x8x16xbf16>
    %44 = vector.shape_cast %43 : vector<1x1x8x16xbf16> to vector<8x16xbf16>
    %c7_52 = arith.constant 7 : index
    %c0_53 = arith.constant 0 : index
    %c0_54 = arith.constant 0 : index
    %45 = vector.load %arg3[%c7_52, %c0_53, %c0_54] : memref<15x8x8xbf16, #tpu.memory_space<vmem>>, vector<1x8x8xbf16>
    %46 = vector.shape_cast %45 : vector<1x8x8xbf16> to vector<8x8xbf16>
    %cst_55 = arith.constant dense<0.000000e+00> : vector<8x16xf32>
    %47 = tpu.matmul %46, %44, %cst_55 {dimension_numbers = #tpu.dot_dimension_numbers<[1], [0], [0], [1], [0, 0, 1, 1], [], []>} : vector<8x8xbf16>, vector<8x16xbf16>, vector<8x16xf32> -> vector<8x16xf32>
    %48 = arith.addf %42, %47 : vector<8x16xf32>
    %c0_56 = arith.constant 0 : index
    %c0_57 = arith.constant 0 : index
    %c0_58 = arith.constant 0 : index
    %c8 = arith.constant 8 : index
    %49 = vector.load %arg2[%c0_56, %c0_57, %c0_58, %c8] : memref<1x1x8x30xbf16, #tpu.memory_space<vmem>>, vector<1x1x8x16xbf16>
    %50 = vector.shape_cast %49 : vector<1x1x8x16xbf16> to vector<8x16xbf16>
    %c8_59 = arith.constant 8 : index
    %c0_60 = arith.constant 0 : index
    %c0_61 = arith.constant 0 : index
    %51 = vector.load %arg3[%c8_59, %c0_60, %c0_61] : memref<15x8x8xbf16, #tpu.memory_space<vmem>>, vector<1x8x8xbf16>
    %52 = vector.shape_cast %51 : vector<1x8x8xbf16> to vector<8x8xbf16>
    %cst_62 = arith.constant dense<0.000000e+00> : vector<8x16xf32>
    %53 = tpu.matmul %52, %50, %cst_62 {dimension_numbers = #tpu.dot_dimension_numbers<[1], [0], [0], [1], [0, 0, 1, 1], [], []>} : vector<8x8xbf16>, vector<8x16xbf16>, vector<8x16xf32> -> vector<8x16xf32>
    %54 = arith.addf %48, %53 : vector<8x16xf32>
    %c0_63 = arith.constant 0 : index
    %c0_64 = arith.constant 0 : index
    %c0_65 = arith.constant 0 : index
    %c9 = arith.constant 9 : index
    %55 = vector.load %arg2[%c0_63, %c0_64, %c0_65, %c9] : memref<1x1x8x30xbf16, #tpu.memory_space<vmem>>, vector<1x1x8x16xbf16>
    %56 = vector.shape_cast %55 : vector<1x1x8x16xbf16> to vector<8x16xbf16>
    %c9_66 = arith.constant 9 : index
    %c0_67 = arith.constant 0 : index
    %c0_68 = arith.constant 0 : index
    %57 = vector.load %arg3[%c9_66, %c0_67, %c0_68] : memref<15x8x8xbf16, #tpu.memory_space<vmem>>, vector<1x8x8xbf16>
    %58 = vector.shape_cast %57 : vector<1x8x8xbf16> to vector<8x8xbf16>
    %cst_69 = arith.constant dense<0.000000e+00> : vector<8x16xf32>
    %59 = tpu.matmul %58, %56, %cst_69 {dimension_numbers = #tpu.dot_dimension_numbers<[1], [0], [0], [1], [0, 0, 1, 1], [], []>} : vector<8x8xbf16>, vector<8x16xbf16>, vector<8x16xf32> -> vector<8x16xf32>
    %60 = arith.addf %54, %59 : vector<8x16xf32>
    %c0_70 = arith.constant 0 : index
    %c0_71 = arith.constant 0 : index
    %c0_72 = arith.constant 0 : index
    %c10 = arith.constant 10 : index
    %61 = vector.load %arg2[%c0_70, %c0_71, %c0_72, %c10] : memref<1x1x8x30xbf16, #tpu.memory_space<vmem>>, vector<1x1x8x16xbf16>
    %62 = vector.shape_cast %61 : vector<1x1x8x16xbf16> to vector<8x16xbf16>
    %c10_73 = arith.constant 10 : index
    %c0_74 = arith.constant 0 : index
    %c0_75 = arith.constant 0 : index
    %63 = vector.load %arg3[%c10_73, %c0_74, %c0_75] : memref<15x8x8xbf16, #tpu.memory_space<vmem>>, vector<1x8x8xbf16>
    %64 = vector.shape_cast %63 : vector<1x8x8xbf16> to vector<8x8xbf16>
    %cst_76 = arith.constant dense<0.000000e+00> : vector<8x16xf32>
    %65 = tpu.matmul %64, %62, %cst_76 {dimension_numbers = #tpu.dot_dimension_numbers<[1], [0], [0], [1], [0, 0, 1, 1], [], []>} : vector<8x8xbf16>, vector<8x16xbf16>, vector<8x16xf32> -> vector<8x16xf32>
    %66 = arith.addf %60, %65 : vector<8x16xf32>
    %c0_77 = arith.constant 0 : index
    %c0_78 = arith.constant 0 : index
    %c0_79 = arith.constant 0 : index
    %c11 = arith.constant 11 : index
    %67 = vector.load %arg2[%c0_77, %c0_78, %c0_79, %c11] : memref<1x1x8x30xbf16, #tpu.memory_space<vmem>>, vector<1x1x8x16xbf16>
    %68 = vector.shape_cast %67 : vector<1x1x8x16xbf16> to vector<8x16xbf16>
    %c11_80 = arith.constant 11 : index
    %c0_81 = arith.constant 0 : index
    %c0_82 = arith.constant 0 : index
    %69 = vector.load %arg3[%c11_80, %c0_81, %c0_82] : memref<15x8x8xbf16, #tpu.memory_space<vmem>>, vector<1x8x8xbf16>
    %70 = vector.shape_cast %69 : vector<1x8x8xbf16> to vector<8x8xbf16>
    %cst_83 = arith.constant dense<0.000000e+00> : vector<8x16xf32>
    %71 = tpu.matmul %70, %68, %cst_83 {dimension_numbers = #tpu.dot_dimension_numbers<[1], [0], [0], [1], [0, 0, 1, 1], [], []>} : vector<8x8xbf16>, vector<8x16xbf16>, vector<8x16xf32> -> vector<8x16xf32>
    %72 = arith.addf %66, %71 : vector<8x16xf32>
    %c0_84 = arith.constant 0 : index
    %c0_85 = arith.constant 0 : index
    %c0_86 = arith.constant 0 : index
    %c12 = arith.constant 12 : index
    %73 = vector.load %arg2[%c0_84, %c0_85, %c0_86, %c12] : memref<1x1x8x30xbf16, #tpu.memory_space<vmem>>, vector<1x1x8x16xbf16>
    %74 = vector.shape_cast %73 : vector<1x1x8x16xbf16> to vector<8x16xbf16>
    %c12_87 = arith.constant 12 : index
    %c0_88 = arith.constant 0 : index
    %c0_89 = arith.constant 0 : index
    %75 = vector.load %arg3[%c12_87, %c0_88, %c0_89] : memref<15x8x8xbf16, #tpu.memory_space<vmem>>, vector<1x8x8xbf16>
    %76 = vector.shape_cast %75 : vector<1x8x8xbf16> to vector<8x8xbf16>
    %cst_90 = arith.constant dense<0.000000e+00> : vector<8x16xf32>
    %77 = tpu.matmul %76, %74, %cst_90 {dimension_numbers = #tpu.dot_dimension_numbers<[1], [0], [0], [1], [0, 0, 1, 1], [], []>} : vector<8x8xbf16>, vector<8x16xbf16>, vector<8x16xf32> -> vector<8x16xf32>
    %78 = arith.addf %72, %77 : vector<8x16xf32>
    %c0_91 = arith.constant 0 : index
    %c0_92 = arith.constant 0 : index
    %c0_93 = arith.constant 0 : index
    %c13 = arith.constant 13 : index
    %79 = vector.load %arg2[%c0_91, %c0_92, %c0_93, %c13] : memref<1x1x8x30xbf16, #tpu.memory_space<vmem>>, vector<1x1x8x16xbf16>
    %80 = vector.shape_cast %79 : vector<1x1x8x16xbf16> to vector<8x16xbf16>
    %c13_94 = arith.constant 13 : index
    %c0_95 = arith.constant 0 : index
    %c0_96 = arith.constant 0 : index
    %81 = vector.load %arg3[%c13_94, %c0_95, %c0_96] : memref<15x8x8xbf16, #tpu.memory_space<vmem>>, vector<1x8x8xbf16>
    %82 = vector.shape_cast %81 : vector<1x8x8xbf16> to vector<8x8xbf16>
    %cst_97 = arith.constant dense<0.000000e+00> : vector<8x16xf32>
    %83 = tpu.matmul %82, %80, %cst_97 {dimension_numbers = #tpu.dot_dimension_numbers<[1], [0], [0], [1], [0, 0, 1, 1], [], []>} : vector<8x8xbf16>, vector<8x16xbf16>, vector<8x16xf32> -> vector<8x16xf32>
    %84 = arith.addf %78, %83 : vector<8x16xf32>
    %c0_98 = arith.constant 0 : index
    %c0_99 = arith.constant 0 : index
    %c0_100 = arith.constant 0 : index
    %c14 = arith.constant 14 : index
    %85 = vector.load %arg2[%c0_98, %c0_99, %c0_100, %c14] : memref<1x1x8x30xbf16, #tpu.memory_space<vmem>>, vector<1x1x8x16xbf16>
    %86 = vector.shape_cast %85 : vector<1x1x8x16xbf16> to vector<8x16xbf16>
    %c14_101 = arith.constant 14 : index
    %c0_102 = arith.constant 0 : index
    %c0_103 = arith.constant 0 : index
    %87 = vector.load %arg3[%c14_101, %c0_102, %c0_103] : memref<15x8x8xbf16, #tpu.memory_space<vmem>>, vector<1x8x8xbf16>
    %88 = vector.shape_cast %87 : vector<1x8x8xbf16> to vector<8x8xbf16>
    %cst_104 = arith.constant dense<0.000000e+00> : vector<8x16xf32>
    %89 = tpu.matmul %88, %86, %cst_104 {dimension_numbers = #tpu.dot_dimension_numbers<[1], [0], [0], [1], [0, 0, 1, 1], [], []>} : vector<8x8xbf16>, vector<8x16xbf16>, vector<8x16xf32> -> vector<8x16xf32>
    %90 = arith.addf %84, %89 : vector<8x16xf32>
    %c0_105 = arith.constant 0 : index
    %c0_106 = arith.constant 0 : index
    %91 = vector.load %arg4[%c0_105, %c0_106] : memref<8x1xf32, #tpu.memory_space<vmem>>, vector<8x1xf32>
    %92 = vector.broadcast %91 : vector<8x1xf32> to vector<8x16xf32>
    %93 = arith.mulf %90, %92 : vector<8x16xf32>
    %c0_107 = arith.constant 0 : index
    %c0_108 = arith.constant 0 : index
    %94 = vector.load %arg5[%c0_107, %c0_108] : memref<8x1xf32, #tpu.memory_space<vmem>>, vector<8x1xf32>
    %95 = vector.broadcast %94 : vector<8x1xf32> to vector<8x16xf32>
    %96 = arith.addf %93, %95 : vector<8x16xf32>
    %cst_109 = arith.constant 0.000000e+00 : f32
    %97 = vector.broadcast %cst_109 : f32 to vector<8x16xf32>
    %98 = arith.maximumf %96, %97 : vector<8x16xf32>
    %99 = arith.truncf %98 : vector<8x16xf32> to vector<8x16xbf16>
    %c0_110 = arith.constant 0 : index
    %c0_111 = arith.constant 0 : index
    %c0_112 = arith.constant 0 : index
    %100 = vector.load %arg6[%c0_110, %c0_111, %c0_112] : memref<1x8x16xbf16, #tpu.memory_space<vmem>>, vector<1x8x16xbf16>
    %101 = vector.shape_cast %100 : vector<1x8x16xbf16> to vector<8x16xbf16>
    %102 = vector.shape_cast %99 : vector<8x16xbf16> to vector<1x8x16xbf16>
    tpu.vector_store %arg6[%c0_110, %c0_111, %c0_112], %102 {strides = array<i32>} : memref<1x8x16xbf16, #tpu.memory_space<vmem>>, vector<1x8x16xbf16>,
    return
  }
  func.func @transform_0(%arg0: i32, %arg1: i32) -> (i32, i32, i32, i32) {
    %c0_i32 = arith.constant 0 : i32
    %c0_i32_0 = arith.constant 0 : i32
    %c0_i32_1 = arith.constant 0 : i32
    %c0_i32_2 = arith.constant 0 : i32
    return %arg0, %c0_i32, %c0_i32_0, %c0_i32_1 : i32, i32, i32, i32
  }
  func.func @transform_1(%arg0: i32, %arg1: i32) -> (i32, i32, i32) {
    %c0_i32 = arith.constant 0 : i32
    %c0_i32_0 = arith.constant 0 : i32
    %c0_i32_1 = arith.constant 0 : i32
    %c0_i32_2 = arith.constant 0 : i32
    return %c0_i32, %c0_i32_0, %c0_i32_1 : i32, i32, i32
  }
  func.func @transform_2(%arg0: i32, %arg1: i32) -> (i32, i32) {
    %c0_i32 = arith.constant 0 : i32
    %c0_i32_0 = arith.constant 0 : i32
    %c0_i32_1 = arith.constant 0 : i32
    return %c0_i32, %c0_i32_0 : i32, i32
  }
  func.func @transform_3(%arg0: i32, %arg1: i32) -> (i32, i32) {
    %c0_i32 = arith.constant 0 : i32
    %c0_i32_0 = arith.constant 0 : i32
    %c0_i32_1 = arith.constant 0 : i32
    return %c0_i32, %c0_i32_0 : i32, i32
  }
  func.func @transform_4(%arg0: i32, %arg1: i32) -> (i32, i32, i32) {
    %c0_i32 = arith.constant 0 : i32
    %c0_i32_0 = arith.constant 0 : i32
    return %arg0, %c0_i32, %arg1 : i32, i32, i32
  }
}

module attributes {stable_mosaic.version = 11 : i64} {
  func.func @_conv_kernel(%arg0: i32, %arg1: i32, %arg2: memref<1x1x8x30xbf16, #tpu.memory_space<vmem>>, %arg3: memref<15x8x8xbf16, #tpu.memory_space<vmem>>, %arg4: memref<8x1xf32, #tpu.memory_space<vmem>>, %arg5: memref<8x1xf32, #tpu.memory_space<vmem>>, %arg6: memref<1x8x16xbf16, #tpu.memory_space<vmem>>, %arg7: memref<1x8x16xbf16, #tpu.memory_space<vmem>>) attributes {dimension_semantics = [#tpu.dimension_semantics<parallel>, #tpu.dimension_semantics<arbitrary>], iteration_bounds = array<i64: 2, 1>, scalar_prefetch = 0 : i64, scratch_operands = 0 : i64, tpu.core_type = #tpu.core_type<tc>, window_params = [{transform_indices = @transform_0, window_bounds = array<i64: 1, 1, 8, 30>}, {pipeline_mode = #tpu.pipeline_mode<synchronous>, transform_indices = @transform_1, window_bounds = array<i64: 15, 8, 8>}, {pipeline_mode = #tpu.pipeline_mode<synchronous>, transform_indices = @transform_2, window_bounds = array<i64: 8, 1>}, {pipeline_mode = #tpu.pipeline_mode<synchronous>, transform_indices = @transform_3, window_bounds = array<i64: 8, 1>}, {transform_indices = @transform_4, window_bounds = array<i64: 1, 8, 16>}, {transform_indices = @transform_5, window_bounds = array<i64: 1, 8, 16>}]} {
    %cst = arith.constant 0.000000e+00 : f32
    %0 = vector.broadcast %cst : f32 to vector<8x16xf32>
    %c0 = arith.constant 0 : index
    %c0_0 = arith.constant 0 : index
    %c0_1 = arith.constant 0 : index
    %c0_2 = arith.constant 0 : index
    %1 = vector.load %arg2[%c0, %c0_0, %c0_1, %c0_2] : memref<1x1x8x30xbf16, #tpu.memory_space<vmem>>, vector<1x1x8x16xbf16>
    %2 = vector.shape_cast %1 : vector<1x1x8x16xbf16> to vector<8x16xbf16>
    %c0_3 = arith.constant 0 : index
    %c0_4 = arith.constant 0 : index
    %c0_5 = arith.constant 0 : index
    %3 = vector.load %arg3[%c0_3, %c0_4, %c0_5] : memref<15x8x8xbf16, #tpu.memory_space<vmem>>, vector<1x8x8xbf16>
    %4 = vector.shape_cast %3 : vector<1x8x8xbf16> to vector<8x8xbf16>
    %cst_6 = arith.constant dense<0.000000e+00> : vector<8x16xf32>
    %5 = tpu.matmul %4, %2, %cst_6 {dimension_numbers = #tpu.dot_dimension_numbers<[1], [0], [0], [1], [0, 0, 1, 1], [], []>} : vector<8x8xbf16>, vector<8x16xbf16>, vector<8x16xf32> -> vector<8x16xf32>
    %6 = arith.addf %0, %5 : vector<8x16xf32>
    %c0_7 = arith.constant 0 : index
    %c0_8 = arith.constant 0 : index
    %c0_9 = arith.constant 0 : index
    %c1 = arith.constant 1 : index
    %7 = vector.load %arg2[%c0_7, %c0_8, %c0_9, %c1] : memref<1x1x8x30xbf16, #tpu.memory_space<vmem>>, vector<1x1x8x16xbf16>
    %8 = vector.shape_cast %7 : vector<1x1x8x16xbf16> to vector<8x16xbf16>
    %c1_10 = arith.constant 1 : index
    %c0_11 = arith.constant 0 : index
    %c0_12 = arith.constant 0 : index
    %9 = vector.load %arg3[%c1_10, %c0_11, %c0_12] : memref<15x8x8xbf16, #tpu.memory_space<vmem>>, vector<1x8x8xbf16>
    %10 = vector.shape_cast %9 : vector<1x8x8xbf16> to vector<8x8xbf16>
    %cst_13 = arith.constant dense<0.000000e+00> : vector<8x16xf32>
    %11 = tpu.matmul %10, %8, %cst_13 {dimension_numbers = #tpu.dot_dimension_numbers<[1], [0], [0], [1], [0, 0, 1, 1], [], []>} : vector<8x8xbf16>, vector<8x16xbf16>, vector<8x16xf32> -> vector<8x16xf32>
    %12 = arith.addf %6, %11 : vector<8x16xf32>
    %c0_14 = arith.constant 0 : index
    %c0_15 = arith.constant 0 : index
    %c0_16 = arith.constant 0 : index
    %c2 = arith.constant 2 : index
    %13 = vector.load %arg2[%c0_14, %c0_15, %c0_16, %c2] : memref<1x1x8x30xbf16, #tpu.memory_space<vmem>>, vector<1x1x8x16xbf16>
    %14 = vector.shape_cast %13 : vector<1x1x8x16xbf16> to vector<8x16xbf16>
    %c2_17 = arith.constant 2 : index
    %c0_18 = arith.constant 0 : index
    %c0_19 = arith.constant 0 : index
    %15 = vector.load %arg3[%c2_17, %c0_18, %c0_19] : memref<15x8x8xbf16, #tpu.memory_space<vmem>>, vector<1x8x8xbf16>
    %16 = vector.shape_cast %15 : vector<1x8x8xbf16> to vector<8x8xbf16>
    %cst_20 = arith.constant dense<0.000000e+00> : vector<8x16xf32>
    %17 = tpu.matmul %16, %14, %cst_20 {dimension_numbers = #tpu.dot_dimension_numbers<[1], [0], [0], [1], [0, 0, 1, 1], [], []>} : vector<8x8xbf16>, vector<8x16xbf16>, vector<8x16xf32> -> vector<8x16xf32>
    %18 = arith.addf %12, %17 : vector<8x16xf32>
    %c0_21 = arith.constant 0 : index
    %c0_22 = arith.constant 0 : index
    %c0_23 = arith.constant 0 : index
    %c3 = arith.constant 3 : index
    %19 = vector.load %arg2[%c0_21, %c0_22, %c0_23, %c3] : memref<1x1x8x30xbf16, #tpu.memory_space<vmem>>, vector<1x1x8x16xbf16>
    %20 = vector.shape_cast %19 : vector<1x1x8x16xbf16> to vector<8x16xbf16>
    %c3_24 = arith.constant 3 : index
    %c0_25 = arith.constant 0 : index
    %c0_26 = arith.constant 0 : index
    %21 = vector.load %arg3[%c3_24, %c0_25, %c0_26] : memref<15x8x8xbf16, #tpu.memory_space<vmem>>, vector<1x8x8xbf16>
    %22 = vector.shape_cast %21 : vector<1x8x8xbf16> to vector<8x8xbf16>
    %cst_27 = arith.constant dense<0.000000e+00> : vector<8x16xf32>
    %23 = tpu.matmul %22, %20, %cst_27 {dimension_numbers = #tpu.dot_dimension_numbers<[1], [0], [0], [1], [0, 0, 1, 1], [], []>} : vector<8x8xbf16>, vector<8x16xbf16>, vector<8x16xf32> -> vector<8x16xf32>
    %24 = arith.addf %18, %23 : vector<8x16xf32>
    %c0_28 = arith.constant 0 : index
    %c0_29 = arith.constant 0 : index
    %c0_30 = arith.constant 0 : index
    %c4 = arith.constant 4 : index
    %25 = vector.load %arg2[%c0_28, %c0_29, %c0_30, %c4] : memref<1x1x8x30xbf16, #tpu.memory_space<vmem>>, vector<1x1x8x16xbf16>
    %26 = vector.shape_cast %25 : vector<1x1x8x16xbf16> to vector<8x16xbf16>
    %c4_31 = arith.constant 4 : index
    %c0_32 = arith.constant 0 : index
    %c0_33 = arith.constant 0 : index
    %27 = vector.load %arg3[%c4_31, %c0_32, %c0_33] : memref<15x8x8xbf16, #tpu.memory_space<vmem>>, vector<1x8x8xbf16>
    %28 = vector.shape_cast %27 : vector<1x8x8xbf16> to vector<8x8xbf16>
    %cst_34 = arith.constant dense<0.000000e+00> : vector<8x16xf32>
    %29 = tpu.matmul %28, %26, %cst_34 {dimension_numbers = #tpu.dot_dimension_numbers<[1], [0], [0], [1], [0, 0, 1, 1], [], []>} : vector<8x8xbf16>, vector<8x16xbf16>, vector<8x16xf32> -> vector<8x16xf32>
    %30 = arith.addf %24, %29 : vector<8x16xf32>
    %c0_35 = arith.constant 0 : index
    %c0_36 = arith.constant 0 : index
    %c0_37 = arith.constant 0 : index
    %c5 = arith.constant 5 : index
    %31 = vector.load %arg2[%c0_35, %c0_36, %c0_37, %c5] : memref<1x1x8x30xbf16, #tpu.memory_space<vmem>>, vector<1x1x8x16xbf16>
    %32 = vector.shape_cast %31 : vector<1x1x8x16xbf16> to vector<8x16xbf16>
    %c5_38 = arith.constant 5 : index
    %c0_39 = arith.constant 0 : index
    %c0_40 = arith.constant 0 : index
    %33 = vector.load %arg3[%c5_38, %c0_39, %c0_40] : memref<15x8x8xbf16, #tpu.memory_space<vmem>>, vector<1x8x8xbf16>
    %34 = vector.shape_cast %33 : vector<1x8x8xbf16> to vector<8x8xbf16>
    %cst_41 = arith.constant dense<0.000000e+00> : vector<8x16xf32>
    %35 = tpu.matmul %34, %32, %cst_41 {dimension_numbers = #tpu.dot_dimension_numbers<[1], [0], [0], [1], [0, 0, 1, 1], [], []>} : vector<8x8xbf16>, vector<8x16xbf16>, vector<8x16xf32> -> vector<8x16xf32>
    %36 = arith.addf %30, %35 : vector<8x16xf32>
    %c0_42 = arith.constant 0 : index
    %c0_43 = arith.constant 0 : index
    %c0_44 = arith.constant 0 : index
    %c6 = arith.constant 6 : index
    %37 = vector.load %arg2[%c0_42, %c0_43, %c0_44, %c6] : memref<1x1x8x30xbf16, #tpu.memory_space<vmem>>, vector<1x1x8x16xbf16>
    %38 = vector.shape_cast %37 : vector<1x1x8x16xbf16> to vector<8x16xbf16>
    %c6_45 = arith.constant 6 : index
    %c0_46 = arith.constant 0 : index
    %c0_47 = arith.constant 0 : index
    %39 = vector.load %arg3[%c6_45, %c0_46, %c0_47] : memref<15x8x8xbf16, #tpu.memory_space<vmem>>, vector<1x8x8xbf16>
    %40 = vector.shape_cast %39 : vector<1x8x8xbf16> to vector<8x8xbf16>
    %cst_48 = arith.constant dense<0.000000e+00> : vector<8x16xf32>
    %41 = tpu.matmul %40, %38, %cst_48 {dimension_numbers = #tpu.dot_dimension_numbers<[1], [0], [0], [1], [0, 0, 1, 1], [], []>} : vector<8x8xbf16>, vector<8x16xbf16>, vector<8x16xf32> -> vector<8x16xf32>
    %42 = arith.addf %36, %41 : vector<8x16xf32>
    %c0_49 = arith.constant 0 : index
    %c0_50 = arith.constant 0 : index
    %c0_51 = arith.constant 0 : index
    %c7 = arith.constant 7 : index
    %43 = vector.load %arg2[%c0_49, %c0_50, %c0_51, %c7] : memref<1x1x8x30xbf16, #tpu.memory_space<vmem>>, vector<1x1x8x16xbf16>
    %44 = vector.shape_cast %43 : vector<1x1x8x16xbf16> to vector<8x16xbf16>
    %c7_52 = arith.constant 7 : index
    %c0_53 = arith.constant 0 : index
    %c0_54 = arith.constant 0 : index
    %45 = vector.load %arg3[%c7_52, %c0_53, %c0_54] : memref<15x8x8xbf16, #tpu.memory_space<vmem>>, vector<1x8x8xbf16>
    %46 = vector.shape_cast %45 : vector<1x8x8xbf16> to vector<8x8xbf16>
    %cst_55 = arith.constant dense<0.000000e+00> : vector<8x16xf32>
    %47 = tpu.matmul %46, %44, %cst_55 {dimension_numbers = #tpu.dot_dimension_numbers<[1], [0], [0], [1], [0, 0, 1, 1], [], []>} : vector<8x8xbf16>, vector<8x16xbf16>, vector<8x16xf32> -> vector<8x16xf32>
    %48 = arith.addf %42, %47 : vector<8x16xf32>
    %c0_56 = arith.constant 0 : index
    %c0_57 = arith.constant 0 : index
    %c0_58 = arith.constant 0 : index
    %c8 = arith.constant 8 : index
    %49 = vector.load %arg2[%c0_56, %c0_57, %c0_58, %c8] : memref<1x1x8x30xbf16, #tpu.memory_space<vmem>>, vector<1x1x8x16xbf16>
    %50 = vector.shape_cast %49 : vector<1x1x8x16xbf16> to vector<8x16xbf16>
    %c8_59 = arith.constant 8 : index
    %c0_60 = arith.constant 0 : index
    %c0_61 = arith.constant 0 : index
    %51 = vector.load %arg3[%c8_59, %c0_60, %c0_61] : memref<15x8x8xbf16, #tpu.memory_space<vmem>>, vector<1x8x8xbf16>
    %52 = vector.shape_cast %51 : vector<1x8x8xbf16> to vector<8x8xbf16>
    %cst_62 = arith.constant dense<0.000000e+00> : vector<8x16xf32>
    %53 = tpu.matmul %52, %50, %cst_62 {dimension_numbers = #tpu.dot_dimension_numbers<[1], [0], [0], [1], [0, 0, 1, 1], [], []>} : vector<8x8xbf16>, vector<8x16xbf16>, vector<8x16xf32> -> vector<8x16xf32>
    %54 = arith.addf %48, %53 : vector<8x16xf32>
    %c0_63 = arith.constant 0 : index
    %c0_64 = arith.constant 0 : index
    %c0_65 = arith.constant 0 : index
    %c9 = arith.constant 9 : index
    %55 = vector.load %arg2[%c0_63, %c0_64, %c0_65, %c9] : memref<1x1x8x30xbf16, #tpu.memory_space<vmem>>, vector<1x1x8x16xbf16>
    %56 = vector.shape_cast %55 : vector<1x1x8x16xbf16> to vector<8x16xbf16>
    %c9_66 = arith.constant 9 : index
    %c0_67 = arith.constant 0 : index
    %c0_68 = arith.constant 0 : index
    %57 = vector.load %arg3[%c9_66, %c0_67, %c0_68] : memref<15x8x8xbf16, #tpu.memory_space<vmem>>, vector<1x8x8xbf16>
    %58 = vector.shape_cast %57 : vector<1x8x8xbf16> to vector<8x8xbf16>
    %cst_69 = arith.constant dense<0.000000e+00> : vector<8x16xf32>
    %59 = tpu.matmul %58, %56, %cst_69 {dimension_numbers = #tpu.dot_dimension_numbers<[1], [0], [0], [1], [0, 0, 1, 1], [], []>} : vector<8x8xbf16>, vector<8x16xbf16>, vector<8x16xf32> -> vector<8x16xf32>
    %60 = arith.addf %54, %59 : vector<8x16xf32>
    %c0_70 = arith.constant 0 : index
    %c0_71 = arith.constant 0 : index
    %c0_72 = arith.constant 0 : index
    %c10 = arith.constant 10 : index
    %61 = vector.load %arg2[%c0_70, %c0_71, %c0_72, %c10] : memref<1x1x8x30xbf16, #tpu.memory_space<vmem>>, vector<1x1x8x16xbf16>
    %62 = vector.shape_cast %61 : vector<1x1x8x16xbf16> to vector<8x16xbf16>
    %c10_73 = arith.constant 10 : index
    %c0_74 = arith.constant 0 : index
    %c0_75 = arith.constant 0 : index
    %63 = vector.load %arg3[%c10_73, %c0_74, %c0_75] : memref<15x8x8xbf16, #tpu.memory_space<vmem>>, vector<1x8x8xbf16>
    %64 = vector.shape_cast %63 : vector<1x8x8xbf16> to vector<8x8xbf16>
    %cst_76 = arith.constant dense<0.000000e+00> : vector<8x16xf32>
    %65 = tpu.matmul %64, %62, %cst_76 {dimension_numbers = #tpu.dot_dimension_numbers<[1], [0], [0], [1], [0, 0, 1, 1], [], []>} : vector<8x8xbf16>, vector<8x16xbf16>, vector<8x16xf32> -> vector<8x16xf32>
    %66 = arith.addf %60, %65 : vector<8x16xf32>
    %c0_77 = arith.constant 0 : index
    %c0_78 = arith.constant 0 : index
    %c0_79 = arith.constant 0 : index
    %c11 = arith.constant 11 : index
    %67 = vector.load %arg2[%c0_77, %c0_78, %c0_79, %c11] : memref<1x1x8x30xbf16, #tpu.memory_space<vmem>>, vector<1x1x8x16xbf16>
    %68 = vector.shape_cast %67 : vector<1x1x8x16xbf16> to vector<8x16xbf16>
    %c11_80 = arith.constant 11 : index
    %c0_81 = arith.constant 0 : index
    %c0_82 = arith.constant 0 : index
    %69 = vector.load %arg3[%c11_80, %c0_81, %c0_82] : memref<15x8x8xbf16, #tpu.memory_space<vmem>>, vector<1x8x8xbf16>
    %70 = vector.shape_cast %69 : vector<1x8x8xbf16> to vector<8x8xbf16>
    %cst_83 = arith.constant dense<0.000000e+00> : vector<8x16xf32>
    %71 = tpu.matmul %70, %68, %cst_83 {dimension_numbers = #tpu.dot_dimension_numbers<[1], [0], [0], [1], [0, 0, 1, 1], [], []>} : vector<8x8xbf16>, vector<8x16xbf16>, vector<8x16xf32> -> vector<8x16xf32>
    %72 = arith.addf %66, %71 : vector<8x16xf32>
    %c0_84 = arith.constant 0 : index
    %c0_85 = arith.constant 0 : index
    %c0_86 = arith.constant 0 : index
    %c12 = arith.constant 12 : index
    %73 = vector.load %arg2[%c0_84, %c0_85, %c0_86, %c12] : memref<1x1x8x30xbf16, #tpu.memory_space<vmem>>, vector<1x1x8x16xbf16>
    %74 = vector.shape_cast %73 : vector<1x1x8x16xbf16> to vector<8x16xbf16>
    %c12_87 = arith.constant 12 : index
    %c0_88 = arith.constant 0 : index
    %c0_89 = arith.constant 0 : index
    %75 = vector.load %arg3[%c12_87, %c0_88, %c0_89] : memref<15x8x8xbf16, #tpu.memory_space<vmem>>, vector<1x8x8xbf16>
    %76 = vector.shape_cast %75 : vector<1x8x8xbf16> to vector<8x8xbf16>
    %cst_90 = arith.constant dense<0.000000e+00> : vector<8x16xf32>
    %77 = tpu.matmul %76, %74, %cst_90 {dimension_numbers = #tpu.dot_dimension_numbers<[1], [0], [0], [1], [0, 0, 1, 1], [], []>} : vector<8x8xbf16>, vector<8x16xbf16>, vector<8x16xf32> -> vector<8x16xf32>
    %78 = arith.addf %72, %77 : vector<8x16xf32>
    %c0_91 = arith.constant 0 : index
    %c0_92 = arith.constant 0 : index
    %c0_93 = arith.constant 0 : index
    %c13 = arith.constant 13 : index
    %79 = vector.load %arg2[%c0_91, %c0_92, %c0_93, %c13] : memref<1x1x8x30xbf16, #tpu.memory_space<vmem>>, vector<1x1x8x16xbf16>
    %80 = vector.shape_cast %79 : vector<1x1x8x16xbf16> to vector<8x16xbf16>
    %c13_94 = arith.constant 13 : index
    %c0_95 = arith.constant 0 : index
    %c0_96 = arith.constant 0 : index
    %81 = vector.load %arg3[%c13_94, %c0_95, %c0_96] : memref<15x8x8xbf16, #tpu.memory_space<vmem>>, vector<1x8x8xbf16>
    %82 = vector.shape_cast %81 : vector<1x8x8xbf16> to vector<8x8xbf16>
    %cst_97 = arith.constant dense<0.000000e+00> : vector<8x16xf32>
    %83 = tpu.matmul %82, %80, %cst_97 {dimension_numbers = #tpu.dot_dimension_numbers<[1], [0], [0], [1], [0, 0, 1, 1], [], []>} : vector<8x8xbf16>, vector<8x16xbf16>, vector<8x16xf32> -> vector<8x16xf32>
    %84 = arith.addf %78, %83 : vector<8x16xf32>
    %c0_98 = arith.constant 0 : index
    %c0_99 = arith.constant 0 : index
    %c0_100 = arith.constant 0 : index
    %c14 = arith.constant 14 : index
    %85 = vector.load %arg2[%c0_98, %c0_99, %c0_100, %c14] : memref<1x1x8x30xbf16, #tpu.memory_space<vmem>>, vector<1x1x8x16xbf16>
    %86 = vector.shape_cast %85 : vector<1x1x8x16xbf16> to vector<8x16xbf16>
    %c14_101 = arith.constant 14 : index
    %c0_102 = arith.constant 0 : index
    %c0_103 = arith.constant 0 : index
    %87 = vector.load %arg3[%c14_101, %c0_102, %c0_103] : memref<15x8x8xbf16, #tpu.memory_space<vmem>>, vector<1x8x8xbf16>
    %88 = vector.shape_cast %87 : vector<1x8x8xbf16> to vector<8x8xbf16>
    %cst_104 = arith.constant dense<0.000000e+00> : vector<8x16xf32>
    %89 = tpu.matmul %88, %86, %cst_104 {dimension_numbers = #tpu.dot_dimension_numbers<[1], [0], [0], [1], [0, 0, 1, 1], [], []>} : vector<8x8xbf16>, vector<8x16xbf16>, vector<8x16xf32> -> vector<8x16xf32>
    %90 = arith.addf %84, %89 : vector<8x16xf32>
    %c0_105 = arith.constant 0 : index
    %c0_106 = arith.constant 0 : index
    %91 = vector.load %arg4[%c0_105, %c0_106] : memref<8x1xf32, #tpu.memory_space<vmem>>, vector<8x1xf32>
    %92 = vector.broadcast %91 : vector<8x1xf32> to vector<8x16xf32>
    %93 = arith.mulf %90, %92 : vector<8x16xf32>
    %c0_107 = arith.constant 0 : index
    %c0_108 = arith.constant 0 : index
    %94 = vector.load %arg5[%c0_107, %c0_108] : memref<8x1xf32, #tpu.memory_space<vmem>>, vector<8x1xf32>
    %95 = vector.broadcast %94 : vector<8x1xf32> to vector<8x16xf32>
    %96 = arith.addf %93, %95 : vector<8x16xf32>
    %cst_109 = arith.constant 0.000000e+00 : f32
    %97 = vector.broadcast %cst_109 : f32 to vector<8x16xf32>
    %98 = arith.maximumf %96, %97 : vector<8x16xf32>
    %c0_110 = arith.constant 0 : index
    %c0_111 = arith.constant 0 : index
    %c0_112 = arith.constant 0 : index
    %99 = vector.load %arg6[%c0_110, %c0_111, %c0_112] : memref<1x8x16xbf16, #tpu.memory_space<vmem>>, vector<1x8x16xbf16>
    %100 = vector.shape_cast %99 : vector<1x8x16xbf16> to vector<8x16xbf16>
    %101 = arith.extf %100 : vector<8x16xbf16> to vector<8x16xf32>
    %102 = arith.addf %98, %101 : vector<8x16xf32>
    %103 = arith.truncf %102 : vector<8x16xf32> to vector<8x16xbf16>
    %c0_113 = arith.constant 0 : index
    %c0_114 = arith.constant 0 : index
    %c0_115 = arith.constant 0 : index
    %104 = vector.load %arg7[%c0_113, %c0_114, %c0_115] : memref<1x8x16xbf16, #tpu.memory_space<vmem>>, vector<1x8x16xbf16>
    %105 = vector.shape_cast %104 : vector<1x8x16xbf16> to vector<8x16xbf16>
    %106 = vector.shape_cast %103 : vector<8x16xbf16> to vector<1x8x16xbf16>
    tpu.vector_store %arg7[%c0_113, %c0_114, %c0_115], %106 {strides = array<i32>} : memref<1x8x16xbf16, #tpu.memory_space<vmem>>, vector<1x8x16xbf16>,
    return
  }
  func.func @transform_0(%arg0: i32, %arg1: i32) -> (i32, i32, i32, i32) {
    %c0_i32 = arith.constant 0 : i32
    %c0_i32_0 = arith.constant 0 : i32
    %c0_i32_1 = arith.constant 0 : i32
    %c0_i32_2 = arith.constant 0 : i32
    return %arg0, %c0_i32, %c0_i32_0, %c0_i32_1 : i32, i32, i32, i32
  }
  func.func @transform_1(%arg0: i32, %arg1: i32) -> (i32, i32, i32) {
    %c0_i32 = arith.constant 0 : i32
    %c0_i32_0 = arith.constant 0 : i32
    %c0_i32_1 = arith.constant 0 : i32
    %c0_i32_2 = arith.constant 0 : i32
    return %c0_i32, %c0_i32_0, %c0_i32_1 : i32, i32, i32
  }
  func.func @transform_2(%arg0: i32, %arg1: i32) -> (i32, i32) {
    %c0_i32 = arith.constant 0 : i32
    %c0_i32_0 = arith.constant 0 : i32
    %c0_i32_1 = arith.constant 0 : i32
    return %c0_i32, %c0_i32_0 : i32, i32
  }
  func.func @transform_3(%arg0: i32, %arg1: i32) -> (i32, i32) {
    %c0_i32 = arith.constant 0 : i32
    %c0_i32_0 = arith.constant 0 : i32
    %c0_i32_1 = arith.constant 0 : i32
    return %c0_i32, %c0_i32_0 : i32, i32
  }
  func.func @transform_4(%arg0: i32, %arg1: i32) -> (i32, i32, i32) {
    %c0_i32 = arith.constant 0 : i32
    %c0_i32_0 = arith.constant 0 : i32
    return %arg0, %c0_i32, %arg1 : i32, i32, i32
  }
  func.func @transform_5(%arg0: i32, %arg1: i32) -> (i32, i32, i32) {
    %c0_i32 = arith.constant 0 : i32
    %c0_i32_0 = arith.constant 0 : i32
    return %arg0, %c0_i32, %arg1 : i32, i32, i32
  }
}

module attributes {stable_mosaic.version = 11 : i64} {
  func.func @_conv_kernel(%arg0: i32, %arg1: i32, %arg2: memref<1x1x1x30xbf16, #tpu.memory_space<vmem>>, %arg3: memref<15x8x1xbf16, #tpu.memory_space<vmem>>, %arg4: memref<8x1xf32, #tpu.memory_space<vmem>>, %arg5: memref<8x1xf32, #tpu.memory_space<vmem>>, %arg6: memref<1x8x16xbf16, #tpu.memory_space<vmem>>) attributes {dimension_semantics = [#tpu.dimension_semantics<parallel>, #tpu.dimension_semantics<arbitrary>], iteration_bounds = array<i64: 2, 1>, scalar_prefetch = 0 : i64, scratch_operands = 0 : i64, tpu.core_type = #tpu.core_type<tc>, window_params = [{transform_indices = @transform_0, window_bounds = array<i64: 1, 1, 1, 30>}, {pipeline_mode = #tpu.pipeline_mode<synchronous>, transform_indices = @transform_1, window_bounds = array<i64: 15, 8, 1>}, {pipeline_mode = #tpu.pipeline_mode<synchronous>, transform_indices = @transform_2, window_bounds = array<i64: 8, 1>}, {pipeline_mode = #tpu.pipeline_mode<synchronous>, transform_indices = @transform_3, window_bounds = array<i64: 8, 1>}, {transform_indices = @transform_4, window_bounds = array<i64: 1, 8, 16>}]} {
    %cst = arith.constant 0.000000e+00 : f32
    %0 = vector.broadcast %cst : f32 to vector<8x16xf32>
    %c0 = arith.constant 0 : index
    %c0_0 = arith.constant 0 : index
    %c0_1 = arith.constant 0 : index
    %c0_2 = arith.constant 0 : index
    %1 = vector.load %arg2[%c0, %c0_0, %c0_1, %c0_2] : memref<1x1x1x30xbf16, #tpu.memory_space<vmem>>, vector<1x1x1x16xbf16>
    %2 = vector.shape_cast %1 : vector<1x1x1x16xbf16> to vector<1x16xbf16>
    %c0_3 = arith.constant 0 : index
    %c0_4 = arith.constant 0 : index
    %c0_5 = arith.constant 0 : index
    %3 = vector.load %arg3[%c0_3, %c0_4, %c0_5] : memref<15x8x1xbf16, #tpu.memory_space<vmem>>, vector<1x8x1xbf16>
    %4 = vector.shape_cast %3 : vector<1x8x1xbf16> to vector<8x1xbf16>
    %cst_6 = arith.constant dense<0.000000e+00> : vector<8x16xf32>
    %5 = tpu.matmul %4, %2, %cst_6 {dimension_numbers = #tpu.dot_dimension_numbers<[1], [0], [0], [1], [0, 0, 1, 1], [], []>} : vector<8x1xbf16>, vector<1x16xbf16>, vector<8x16xf32> -> vector<8x16xf32>
    %6 = arith.addf %0, %5 : vector<8x16xf32>
    %c0_7 = arith.constant 0 : index
    %c0_8 = arith.constant 0 : index
    %c0_9 = arith.constant 0 : index
    %c1 = arith.constant 1 : index
    %7 = vector.load %arg2[%c0_7, %c0_8, %c0_9, %c1] : memref<1x1x1x30xbf16, #tpu.memory_space<vmem>>, vector<1x1x1x16xbf16>
    %8 = vector.shape_cast %7 : vector<1x1x1x16xbf16> to vector<1x16xbf16>
    %c1_10 = arith.constant 1 : index
    %c0_11 = arith.constant 0 : index
    %c0_12 = arith.constant 0 : index
    %9 = vector.load %arg3[%c1_10, %c0_11, %c0_12] : memref<15x8x1xbf16, #tpu.memory_space<vmem>>, vector<1x8x1xbf16>
    %10 = vector.shape_cast %9 : vector<1x8x1xbf16> to vector<8x1xbf16>
    %cst_13 = arith.constant dense<0.000000e+00> : vector<8x16xf32>
    %11 = tpu.matmul %10, %8, %cst_13 {dimension_numbers = #tpu.dot_dimension_numbers<[1], [0], [0], [1], [0, 0, 1, 1], [], []>} : vector<8x1xbf16>, vector<1x16xbf16>, vector<8x16xf32> -> vector<8x16xf32>
    %12 = arith.addf %6, %11 : vector<8x16xf32>
    %c0_14 = arith.constant 0 : index
    %c0_15 = arith.constant 0 : index
    %c0_16 = arith.constant 0 : index
    %c2 = arith.constant 2 : index
    %13 = vector.load %arg2[%c0_14, %c0_15, %c0_16, %c2] : memref<1x1x1x30xbf16, #tpu.memory_space<vmem>>, vector<1x1x1x16xbf16>
    %14 = vector.shape_cast %13 : vector<1x1x1x16xbf16> to vector<1x16xbf16>
    %c2_17 = arith.constant 2 : index
    %c0_18 = arith.constant 0 : index
    %c0_19 = arith.constant 0 : index
    %15 = vector.load %arg3[%c2_17, %c0_18, %c0_19] : memref<15x8x1xbf16, #tpu.memory_space<vmem>>, vector<1x8x1xbf16>
    %16 = vector.shape_cast %15 : vector<1x8x1xbf16> to vector<8x1xbf16>
    %cst_20 = arith.constant dense<0.000000e+00> : vector<8x16xf32>
    %17 = tpu.matmul %16, %14, %cst_20 {dimension_numbers = #tpu.dot_dimension_numbers<[1], [0], [0], [1], [0, 0, 1, 1], [], []>} : vector<8x1xbf16>, vector<1x16xbf16>, vector<8x16xf32> -> vector<8x16xf32>
    %18 = arith.addf %12, %17 : vector<8x16xf32>
    %c0_21 = arith.constant 0 : index
    %c0_22 = arith.constant 0 : index
    %c0_23 = arith.constant 0 : index
    %c3 = arith.constant 3 : index
    %19 = vector.load %arg2[%c0_21, %c0_22, %c0_23, %c3] : memref<1x1x1x30xbf16, #tpu.memory_space<vmem>>, vector<1x1x1x16xbf16>
    %20 = vector.shape_cast %19 : vector<1x1x1x16xbf16> to vector<1x16xbf16>
    %c3_24 = arith.constant 3 : index
    %c0_25 = arith.constant 0 : index
    %c0_26 = arith.constant 0 : index
    %21 = vector.load %arg3[%c3_24, %c0_25, %c0_26] : memref<15x8x1xbf16, #tpu.memory_space<vmem>>, vector<1x8x1xbf16>
    %22 = vector.shape_cast %21 : vector<1x8x1xbf16> to vector<8x1xbf16>
    %cst_27 = arith.constant dense<0.000000e+00> : vector<8x16xf32>
    %23 = tpu.matmul %22, %20, %cst_27 {dimension_numbers = #tpu.dot_dimension_numbers<[1], [0], [0], [1], [0, 0, 1, 1], [], []>} : vector<8x1xbf16>, vector<1x16xbf16>, vector<8x16xf32> -> vector<8x16xf32>
    %24 = arith.addf %18, %23 : vector<8x16xf32>
    %c0_28 = arith.constant 0 : index
    %c0_29 = arith.constant 0 : index
    %c0_30 = arith.constant 0 : index
    %c4 = arith.constant 4 : index
    %25 = vector.load %arg2[%c0_28, %c0_29, %c0_30, %c4] : memref<1x1x1x30xbf16, #tpu.memory_space<vmem>>, vector<1x1x1x16xbf16>
    %26 = vector.shape_cast %25 : vector<1x1x1x16xbf16> to vector<1x16xbf16>
    %c4_31 = arith.constant 4 : index
    %c0_32 = arith.constant 0 : index
    %c0_33 = arith.constant 0 : index
    %27 = vector.load %arg3[%c4_31, %c0_32, %c0_33] : memref<15x8x1xbf16, #tpu.memory_space<vmem>>, vector<1x8x1xbf16>
    %28 = vector.shape_cast %27 : vector<1x8x1xbf16> to vector<8x1xbf16>
    %cst_34 = arith.constant dense<0.000000e+00> : vector<8x16xf32>
    %29 = tpu.matmul %28, %26, %cst_34 {dimension_numbers = #tpu.dot_dimension_numbers<[1], [0], [0], [1], [0, 0, 1, 1], [], []>} : vector<8x1xbf16>, vector<1x16xbf16>, vector<8x16xf32> -> vector<8x16xf32>
    %30 = arith.addf %24, %29 : vector<8x16xf32>
    %c0_35 = arith.constant 0 : index
    %c0_36 = arith.constant 0 : index
    %c0_37 = arith.constant 0 : index
    %c5 = arith.constant 5 : index
    %31 = vector.load %arg2[%c0_35, %c0_36, %c0_37, %c5] : memref<1x1x1x30xbf16, #tpu.memory_space<vmem>>, vector<1x1x1x16xbf16>
    %32 = vector.shape_cast %31 : vector<1x1x1x16xbf16> to vector<1x16xbf16>
    %c5_38 = arith.constant 5 : index
    %c0_39 = arith.constant 0 : index
    %c0_40 = arith.constant 0 : index
    %33 = vector.load %arg3[%c5_38, %c0_39, %c0_40] : memref<15x8x1xbf16, #tpu.memory_space<vmem>>, vector<1x8x1xbf16>
    %34 = vector.shape_cast %33 : vector<1x8x1xbf16> to vector<8x1xbf16>
    %cst_41 = arith.constant dense<0.000000e+00> : vector<8x16xf32>
    %35 = tpu.matmul %34, %32, %cst_41 {dimension_numbers = #tpu.dot_dimension_numbers<[1], [0], [0], [1], [0, 0, 1, 1], [], []>} : vector<8x1xbf16>, vector<1x16xbf16>, vector<8x16xf32> -> vector<8x16xf32>
    %36 = arith.addf %30, %35 : vector<8x16xf32>
    %c0_42 = arith.constant 0 : index
    %c0_43 = arith.constant 0 : index
    %c0_44 = arith.constant 0 : index
    %c6 = arith.constant 6 : index
    %37 = vector.load %arg2[%c0_42, %c0_43, %c0_44, %c6] : memref<1x1x1x30xbf16, #tpu.memory_space<vmem>>, vector<1x1x1x16xbf16>
    %38 = vector.shape_cast %37 : vector<1x1x1x16xbf16> to vector<1x16xbf16>
    %c6_45 = arith.constant 6 : index
    %c0_46 = arith.constant 0 : index
    %c0_47 = arith.constant 0 : index
    %39 = vector.load %arg3[%c6_45, %c0_46, %c0_47] : memref<15x8x1xbf16, #tpu.memory_space<vmem>>, vector<1x8x1xbf16>
    %40 = vector.shape_cast %39 : vector<1x8x1xbf16> to vector<8x1xbf16>
    %cst_48 = arith.constant dense<0.000000e+00> : vector<8x16xf32>
    %41 = tpu.matmul %40, %38, %cst_48 {dimension_numbers = #tpu.dot_dimension_numbers<[1], [0], [0], [1], [0, 0, 1, 1], [], []>} : vector<8x1xbf16>, vector<1x16xbf16>, vector<8x16xf32> -> vector<8x16xf32>
    %42 = arith.addf %36, %41 : vector<8x16xf32>
    %c0_49 = arith.constant 0 : index
    %c0_50 = arith.constant 0 : index
    %c0_51 = arith.constant 0 : index
    %c7 = arith.constant 7 : index
    %43 = vector.load %arg2[%c0_49, %c0_50, %c0_51, %c7] : memref<1x1x1x30xbf16, #tpu.memory_space<vmem>>, vector<1x1x1x16xbf16>
    %44 = vector.shape_cast %43 : vector<1x1x1x16xbf16> to vector<1x16xbf16>
    %c7_52 = arith.constant 7 : index
    %c0_53 = arith.constant 0 : index
    %c0_54 = arith.constant 0 : index
    %45 = vector.load %arg3[%c7_52, %c0_53, %c0_54] : memref<15x8x1xbf16, #tpu.memory_space<vmem>>, vector<1x8x1xbf16>
    %46 = vector.shape_cast %45 : vector<1x8x1xbf16> to vector<8x1xbf16>
    %cst_55 = arith.constant dense<0.000000e+00> : vector<8x16xf32>
    %47 = tpu.matmul %46, %44, %cst_55 {dimension_numbers = #tpu.dot_dimension_numbers<[1], [0], [0], [1], [0, 0, 1, 1], [], []>} : vector<8x1xbf16>, vector<1x16xbf16>, vector<8x16xf32> -> vector<8x16xf32>
    %48 = arith.addf %42, %47 : vector<8x16xf32>
    %c0_56 = arith.constant 0 : index
    %c0_57 = arith.constant 0 : index
    %c0_58 = arith.constant 0 : index
    %c8 = arith.constant 8 : index
    %49 = vector.load %arg2[%c0_56, %c0_57, %c0_58, %c8] : memref<1x1x1x30xbf16, #tpu.memory_space<vmem>>, vector<1x1x1x16xbf16>
    %50 = vector.shape_cast %49 : vector<1x1x1x16xbf16> to vector<1x16xbf16>
    %c8_59 = arith.constant 8 : index
    %c0_60 = arith.constant 0 : index
    %c0_61 = arith.constant 0 : index
    %51 = vector.load %arg3[%c8_59, %c0_60, %c0_61] : memref<15x8x1xbf16, #tpu.memory_space<vmem>>, vector<1x8x1xbf16>
    %52 = vector.shape_cast %51 : vector<1x8x1xbf16> to vector<8x1xbf16>
    %cst_62 = arith.constant dense<0.000000e+00> : vector<8x16xf32>
    %53 = tpu.matmul %52, %50, %cst_62 {dimension_numbers = #tpu.dot_dimension_numbers<[1], [0], [0], [1], [0, 0, 1, 1], [], []>} : vector<8x1xbf16>, vector<1x16xbf16>, vector<8x16xf32> -> vector<8x16xf32>
    %54 = arith.addf %48, %53 : vector<8x16xf32>
    %c0_63 = arith.constant 0 : index
    %c0_64 = arith.constant 0 : index
    %c0_65 = arith.constant 0 : index
    %c9 = arith.constant 9 : index
    %55 = vector.load %arg2[%c0_63, %c0_64, %c0_65, %c9] : memref<1x1x1x30xbf16, #tpu.memory_space<vmem>>, vector<1x1x1x16xbf16>
    %56 = vector.shape_cast %55 : vector<1x1x1x16xbf16> to vector<1x16xbf16>
    %c9_66 = arith.constant 9 : index
    %c0_67 = arith.constant 0 : index
    %c0_68 = arith.constant 0 : index
    %57 = vector.load %arg3[%c9_66, %c0_67, %c0_68] : memref<15x8x1xbf16, #tpu.memory_space<vmem>>, vector<1x8x1xbf16>
    %58 = vector.shape_cast %57 : vector<1x8x1xbf16> to vector<8x1xbf16>
    %cst_69 = arith.constant dense<0.000000e+00> : vector<8x16xf32>
    %59 = tpu.matmul %58, %56, %cst_69 {dimension_numbers = #tpu.dot_dimension_numbers<[1], [0], [0], [1], [0, 0, 1, 1], [], []>} : vector<8x1xbf16>, vector<1x16xbf16>, vector<8x16xf32> -> vector<8x16xf32>
    %60 = arith.addf %54, %59 : vector<8x16xf32>
    %c0_70 = arith.constant 0 : index
    %c0_71 = arith.constant 0 : index
    %c0_72 = arith.constant 0 : index
    %c10 = arith.constant 10 : index
    %61 = vector.load %arg2[%c0_70, %c0_71, %c0_72, %c10] : memref<1x1x1x30xbf16, #tpu.memory_space<vmem>>, vector<1x1x1x16xbf16>
    %62 = vector.shape_cast %61 : vector<1x1x1x16xbf16> to vector<1x16xbf16>
    %c10_73 = arith.constant 10 : index
    %c0_74 = arith.constant 0 : index
    %c0_75 = arith.constant 0 : index
    %63 = vector.load %arg3[%c10_73, %c0_74, %c0_75] : memref<15x8x1xbf16, #tpu.memory_space<vmem>>, vector<1x8x1xbf16>
    %64 = vector.shape_cast %63 : vector<1x8x1xbf16> to vector<8x1xbf16>
    %cst_76 = arith.constant dense<0.000000e+00> : vector<8x16xf32>
    %65 = tpu.matmul %64, %62, %cst_76 {dimension_numbers = #tpu.dot_dimension_numbers<[1], [0], [0], [1], [0, 0, 1, 1], [], []>} : vector<8x1xbf16>, vector<1x16xbf16>, vector<8x16xf32> -> vector<8x16xf32>
    %66 = arith.addf %60, %65 : vector<8x16xf32>
    %c0_77 = arith.constant 0 : index
    %c0_78 = arith.constant 0 : index
    %c0_79 = arith.constant 0 : index
    %c11 = arith.constant 11 : index
    %67 = vector.load %arg2[%c0_77, %c0_78, %c0_79, %c11] : memref<1x1x1x30xbf16, #tpu.memory_space<vmem>>, vector<1x1x1x16xbf16>
    %68 = vector.shape_cast %67 : vector<1x1x1x16xbf16> to vector<1x16xbf16>
    %c11_80 = arith.constant 11 : index
    %c0_81 = arith.constant 0 : index
    %c0_82 = arith.constant 0 : index
    %69 = vector.load %arg3[%c11_80, %c0_81, %c0_82] : memref<15x8x1xbf16, #tpu.memory_space<vmem>>, vector<1x8x1xbf16>
    %70 = vector.shape_cast %69 : vector<1x8x1xbf16> to vector<8x1xbf16>
    %cst_83 = arith.constant dense<0.000000e+00> : vector<8x16xf32>
    %71 = tpu.matmul %70, %68, %cst_83 {dimension_numbers = #tpu.dot_dimension_numbers<[1], [0], [0], [1], [0, 0, 1, 1], [], []>} : vector<8x1xbf16>, vector<1x16xbf16>, vector<8x16xf32> -> vector<8x16xf32>
    %72 = arith.addf %66, %71 : vector<8x16xf32>
    %c0_84 = arith.constant 0 : index
    %c0_85 = arith.constant 0 : index
    %c0_86 = arith.constant 0 : index
    %c12 = arith.constant 12 : index
    %73 = vector.load %arg2[%c0_84, %c0_85, %c0_86, %c12] : memref<1x1x1x30xbf16, #tpu.memory_space<vmem>>, vector<1x1x1x16xbf16>
    %74 = vector.shape_cast %73 : vector<1x1x1x16xbf16> to vector<1x16xbf16>
    %c12_87 = arith.constant 12 : index
    %c0_88 = arith.constant 0 : index
    %c0_89 = arith.constant 0 : index
    %75 = vector.load %arg3[%c12_87, %c0_88, %c0_89] : memref<15x8x1xbf16, #tpu.memory_space<vmem>>, vector<1x8x1xbf16>
    %76 = vector.shape_cast %75 : vector<1x8x1xbf16> to vector<8x1xbf16>
    %cst_90 = arith.constant dense<0.000000e+00> : vector<8x16xf32>
    %77 = tpu.matmul %76, %74, %cst_90 {dimension_numbers = #tpu.dot_dimension_numbers<[1], [0], [0], [1], [0, 0, 1, 1], [], []>} : vector<8x1xbf16>, vector<1x16xbf16>, vector<8x16xf32> -> vector<8x16xf32>
    %78 = arith.addf %72, %77 : vector<8x16xf32>
    %c0_91 = arith.constant 0 : index
    %c0_92 = arith.constant 0 : index
    %c0_93 = arith.constant 0 : index
    %c13 = arith.constant 13 : index
    %79 = vector.load %arg2[%c0_91, %c0_92, %c0_93, %c13] : memref<1x1x1x30xbf16, #tpu.memory_space<vmem>>, vector<1x1x1x16xbf16>
    %80 = vector.shape_cast %79 : vector<1x1x1x16xbf16> to vector<1x16xbf16>
    %c13_94 = arith.constant 13 : index
    %c0_95 = arith.constant 0 : index
    %c0_96 = arith.constant 0 : index
    %81 = vector.load %arg3[%c13_94, %c0_95, %c0_96] : memref<15x8x1xbf16, #tpu.memory_space<vmem>>, vector<1x8x1xbf16>
    %82 = vector.shape_cast %81 : vector<1x8x1xbf16> to vector<8x1xbf16>
    %cst_97 = arith.constant dense<0.000000e+00> : vector<8x16xf32>
    %83 = tpu.matmul %82, %80, %cst_97 {dimension_numbers = #tpu.dot_dimension_numbers<[1], [0], [0], [1], [0, 0, 1, 1], [], []>} : vector<8x1xbf16>, vector<1x16xbf16>, vector<8x16xf32> -> vector<8x16xf32>
    %84 = arith.addf %78, %83 : vector<8x16xf32>
    %c0_98 = arith.constant 0 : index
    %c0_99 = arith.constant 0 : index
    %c0_100 = arith.constant 0 : index
    %c14 = arith.constant 14 : index
    %85 = vector.load %arg2[%c0_98, %c0_99, %c0_100, %c14] : memref<1x1x1x30xbf16, #tpu.memory_space<vmem>>, vector<1x1x1x16xbf16>
    %86 = vector.shape_cast %85 : vector<1x1x1x16xbf16> to vector<1x16xbf16>
    %c14_101 = arith.constant 14 : index
    %c0_102 = arith.constant 0 : index
    %c0_103 = arith.constant 0 : index
    %87 = vector.load %arg3[%c14_101, %c0_102, %c0_103] : memref<15x8x1xbf16, #tpu.memory_space<vmem>>, vector<1x8x1xbf16>
    %88 = vector.shape_cast %87 : vector<1x8x1xbf16> to vector<8x1xbf16>
    %cst_104 = arith.constant dense<0.000000e+00> : vector<8x16xf32>
    %89 = tpu.matmul %88, %86, %cst_104 {dimension_numbers = #tpu.dot_dimension_numbers<[1], [0], [0], [1], [0, 0, 1, 1], [], []>} : vector<8x1xbf16>, vector<1x16xbf16>, vector<8x16xf32> -> vector<8x16xf32>
    %90 = arith.addf %84, %89 : vector<8x16xf32>
    %c0_105 = arith.constant 0 : index
    %c0_106 = arith.constant 0 : index
    %91 = vector.load %arg4[%c0_105, %c0_106] : memref<8x1xf32, #tpu.memory_space<vmem>>, vector<8x1xf32>
    %92 = vector.broadcast %91 : vector<8x1xf32> to vector<8x16xf32>
    %93 = arith.mulf %90, %92 : vector<8x16xf32>
    %c0_107 = arith.constant 0 : index
    %c0_108 = arith.constant 0 : index
    %94 = vector.load %arg5[%c0_107, %c0_108] : memref<8x1xf32, #tpu.memory_space<vmem>>, vector<8x1xf32>
    %95 = vector.broadcast %94 : vector<8x1xf32> to vector<8x16xf32>
    %96 = arith.addf %93, %95 : vector<8x16xf32>
    %cst_109 = arith.constant 0.000000e+00 : f32
    %97 = vector.broadcast %cst_109 : f32 to vector<8x16xf32>
    %98 = arith.maximumf %96, %97 : vector<8x16xf32>
    %99 = arith.truncf %98 : vector<8x16xf32> to vector<8x16xbf16>
    %c0_110 = arith.constant 0 : index
    %c0_111 = arith.constant 0 : index
    %c0_112 = arith.constant 0 : index
    %100 = vector.load %arg6[%c0_110, %c0_111, %c0_112] : memref<1x8x16xbf16, #tpu.memory_space<vmem>>, vector<1x8x16xbf16>
    %101 = vector.shape_cast %100 : vector<1x8x16xbf16> to vector<8x16xbf16>
    %102 = vector.shape_cast %99 : vector<8x16xbf16> to vector<1x8x16xbf16>
    tpu.vector_store %arg6[%c0_110, %c0_111, %c0_112], %102 {strides = array<i32>} : memref<1x8x16xbf16, #tpu.memory_space<vmem>>, vector<1x8x16xbf16>,
    return
  }
  func.func @transform_0(%arg0: i32, %arg1: i32) -> (i32, i32, i32, i32) {
    %c0_i32 = arith.constant 0 : i32
    %c0_i32_0 = arith.constant 0 : i32
    %c0_i32_1 = arith.constant 0 : i32
    %c0_i32_2 = arith.constant 0 : i32
    return %arg0, %c0_i32, %c0_i32_0, %c0_i32_1 : i32, i32, i32, i32
  }
  func.func @transform_1(%arg0: i32, %arg1: i32) -> (i32, i32, i32) {
    %c0_i32 = arith.constant 0 : i32
    %c0_i32_0 = arith.constant 0 : i32
    %c0_i32_1 = arith.constant 0 : i32
    %c0_i32_2 = arith.constant 0 : i32
    return %c0_i32, %c0_i32_0, %c0_i32_1 : i32, i32, i32
  }
  func.func @transform_2(%arg0: i32, %arg1: i32) -> (i32, i32) {
    %c0_i32 = arith.constant 0 : i32
    %c0_i32_0 = arith.constant 0 : i32
    %c0_i32_1 = arith.constant 0 : i32
    return %c0_i32, %c0_i32_0 : i32, i32
  }
  func.func @transform_3(%arg0: i32, %arg1: i32) -> (i32, i32) {
    %c0_i32 = arith.constant 0 : i32
    %c0_i32_0 = arith.constant 0 : i32
    %c0_i32_1 = arith.constant 0 : i32
    return %c0_i32, %c0_i32_0 : i32, i32
  }
  func.func @transform_4(%arg0: i32, %arg1: i32) -> (i32, i32, i32) {
    %c0_i32 = arith.constant 0 : i32
    %c0_i32_0 = arith.constant 0 : i32
    return %arg0, %c0_i32, %arg1 : i32, i32, i32
  }
}

module attributes {stable_mosaic.version = 11 : i64} {
  func.func @_conv_kernel(%arg0: i32, %arg1: i32, %arg2: memref<1x2x8x15xbf16, #tpu.memory_space<vmem>>, %arg3: memref<15x16x8xbf16, #tpu.memory_space<vmem>>, %arg4: memref<16x1xf32, #tpu.memory_space<vmem>>, %arg5: memref<16x1xf32, #tpu.memory_space<vmem>>, %arg6: memref<1x16x8xbf16, #tpu.memory_space<vmem>>) attributes {dimension_semantics = [#tpu.dimension_semantics<parallel>, #tpu.dimension_semantics<arbitrary>], iteration_bounds = array<i64: 2, 1>, scalar_prefetch = 0 : i64, scratch_operands = 0 : i64, tpu.core_type = #tpu.core_type<tc>, window_params = [{transform_indices = @transform_0, window_bounds = array<i64: 1, 2, 8, 15>}, {pipeline_mode = #tpu.pipeline_mode<synchronous>, transform_indices = @transform_1, window_bounds = array<i64: 15, 16, 8>}, {pipeline_mode = #tpu.pipeline_mode<synchronous>, transform_indices = @transform_2, window_bounds = array<i64: 16, 1>}, {pipeline_mode = #tpu.pipeline_mode<synchronous>, transform_indices = @transform_3, window_bounds = array<i64: 16, 1>}, {transform_indices = @transform_4, window_bounds = array<i64: 1, 16, 8>}]} {
    %cst = arith.constant 0.000000e+00 : f32
    %0 = vector.broadcast %cst : f32 to vector<16x8xf32>
    %c0 = arith.constant 0 : index
    %c0_0 = arith.constant 0 : index
    %c0_1 = arith.constant 0 : index
    %c0_2 = arith.constant 0 : index
    %1 = vector.load %arg2[%c0, %c0_0, %c0_1, %c0_2] : memref<1x2x8x15xbf16, #tpu.memory_space<vmem>>, vector<1x1x8x8xbf16>
    %2 = vector.shape_cast %1 : vector<1x1x8x8xbf16> to vector<8x8xbf16>
    %c0_3 = arith.constant 0 : index
    %c0_4 = arith.constant 0 : index
    %c0_5 = arith.constant 0 : index
    %3 = vector.load %arg3[%c0_3, %c0_4, %c0_5] : memref<15x16x8xbf16, #tpu.memory_space<vmem>>, vector<1x16x8xbf16>
    %4 = vector.shape_cast %3 : vector<1x16x8xbf16> to vector<16x8xbf16>
    %cst_6 = arith.constant dense<0.000000e+00> : vector<16x8xf32>
    %5 = tpu.matmul %4, %2, %cst_6 {dimension_numbers = #tpu.dot_dimension_numbers<[1], [0], [0], [1], [0, 0, 1, 1], [], []>} : vector<16x8xbf16>, vector<8x8xbf16>, vector<16x8xf32> -> vector<16x8xf32>
    %6 = arith.addf %0, %5 : vector<16x8xf32>
    %c0_7 = arith.constant 0 : index
    %c1 = arith.constant 1 : index
    %c0_8 = arith.constant 0 : index
    %c0_9 = arith.constant 0 : index
    %7 = vector.load %arg2[%c0_7, %c1, %c0_8, %c0_9] : memref<1x2x8x15xbf16, #tpu.memory_space<vmem>>, vector<1x1x8x8xbf16>
    %8 = vector.shape_cast %7 : vector<1x1x8x8xbf16> to vector<8x8xbf16>
    %c1_10 = arith.constant 1 : index
    %c0_11 = arith.constant 0 : index
    %c0_12 = arith.constant 0 : index
    %9 = vector.load %arg3[%c1_10, %c0_11, %c0_12] : memref<15x16x8xbf16, #tpu.memory_space<vmem>>, vector<1x16x8xbf16>
    %10 = vector.shape_cast %9 : vector<1x16x8xbf16> to vector<16x8xbf16>
    %cst_13 = arith.constant dense<0.000000e+00> : vector<16x8xf32>
    %11 = tpu.matmul %10, %8, %cst_13 {dimension_numbers = #tpu.dot_dimension_numbers<[1], [0], [0], [1], [0, 0, 1, 1], [], []>} : vector<16x8xbf16>, vector<8x8xbf16>, vector<16x8xf32> -> vector<16x8xf32>
    %12 = arith.addf %6, %11 : vector<16x8xf32>
    %c0_14 = arith.constant 0 : index
    %c0_15 = arith.constant 0 : index
    %c0_16 = arith.constant 0 : index
    %c1_17 = arith.constant 1 : index
    %13 = vector.load %arg2[%c0_14, %c0_15, %c0_16, %c1_17] : memref<1x2x8x15xbf16, #tpu.memory_space<vmem>>, vector<1x1x8x8xbf16>
    %14 = vector.shape_cast %13 : vector<1x1x8x8xbf16> to vector<8x8xbf16>
    %c2 = arith.constant 2 : index
    %c0_18 = arith.constant 0 : index
    %c0_19 = arith.constant 0 : index
    %15 = vector.load %arg3[%c2, %c0_18, %c0_19] : memref<15x16x8xbf16, #tpu.memory_space<vmem>>, vector<1x16x8xbf16>
    %16 = vector.shape_cast %15 : vector<1x16x8xbf16> to vector<16x8xbf16>
    %cst_20 = arith.constant dense<0.000000e+00> : vector<16x8xf32>
    %17 = tpu.matmul %16, %14, %cst_20 {dimension_numbers = #tpu.dot_dimension_numbers<[1], [0], [0], [1], [0, 0, 1, 1], [], []>} : vector<16x8xbf16>, vector<8x8xbf16>, vector<16x8xf32> -> vector<16x8xf32>
    %18 = arith.addf %12, %17 : vector<16x8xf32>
    %c0_21 = arith.constant 0 : index
    %c1_22 = arith.constant 1 : index
    %c0_23 = arith.constant 0 : index
    %c1_24 = arith.constant 1 : index
    %19 = vector.load %arg2[%c0_21, %c1_22, %c0_23, %c1_24] : memref<1x2x8x15xbf16, #tpu.memory_space<vmem>>, vector<1x1x8x8xbf16>
    %20 = vector.shape_cast %19 : vector<1x1x8x8xbf16> to vector<8x8xbf16>
    %c3 = arith.constant 3 : index
    %c0_25 = arith.constant 0 : index
    %c0_26 = arith.constant 0 : index
    %21 = vector.load %arg3[%c3, %c0_25, %c0_26] : memref<15x16x8xbf16, #tpu.memory_space<vmem>>, vector<1x16x8xbf16>
    %22 = vector.shape_cast %21 : vector<1x16x8xbf16> to vector<16x8xbf16>
    %cst_27 = arith.constant dense<0.000000e+00> : vector<16x8xf32>
    %23 = tpu.matmul %22, %20, %cst_27 {dimension_numbers = #tpu.dot_dimension_numbers<[1], [0], [0], [1], [0, 0, 1, 1], [], []>} : vector<16x8xbf16>, vector<8x8xbf16>, vector<16x8xf32> -> vector<16x8xf32>
    %24 = arith.addf %18, %23 : vector<16x8xf32>
    %c0_28 = arith.constant 0 : index
    %c0_29 = arith.constant 0 : index
    %c0_30 = arith.constant 0 : index
    %c2_31 = arith.constant 2 : index
    %25 = vector.load %arg2[%c0_28, %c0_29, %c0_30, %c2_31] : memref<1x2x8x15xbf16, #tpu.memory_space<vmem>>, vector<1x1x8x8xbf16>
    %26 = vector.shape_cast %25 : vector<1x1x8x8xbf16> to vector<8x8xbf16>
    %c4 = arith.constant 4 : index
    %c0_32 = arith.constant 0 : index
    %c0_33 = arith.constant 0 : index
    %27 = vector.load %arg3[%c4, %c0_32, %c0_33] : memref<15x16x8xbf16, #tpu.memory_space<vmem>>, vector<1x16x8xbf16>
    %28 = vector.shape_cast %27 : vector<1x16x8xbf16> to vector<16x8xbf16>
    %cst_34 = arith.constant dense<0.000000e+00> : vector<16x8xf32>
    %29 = tpu.matmul %28, %26, %cst_34 {dimension_numbers = #tpu.dot_dimension_numbers<[1], [0], [0], [1], [0, 0, 1, 1], [], []>} : vector<16x8xbf16>, vector<8x8xbf16>, vector<16x8xf32> -> vector<16x8xf32>
    %30 = arith.addf %24, %29 : vector<16x8xf32>
    %c0_35 = arith.constant 0 : index
    %c1_36 = arith.constant 1 : index
    %c0_37 = arith.constant 0 : index
    %c2_38 = arith.constant 2 : index
    %31 = vector.load %arg2[%c0_35, %c1_36, %c0_37, %c2_38] : memref<1x2x8x15xbf16, #tpu.memory_space<vmem>>, vector<1x1x8x8xbf16>
    %32 = vector.shape_cast %31 : vector<1x1x8x8xbf16> to vector<8x8xbf16>
    %c5 = arith.constant 5 : index
    %c0_39 = arith.constant 0 : index
    %c0_40 = arith.constant 0 : index
    %33 = vector.load %arg3[%c5, %c0_39, %c0_40] : memref<15x16x8xbf16, #tpu.memory_space<vmem>>, vector<1x16x8xbf16>
    %34 = vector.shape_cast %33 : vector<1x16x8xbf16> to vector<16x8xbf16>
    %cst_41 = arith.constant dense<0.000000e+00> : vector<16x8xf32>
    %35 = tpu.matmul %34, %32, %cst_41 {dimension_numbers = #tpu.dot_dimension_numbers<[1], [0], [0], [1], [0, 0, 1, 1], [], []>} : vector<16x8xbf16>, vector<8x8xbf16>, vector<16x8xf32> -> vector<16x8xf32>
    %36 = arith.addf %30, %35 : vector<16x8xf32>
    %c0_42 = arith.constant 0 : index
    %c0_43 = arith.constant 0 : index
    %c0_44 = arith.constant 0 : index
    %c3_45 = arith.constant 3 : index
    %37 = vector.load %arg2[%c0_42, %c0_43, %c0_44, %c3_45] : memref<1x2x8x15xbf16, #tpu.memory_space<vmem>>, vector<1x1x8x8xbf16>
    %38 = vector.shape_cast %37 : vector<1x1x8x8xbf16> to vector<8x8xbf16>
    %c6 = arith.constant 6 : index
    %c0_46 = arith.constant 0 : index
    %c0_47 = arith.constant 0 : index
    %39 = vector.load %arg3[%c6, %c0_46, %c0_47] : memref<15x16x8xbf16, #tpu.memory_space<vmem>>, vector<1x16x8xbf16>
    %40 = vector.shape_cast %39 : vector<1x16x8xbf16> to vector<16x8xbf16>
    %cst_48 = arith.constant dense<0.000000e+00> : vector<16x8xf32>
    %41 = tpu.matmul %40, %38, %cst_48 {dimension_numbers = #tpu.dot_dimension_numbers<[1], [0], [0], [1], [0, 0, 1, 1], [], []>} : vector<16x8xbf16>, vector<8x8xbf16>, vector<16x8xf32> -> vector<16x8xf32>
    %42 = arith.addf %36, %41 : vector<16x8xf32>
    %c0_49 = arith.constant 0 : index
    %c1_50 = arith.constant 1 : index
    %c0_51 = arith.constant 0 : index
    %c3_52 = arith.constant 3 : index
    %43 = vector.load %arg2[%c0_49, %c1_50, %c0_51, %c3_52] : memref<1x2x8x15xbf16, #tpu.memory_space<vmem>>, vector<1x1x8x8xbf16>
    %44 = vector.shape_cast %43 : vector<1x1x8x8xbf16> to vector<8x8xbf16>
    %c7 = arith.constant 7 : index
    %c0_53 = arith.constant 0 : index
    %c0_54 = arith.constant 0 : index
    %45 = vector.load %arg3[%c7, %c0_53, %c0_54] : memref<15x16x8xbf16, #tpu.memory_space<vmem>>, vector<1x16x8xbf16>
    %46 = vector.shape_cast %45 : vector<1x16x8xbf16> to vector<16x8xbf16>
    %cst_55 = arith.constant dense<0.000000e+00> : vector<16x8xf32>
    %47 = tpu.matmul %46, %44, %cst_55 {dimension_numbers = #tpu.dot_dimension_numbers<[1], [0], [0], [1], [0, 0, 1, 1], [], []>} : vector<16x8xbf16>, vector<8x8xbf16>, vector<16x8xf32> -> vector<16x8xf32>
    %48 = arith.addf %42, %47 : vector<16x8xf32>
    %c0_56 = arith.constant 0 : index
    %c0_57 = arith.constant 0 : index
    %c0_58 = arith.constant 0 : index
    %c4_59 = arith.constant 4 : index
    %49 = vector.load %arg2[%c0_56, %c0_57, %c0_58, %c4_59] : memref<1x2x8x15xbf16, #tpu.memory_space<vmem>>, vector<1x1x8x8xbf16>
    %50 = vector.shape_cast %49 : vector<1x1x8x8xbf16> to vector<8x8xbf16>
    %c8 = arith.constant 8 : index
    %c0_60 = arith.constant 0 : index
    %c0_61 = arith.constant 0 : index
    %51 = vector.load %arg3[%c8, %c0_60, %c0_61] : memref<15x16x8xbf16, #tpu.memory_space<vmem>>, vector<1x16x8xbf16>
    %52 = vector.shape_cast %51 : vector<1x16x8xbf16> to vector<16x8xbf16>
    %cst_62 = arith.constant dense<0.000000e+00> : vector<16x8xf32>
    %53 = tpu.matmul %52, %50, %cst_62 {dimension_numbers = #tpu.dot_dimension_numbers<[1], [0], [0], [1], [0, 0, 1, 1], [], []>} : vector<16x8xbf16>, vector<8x8xbf16>, vector<16x8xf32> -> vector<16x8xf32>
    %54 = arith.addf %48, %53 : vector<16x8xf32>
    %c0_63 = arith.constant 0 : index
    %c1_64 = arith.constant 1 : index
    %c0_65 = arith.constant 0 : index
    %c4_66 = arith.constant 4 : index
    %55 = vector.load %arg2[%c0_63, %c1_64, %c0_65, %c4_66] : memref<1x2x8x15xbf16, #tpu.memory_space<vmem>>, vector<1x1x8x8xbf16>
    %56 = vector.shape_cast %55 : vector<1x1x8x8xbf16> to vector<8x8xbf16>
    %c9 = arith.constant 9 : index
    %c0_67 = arith.constant 0 : index
    %c0_68 = arith.constant 0 : index
    %57 = vector.load %arg3[%c9, %c0_67, %c0_68] : memref<15x16x8xbf16, #tpu.memory_space<vmem>>, vector<1x16x8xbf16>
    %58 = vector.shape_cast %57 : vector<1x16x8xbf16> to vector<16x8xbf16>
    %cst_69 = arith.constant dense<0.000000e+00> : vector<16x8xf32>
    %59 = tpu.matmul %58, %56, %cst_69 {dimension_numbers = #tpu.dot_dimension_numbers<[1], [0], [0], [1], [0, 0, 1, 1], [], []>} : vector<16x8xbf16>, vector<8x8xbf16>, vector<16x8xf32> -> vector<16x8xf32>
    %60 = arith.addf %54, %59 : vector<16x8xf32>
    %c0_70 = arith.constant 0 : index
    %c0_71 = arith.constant 0 : index
    %c0_72 = arith.constant 0 : index
    %c5_73 = arith.constant 5 : index
    %61 = vector.load %arg2[%c0_70, %c0_71, %c0_72, %c5_73] : memref<1x2x8x15xbf16, #tpu.memory_space<vmem>>, vector<1x1x8x8xbf16>
    %62 = vector.shape_cast %61 : vector<1x1x8x8xbf16> to vector<8x8xbf16>
    %c10 = arith.constant 10 : index
    %c0_74 = arith.constant 0 : index
    %c0_75 = arith.constant 0 : index
    %63 = vector.load %arg3[%c10, %c0_74, %c0_75] : memref<15x16x8xbf16, #tpu.memory_space<vmem>>, vector<1x16x8xbf16>
    %64 = vector.shape_cast %63 : vector<1x16x8xbf16> to vector<16x8xbf16>
    %cst_76 = arith.constant dense<0.000000e+00> : vector<16x8xf32>
    %65 = tpu.matmul %64, %62, %cst_76 {dimension_numbers = #tpu.dot_dimension_numbers<[1], [0], [0], [1], [0, 0, 1, 1], [], []>} : vector<16x8xbf16>, vector<8x8xbf16>, vector<16x8xf32> -> vector<16x8xf32>
    %66 = arith.addf %60, %65 : vector<16x8xf32>
    %c0_77 = arith.constant 0 : index
    %c1_78 = arith.constant 1 : index
    %c0_79 = arith.constant 0 : index
    %c5_80 = arith.constant 5 : index
    %67 = vector.load %arg2[%c0_77, %c1_78, %c0_79, %c5_80] : memref<1x2x8x15xbf16, #tpu.memory_space<vmem>>, vector<1x1x8x8xbf16>
    %68 = vector.shape_cast %67 : vector<1x1x8x8xbf16> to vector<8x8xbf16>
    %c11 = arith.constant 11 : index
    %c0_81 = arith.constant 0 : index
    %c0_82 = arith.constant 0 : index
    %69 = vector.load %arg3[%c11, %c0_81, %c0_82] : memref<15x16x8xbf16, #tpu.memory_space<vmem>>, vector<1x16x8xbf16>
    %70 = vector.shape_cast %69 : vector<1x16x8xbf16> to vector<16x8xbf16>
    %cst_83 = arith.constant dense<0.000000e+00> : vector<16x8xf32>
    %71 = tpu.matmul %70, %68, %cst_83 {dimension_numbers = #tpu.dot_dimension_numbers<[1], [0], [0], [1], [0, 0, 1, 1], [], []>} : vector<16x8xbf16>, vector<8x8xbf16>, vector<16x8xf32> -> vector<16x8xf32>
    %72 = arith.addf %66, %71 : vector<16x8xf32>
    %c0_84 = arith.constant 0 : index
    %c0_85 = arith.constant 0 : index
    %c0_86 = arith.constant 0 : index
    %c6_87 = arith.constant 6 : index
    %73 = vector.load %arg2[%c0_84, %c0_85, %c0_86, %c6_87] : memref<1x2x8x15xbf16, #tpu.memory_space<vmem>>, vector<1x1x8x8xbf16>
    %74 = vector.shape_cast %73 : vector<1x1x8x8xbf16> to vector<8x8xbf16>
    %c12 = arith.constant 12 : index
    %c0_88 = arith.constant 0 : index
    %c0_89 = arith.constant 0 : index
    %75 = vector.load %arg3[%c12, %c0_88, %c0_89] : memref<15x16x8xbf16, #tpu.memory_space<vmem>>, vector<1x16x8xbf16>
    %76 = vector.shape_cast %75 : vector<1x16x8xbf16> to vector<16x8xbf16>
    %cst_90 = arith.constant dense<0.000000e+00> : vector<16x8xf32>
    %77 = tpu.matmul %76, %74, %cst_90 {dimension_numbers = #tpu.dot_dimension_numbers<[1], [0], [0], [1], [0, 0, 1, 1], [], []>} : vector<16x8xbf16>, vector<8x8xbf16>, vector<16x8xf32> -> vector<16x8xf32>
    %78 = arith.addf %72, %77 : vector<16x8xf32>
    %c0_91 = arith.constant 0 : index
    %c1_92 = arith.constant 1 : index
    %c0_93 = arith.constant 0 : index
    %c6_94 = arith.constant 6 : index
    %79 = vector.load %arg2[%c0_91, %c1_92, %c0_93, %c6_94] : memref<1x2x8x15xbf16, #tpu.memory_space<vmem>>, vector<1x1x8x8xbf16>
    %80 = vector.shape_cast %79 : vector<1x1x8x8xbf16> to vector<8x8xbf16>
    %c13 = arith.constant 13 : index
    %c0_95 = arith.constant 0 : index
    %c0_96 = arith.constant 0 : index
    %81 = vector.load %arg3[%c13, %c0_95, %c0_96] : memref<15x16x8xbf16, #tpu.memory_space<vmem>>, vector<1x16x8xbf16>
    %82 = vector.shape_cast %81 : vector<1x16x8xbf16> to vector<16x8xbf16>
    %cst_97 = arith.constant dense<0.000000e+00> : vector<16x8xf32>
    %83 = tpu.matmul %82, %80, %cst_97 {dimension_numbers = #tpu.dot_dimension_numbers<[1], [0], [0], [1], [0, 0, 1, 1], [], []>} : vector<16x8xbf16>, vector<8x8xbf16>, vector<16x8xf32> -> vector<16x8xf32>
    %84 = arith.addf %78, %83 : vector<16x8xf32>
    %c0_98 = arith.constant 0 : index
    %c0_99 = arith.constant 0 : index
    %c0_100 = arith.constant 0 : index
    %c7_101 = arith.constant 7 : index
    %85 = vector.load %arg2[%c0_98, %c0_99, %c0_100, %c7_101] : memref<1x2x8x15xbf16, #tpu.memory_space<vmem>>, vector<1x1x8x8xbf16>
    %86 = vector.shape_cast %85 : vector<1x1x8x8xbf16> to vector<8x8xbf16>
    %c14 = arith.constant 14 : index
    %c0_102 = arith.constant 0 : index
    %c0_103 = arith.constant 0 : index
    %87 = vector.load %arg3[%c14, %c0_102, %c0_103] : memref<15x16x8xbf16, #tpu.memory_space<vmem>>, vector<1x16x8xbf16>
    %88 = vector.shape_cast %87 : vector<1x16x8xbf16> to vector<16x8xbf16>
    %cst_104 = arith.constant dense<0.000000e+00> : vector<16x8xf32>
    %89 = tpu.matmul %88, %86, %cst_104 {dimension_numbers = #tpu.dot_dimension_numbers<[1], [0], [0], [1], [0, 0, 1, 1], [], []>} : vector<16x8xbf16>, vector<8x8xbf16>, vector<16x8xf32> -> vector<16x8xf32>
    %90 = arith.addf %84, %89 : vector<16x8xf32>
    %c0_105 = arith.constant 0 : index
    %c0_106 = arith.constant 0 : index
    %91 = vector.load %arg4[%c0_105, %c0_106] : memref<16x1xf32, #tpu.memory_space<vmem>>, vector<16x1xf32>
    %92 = vector.broadcast %91 : vector<16x1xf32> to vector<16x8xf32>
    %93 = arith.mulf %90, %92 : vector<16x8xf32>
    %c0_107 = arith.constant 0 : index
    %c0_108 = arith.constant 0 : index
    %94 = vector.load %arg5[%c0_107, %c0_108] : memref<16x1xf32, #tpu.memory_space<vmem>>, vector<16x1xf32>
    %95 = vector.broadcast %94 : vector<16x1xf32> to vector<16x8xf32>
    %96 = arith.addf %93, %95 : vector<16x8xf32>
    %cst_109 = arith.constant 0.000000e+00 : f32
    %97 = vector.broadcast %cst_109 : f32 to vector<16x8xf32>
    %98 = arith.maximumf %96, %97 : vector<16x8xf32>
    %99 = arith.truncf %98 : vector<16x8xf32> to vector<16x8xbf16>
    %c0_110 = arith.constant 0 : index
    %c0_111 = arith.constant 0 : index
    %c0_112 = arith.constant 0 : index
    %100 = vector.load %arg6[%c0_110, %c0_111, %c0_112] : memref<1x16x8xbf16, #tpu.memory_space<vmem>>, vector<1x16x8xbf16>
    %101 = vector.shape_cast %100 : vector<1x16x8xbf16> to vector<16x8xbf16>
    %102 = vector.shape_cast %99 : vector<16x8xbf16> to vector<1x16x8xbf16>
    tpu.vector_store %arg6[%c0_110, %c0_111, %c0_112], %102 {strides = array<i32>} : memref<1x16x8xbf16, #tpu.memory_space<vmem>>, vector<1x16x8xbf16>,
    return
  }
  func.func @transform_0(%arg0: i32, %arg1: i32) -> (i32, i32, i32, i32) {
    %c0_i32 = arith.constant 0 : i32
    %c0_i32_0 = arith.constant 0 : i32
    %c0_i32_1 = arith.constant 0 : i32
    %c0_i32_2 = arith.constant 0 : i32
    return %arg0, %c0_i32, %c0_i32_0, %c0_i32_1 : i32, i32, i32, i32
  }
  func.func @transform_1(%arg0: i32, %arg1: i32) -> (i32, i32, i32) {
    %c0_i32 = arith.constant 0 : i32
    %c0_i32_0 = arith.constant 0 : i32
    %c0_i32_1 = arith.constant 0 : i32
    %c0_i32_2 = arith.constant 0 : i32
    return %c0_i32, %c0_i32_0, %c0_i32_1 : i32, i32, i32
  }
  func.func @transform_2(%arg0: i32, %arg1: i32) -> (i32, i32) {
    %c0_i32 = arith.constant 0 : i32
    %c0_i32_0 = arith.constant 0 : i32
    %c0_i32_1 = arith.constant 0 : i32
    return %c0_i32, %c0_i32_0 : i32, i32
  }
  func.func @transform_3(%arg0: i32, %arg1: i32) -> (i32, i32) {
    %c0_i32 = arith.constant 0 : i32
    %c0_i32_0 = arith.constant 0 : i32
    %c0_i32_1 = arith.constant 0 : i32
    return %c0_i32, %c0_i32_0 : i32, i32
  }
  func.func @transform_4(%arg0: i32, %arg1: i32) -> (i32, i32, i32) {
    %c0_i32 = arith.constant 0 : i32
    %c0_i32_0 = arith.constant 0 : i32
    return %arg0, %c0_i32, %arg1 : i32, i32, i32
  }
}

module attributes {stable_mosaic.version = 11 : i64} {
  func.func @_conv_kernel(%arg0: i32, %arg1: i32, %arg2: memref<1x1x16x22xbf16, #tpu.memory_space<vmem>>, %arg3: memref<15x16x16xbf16, #tpu.memory_space<vmem>>, %arg4: memref<16x1xf32, #tpu.memory_space<vmem>>, %arg5: memref<16x1xf32, #tpu.memory_space<vmem>>, %arg6: memref<1x16x8xbf16, #tpu.memory_space<vmem>>) attributes {dimension_semantics = [#tpu.dimension_semantics<parallel>, #tpu.dimension_semantics<arbitrary>], iteration_bounds = array<i64: 2, 1>, scalar_prefetch = 0 : i64, scratch_operands = 0 : i64, tpu.core_type = #tpu.core_type<tc>, window_params = [{transform_indices = @transform_0, window_bounds = array<i64: 1, 1, 16, 22>}, {pipeline_mode = #tpu.pipeline_mode<synchronous>, transform_indices = @transform_1, window_bounds = array<i64: 15, 16, 16>}, {pipeline_mode = #tpu.pipeline_mode<synchronous>, transform_indices = @transform_2, window_bounds = array<i64: 16, 1>}, {pipeline_mode = #tpu.pipeline_mode<synchronous>, transform_indices = @transform_3, window_bounds = array<i64: 16, 1>}, {transform_indices = @transform_4, window_bounds = array<i64: 1, 16, 8>}]} {
    %cst = arith.constant 0.000000e+00 : f32
    %0 = vector.broadcast %cst : f32 to vector<16x8xf32>
    %c0 = arith.constant 0 : index
    %c0_0 = arith.constant 0 : index
    %c0_1 = arith.constant 0 : index
    %c0_2 = arith.constant 0 : index
    %1 = vector.load %arg2[%c0, %c0_0, %c0_1, %c0_2] : memref<1x1x16x22xbf16, #tpu.memory_space<vmem>>, vector<1x1x16x8xbf16>
    %2 = vector.shape_cast %1 : vector<1x1x16x8xbf16> to vector<16x8xbf16>
    %c0_3 = arith.constant 0 : index
    %c0_4 = arith.constant 0 : index
    %c0_5 = arith.constant 0 : index
    %3 = vector.load %arg3[%c0_3, %c0_4, %c0_5] : memref<15x16x16xbf16, #tpu.memory_space<vmem>>, vector<1x16x16xbf16>
    %4 = vector.shape_cast %3 : vector<1x16x16xbf16> to vector<16x16xbf16>
    %cst_6 = arith.constant dense<0.000000e+00> : vector<16x8xf32>
    %5 = tpu.matmul %4, %2, %cst_6 {dimension_numbers = #tpu.dot_dimension_numbers<[1], [0], [0], [1], [0, 0, 1, 1], [], []>} : vector<16x16xbf16>, vector<16x8xbf16>, vector<16x8xf32> -> vector<16x8xf32>
    %6 = arith.addf %0, %5 : vector<16x8xf32>
    %c0_7 = arith.constant 0 : index
    %c0_8 = arith.constant 0 : index
    %c0_9 = arith.constant 0 : index
    %c1 = arith.constant 1 : index
    %7 = vector.load %arg2[%c0_7, %c0_8, %c0_9, %c1] : memref<1x1x16x22xbf16, #tpu.memory_space<vmem>>, vector<1x1x16x8xbf16>
    %8 = vector.shape_cast %7 : vector<1x1x16x8xbf16> to vector<16x8xbf16>
    %c1_10 = arith.constant 1 : index
    %c0_11 = arith.constant 0 : index
    %c0_12 = arith.constant 0 : index
    %9 = vector.load %arg3[%c1_10, %c0_11, %c0_12] : memref<15x16x16xbf16, #tpu.memory_space<vmem>>, vector<1x16x16xbf16>
    %10 = vector.shape_cast %9 : vector<1x16x16xbf16> to vector<16x16xbf16>
    %cst_13 = arith.constant dense<0.000000e+00> : vector<16x8xf32>
    %11 = tpu.matmul %10, %8, %cst_13 {dimension_numbers = #tpu.dot_dimension_numbers<[1], [0], [0], [1], [0, 0, 1, 1], [], []>} : vector<16x16xbf16>, vector<16x8xbf16>, vector<16x8xf32> -> vector<16x8xf32>
    %12 = arith.addf %6, %11 : vector<16x8xf32>
    %c0_14 = arith.constant 0 : index
    %c0_15 = arith.constant 0 : index
    %c0_16 = arith.constant 0 : index
    %c2 = arith.constant 2 : index
    %13 = vector.load %arg2[%c0_14, %c0_15, %c0_16, %c2] : memref<1x1x16x22xbf16, #tpu.memory_space<vmem>>, vector<1x1x16x8xbf16>
    %14 = vector.shape_cast %13 : vector<1x1x16x8xbf16> to vector<16x8xbf16>
    %c2_17 = arith.constant 2 : index
    %c0_18 = arith.constant 0 : index
    %c0_19 = arith.constant 0 : index
    %15 = vector.load %arg3[%c2_17, %c0_18, %c0_19] : memref<15x16x16xbf16, #tpu.memory_space<vmem>>, vector<1x16x16xbf16>
    %16 = vector.shape_cast %15 : vector<1x16x16xbf16> to vector<16x16xbf16>
    %cst_20 = arith.constant dense<0.000000e+00> : vector<16x8xf32>
    %17 = tpu.matmul %16, %14, %cst_20 {dimension_numbers = #tpu.dot_dimension_numbers<[1], [0], [0], [1], [0, 0, 1, 1], [], []>} : vector<16x16xbf16>, vector<16x8xbf16>, vector<16x8xf32> -> vector<16x8xf32>
    %18 = arith.addf %12, %17 : vector<16x8xf32>
    %c0_21 = arith.constant 0 : index
    %c0_22 = arith.constant 0 : index
    %c0_23 = arith.constant 0 : index
    %c3 = arith.constant 3 : index
    %19 = vector.load %arg2[%c0_21, %c0_22, %c0_23, %c3] : memref<1x1x16x22xbf16, #tpu.memory_space<vmem>>, vector<1x1x16x8xbf16>
    %20 = vector.shape_cast %19 : vector<1x1x16x8xbf16> to vector<16x8xbf16>
    %c3_24 = arith.constant 3 : index
    %c0_25 = arith.constant 0 : index
    %c0_26 = arith.constant 0 : index
    %21 = vector.load %arg3[%c3_24, %c0_25, %c0_26] : memref<15x16x16xbf16, #tpu.memory_space<vmem>>, vector<1x16x16xbf16>
    %22 = vector.shape_cast %21 : vector<1x16x16xbf16> to vector<16x16xbf16>
    %cst_27 = arith.constant dense<0.000000e+00> : vector<16x8xf32>
    %23 = tpu.matmul %22, %20, %cst_27 {dimension_numbers = #tpu.dot_dimension_numbers<[1], [0], [0], [1], [0, 0, 1, 1], [], []>} : vector<16x16xbf16>, vector<16x8xbf16>, vector<16x8xf32> -> vector<16x8xf32>
    %24 = arith.addf %18, %23 : vector<16x8xf32>
    %c0_28 = arith.constant 0 : index
    %c0_29 = arith.constant 0 : index
    %c0_30 = arith.constant 0 : index
    %c4 = arith.constant 4 : index
    %25 = vector.load %arg2[%c0_28, %c0_29, %c0_30, %c4] : memref<1x1x16x22xbf16, #tpu.memory_space<vmem>>, vector<1x1x16x8xbf16>
    %26 = vector.shape_cast %25 : vector<1x1x16x8xbf16> to vector<16x8xbf16>
    %c4_31 = arith.constant 4 : index
    %c0_32 = arith.constant 0 : index
    %c0_33 = arith.constant 0 : index
    %27 = vector.load %arg3[%c4_31, %c0_32, %c0_33] : memref<15x16x16xbf16, #tpu.memory_space<vmem>>, vector<1x16x16xbf16>
    %28 = vector.shape_cast %27 : vector<1x16x16xbf16> to vector<16x16xbf16>
    %cst_34 = arith.constant dense<0.000000e+00> : vector<16x8xf32>
    %29 = tpu.matmul %28, %26, %cst_34 {dimension_numbers = #tpu.dot_dimension_numbers<[1], [0], [0], [1], [0, 0, 1, 1], [], []>} : vector<16x16xbf16>, vector<16x8xbf16>, vector<16x8xf32> -> vector<16x8xf32>
    %30 = arith.addf %24, %29 : vector<16x8xf32>
    %c0_35 = arith.constant 0 : index
    %c0_36 = arith.constant 0 : index
    %c0_37 = arith.constant 0 : index
    %c5 = arith.constant 5 : index
    %31 = vector.load %arg2[%c0_35, %c0_36, %c0_37, %c5] : memref<1x1x16x22xbf16, #tpu.memory_space<vmem>>, vector<1x1x16x8xbf16>
    %32 = vector.shape_cast %31 : vector<1x1x16x8xbf16> to vector<16x8xbf16>
    %c5_38 = arith.constant 5 : index
    %c0_39 = arith.constant 0 : index
    %c0_40 = arith.constant 0 : index
    %33 = vector.load %arg3[%c5_38, %c0_39, %c0_40] : memref<15x16x16xbf16, #tpu.memory_space<vmem>>, vector<1x16x16xbf16>
    %34 = vector.shape_cast %33 : vector<1x16x16xbf16> to vector<16x16xbf16>
    %cst_41 = arith.constant dense<0.000000e+00> : vector<16x8xf32>
    %35 = tpu.matmul %34, %32, %cst_41 {dimension_numbers = #tpu.dot_dimension_numbers<[1], [0], [0], [1], [0, 0, 1, 1], [], []>} : vector<16x16xbf16>, vector<16x8xbf16>, vector<16x8xf32> -> vector<16x8xf32>
    %36 = arith.addf %30, %35 : vector<16x8xf32>
    %c0_42 = arith.constant 0 : index
    %c0_43 = arith.constant 0 : index
    %c0_44 = arith.constant 0 : index
    %c6 = arith.constant 6 : index
    %37 = vector.load %arg2[%c0_42, %c0_43, %c0_44, %c6] : memref<1x1x16x22xbf16, #tpu.memory_space<vmem>>, vector<1x1x16x8xbf16>
    %38 = vector.shape_cast %37 : vector<1x1x16x8xbf16> to vector<16x8xbf16>
    %c6_45 = arith.constant 6 : index
    %c0_46 = arith.constant 0 : index
    %c0_47 = arith.constant 0 : index
    %39 = vector.load %arg3[%c6_45, %c0_46, %c0_47] : memref<15x16x16xbf16, #tpu.memory_space<vmem>>, vector<1x16x16xbf16>
    %40 = vector.shape_cast %39 : vector<1x16x16xbf16> to vector<16x16xbf16>
    %cst_48 = arith.constant dense<0.000000e+00> : vector<16x8xf32>
    %41 = tpu.matmul %40, %38, %cst_48 {dimension_numbers = #tpu.dot_dimension_numbers<[1], [0], [0], [1], [0, 0, 1, 1], [], []>} : vector<16x16xbf16>, vector<16x8xbf16>, vector<16x8xf32> -> vector<16x8xf32>
    %42 = arith.addf %36, %41 : vector<16x8xf32>
    %c0_49 = arith.constant 0 : index
    %c0_50 = arith.constant 0 : index
    %c0_51 = arith.constant 0 : index
    %c7 = arith.constant 7 : index
    %43 = vector.load %arg2[%c0_49, %c0_50, %c0_51, %c7] : memref<1x1x16x22xbf16, #tpu.memory_space<vmem>>, vector<1x1x16x8xbf16>
    %44 = vector.shape_cast %43 : vector<1x1x16x8xbf16> to vector<16x8xbf16>
    %c7_52 = arith.constant 7 : index
    %c0_53 = arith.constant 0 : index
    %c0_54 = arith.constant 0 : index
    %45 = vector.load %arg3[%c7_52, %c0_53, %c0_54] : memref<15x16x16xbf16, #tpu.memory_space<vmem>>, vector<1x16x16xbf16>
    %46 = vector.shape_cast %45 : vector<1x16x16xbf16> to vector<16x16xbf16>
    %cst_55 = arith.constant dense<0.000000e+00> : vector<16x8xf32>
    %47 = tpu.matmul %46, %44, %cst_55 {dimension_numbers = #tpu.dot_dimension_numbers<[1], [0], [0], [1], [0, 0, 1, 1], [], []>} : vector<16x16xbf16>, vector<16x8xbf16>, vector<16x8xf32> -> vector<16x8xf32>
    %48 = arith.addf %42, %47 : vector<16x8xf32>
    %c0_56 = arith.constant 0 : index
    %c0_57 = arith.constant 0 : index
    %c0_58 = arith.constant 0 : index
    %c8 = arith.constant 8 : index
    %49 = vector.load %arg2[%c0_56, %c0_57, %c0_58, %c8] : memref<1x1x16x22xbf16, #tpu.memory_space<vmem>>, vector<1x1x16x8xbf16>
    %50 = vector.shape_cast %49 : vector<1x1x16x8xbf16> to vector<16x8xbf16>
    %c8_59 = arith.constant 8 : index
    %c0_60 = arith.constant 0 : index
    %c0_61 = arith.constant 0 : index
    %51 = vector.load %arg3[%c8_59, %c0_60, %c0_61] : memref<15x16x16xbf16, #tpu.memory_space<vmem>>, vector<1x16x16xbf16>
    %52 = vector.shape_cast %51 : vector<1x16x16xbf16> to vector<16x16xbf16>
    %cst_62 = arith.constant dense<0.000000e+00> : vector<16x8xf32>
    %53 = tpu.matmul %52, %50, %cst_62 {dimension_numbers = #tpu.dot_dimension_numbers<[1], [0], [0], [1], [0, 0, 1, 1], [], []>} : vector<16x16xbf16>, vector<16x8xbf16>, vector<16x8xf32> -> vector<16x8xf32>
    %54 = arith.addf %48, %53 : vector<16x8xf32>
    %c0_63 = arith.constant 0 : index
    %c0_64 = arith.constant 0 : index
    %c0_65 = arith.constant 0 : index
    %c9 = arith.constant 9 : index
    %55 = vector.load %arg2[%c0_63, %c0_64, %c0_65, %c9] : memref<1x1x16x22xbf16, #tpu.memory_space<vmem>>, vector<1x1x16x8xbf16>
    %56 = vector.shape_cast %55 : vector<1x1x16x8xbf16> to vector<16x8xbf16>
    %c9_66 = arith.constant 9 : index
    %c0_67 = arith.constant 0 : index
    %c0_68 = arith.constant 0 : index
    %57 = vector.load %arg3[%c9_66, %c0_67, %c0_68] : memref<15x16x16xbf16, #tpu.memory_space<vmem>>, vector<1x16x16xbf16>
    %58 = vector.shape_cast %57 : vector<1x16x16xbf16> to vector<16x16xbf16>
    %cst_69 = arith.constant dense<0.000000e+00> : vector<16x8xf32>
    %59 = tpu.matmul %58, %56, %cst_69 {dimension_numbers = #tpu.dot_dimension_numbers<[1], [0], [0], [1], [0, 0, 1, 1], [], []>} : vector<16x16xbf16>, vector<16x8xbf16>, vector<16x8xf32> -> vector<16x8xf32>
    %60 = arith.addf %54, %59 : vector<16x8xf32>
    %c0_70 = arith.constant 0 : index
    %c0_71 = arith.constant 0 : index
    %c0_72 = arith.constant 0 : index
    %c10 = arith.constant 10 : index
    %61 = vector.load %arg2[%c0_70, %c0_71, %c0_72, %c10] : memref<1x1x16x22xbf16, #tpu.memory_space<vmem>>, vector<1x1x16x8xbf16>
    %62 = vector.shape_cast %61 : vector<1x1x16x8xbf16> to vector<16x8xbf16>
    %c10_73 = arith.constant 10 : index
    %c0_74 = arith.constant 0 : index
    %c0_75 = arith.constant 0 : index
    %63 = vector.load %arg3[%c10_73, %c0_74, %c0_75] : memref<15x16x16xbf16, #tpu.memory_space<vmem>>, vector<1x16x16xbf16>
    %64 = vector.shape_cast %63 : vector<1x16x16xbf16> to vector<16x16xbf16>
    %cst_76 = arith.constant dense<0.000000e+00> : vector<16x8xf32>
    %65 = tpu.matmul %64, %62, %cst_76 {dimension_numbers = #tpu.dot_dimension_numbers<[1], [0], [0], [1], [0, 0, 1, 1], [], []>} : vector<16x16xbf16>, vector<16x8xbf16>, vector<16x8xf32> -> vector<16x8xf32>
    %66 = arith.addf %60, %65 : vector<16x8xf32>
    %c0_77 = arith.constant 0 : index
    %c0_78 = arith.constant 0 : index
    %c0_79 = arith.constant 0 : index
    %c11 = arith.constant 11 : index
    %67 = vector.load %arg2[%c0_77, %c0_78, %c0_79, %c11] : memref<1x1x16x22xbf16, #tpu.memory_space<vmem>>, vector<1x1x16x8xbf16>
    %68 = vector.shape_cast %67 : vector<1x1x16x8xbf16> to vector<16x8xbf16>
    %c11_80 = arith.constant 11 : index
    %c0_81 = arith.constant 0 : index
    %c0_82 = arith.constant 0 : index
    %69 = vector.load %arg3[%c11_80, %c0_81, %c0_82] : memref<15x16x16xbf16, #tpu.memory_space<vmem>>, vector<1x16x16xbf16>
    %70 = vector.shape_cast %69 : vector<1x16x16xbf16> to vector<16x16xbf16>
    %cst_83 = arith.constant dense<0.000000e+00> : vector<16x8xf32>
    %71 = tpu.matmul %70, %68, %cst_83 {dimension_numbers = #tpu.dot_dimension_numbers<[1], [0], [0], [1], [0, 0, 1, 1], [], []>} : vector<16x16xbf16>, vector<16x8xbf16>, vector<16x8xf32> -> vector<16x8xf32>
    %72 = arith.addf %66, %71 : vector<16x8xf32>
    %c0_84 = arith.constant 0 : index
    %c0_85 = arith.constant 0 : index
    %c0_86 = arith.constant 0 : index
    %c12 = arith.constant 12 : index
    %73 = vector.load %arg2[%c0_84, %c0_85, %c0_86, %c12] : memref<1x1x16x22xbf16, #tpu.memory_space<vmem>>, vector<1x1x16x8xbf16>
    %74 = vector.shape_cast %73 : vector<1x1x16x8xbf16> to vector<16x8xbf16>
    %c12_87 = arith.constant 12 : index
    %c0_88 = arith.constant 0 : index
    %c0_89 = arith.constant 0 : index
    %75 = vector.load %arg3[%c12_87, %c0_88, %c0_89] : memref<15x16x16xbf16, #tpu.memory_space<vmem>>, vector<1x16x16xbf16>
    %76 = vector.shape_cast %75 : vector<1x16x16xbf16> to vector<16x16xbf16>
    %cst_90 = arith.constant dense<0.000000e+00> : vector<16x8xf32>
    %77 = tpu.matmul %76, %74, %cst_90 {dimension_numbers = #tpu.dot_dimension_numbers<[1], [0], [0], [1], [0, 0, 1, 1], [], []>} : vector<16x16xbf16>, vector<16x8xbf16>, vector<16x8xf32> -> vector<16x8xf32>
    %78 = arith.addf %72, %77 : vector<16x8xf32>
    %c0_91 = arith.constant 0 : index
    %c0_92 = arith.constant 0 : index
    %c0_93 = arith.constant 0 : index
    %c13 = arith.constant 13 : index
    %79 = vector.load %arg2[%c0_91, %c0_92, %c0_93, %c13] : memref<1x1x16x22xbf16, #tpu.memory_space<vmem>>, vector<1x1x16x8xbf16>
    %80 = vector.shape_cast %79 : vector<1x1x16x8xbf16> to vector<16x8xbf16>
    %c13_94 = arith.constant 13 : index
    %c0_95 = arith.constant 0 : index
    %c0_96 = arith.constant 0 : index
    %81 = vector.load %arg3[%c13_94, %c0_95, %c0_96] : memref<15x16x16xbf16, #tpu.memory_space<vmem>>, vector<1x16x16xbf16>
    %82 = vector.shape_cast %81 : vector<1x16x16xbf16> to vector<16x16xbf16>
    %cst_97 = arith.constant dense<0.000000e+00> : vector<16x8xf32>
    %83 = tpu.matmul %82, %80, %cst_97 {dimension_numbers = #tpu.dot_dimension_numbers<[1], [0], [0], [1], [0, 0, 1, 1], [], []>} : vector<16x16xbf16>, vector<16x8xbf16>, vector<16x8xf32> -> vector<16x8xf32>
    %84 = arith.addf %78, %83 : vector<16x8xf32>
    %c0_98 = arith.constant 0 : index
    %c0_99 = arith.constant 0 : index
    %c0_100 = arith.constant 0 : index
    %c14 = arith.constant 14 : index
    %85 = vector.load %arg2[%c0_98, %c0_99, %c0_100, %c14] : memref<1x1x16x22xbf16, #tpu.memory_space<vmem>>, vector<1x1x16x8xbf16>
    %86 = vector.shape_cast %85 : vector<1x1x16x8xbf16> to vector<16x8xbf16>
    %c14_101 = arith.constant 14 : index
    %c0_102 = arith.constant 0 : index
    %c0_103 = arith.constant 0 : index
    %87 = vector.load %arg3[%c14_101, %c0_102, %c0_103] : memref<15x16x16xbf16, #tpu.memory_space<vmem>>, vector<1x16x16xbf16>
    %88 = vector.shape_cast %87 : vector<1x16x16xbf16> to vector<16x16xbf16>
    %cst_104 = arith.constant dense<0.000000e+00> : vector<16x8xf32>
    %89 = tpu.matmul %88, %86, %cst_104 {dimension_numbers = #tpu.dot_dimension_numbers<[1], [0], [0], [1], [0, 0, 1, 1], [], []>} : vector<16x16xbf16>, vector<16x8xbf16>, vector<16x8xf32> -> vector<16x8xf32>
    %90 = arith.addf %84, %89 : vector<16x8xf32>
    %c0_105 = arith.constant 0 : index
    %c0_106 = arith.constant 0 : index
    %91 = vector.load %arg4[%c0_105, %c0_106] : memref<16x1xf32, #tpu.memory_space<vmem>>, vector<16x1xf32>
    %92 = vector.broadcast %91 : vector<16x1xf32> to vector<16x8xf32>
    %93 = arith.mulf %90, %92 : vector<16x8xf32>
    %c0_107 = arith.constant 0 : index
    %c0_108 = arith.constant 0 : index
    %94 = vector.load %arg5[%c0_107, %c0_108] : memref<16x1xf32, #tpu.memory_space<vmem>>, vector<16x1xf32>
    %95 = vector.broadcast %94 : vector<16x1xf32> to vector<16x8xf32>
    %96 = arith.addf %93, %95 : vector<16x8xf32>
    %cst_109 = arith.constant 0.000000e+00 : f32
    %97 = vector.broadcast %cst_109 : f32 to vector<16x8xf32>
    %98 = arith.maximumf %96, %97 : vector<16x8xf32>
    %99 = arith.truncf %98 : vector<16x8xf32> to vector<16x8xbf16>
    %c0_110 = arith.constant 0 : index
    %c0_111 = arith.constant 0 : index
    %c0_112 = arith.constant 0 : index
    %100 = vector.load %arg6[%c0_110, %c0_111, %c0_112] : memref<1x16x8xbf16, #tpu.memory_space<vmem>>, vector<1x16x8xbf16>
    %101 = vector.shape_cast %100 : vector<1x16x8xbf16> to vector<16x8xbf16>
    %102 = vector.shape_cast %99 : vector<16x8xbf16> to vector<1x16x8xbf16>
    tpu.vector_store %arg6[%c0_110, %c0_111, %c0_112], %102 {strides = array<i32>} : memref<1x16x8xbf16, #tpu.memory_space<vmem>>, vector<1x16x8xbf16>,
    return
  }
  func.func @transform_0(%arg0: i32, %arg1: i32) -> (i32, i32, i32, i32) {
    %c0_i32 = arith.constant 0 : i32
    %c0_i32_0 = arith.constant 0 : i32
    %c0_i32_1 = arith.constant 0 : i32
    %c0_i32_2 = arith.constant 0 : i32
    return %arg0, %c0_i32, %c0_i32_0, %c0_i32_1 : i32, i32, i32, i32
  }
  func.func @transform_1(%arg0: i32, %arg1: i32) -> (i32, i32, i32) {
    %c0_i32 = arith.constant 0 : i32
    %c0_i32_0 = arith.constant 0 : i32
    %c0_i32_1 = arith.constant 0 : i32
    %c0_i32_2 = arith.constant 0 : i32
    return %c0_i32, %c0_i32_0, %c0_i32_1 : i32, i32, i32
  }
  func.func @transform_2(%arg0: i32, %arg1: i32) -> (i32, i32) {
    %c0_i32 = arith.constant 0 : i32
    %c0_i32_0 = arith.constant 0 : i32
    %c0_i32_1 = arith.constant 0 : i32
    return %c0_i32, %c0_i32_0 : i32, i32
  }
  func.func @transform_3(%arg0: i32, %arg1: i32) -> (i32, i32) {
    %c0_i32 = arith.constant 0 : i32
    %c0_i32_0 = arith.constant 0 : i32
    %c0_i32_1 = arith.constant 0 : i32
    return %c0_i32, %c0_i32_0 : i32, i32
  }
  func.func @transform_4(%arg0: i32, %arg1: i32) -> (i32, i32, i32) {
    %c0_i32 = arith.constant 0 : i32
    %c0_i32_0 = arith.constant 0 : i32
    return %arg0, %c0_i32, %arg1 : i32, i32, i32
  }
}

module attributes {stable_mosaic.version = 11 : i64} {
  func.func @_conv_kernel(%arg0: i32, %arg1: i32, %arg2: memref<1x1x16x22xbf16, #tpu.memory_space<vmem>>, %arg3: memref<15x16x16xbf16, #tpu.memory_space<vmem>>, %arg4: memref<16x1xf32, #tpu.memory_space<vmem>>, %arg5: memref<16x1xf32, #tpu.memory_space<vmem>>, %arg6: memref<1x16x8xbf16, #tpu.memory_space<vmem>>, %arg7: memref<1x16x8xbf16, #tpu.memory_space<vmem>>) attributes {dimension_semantics = [#tpu.dimension_semantics<parallel>, #tpu.dimension_semantics<arbitrary>], iteration_bounds = array<i64: 2, 1>, scalar_prefetch = 0 : i64, scratch_operands = 0 : i64, tpu.core_type = #tpu.core_type<tc>, window_params = [{transform_indices = @transform_0, window_bounds = array<i64: 1, 1, 16, 22>}, {pipeline_mode = #tpu.pipeline_mode<synchronous>, transform_indices = @transform_1, window_bounds = array<i64: 15, 16, 16>}, {pipeline_mode = #tpu.pipeline_mode<synchronous>, transform_indices = @transform_2, window_bounds = array<i64: 16, 1>}, {pipeline_mode = #tpu.pipeline_mode<synchronous>, transform_indices = @transform_3, window_bounds = array<i64: 16, 1>}, {transform_indices = @transform_4, window_bounds = array<i64: 1, 16, 8>}, {transform_indices = @transform_5, window_bounds = array<i64: 1, 16, 8>}]} {
    %cst = arith.constant 0.000000e+00 : f32
    %0 = vector.broadcast %cst : f32 to vector<16x8xf32>
    %c0 = arith.constant 0 : index
    %c0_0 = arith.constant 0 : index
    %c0_1 = arith.constant 0 : index
    %c0_2 = arith.constant 0 : index
    %1 = vector.load %arg2[%c0, %c0_0, %c0_1, %c0_2] : memref<1x1x16x22xbf16, #tpu.memory_space<vmem>>, vector<1x1x16x8xbf16>
    %2 = vector.shape_cast %1 : vector<1x1x16x8xbf16> to vector<16x8xbf16>
    %c0_3 = arith.constant 0 : index
    %c0_4 = arith.constant 0 : index
    %c0_5 = arith.constant 0 : index
    %3 = vector.load %arg3[%c0_3, %c0_4, %c0_5] : memref<15x16x16xbf16, #tpu.memory_space<vmem>>, vector<1x16x16xbf16>
    %4 = vector.shape_cast %3 : vector<1x16x16xbf16> to vector<16x16xbf16>
    %cst_6 = arith.constant dense<0.000000e+00> : vector<16x8xf32>
    %5 = tpu.matmul %4, %2, %cst_6 {dimension_numbers = #tpu.dot_dimension_numbers<[1], [0], [0], [1], [0, 0, 1, 1], [], []>} : vector<16x16xbf16>, vector<16x8xbf16>, vector<16x8xf32> -> vector<16x8xf32>
    %6 = arith.addf %0, %5 : vector<16x8xf32>
    %c0_7 = arith.constant 0 : index
    %c0_8 = arith.constant 0 : index
    %c0_9 = arith.constant 0 : index
    %c1 = arith.constant 1 : index
    %7 = vector.load %arg2[%c0_7, %c0_8, %c0_9, %c1] : memref<1x1x16x22xbf16, #tpu.memory_space<vmem>>, vector<1x1x16x8xbf16>
    %8 = vector.shape_cast %7 : vector<1x1x16x8xbf16> to vector<16x8xbf16>
    %c1_10 = arith.constant 1 : index
    %c0_11 = arith.constant 0 : index
    %c0_12 = arith.constant 0 : index
    %9 = vector.load %arg3[%c1_10, %c0_11, %c0_12] : memref<15x16x16xbf16, #tpu.memory_space<vmem>>, vector<1x16x16xbf16>
    %10 = vector.shape_cast %9 : vector<1x16x16xbf16> to vector<16x16xbf16>
    %cst_13 = arith.constant dense<0.000000e+00> : vector<16x8xf32>
    %11 = tpu.matmul %10, %8, %cst_13 {dimension_numbers = #tpu.dot_dimension_numbers<[1], [0], [0], [1], [0, 0, 1, 1], [], []>} : vector<16x16xbf16>, vector<16x8xbf16>, vector<16x8xf32> -> vector<16x8xf32>
    %12 = arith.addf %6, %11 : vector<16x8xf32>
    %c0_14 = arith.constant 0 : index
    %c0_15 = arith.constant 0 : index
    %c0_16 = arith.constant 0 : index
    %c2 = arith.constant 2 : index
    %13 = vector.load %arg2[%c0_14, %c0_15, %c0_16, %c2] : memref<1x1x16x22xbf16, #tpu.memory_space<vmem>>, vector<1x1x16x8xbf16>
    %14 = vector.shape_cast %13 : vector<1x1x16x8xbf16> to vector<16x8xbf16>
    %c2_17 = arith.constant 2 : index
    %c0_18 = arith.constant 0 : index
    %c0_19 = arith.constant 0 : index
    %15 = vector.load %arg3[%c2_17, %c0_18, %c0_19] : memref<15x16x16xbf16, #tpu.memory_space<vmem>>, vector<1x16x16xbf16>
    %16 = vector.shape_cast %15 : vector<1x16x16xbf16> to vector<16x16xbf16>
    %cst_20 = arith.constant dense<0.000000e+00> : vector<16x8xf32>
    %17 = tpu.matmul %16, %14, %cst_20 {dimension_numbers = #tpu.dot_dimension_numbers<[1], [0], [0], [1], [0, 0, 1, 1], [], []>} : vector<16x16xbf16>, vector<16x8xbf16>, vector<16x8xf32> -> vector<16x8xf32>
    %18 = arith.addf %12, %17 : vector<16x8xf32>
    %c0_21 = arith.constant 0 : index
    %c0_22 = arith.constant 0 : index
    %c0_23 = arith.constant 0 : index
    %c3 = arith.constant 3 : index
    %19 = vector.load %arg2[%c0_21, %c0_22, %c0_23, %c3] : memref<1x1x16x22xbf16, #tpu.memory_space<vmem>>, vector<1x1x16x8xbf16>
    %20 = vector.shape_cast %19 : vector<1x1x16x8xbf16> to vector<16x8xbf16>
    %c3_24 = arith.constant 3 : index
    %c0_25 = arith.constant 0 : index
    %c0_26 = arith.constant 0 : index
    %21 = vector.load %arg3[%c3_24, %c0_25, %c0_26] : memref<15x16x16xbf16, #tpu.memory_space<vmem>>, vector<1x16x16xbf16>
    %22 = vector.shape_cast %21 : vector<1x16x16xbf16> to vector<16x16xbf16>
    %cst_27 = arith.constant dense<0.000000e+00> : vector<16x8xf32>
    %23 = tpu.matmul %22, %20, %cst_27 {dimension_numbers = #tpu.dot_dimension_numbers<[1], [0], [0], [1], [0, 0, 1, 1], [], []>} : vector<16x16xbf16>, vector<16x8xbf16>, vector<16x8xf32> -> vector<16x8xf32>
    %24 = arith.addf %18, %23 : vector<16x8xf32>
    %c0_28 = arith.constant 0 : index
    %c0_29 = arith.constant 0 : index
    %c0_30 = arith.constant 0 : index
    %c4 = arith.constant 4 : index
    %25 = vector.load %arg2[%c0_28, %c0_29, %c0_30, %c4] : memref<1x1x16x22xbf16, #tpu.memory_space<vmem>>, vector<1x1x16x8xbf16>
    %26 = vector.shape_cast %25 : vector<1x1x16x8xbf16> to vector<16x8xbf16>
    %c4_31 = arith.constant 4 : index
    %c0_32 = arith.constant 0 : index
    %c0_33 = arith.constant 0 : index
    %27 = vector.load %arg3[%c4_31, %c0_32, %c0_33] : memref<15x16x16xbf16, #tpu.memory_space<vmem>>, vector<1x16x16xbf16>
    %28 = vector.shape_cast %27 : vector<1x16x16xbf16> to vector<16x16xbf16>
    %cst_34 = arith.constant dense<0.000000e+00> : vector<16x8xf32>
    %29 = tpu.matmul %28, %26, %cst_34 {dimension_numbers = #tpu.dot_dimension_numbers<[1], [0], [0], [1], [0, 0, 1, 1], [], []>} : vector<16x16xbf16>, vector<16x8xbf16>, vector<16x8xf32> -> vector<16x8xf32>
    %30 = arith.addf %24, %29 : vector<16x8xf32>
    %c0_35 = arith.constant 0 : index
    %c0_36 = arith.constant 0 : index
    %c0_37 = arith.constant 0 : index
    %c5 = arith.constant 5 : index
    %31 = vector.load %arg2[%c0_35, %c0_36, %c0_37, %c5] : memref<1x1x16x22xbf16, #tpu.memory_space<vmem>>, vector<1x1x16x8xbf16>
    %32 = vector.shape_cast %31 : vector<1x1x16x8xbf16> to vector<16x8xbf16>
    %c5_38 = arith.constant 5 : index
    %c0_39 = arith.constant 0 : index
    %c0_40 = arith.constant 0 : index
    %33 = vector.load %arg3[%c5_38, %c0_39, %c0_40] : memref<15x16x16xbf16, #tpu.memory_space<vmem>>, vector<1x16x16xbf16>
    %34 = vector.shape_cast %33 : vector<1x16x16xbf16> to vector<16x16xbf16>
    %cst_41 = arith.constant dense<0.000000e+00> : vector<16x8xf32>
    %35 = tpu.matmul %34, %32, %cst_41 {dimension_numbers = #tpu.dot_dimension_numbers<[1], [0], [0], [1], [0, 0, 1, 1], [], []>} : vector<16x16xbf16>, vector<16x8xbf16>, vector<16x8xf32> -> vector<16x8xf32>
    %36 = arith.addf %30, %35 : vector<16x8xf32>
    %c0_42 = arith.constant 0 : index
    %c0_43 = arith.constant 0 : index
    %c0_44 = arith.constant 0 : index
    %c6 = arith.constant 6 : index
    %37 = vector.load %arg2[%c0_42, %c0_43, %c0_44, %c6] : memref<1x1x16x22xbf16, #tpu.memory_space<vmem>>, vector<1x1x16x8xbf16>
    %38 = vector.shape_cast %37 : vector<1x1x16x8xbf16> to vector<16x8xbf16>
    %c6_45 = arith.constant 6 : index
    %c0_46 = arith.constant 0 : index
    %c0_47 = arith.constant 0 : index
    %39 = vector.load %arg3[%c6_45, %c0_46, %c0_47] : memref<15x16x16xbf16, #tpu.memory_space<vmem>>, vector<1x16x16xbf16>
    %40 = vector.shape_cast %39 : vector<1x16x16xbf16> to vector<16x16xbf16>
    %cst_48 = arith.constant dense<0.000000e+00> : vector<16x8xf32>
    %41 = tpu.matmul %40, %38, %cst_48 {dimension_numbers = #tpu.dot_dimension_numbers<[1], [0], [0], [1], [0, 0, 1, 1], [], []>} : vector<16x16xbf16>, vector<16x8xbf16>, vector<16x8xf32> -> vector<16x8xf32>
    %42 = arith.addf %36, %41 : vector<16x8xf32>
    %c0_49 = arith.constant 0 : index
    %c0_50 = arith.constant 0 : index
    %c0_51 = arith.constant 0 : index
    %c7 = arith.constant 7 : index
    %43 = vector.load %arg2[%c0_49, %c0_50, %c0_51, %c7] : memref<1x1x16x22xbf16, #tpu.memory_space<vmem>>, vector<1x1x16x8xbf16>
    %44 = vector.shape_cast %43 : vector<1x1x16x8xbf16> to vector<16x8xbf16>
    %c7_52 = arith.constant 7 : index
    %c0_53 = arith.constant 0 : index
    %c0_54 = arith.constant 0 : index
    %45 = vector.load %arg3[%c7_52, %c0_53, %c0_54] : memref<15x16x16xbf16, #tpu.memory_space<vmem>>, vector<1x16x16xbf16>
    %46 = vector.shape_cast %45 : vector<1x16x16xbf16> to vector<16x16xbf16>
    %cst_55 = arith.constant dense<0.000000e+00> : vector<16x8xf32>
    %47 = tpu.matmul %46, %44, %cst_55 {dimension_numbers = #tpu.dot_dimension_numbers<[1], [0], [0], [1], [0, 0, 1, 1], [], []>} : vector<16x16xbf16>, vector<16x8xbf16>, vector<16x8xf32> -> vector<16x8xf32>
    %48 = arith.addf %42, %47 : vector<16x8xf32>
    %c0_56 = arith.constant 0 : index
    %c0_57 = arith.constant 0 : index
    %c0_58 = arith.constant 0 : index
    %c8 = arith.constant 8 : index
    %49 = vector.load %arg2[%c0_56, %c0_57, %c0_58, %c8] : memref<1x1x16x22xbf16, #tpu.memory_space<vmem>>, vector<1x1x16x8xbf16>
    %50 = vector.shape_cast %49 : vector<1x1x16x8xbf16> to vector<16x8xbf16>
    %c8_59 = arith.constant 8 : index
    %c0_60 = arith.constant 0 : index
    %c0_61 = arith.constant 0 : index
    %51 = vector.load %arg3[%c8_59, %c0_60, %c0_61] : memref<15x16x16xbf16, #tpu.memory_space<vmem>>, vector<1x16x16xbf16>
    %52 = vector.shape_cast %51 : vector<1x16x16xbf16> to vector<16x16xbf16>
    %cst_62 = arith.constant dense<0.000000e+00> : vector<16x8xf32>
    %53 = tpu.matmul %52, %50, %cst_62 {dimension_numbers = #tpu.dot_dimension_numbers<[1], [0], [0], [1], [0, 0, 1, 1], [], []>} : vector<16x16xbf16>, vector<16x8xbf16>, vector<16x8xf32> -> vector<16x8xf32>
    %54 = arith.addf %48, %53 : vector<16x8xf32>
    %c0_63 = arith.constant 0 : index
    %c0_64 = arith.constant 0 : index
    %c0_65 = arith.constant 0 : index
    %c9 = arith.constant 9 : index
    %55 = vector.load %arg2[%c0_63, %c0_64, %c0_65, %c9] : memref<1x1x16x22xbf16, #tpu.memory_space<vmem>>, vector<1x1x16x8xbf16>
    %56 = vector.shape_cast %55 : vector<1x1x16x8xbf16> to vector<16x8xbf16>
    %c9_66 = arith.constant 9 : index
    %c0_67 = arith.constant 0 : index
    %c0_68 = arith.constant 0 : index
    %57 = vector.load %arg3[%c9_66, %c0_67, %c0_68] : memref<15x16x16xbf16, #tpu.memory_space<vmem>>, vector<1x16x16xbf16>
    %58 = vector.shape_cast %57 : vector<1x16x16xbf16> to vector<16x16xbf16>
    %cst_69 = arith.constant dense<0.000000e+00> : vector<16x8xf32>
    %59 = tpu.matmul %58, %56, %cst_69 {dimension_numbers = #tpu.dot_dimension_numbers<[1], [0], [0], [1], [0, 0, 1, 1], [], []>} : vector<16x16xbf16>, vector<16x8xbf16>, vector<16x8xf32> -> vector<16x8xf32>
    %60 = arith.addf %54, %59 : vector<16x8xf32>
    %c0_70 = arith.constant 0 : index
    %c0_71 = arith.constant 0 : index
    %c0_72 = arith.constant 0 : index
    %c10 = arith.constant 10 : index
    %61 = vector.load %arg2[%c0_70, %c0_71, %c0_72, %c10] : memref<1x1x16x22xbf16, #tpu.memory_space<vmem>>, vector<1x1x16x8xbf16>
    %62 = vector.shape_cast %61 : vector<1x1x16x8xbf16> to vector<16x8xbf16>
    %c10_73 = arith.constant 10 : index
    %c0_74 = arith.constant 0 : index
    %c0_75 = arith.constant 0 : index
    %63 = vector.load %arg3[%c10_73, %c0_74, %c0_75] : memref<15x16x16xbf16, #tpu.memory_space<vmem>>, vector<1x16x16xbf16>
    %64 = vector.shape_cast %63 : vector<1x16x16xbf16> to vector<16x16xbf16>
    %cst_76 = arith.constant dense<0.000000e+00> : vector<16x8xf32>
    %65 = tpu.matmul %64, %62, %cst_76 {dimension_numbers = #tpu.dot_dimension_numbers<[1], [0], [0], [1], [0, 0, 1, 1], [], []>} : vector<16x16xbf16>, vector<16x8xbf16>, vector<16x8xf32> -> vector<16x8xf32>
    %66 = arith.addf %60, %65 : vector<16x8xf32>
    %c0_77 = arith.constant 0 : index
    %c0_78 = arith.constant 0 : index
    %c0_79 = arith.constant 0 : index
    %c11 = arith.constant 11 : index
    %67 = vector.load %arg2[%c0_77, %c0_78, %c0_79, %c11] : memref<1x1x16x22xbf16, #tpu.memory_space<vmem>>, vector<1x1x16x8xbf16>
    %68 = vector.shape_cast %67 : vector<1x1x16x8xbf16> to vector<16x8xbf16>
    %c11_80 = arith.constant 11 : index
    %c0_81 = arith.constant 0 : index
    %c0_82 = arith.constant 0 : index
    %69 = vector.load %arg3[%c11_80, %c0_81, %c0_82] : memref<15x16x16xbf16, #tpu.memory_space<vmem>>, vector<1x16x16xbf16>
    %70 = vector.shape_cast %69 : vector<1x16x16xbf16> to vector<16x16xbf16>
    %cst_83 = arith.constant dense<0.000000e+00> : vector<16x8xf32>
    %71 = tpu.matmul %70, %68, %cst_83 {dimension_numbers = #tpu.dot_dimension_numbers<[1], [0], [0], [1], [0, 0, 1, 1], [], []>} : vector<16x16xbf16>, vector<16x8xbf16>, vector<16x8xf32> -> vector<16x8xf32>
    %72 = arith.addf %66, %71 : vector<16x8xf32>
    %c0_84 = arith.constant 0 : index
    %c0_85 = arith.constant 0 : index
    %c0_86 = arith.constant 0 : index
    %c12 = arith.constant 12 : index
    %73 = vector.load %arg2[%c0_84, %c0_85, %c0_86, %c12] : memref<1x1x16x22xbf16, #tpu.memory_space<vmem>>, vector<1x1x16x8xbf16>
    %74 = vector.shape_cast %73 : vector<1x1x16x8xbf16> to vector<16x8xbf16>
    %c12_87 = arith.constant 12 : index
    %c0_88 = arith.constant 0 : index
    %c0_89 = arith.constant 0 : index
    %75 = vector.load %arg3[%c12_87, %c0_88, %c0_89] : memref<15x16x16xbf16, #tpu.memory_space<vmem>>, vector<1x16x16xbf16>
    %76 = vector.shape_cast %75 : vector<1x16x16xbf16> to vector<16x16xbf16>
    %cst_90 = arith.constant dense<0.000000e+00> : vector<16x8xf32>
    %77 = tpu.matmul %76, %74, %cst_90 {dimension_numbers = #tpu.dot_dimension_numbers<[1], [0], [0], [1], [0, 0, 1, 1], [], []>} : vector<16x16xbf16>, vector<16x8xbf16>, vector<16x8xf32> -> vector<16x8xf32>
    %78 = arith.addf %72, %77 : vector<16x8xf32>
    %c0_91 = arith.constant 0 : index
    %c0_92 = arith.constant 0 : index
    %c0_93 = arith.constant 0 : index
    %c13 = arith.constant 13 : index
    %79 = vector.load %arg2[%c0_91, %c0_92, %c0_93, %c13] : memref<1x1x16x22xbf16, #tpu.memory_space<vmem>>, vector<1x1x16x8xbf16>
    %80 = vector.shape_cast %79 : vector<1x1x16x8xbf16> to vector<16x8xbf16>
    %c13_94 = arith.constant 13 : index
    %c0_95 = arith.constant 0 : index
    %c0_96 = arith.constant 0 : index
    %81 = vector.load %arg3[%c13_94, %c0_95, %c0_96] : memref<15x16x16xbf16, #tpu.memory_space<vmem>>, vector<1x16x16xbf16>
    %82 = vector.shape_cast %81 : vector<1x16x16xbf16> to vector<16x16xbf16>
    %cst_97 = arith.constant dense<0.000000e+00> : vector<16x8xf32>
    %83 = tpu.matmul %82, %80, %cst_97 {dimension_numbers = #tpu.dot_dimension_numbers<[1], [0], [0], [1], [0, 0, 1, 1], [], []>} : vector<16x16xbf16>, vector<16x8xbf16>, vector<16x8xf32> -> vector<16x8xf32>
    %84 = arith.addf %78, %83 : vector<16x8xf32>
    %c0_98 = arith.constant 0 : index
    %c0_99 = arith.constant 0 : index
    %c0_100 = arith.constant 0 : index
    %c14 = arith.constant 14 : index
    %85 = vector.load %arg2[%c0_98, %c0_99, %c0_100, %c14] : memref<1x1x16x22xbf16, #tpu.memory_space<vmem>>, vector<1x1x16x8xbf16>
    %86 = vector.shape_cast %85 : vector<1x1x16x8xbf16> to vector<16x8xbf16>
    %c14_101 = arith.constant 14 : index
    %c0_102 = arith.constant 0 : index
    %c0_103 = arith.constant 0 : index
    %87 = vector.load %arg3[%c14_101, %c0_102, %c0_103] : memref<15x16x16xbf16, #tpu.memory_space<vmem>>, vector<1x16x16xbf16>
    %88 = vector.shape_cast %87 : vector<1x16x16xbf16> to vector<16x16xbf16>
    %cst_104 = arith.constant dense<0.000000e+00> : vector<16x8xf32>
    %89 = tpu.matmul %88, %86, %cst_104 {dimension_numbers = #tpu.dot_dimension_numbers<[1], [0], [0], [1], [0, 0, 1, 1], [], []>} : vector<16x16xbf16>, vector<16x8xbf16>, vector<16x8xf32> -> vector<16x8xf32>
    %90 = arith.addf %84, %89 : vector<16x8xf32>
    %c0_105 = arith.constant 0 : index
    %c0_106 = arith.constant 0 : index
    %91 = vector.load %arg4[%c0_105, %c0_106] : memref<16x1xf32, #tpu.memory_space<vmem>>, vector<16x1xf32>
    %92 = vector.broadcast %91 : vector<16x1xf32> to vector<16x8xf32>
    %93 = arith.mulf %90, %92 : vector<16x8xf32>
    %c0_107 = arith.constant 0 : index
    %c0_108 = arith.constant 0 : index
    %94 = vector.load %arg5[%c0_107, %c0_108] : memref<16x1xf32, #tpu.memory_space<vmem>>, vector<16x1xf32>
    %95 = vector.broadcast %94 : vector<16x1xf32> to vector<16x8xf32>
    %96 = arith.addf %93, %95 : vector<16x8xf32>
    %cst_109 = arith.constant 0.000000e+00 : f32
    %97 = vector.broadcast %cst_109 : f32 to vector<16x8xf32>
    %98 = arith.maximumf %96, %97 : vector<16x8xf32>
    %c0_110 = arith.constant 0 : index
    %c0_111 = arith.constant 0 : index
    %c0_112 = arith.constant 0 : index
    %99 = vector.load %arg6[%c0_110, %c0_111, %c0_112] : memref<1x16x8xbf16, #tpu.memory_space<vmem>>, vector<1x16x8xbf16>
    %100 = vector.shape_cast %99 : vector<1x16x8xbf16> to vector<16x8xbf16>
    %101 = arith.extf %100 : vector<16x8xbf16> to vector<16x8xf32>
    %102 = arith.addf %98, %101 : vector<16x8xf32>
    %103 = arith.truncf %102 : vector<16x8xf32> to vector<16x8xbf16>
    %c0_113 = arith.constant 0 : index
    %c0_114 = arith.constant 0 : index
    %c0_115 = arith.constant 0 : index
    %104 = vector.load %arg7[%c0_113, %c0_114, %c0_115] : memref<1x16x8xbf16, #tpu.memory_space<vmem>>, vector<1x16x8xbf16>
    %105 = vector.shape_cast %104 : vector<1x16x8xbf16> to vector<16x8xbf16>
    %106 = vector.shape_cast %103 : vector<16x8xbf16> to vector<1x16x8xbf16>
    tpu.vector_store %arg7[%c0_113, %c0_114, %c0_115], %106 {strides = array<i32>} : memref<1x16x8xbf16, #tpu.memory_space<vmem>>, vector<1x16x8xbf16>,
    return
  }
  func.func @transform_0(%arg0: i32, %arg1: i32) -> (i32, i32, i32, i32) {
    %c0_i32 = arith.constant 0 : i32
    %c0_i32_0 = arith.constant 0 : i32
    %c0_i32_1 = arith.constant 0 : i32
    %c0_i32_2 = arith.constant 0 : i32
    return %arg0, %c0_i32, %c0_i32_0, %c0_i32_1 : i32, i32, i32, i32
  }
  func.func @transform_1(%arg0: i32, %arg1: i32) -> (i32, i32, i32) {
    %c0_i32 = arith.constant 0 : i32
    %c0_i32_0 = arith.constant 0 : i32
    %c0_i32_1 = arith.constant 0 : i32
    %c0_i32_2 = arith.constant 0 : i32
    return %c0_i32, %c0_i32_0, %c0_i32_1 : i32, i32, i32
  }
  func.func @transform_2(%arg0: i32, %arg1: i32) -> (i32, i32) {
    %c0_i32 = arith.constant 0 : i32
    %c0_i32_0 = arith.constant 0 : i32
    %c0_i32_1 = arith.constant 0 : i32
    return %c0_i32, %c0_i32_0 : i32, i32
  }
  func.func @transform_3(%arg0: i32, %arg1: i32) -> (i32, i32) {
    %c0_i32 = arith.constant 0 : i32
    %c0_i32_0 = arith.constant 0 : i32
    %c0_i32_1 = arith.constant 0 : i32
    return %c0_i32, %c0_i32_0 : i32, i32
  }
  func.func @transform_4(%arg0: i32, %arg1: i32) -> (i32, i32, i32) {
    %c0_i32 = arith.constant 0 : i32
    %c0_i32_0 = arith.constant 0 : i32
    return %arg0, %c0_i32, %arg1 : i32, i32, i32
  }
  func.func @transform_5(%arg0: i32, %arg1: i32) -> (i32, i32, i32) {
    %c0_i32 = arith.constant 0 : i32
    %c0_i32_0 = arith.constant 0 : i32
    return %arg0, %c0_i32, %arg1 : i32, i32, i32
  }
}

module attributes {stable_mosaic.version = 11 : i64} {
  func.func @_conv_kernel(%arg0: i32, %arg1: i32, %arg2: memref<1x2x16x11xbf16, #tpu.memory_space<vmem>>, %arg3: memref<15x32x16xbf16, #tpu.memory_space<vmem>>, %arg4: memref<32x1xf32, #tpu.memory_space<vmem>>, %arg5: memref<32x1xf32, #tpu.memory_space<vmem>>, %arg6: memref<1x32x4xbf16, #tpu.memory_space<vmem>>) attributes {dimension_semantics = [#tpu.dimension_semantics<parallel>, #tpu.dimension_semantics<arbitrary>], iteration_bounds = array<i64: 2, 1>, scalar_prefetch = 0 : i64, scratch_operands = 0 : i64, tpu.core_type = #tpu.core_type<tc>, window_params = [{transform_indices = @transform_0, window_bounds = array<i64: 1, 2, 16, 11>}, {pipeline_mode = #tpu.pipeline_mode<synchronous>, transform_indices = @transform_1, window_bounds = array<i64: 15, 32, 16>}, {pipeline_mode = #tpu.pipeline_mode<synchronous>, transform_indices = @transform_2, window_bounds = array<i64: 32, 1>}, {pipeline_mode = #tpu.pipeline_mode<synchronous>, transform_indices = @transform_3, window_bounds = array<i64: 32, 1>}, {transform_indices = @transform_4, window_bounds = array<i64: 1, 32, 4>}]} {
    %cst = arith.constant 0.000000e+00 : f32
    %0 = vector.broadcast %cst : f32 to vector<32x4xf32>
    %c0 = arith.constant 0 : index
    %c0_0 = arith.constant 0 : index
    %c0_1 = arith.constant 0 : index
    %c0_2 = arith.constant 0 : index
    %1 = vector.load %arg2[%c0, %c0_0, %c0_1, %c0_2] : memref<1x2x16x11xbf16, #tpu.memory_space<vmem>>, vector<1x1x16x4xbf16>
    %2 = vector.shape_cast %1 : vector<1x1x16x4xbf16> to vector<16x4xbf16>
    %c0_3 = arith.constant 0 : index
    %c0_4 = arith.constant 0 : index
    %c0_5 = arith.constant 0 : index
    %3 = vector.load %arg3[%c0_3, %c0_4, %c0_5] : memref<15x32x16xbf16, #tpu.memory_space<vmem>>, vector<1x32x16xbf16>
    %4 = vector.shape_cast %3 : vector<1x32x16xbf16> to vector<32x16xbf16>
    %cst_6 = arith.constant dense<0.000000e+00> : vector<32x4xf32>
    %5 = tpu.matmul %4, %2, %cst_6 {dimension_numbers = #tpu.dot_dimension_numbers<[1], [0], [0], [1], [0, 0, 1, 1], [], []>} : vector<32x16xbf16>, vector<16x4xbf16>, vector<32x4xf32> -> vector<32x4xf32>
    %6 = arith.addf %0, %5 : vector<32x4xf32>
    %c0_7 = arith.constant 0 : index
    %c1 = arith.constant 1 : index
    %c0_8 = arith.constant 0 : index
    %c0_9 = arith.constant 0 : index
    %7 = vector.load %arg2[%c0_7, %c1, %c0_8, %c0_9] : memref<1x2x16x11xbf16, #tpu.memory_space<vmem>>, vector<1x1x16x4xbf16>
    %8 = vector.shape_cast %7 : vector<1x1x16x4xbf16> to vector<16x4xbf16>
    %c1_10 = arith.constant 1 : index
    %c0_11 = arith.constant 0 : index
    %c0_12 = arith.constant 0 : index
    %9 = vector.load %arg3[%c1_10, %c0_11, %c0_12] : memref<15x32x16xbf16, #tpu.memory_space<vmem>>, vector<1x32x16xbf16>
    %10 = vector.shape_cast %9 : vector<1x32x16xbf16> to vector<32x16xbf16>
    %cst_13 = arith.constant dense<0.000000e+00> : vector<32x4xf32>
    %11 = tpu.matmul %10, %8, %cst_13 {dimension_numbers = #tpu.dot_dimension_numbers<[1], [0], [0], [1], [0, 0, 1, 1], [], []>} : vector<32x16xbf16>, vector<16x4xbf16>, vector<32x4xf32> -> vector<32x4xf32>
    %12 = arith.addf %6, %11 : vector<32x4xf32>
    %c0_14 = arith.constant 0 : index
    %c0_15 = arith.constant 0 : index
    %c0_16 = arith.constant 0 : index
    %c1_17 = arith.constant 1 : index
    %13 = vector.load %arg2[%c0_14, %c0_15, %c0_16, %c1_17] : memref<1x2x16x11xbf16, #tpu.memory_space<vmem>>, vector<1x1x16x4xbf16>
    %14 = vector.shape_cast %13 : vector<1x1x16x4xbf16> to vector<16x4xbf16>
    %c2 = arith.constant 2 : index
    %c0_18 = arith.constant 0 : index
    %c0_19 = arith.constant 0 : index
    %15 = vector.load %arg3[%c2, %c0_18, %c0_19] : memref<15x32x16xbf16, #tpu.memory_space<vmem>>, vector<1x32x16xbf16>
    %16 = vector.shape_cast %15 : vector<1x32x16xbf16> to vector<32x16xbf16>
    %cst_20 = arith.constant dense<0.000000e+00> : vector<32x4xf32>
    %17 = tpu.matmul %16, %14, %cst_20 {dimension_numbers = #tpu.dot_dimension_numbers<[1], [0], [0], [1], [0, 0, 1, 1], [], []>} : vector<32x16xbf16>, vector<16x4xbf16>, vector<32x4xf32> -> vector<32x4xf32>
    %18 = arith.addf %12, %17 : vector<32x4xf32>
    %c0_21 = arith.constant 0 : index
    %c1_22 = arith.constant 1 : index
    %c0_23 = arith.constant 0 : index
    %c1_24 = arith.constant 1 : index
    %19 = vector.load %arg2[%c0_21, %c1_22, %c0_23, %c1_24] : memref<1x2x16x11xbf16, #tpu.memory_space<vmem>>, vector<1x1x16x4xbf16>
    %20 = vector.shape_cast %19 : vector<1x1x16x4xbf16> to vector<16x4xbf16>
    %c3 = arith.constant 3 : index
    %c0_25 = arith.constant 0 : index
    %c0_26 = arith.constant 0 : index
    %21 = vector.load %arg3[%c3, %c0_25, %c0_26] : memref<15x32x16xbf16, #tpu.memory_space<vmem>>, vector<1x32x16xbf16>
    %22 = vector.shape_cast %21 : vector<1x32x16xbf16> to vector<32x16xbf16>
    %cst_27 = arith.constant dense<0.000000e+00> : vector<32x4xf32>
    %23 = tpu.matmul %22, %20, %cst_27 {dimension_numbers = #tpu.dot_dimension_numbers<[1], [0], [0], [1], [0, 0, 1, 1], [], []>} : vector<32x16xbf16>, vector<16x4xbf16>, vector<32x4xf32> -> vector<32x4xf32>
    %24 = arith.addf %18, %23 : vector<32x4xf32>
    %c0_28 = arith.constant 0 : index
    %c0_29 = arith.constant 0 : index
    %c0_30 = arith.constant 0 : index
    %c2_31 = arith.constant 2 : index
    %25 = vector.load %arg2[%c0_28, %c0_29, %c0_30, %c2_31] : memref<1x2x16x11xbf16, #tpu.memory_space<vmem>>, vector<1x1x16x4xbf16>
    %26 = vector.shape_cast %25 : vector<1x1x16x4xbf16> to vector<16x4xbf16>
    %c4 = arith.constant 4 : index
    %c0_32 = arith.constant 0 : index
    %c0_33 = arith.constant 0 : index
    %27 = vector.load %arg3[%c4, %c0_32, %c0_33] : memref<15x32x16xbf16, #tpu.memory_space<vmem>>, vector<1x32x16xbf16>
    %28 = vector.shape_cast %27 : vector<1x32x16xbf16> to vector<32x16xbf16>
    %cst_34 = arith.constant dense<0.000000e+00> : vector<32x4xf32>
    %29 = tpu.matmul %28, %26, %cst_34 {dimension_numbers = #tpu.dot_dimension_numbers<[1], [0], [0], [1], [0, 0, 1, 1], [], []>} : vector<32x16xbf16>, vector<16x4xbf16>, vector<32x4xf32> -> vector<32x4xf32>
    %30 = arith.addf %24, %29 : vector<32x4xf32>
    %c0_35 = arith.constant 0 : index
    %c1_36 = arith.constant 1 : index
    %c0_37 = arith.constant 0 : index
    %c2_38 = arith.constant 2 : index
    %31 = vector.load %arg2[%c0_35, %c1_36, %c0_37, %c2_38] : memref<1x2x16x11xbf16, #tpu.memory_space<vmem>>, vector<1x1x16x4xbf16>
    %32 = vector.shape_cast %31 : vector<1x1x16x4xbf16> to vector<16x4xbf16>
    %c5 = arith.constant 5 : index
    %c0_39 = arith.constant 0 : index
    %c0_40 = arith.constant 0 : index
    %33 = vector.load %arg3[%c5, %c0_39, %c0_40] : memref<15x32x16xbf16, #tpu.memory_space<vmem>>, vector<1x32x16xbf16>
    %34 = vector.shape_cast %33 : vector<1x32x16xbf16> to vector<32x16xbf16>
    %cst_41 = arith.constant dense<0.000000e+00> : vector<32x4xf32>
    %35 = tpu.matmul %34, %32, %cst_41 {dimension_numbers = #tpu.dot_dimension_numbers<[1], [0], [0], [1], [0, 0, 1, 1], [], []>} : vector<32x16xbf16>, vector<16x4xbf16>, vector<32x4xf32> -> vector<32x4xf32>
    %36 = arith.addf %30, %35 : vector<32x4xf32>
    %c0_42 = arith.constant 0 : index
    %c0_43 = arith.constant 0 : index
    %c0_44 = arith.constant 0 : index
    %c3_45 = arith.constant 3 : index
    %37 = vector.load %arg2[%c0_42, %c0_43, %c0_44, %c3_45] : memref<1x2x16x11xbf16, #tpu.memory_space<vmem>>, vector<1x1x16x4xbf16>
    %38 = vector.shape_cast %37 : vector<1x1x16x4xbf16> to vector<16x4xbf16>
    %c6 = arith.constant 6 : index
    %c0_46 = arith.constant 0 : index
    %c0_47 = arith.constant 0 : index
    %39 = vector.load %arg3[%c6, %c0_46, %c0_47] : memref<15x32x16xbf16, #tpu.memory_space<vmem>>, vector<1x32x16xbf16>
    %40 = vector.shape_cast %39 : vector<1x32x16xbf16> to vector<32x16xbf16>
    %cst_48 = arith.constant dense<0.000000e+00> : vector<32x4xf32>
    %41 = tpu.matmul %40, %38, %cst_48 {dimension_numbers = #tpu.dot_dimension_numbers<[1], [0], [0], [1], [0, 0, 1, 1], [], []>} : vector<32x16xbf16>, vector<16x4xbf16>, vector<32x4xf32> -> vector<32x4xf32>
    %42 = arith.addf %36, %41 : vector<32x4xf32>
    %c0_49 = arith.constant 0 : index
    %c1_50 = arith.constant 1 : index
    %c0_51 = arith.constant 0 : index
    %c3_52 = arith.constant 3 : index
    %43 = vector.load %arg2[%c0_49, %c1_50, %c0_51, %c3_52] : memref<1x2x16x11xbf16, #tpu.memory_space<vmem>>, vector<1x1x16x4xbf16>
    %44 = vector.shape_cast %43 : vector<1x1x16x4xbf16> to vector<16x4xbf16>
    %c7 = arith.constant 7 : index
    %c0_53 = arith.constant 0 : index
    %c0_54 = arith.constant 0 : index
    %45 = vector.load %arg3[%c7, %c0_53, %c0_54] : memref<15x32x16xbf16, #tpu.memory_space<vmem>>, vector<1x32x16xbf16>
    %46 = vector.shape_cast %45 : vector<1x32x16xbf16> to vector<32x16xbf16>
    %cst_55 = arith.constant dense<0.000000e+00> : vector<32x4xf32>
    %47 = tpu.matmul %46, %44, %cst_55 {dimension_numbers = #tpu.dot_dimension_numbers<[1], [0], [0], [1], [0, 0, 1, 1], [], []>} : vector<32x16xbf16>, vector<16x4xbf16>, vector<32x4xf32> -> vector<32x4xf32>
    %48 = arith.addf %42, %47 : vector<32x4xf32>
    %c0_56 = arith.constant 0 : index
    %c0_57 = arith.constant 0 : index
    %c0_58 = arith.constant 0 : index
    %c4_59 = arith.constant 4 : index
    %49 = vector.load %arg2[%c0_56, %c0_57, %c0_58, %c4_59] : memref<1x2x16x11xbf16, #tpu.memory_space<vmem>>, vector<1x1x16x4xbf16>
    %50 = vector.shape_cast %49 : vector<1x1x16x4xbf16> to vector<16x4xbf16>
    %c8 = arith.constant 8 : index
    %c0_60 = arith.constant 0 : index
    %c0_61 = arith.constant 0 : index
    %51 = vector.load %arg3[%c8, %c0_60, %c0_61] : memref<15x32x16xbf16, #tpu.memory_space<vmem>>, vector<1x32x16xbf16>
    %52 = vector.shape_cast %51 : vector<1x32x16xbf16> to vector<32x16xbf16>
    %cst_62 = arith.constant dense<0.000000e+00> : vector<32x4xf32>
    %53 = tpu.matmul %52, %50, %cst_62 {dimension_numbers = #tpu.dot_dimension_numbers<[1], [0], [0], [1], [0, 0, 1, 1], [], []>} : vector<32x16xbf16>, vector<16x4xbf16>, vector<32x4xf32> -> vector<32x4xf32>
    %54 = arith.addf %48, %53 : vector<32x4xf32>
    %c0_63 = arith.constant 0 : index
    %c1_64 = arith.constant 1 : index
    %c0_65 = arith.constant 0 : index
    %c4_66 = arith.constant 4 : index
    %55 = vector.load %arg2[%c0_63, %c1_64, %c0_65, %c4_66] : memref<1x2x16x11xbf16, #tpu.memory_space<vmem>>, vector<1x1x16x4xbf16>
    %56 = vector.shape_cast %55 : vector<1x1x16x4xbf16> to vector<16x4xbf16>
    %c9 = arith.constant 9 : index
    %c0_67 = arith.constant 0 : index
    %c0_68 = arith.constant 0 : index
    %57 = vector.load %arg3[%c9, %c0_67, %c0_68] : memref<15x32x16xbf16, #tpu.memory_space<vmem>>, vector<1x32x16xbf16>
    %58 = vector.shape_cast %57 : vector<1x32x16xbf16> to vector<32x16xbf16>
    %cst_69 = arith.constant dense<0.000000e+00> : vector<32x4xf32>
    %59 = tpu.matmul %58, %56, %cst_69 {dimension_numbers = #tpu.dot_dimension_numbers<[1], [0], [0], [1], [0, 0, 1, 1], [], []>} : vector<32x16xbf16>, vector<16x4xbf16>, vector<32x4xf32> -> vector<32x4xf32>
    %60 = arith.addf %54, %59 : vector<32x4xf32>
    %c0_70 = arith.constant 0 : index
    %c0_71 = arith.constant 0 : index
    %c0_72 = arith.constant 0 : index
    %c5_73 = arith.constant 5 : index
    %61 = vector.load %arg2[%c0_70, %c0_71, %c0_72, %c5_73] : memref<1x2x16x11xbf16, #tpu.memory_space<vmem>>, vector<1x1x16x4xbf16>
    %62 = vector.shape_cast %61 : vector<1x1x16x4xbf16> to vector<16x4xbf16>
    %c10 = arith.constant 10 : index
    %c0_74 = arith.constant 0 : index
    %c0_75 = arith.constant 0 : index
    %63 = vector.load %arg3[%c10, %c0_74, %c0_75] : memref<15x32x16xbf16, #tpu.memory_space<vmem>>, vector<1x32x16xbf16>
    %64 = vector.shape_cast %63 : vector<1x32x16xbf16> to vector<32x16xbf16>
    %cst_76 = arith.constant dense<0.000000e+00> : vector<32x4xf32>
    %65 = tpu.matmul %64, %62, %cst_76 {dimension_numbers = #tpu.dot_dimension_numbers<[1], [0], [0], [1], [0, 0, 1, 1], [], []>} : vector<32x16xbf16>, vector<16x4xbf16>, vector<32x4xf32> -> vector<32x4xf32>
    %66 = arith.addf %60, %65 : vector<32x4xf32>
    %c0_77 = arith.constant 0 : index
    %c1_78 = arith.constant 1 : index
    %c0_79 = arith.constant 0 : index
    %c5_80 = arith.constant 5 : index
    %67 = vector.load %arg2[%c0_77, %c1_78, %c0_79, %c5_80] : memref<1x2x16x11xbf16, #tpu.memory_space<vmem>>, vector<1x1x16x4xbf16>
    %68 = vector.shape_cast %67 : vector<1x1x16x4xbf16> to vector<16x4xbf16>
    %c11 = arith.constant 11 : index
    %c0_81 = arith.constant 0 : index
    %c0_82 = arith.constant 0 : index
    %69 = vector.load %arg3[%c11, %c0_81, %c0_82] : memref<15x32x16xbf16, #tpu.memory_space<vmem>>, vector<1x32x16xbf16>
    %70 = vector.shape_cast %69 : vector<1x32x16xbf16> to vector<32x16xbf16>
    %cst_83 = arith.constant dense<0.000000e+00> : vector<32x4xf32>
    %71 = tpu.matmul %70, %68, %cst_83 {dimension_numbers = #tpu.dot_dimension_numbers<[1], [0], [0], [1], [0, 0, 1, 1], [], []>} : vector<32x16xbf16>, vector<16x4xbf16>, vector<32x4xf32> -> vector<32x4xf32>
    %72 = arith.addf %66, %71 : vector<32x4xf32>
    %c0_84 = arith.constant 0 : index
    %c0_85 = arith.constant 0 : index
    %c0_86 = arith.constant 0 : index
    %c6_87 = arith.constant 6 : index
    %73 = vector.load %arg2[%c0_84, %c0_85, %c0_86, %c6_87] : memref<1x2x16x11xbf16, #tpu.memory_space<vmem>>, vector<1x1x16x4xbf16>
    %74 = vector.shape_cast %73 : vector<1x1x16x4xbf16> to vector<16x4xbf16>
    %c12 = arith.constant 12 : index
    %c0_88 = arith.constant 0 : index
    %c0_89 = arith.constant 0 : index
    %75 = vector.load %arg3[%c12, %c0_88, %c0_89] : memref<15x32x16xbf16, #tpu.memory_space<vmem>>, vector<1x32x16xbf16>
    %76 = vector.shape_cast %75 : vector<1x32x16xbf16> to vector<32x16xbf16>
    %cst_90 = arith.constant dense<0.000000e+00> : vector<32x4xf32>
    %77 = tpu.matmul %76, %74, %cst_90 {dimension_numbers = #tpu.dot_dimension_numbers<[1], [0], [0], [1], [0, 0, 1, 1], [], []>} : vector<32x16xbf16>, vector<16x4xbf16>, vector<32x4xf32> -> vector<32x4xf32>
    %78 = arith.addf %72, %77 : vector<32x4xf32>
    %c0_91 = arith.constant 0 : index
    %c1_92 = arith.constant 1 : index
    %c0_93 = arith.constant 0 : index
    %c6_94 = arith.constant 6 : index
    %79 = vector.load %arg2[%c0_91, %c1_92, %c0_93, %c6_94] : memref<1x2x16x11xbf16, #tpu.memory_space<vmem>>, vector<1x1x16x4xbf16>
    %80 = vector.shape_cast %79 : vector<1x1x16x4xbf16> to vector<16x4xbf16>
    %c13 = arith.constant 13 : index
    %c0_95 = arith.constant 0 : index
    %c0_96 = arith.constant 0 : index
    %81 = vector.load %arg3[%c13, %c0_95, %c0_96] : memref<15x32x16xbf16, #tpu.memory_space<vmem>>, vector<1x32x16xbf16>
    %82 = vector.shape_cast %81 : vector<1x32x16xbf16> to vector<32x16xbf16>
    %cst_97 = arith.constant dense<0.000000e+00> : vector<32x4xf32>
    %83 = tpu.matmul %82, %80, %cst_97 {dimension_numbers = #tpu.dot_dimension_numbers<[1], [0], [0], [1], [0, 0, 1, 1], [], []>} : vector<32x16xbf16>, vector<16x4xbf16>, vector<32x4xf32> -> vector<32x4xf32>
    %84 = arith.addf %78, %83 : vector<32x4xf32>
    %c0_98 = arith.constant 0 : index
    %c0_99 = arith.constant 0 : index
    %c0_100 = arith.constant 0 : index
    %c7_101 = arith.constant 7 : index
    %85 = vector.load %arg2[%c0_98, %c0_99, %c0_100, %c7_101] : memref<1x2x16x11xbf16, #tpu.memory_space<vmem>>, vector<1x1x16x4xbf16>
    %86 = vector.shape_cast %85 : vector<1x1x16x4xbf16> to vector<16x4xbf16>
    %c14 = arith.constant 14 : index
    %c0_102 = arith.constant 0 : index
    %c0_103 = arith.constant 0 : index
    %87 = vector.load %arg3[%c14, %c0_102, %c0_103] : memref<15x32x16xbf16, #tpu.memory_space<vmem>>, vector<1x32x16xbf16>
    %88 = vector.shape_cast %87 : vector<1x32x16xbf16> to vector<32x16xbf16>
    %cst_104 = arith.constant dense<0.000000e+00> : vector<32x4xf32>
    %89 = tpu.matmul %88, %86, %cst_104 {dimension_numbers = #tpu.dot_dimension_numbers<[1], [0], [0], [1], [0, 0, 1, 1], [], []>} : vector<32x16xbf16>, vector<16x4xbf16>, vector<32x4xf32> -> vector<32x4xf32>
    %90 = arith.addf %84, %89 : vector<32x4xf32>
    %c0_105 = arith.constant 0 : index
    %c0_106 = arith.constant 0 : index
    %91 = vector.load %arg4[%c0_105, %c0_106] : memref<32x1xf32, #tpu.memory_space<vmem>>, vector<32x1xf32>
    %92 = vector.broadcast %91 : vector<32x1xf32> to vector<32x4xf32>
    %93 = arith.mulf %90, %92 : vector<32x4xf32>
    %c0_107 = arith.constant 0 : index
    %c0_108 = arith.constant 0 : index
    %94 = vector.load %arg5[%c0_107, %c0_108] : memref<32x1xf32, #tpu.memory_space<vmem>>, vector<32x1xf32>
    %95 = vector.broadcast %94 : vector<32x1xf32> to vector<32x4xf32>
    %96 = arith.addf %93, %95 : vector<32x4xf32>
    %cst_109 = arith.constant 0.000000e+00 : f32
    %97 = vector.broadcast %cst_109 : f32 to vector<32x4xf32>
    %98 = arith.maximumf %96, %97 : vector<32x4xf32>
    %99 = arith.truncf %98 : vector<32x4xf32> to vector<32x4xbf16>
    %c0_110 = arith.constant 0 : index
    %c0_111 = arith.constant 0 : index
    %c0_112 = arith.constant 0 : index
    %100 = vector.load %arg6[%c0_110, %c0_111, %c0_112] : memref<1x32x4xbf16, #tpu.memory_space<vmem>>, vector<1x32x4xbf16>
    %101 = vector.shape_cast %100 : vector<1x32x4xbf16> to vector<32x4xbf16>
    %102 = vector.shape_cast %99 : vector<32x4xbf16> to vector<1x32x4xbf16>
    tpu.vector_store %arg6[%c0_110, %c0_111, %c0_112], %102 {strides = array<i32>} : memref<1x32x4xbf16, #tpu.memory_space<vmem>>, vector<1x32x4xbf16>,
    return
  }
  func.func @transform_0(%arg0: i32, %arg1: i32) -> (i32, i32, i32, i32) {
    %c0_i32 = arith.constant 0 : i32
    %c0_i32_0 = arith.constant 0 : i32
    %c0_i32_1 = arith.constant 0 : i32
    %c0_i32_2 = arith.constant 0 : i32
    return %arg0, %c0_i32, %c0_i32_0, %c0_i32_1 : i32, i32, i32, i32
  }
  func.func @transform_1(%arg0: i32, %arg1: i32) -> (i32, i32, i32) {
    %c0_i32 = arith.constant 0 : i32
    %c0_i32_0 = arith.constant 0 : i32
    %c0_i32_1 = arith.constant 0 : i32
    %c0_i32_2 = arith.constant 0 : i32
    return %c0_i32, %c0_i32_0, %c0_i32_1 : i32, i32, i32
  }
  func.func @transform_2(%arg0: i32, %arg1: i32) -> (i32, i32) {
    %c0_i32 = arith.constant 0 : i32
    %c0_i32_0 = arith.constant 0 : i32
    %c0_i32_1 = arith.constant 0 : i32
    return %c0_i32, %c0_i32_0 : i32, i32
  }
  func.func @transform_3(%arg0: i32, %arg1: i32) -> (i32, i32) {
    %c0_i32 = arith.constant 0 : i32
    %c0_i32_0 = arith.constant 0 : i32
    %c0_i32_1 = arith.constant 0 : i32
    return %c0_i32, %c0_i32_0 : i32, i32
  }
  func.func @transform_4(%arg0: i32, %arg1: i32) -> (i32, i32, i32) {
    %c0_i32 = arith.constant 0 : i32
    %c0_i32_0 = arith.constant 0 : i32
    return %arg0, %c0_i32, %arg1 : i32, i32, i32
  }
}

module attributes {stable_mosaic.version = 11 : i64} {
  func.func @_conv_kernel(%arg0: i32, %arg1: i32, %arg2: memref<1x1x32x18xbf16, #tpu.memory_space<vmem>>, %arg3: memref<15x32x32xbf16, #tpu.memory_space<vmem>>, %arg4: memref<32x1xf32, #tpu.memory_space<vmem>>, %arg5: memref<32x1xf32, #tpu.memory_space<vmem>>, %arg6: memref<1x32x4xbf16, #tpu.memory_space<vmem>>, %arg7: memref<1x32x4xbf16, #tpu.memory_space<vmem>>) attributes {dimension_semantics = [#tpu.dimension_semantics<parallel>, #tpu.dimension_semantics<arbitrary>], iteration_bounds = array<i64: 2, 1>, scalar_prefetch = 0 : i64, scratch_operands = 0 : i64, tpu.core_type = #tpu.core_type<tc>, window_params = [{transform_indices = @transform_0, window_bounds = array<i64: 1, 1, 32, 18>}, {pipeline_mode = #tpu.pipeline_mode<synchronous>, transform_indices = @transform_1, window_bounds = array<i64: 15, 32, 32>}, {pipeline_mode = #tpu.pipeline_mode<synchronous>, transform_indices = @transform_2, window_bounds = array<i64: 32, 1>}, {pipeline_mode = #tpu.pipeline_mode<synchronous>, transform_indices = @transform_3, window_bounds = array<i64: 32, 1>}, {transform_indices = @transform_4, window_bounds = array<i64: 1, 32, 4>}, {transform_indices = @transform_5, window_bounds = array<i64: 1, 32, 4>}]} {
    %cst = arith.constant 0.000000e+00 : f32
    %0 = vector.broadcast %cst : f32 to vector<32x4xf32>
    %c0 = arith.constant 0 : index
    %c0_0 = arith.constant 0 : index
    %c0_1 = arith.constant 0 : index
    %c0_2 = arith.constant 0 : index
    %1 = vector.load %arg2[%c0, %c0_0, %c0_1, %c0_2] : memref<1x1x32x18xbf16, #tpu.memory_space<vmem>>, vector<1x1x32x4xbf16>
    %2 = vector.shape_cast %1 : vector<1x1x32x4xbf16> to vector<32x4xbf16>
    %c0_3 = arith.constant 0 : index
    %c0_4 = arith.constant 0 : index
    %c0_5 = arith.constant 0 : index
    %3 = vector.load %arg3[%c0_3, %c0_4, %c0_5] : memref<15x32x32xbf16, #tpu.memory_space<vmem>>, vector<1x32x32xbf16>
    %4 = vector.shape_cast %3 : vector<1x32x32xbf16> to vector<32x32xbf16>
    %cst_6 = arith.constant dense<0.000000e+00> : vector<32x4xf32>
    %5 = tpu.matmul %4, %2, %cst_6 {dimension_numbers = #tpu.dot_dimension_numbers<[1], [0], [0], [1], [0, 0, 1, 1], [], []>} : vector<32x32xbf16>, vector<32x4xbf16>, vector<32x4xf32> -> vector<32x4xf32>
    %6 = arith.addf %0, %5 : vector<32x4xf32>
    %c0_7 = arith.constant 0 : index
    %c0_8 = arith.constant 0 : index
    %c0_9 = arith.constant 0 : index
    %c1 = arith.constant 1 : index
    %7 = vector.load %arg2[%c0_7, %c0_8, %c0_9, %c1] : memref<1x1x32x18xbf16, #tpu.memory_space<vmem>>, vector<1x1x32x4xbf16>
    %8 = vector.shape_cast %7 : vector<1x1x32x4xbf16> to vector<32x4xbf16>
    %c1_10 = arith.constant 1 : index
    %c0_11 = arith.constant 0 : index
    %c0_12 = arith.constant 0 : index
    %9 = vector.load %arg3[%c1_10, %c0_11, %c0_12] : memref<15x32x32xbf16, #tpu.memory_space<vmem>>, vector<1x32x32xbf16>
    %10 = vector.shape_cast %9 : vector<1x32x32xbf16> to vector<32x32xbf16>
    %cst_13 = arith.constant dense<0.000000e+00> : vector<32x4xf32>
    %11 = tpu.matmul %10, %8, %cst_13 {dimension_numbers = #tpu.dot_dimension_numbers<[1], [0], [0], [1], [0, 0, 1, 1], [], []>} : vector<32x32xbf16>, vector<32x4xbf16>, vector<32x4xf32> -> vector<32x4xf32>
    %12 = arith.addf %6, %11 : vector<32x4xf32>
    %c0_14 = arith.constant 0 : index
    %c0_15 = arith.constant 0 : index
    %c0_16 = arith.constant 0 : index
    %c2 = arith.constant 2 : index
    %13 = vector.load %arg2[%c0_14, %c0_15, %c0_16, %c2] : memref<1x1x32x18xbf16, #tpu.memory_space<vmem>>, vector<1x1x32x4xbf16>
    %14 = vector.shape_cast %13 : vector<1x1x32x4xbf16> to vector<32x4xbf16>
    %c2_17 = arith.constant 2 : index
    %c0_18 = arith.constant 0 : index
    %c0_19 = arith.constant 0 : index
    %15 = vector.load %arg3[%c2_17, %c0_18, %c0_19] : memref<15x32x32xbf16, #tpu.memory_space<vmem>>, vector<1x32x32xbf16>
    %16 = vector.shape_cast %15 : vector<1x32x32xbf16> to vector<32x32xbf16>
    %cst_20 = arith.constant dense<0.000000e+00> : vector<32x4xf32>
    %17 = tpu.matmul %16, %14, %cst_20 {dimension_numbers = #tpu.dot_dimension_numbers<[1], [0], [0], [1], [0, 0, 1, 1], [], []>} : vector<32x32xbf16>, vector<32x4xbf16>, vector<32x4xf32> -> vector<32x4xf32>
    %18 = arith.addf %12, %17 : vector<32x4xf32>
    %c0_21 = arith.constant 0 : index
    %c0_22 = arith.constant 0 : index
    %c0_23 = arith.constant 0 : index
    %c3 = arith.constant 3 : index
    %19 = vector.load %arg2[%c0_21, %c0_22, %c0_23, %c3] : memref<1x1x32x18xbf16, #tpu.memory_space<vmem>>, vector<1x1x32x4xbf16>
    %20 = vector.shape_cast %19 : vector<1x1x32x4xbf16> to vector<32x4xbf16>
    %c3_24 = arith.constant 3 : index
    %c0_25 = arith.constant 0 : index
    %c0_26 = arith.constant 0 : index
    %21 = vector.load %arg3[%c3_24, %c0_25, %c0_26] : memref<15x32x32xbf16, #tpu.memory_space<vmem>>, vector<1x32x32xbf16>
    %22 = vector.shape_cast %21 : vector<1x32x32xbf16> to vector<32x32xbf16>
    %cst_27 = arith.constant dense<0.000000e+00> : vector<32x4xf32>
    %23 = tpu.matmul %22, %20, %cst_27 {dimension_numbers = #tpu.dot_dimension_numbers<[1], [0], [0], [1], [0, 0, 1, 1], [], []>} : vector<32x32xbf16>, vector<32x4xbf16>, vector<32x4xf32> -> vector<32x4xf32>
    %24 = arith.addf %18, %23 : vector<32x4xf32>
    %c0_28 = arith.constant 0 : index
    %c0_29 = arith.constant 0 : index
    %c0_30 = arith.constant 0 : index
    %c4 = arith.constant 4 : index
    %25 = vector.load %arg2[%c0_28, %c0_29, %c0_30, %c4] : memref<1x1x32x18xbf16, #tpu.memory_space<vmem>>, vector<1x1x32x4xbf16>
    %26 = vector.shape_cast %25 : vector<1x1x32x4xbf16> to vector<32x4xbf16>
    %c4_31 = arith.constant 4 : index
    %c0_32 = arith.constant 0 : index
    %c0_33 = arith.constant 0 : index
    %27 = vector.load %arg3[%c4_31, %c0_32, %c0_33] : memref<15x32x32xbf16, #tpu.memory_space<vmem>>, vector<1x32x32xbf16>
    %28 = vector.shape_cast %27 : vector<1x32x32xbf16> to vector<32x32xbf16>
    %cst_34 = arith.constant dense<0.000000e+00> : vector<32x4xf32>
    %29 = tpu.matmul %28, %26, %cst_34 {dimension_numbers = #tpu.dot_dimension_numbers<[1], [0], [0], [1], [0, 0, 1, 1], [], []>} : vector<32x32xbf16>, vector<32x4xbf16>, vector<32x4xf32> -> vector<32x4xf32>
    %30 = arith.addf %24, %29 : vector<32x4xf32>
    %c0_35 = arith.constant 0 : index
    %c0_36 = arith.constant 0 : index
    %c0_37 = arith.constant 0 : index
    %c5 = arith.constant 5 : index
    %31 = vector.load %arg2[%c0_35, %c0_36, %c0_37, %c5] : memref<1x1x32x18xbf16, #tpu.memory_space<vmem>>, vector<1x1x32x4xbf16>
    %32 = vector.shape_cast %31 : vector<1x1x32x4xbf16> to vector<32x4xbf16>
    %c5_38 = arith.constant 5 : index
    %c0_39 = arith.constant 0 : index
    %c0_40 = arith.constant 0 : index
    %33 = vector.load %arg3[%c5_38, %c0_39, %c0_40] : memref<15x32x32xbf16, #tpu.memory_space<vmem>>, vector<1x32x32xbf16>
    %34 = vector.shape_cast %33 : vector<1x32x32xbf16> to vector<32x32xbf16>
    %cst_41 = arith.constant dense<0.000000e+00> : vector<32x4xf32>
    %35 = tpu.matmul %34, %32, %cst_41 {dimension_numbers = #tpu.dot_dimension_numbers<[1], [0], [0], [1], [0, 0, 1, 1], [], []>} : vector<32x32xbf16>, vector<32x4xbf16>, vector<32x4xf32> -> vector<32x4xf32>
    %36 = arith.addf %30, %35 : vector<32x4xf32>
    %c0_42 = arith.constant 0 : index
    %c0_43 = arith.constant 0 : index
    %c0_44 = arith.constant 0 : index
    %c6 = arith.constant 6 : index
    %37 = vector.load %arg2[%c0_42, %c0_43, %c0_44, %c6] : memref<1x1x32x18xbf16, #tpu.memory_space<vmem>>, vector<1x1x32x4xbf16>
    %38 = vector.shape_cast %37 : vector<1x1x32x4xbf16> to vector<32x4xbf16>
    %c6_45 = arith.constant 6 : index
    %c0_46 = arith.constant 0 : index
    %c0_47 = arith.constant 0 : index
    %39 = vector.load %arg3[%c6_45, %c0_46, %c0_47] : memref<15x32x32xbf16, #tpu.memory_space<vmem>>, vector<1x32x32xbf16>
    %40 = vector.shape_cast %39 : vector<1x32x32xbf16> to vector<32x32xbf16>
    %cst_48 = arith.constant dense<0.000000e+00> : vector<32x4xf32>
    %41 = tpu.matmul %40, %38, %cst_48 {dimension_numbers = #tpu.dot_dimension_numbers<[1], [0], [0], [1], [0, 0, 1, 1], [], []>} : vector<32x32xbf16>, vector<32x4xbf16>, vector<32x4xf32> -> vector<32x4xf32>
    %42 = arith.addf %36, %41 : vector<32x4xf32>
    %c0_49 = arith.constant 0 : index
    %c0_50 = arith.constant 0 : index
    %c0_51 = arith.constant 0 : index
    %c7 = arith.constant 7 : index
    %43 = vector.load %arg2[%c0_49, %c0_50, %c0_51, %c7] : memref<1x1x32x18xbf16, #tpu.memory_space<vmem>>, vector<1x1x32x4xbf16>
    %44 = vector.shape_cast %43 : vector<1x1x32x4xbf16> to vector<32x4xbf16>
    %c7_52 = arith.constant 7 : index
    %c0_53 = arith.constant 0 : index
    %c0_54 = arith.constant 0 : index
    %45 = vector.load %arg3[%c7_52, %c0_53, %c0_54] : memref<15x32x32xbf16, #tpu.memory_space<vmem>>, vector<1x32x32xbf16>
    %46 = vector.shape_cast %45 : vector<1x32x32xbf16> to vector<32x32xbf16>
    %cst_55 = arith.constant dense<0.000000e+00> : vector<32x4xf32>
    %47 = tpu.matmul %46, %44, %cst_55 {dimension_numbers = #tpu.dot_dimension_numbers<[1], [0], [0], [1], [0, 0, 1, 1], [], []>} : vector<32x32xbf16>, vector<32x4xbf16>, vector<32x4xf32> -> vector<32x4xf32>
    %48 = arith.addf %42, %47 : vector<32x4xf32>
    %c0_56 = arith.constant 0 : index
    %c0_57 = arith.constant 0 : index
    %c0_58 = arith.constant 0 : index
    %c8 = arith.constant 8 : index
    %49 = vector.load %arg2[%c0_56, %c0_57, %c0_58, %c8] : memref<1x1x32x18xbf16, #tpu.memory_space<vmem>>, vector<1x1x32x4xbf16>
    %50 = vector.shape_cast %49 : vector<1x1x32x4xbf16> to vector<32x4xbf16>
    %c8_59 = arith.constant 8 : index
    %c0_60 = arith.constant 0 : index
    %c0_61 = arith.constant 0 : index
    %51 = vector.load %arg3[%c8_59, %c0_60, %c0_61] : memref<15x32x32xbf16, #tpu.memory_space<vmem>>, vector<1x32x32xbf16>
    %52 = vector.shape_cast %51 : vector<1x32x32xbf16> to vector<32x32xbf16>
    %cst_62 = arith.constant dense<0.000000e+00> : vector<32x4xf32>
    %53 = tpu.matmul %52, %50, %cst_62 {dimension_numbers = #tpu.dot_dimension_numbers<[1], [0], [0], [1], [0, 0, 1, 1], [], []>} : vector<32x32xbf16>, vector<32x4xbf16>, vector<32x4xf32> -> vector<32x4xf32>
    %54 = arith.addf %48, %53 : vector<32x4xf32>
    %c0_63 = arith.constant 0 : index
    %c0_64 = arith.constant 0 : index
    %c0_65 = arith.constant 0 : index
    %c9 = arith.constant 9 : index
    %55 = vector.load %arg2[%c0_63, %c0_64, %c0_65, %c9] : memref<1x1x32x18xbf16, #tpu.memory_space<vmem>>, vector<1x1x32x4xbf16>
    %56 = vector.shape_cast %55 : vector<1x1x32x4xbf16> to vector<32x4xbf16>
    %c9_66 = arith.constant 9 : index
    %c0_67 = arith.constant 0 : index
    %c0_68 = arith.constant 0 : index
    %57 = vector.load %arg3[%c9_66, %c0_67, %c0_68] : memref<15x32x32xbf16, #tpu.memory_space<vmem>>, vector<1x32x32xbf16>
    %58 = vector.shape_cast %57 : vector<1x32x32xbf16> to vector<32x32xbf16>
    %cst_69 = arith.constant dense<0.000000e+00> : vector<32x4xf32>
    %59 = tpu.matmul %58, %56, %cst_69 {dimension_numbers = #tpu.dot_dimension_numbers<[1], [0], [0], [1], [0, 0, 1, 1], [], []>} : vector<32x32xbf16>, vector<32x4xbf16>, vector<32x4xf32> -> vector<32x4xf32>
    %60 = arith.addf %54, %59 : vector<32x4xf32>
    %c0_70 = arith.constant 0 : index
    %c0_71 = arith.constant 0 : index
    %c0_72 = arith.constant 0 : index
    %c10 = arith.constant 10 : index
    %61 = vector.load %arg2[%c0_70, %c0_71, %c0_72, %c10] : memref<1x1x32x18xbf16, #tpu.memory_space<vmem>>, vector<1x1x32x4xbf16>
    %62 = vector.shape_cast %61 : vector<1x1x32x4xbf16> to vector<32x4xbf16>
    %c10_73 = arith.constant 10 : index
    %c0_74 = arith.constant 0 : index
    %c0_75 = arith.constant 0 : index
    %63 = vector.load %arg3[%c10_73, %c0_74, %c0_75] : memref<15x32x32xbf16, #tpu.memory_space<vmem>>, vector<1x32x32xbf16>
    %64 = vector.shape_cast %63 : vector<1x32x32xbf16> to vector<32x32xbf16>
    %cst_76 = arith.constant dense<0.000000e+00> : vector<32x4xf32>
    %65 = tpu.matmul %64, %62, %cst_76 {dimension_numbers = #tpu.dot_dimension_numbers<[1], [0], [0], [1], [0, 0, 1, 1], [], []>} : vector<32x32xbf16>, vector<32x4xbf16>, vector<32x4xf32> -> vector<32x4xf32>
    %66 = arith.addf %60, %65 : vector<32x4xf32>
    %c0_77 = arith.constant 0 : index
    %c0_78 = arith.constant 0 : index
    %c0_79 = arith.constant 0 : index
    %c11 = arith.constant 11 : index
    %67 = vector.load %arg2[%c0_77, %c0_78, %c0_79, %c11] : memref<1x1x32x18xbf16, #tpu.memory_space<vmem>>, vector<1x1x32x4xbf16>
    %68 = vector.shape_cast %67 : vector<1x1x32x4xbf16> to vector<32x4xbf16>
    %c11_80 = arith.constant 11 : index
    %c0_81 = arith.constant 0 : index
    %c0_82 = arith.constant 0 : index
    %69 = vector.load %arg3[%c11_80, %c0_81, %c0_82] : memref<15x32x32xbf16, #tpu.memory_space<vmem>>, vector<1x32x32xbf16>
    %70 = vector.shape_cast %69 : vector<1x32x32xbf16> to vector<32x32xbf16>
    %cst_83 = arith.constant dense<0.000000e+00> : vector<32x4xf32>
    %71 = tpu.matmul %70, %68, %cst_83 {dimension_numbers = #tpu.dot_dimension_numbers<[1], [0], [0], [1], [0, 0, 1, 1], [], []>} : vector<32x32xbf16>, vector<32x4xbf16>, vector<32x4xf32> -> vector<32x4xf32>
    %72 = arith.addf %66, %71 : vector<32x4xf32>
    %c0_84 = arith.constant 0 : index
    %c0_85 = arith.constant 0 : index
    %c0_86 = arith.constant 0 : index
    %c12 = arith.constant 12 : index
    %73 = vector.load %arg2[%c0_84, %c0_85, %c0_86, %c12] : memref<1x1x32x18xbf16, #tpu.memory_space<vmem>>, vector<1x1x32x4xbf16>
    %74 = vector.shape_cast %73 : vector<1x1x32x4xbf16> to vector<32x4xbf16>
    %c12_87 = arith.constant 12 : index
    %c0_88 = arith.constant 0 : index
    %c0_89 = arith.constant 0 : index
    %75 = vector.load %arg3[%c12_87, %c0_88, %c0_89] : memref<15x32x32xbf16, #tpu.memory_space<vmem>>, vector<1x32x32xbf16>
    %76 = vector.shape_cast %75 : vector<1x32x32xbf16> to vector<32x32xbf16>
    %cst_90 = arith.constant dense<0.000000e+00> : vector<32x4xf32>
    %77 = tpu.matmul %76, %74, %cst_90 {dimension_numbers = #tpu.dot_dimension_numbers<[1], [0], [0], [1], [0, 0, 1, 1], [], []>} : vector<32x32xbf16>, vector<32x4xbf16>, vector<32x4xf32> -> vector<32x4xf32>
    %78 = arith.addf %72, %77 : vector<32x4xf32>
    %c0_91 = arith.constant 0 : index
    %c0_92 = arith.constant 0 : index
    %c0_93 = arith.constant 0 : index
    %c13 = arith.constant 13 : index
    %79 = vector.load %arg2[%c0_91, %c0_92, %c0_93, %c13] : memref<1x1x32x18xbf16, #tpu.memory_space<vmem>>, vector<1x1x32x4xbf16>
    %80 = vector.shape_cast %79 : vector<1x1x32x4xbf16> to vector<32x4xbf16>
    %c13_94 = arith.constant 13 : index
    %c0_95 = arith.constant 0 : index
    %c0_96 = arith.constant 0 : index
    %81 = vector.load %arg3[%c13_94, %c0_95, %c0_96] : memref<15x32x32xbf16, #tpu.memory_space<vmem>>, vector<1x32x32xbf16>
    %82 = vector.shape_cast %81 : vector<1x32x32xbf16> to vector<32x32xbf16>
    %cst_97 = arith.constant dense<0.000000e+00> : vector<32x4xf32>
    %83 = tpu.matmul %82, %80, %cst_97 {dimension_numbers = #tpu.dot_dimension_numbers<[1], [0], [0], [1], [0, 0, 1, 1], [], []>} : vector<32x32xbf16>, vector<32x4xbf16>, vector<32x4xf32> -> vector<32x4xf32>
    %84 = arith.addf %78, %83 : vector<32x4xf32>
    %c0_98 = arith.constant 0 : index
    %c0_99 = arith.constant 0 : index
    %c0_100 = arith.constant 0 : index
    %c14 = arith.constant 14 : index
    %85 = vector.load %arg2[%c0_98, %c0_99, %c0_100, %c14] : memref<1x1x32x18xbf16, #tpu.memory_space<vmem>>, vector<1x1x32x4xbf16>
    %86 = vector.shape_cast %85 : vector<1x1x32x4xbf16> to vector<32x4xbf16>
    %c14_101 = arith.constant 14 : index
    %c0_102 = arith.constant 0 : index
    %c0_103 = arith.constant 0 : index
    %87 = vector.load %arg3[%c14_101, %c0_102, %c0_103] : memref<15x32x32xbf16, #tpu.memory_space<vmem>>, vector<1x32x32xbf16>
    %88 = vector.shape_cast %87 : vector<1x32x32xbf16> to vector<32x32xbf16>
    %cst_104 = arith.constant dense<0.000000e+00> : vector<32x4xf32>
    %89 = tpu.matmul %88, %86, %cst_104 {dimension_numbers = #tpu.dot_dimension_numbers<[1], [0], [0], [1], [0, 0, 1, 1], [], []>} : vector<32x32xbf16>, vector<32x4xbf16>, vector<32x4xf32> -> vector<32x4xf32>
    %90 = arith.addf %84, %89 : vector<32x4xf32>
    %c0_105 = arith.constant 0 : index
    %c0_106 = arith.constant 0 : index
    %91 = vector.load %arg4[%c0_105, %c0_106] : memref<32x1xf32, #tpu.memory_space<vmem>>, vector<32x1xf32>
    %92 = vector.broadcast %91 : vector<32x1xf32> to vector<32x4xf32>
    %93 = arith.mulf %90, %92 : vector<32x4xf32>
    %c0_107 = arith.constant 0 : index
    %c0_108 = arith.constant 0 : index
    %94 = vector.load %arg5[%c0_107, %c0_108] : memref<32x1xf32, #tpu.memory_space<vmem>>, vector<32x1xf32>
    %95 = vector.broadcast %94 : vector<32x1xf32> to vector<32x4xf32>
    %96 = arith.addf %93, %95 : vector<32x4xf32>
    %cst_109 = arith.constant 0.000000e+00 : f32
    %97 = vector.broadcast %cst_109 : f32 to vector<32x4xf32>
    %98 = arith.maximumf %96, %97 : vector<32x4xf32>
    %c0_110 = arith.constant 0 : index
    %c0_111 = arith.constant 0 : index
    %c0_112 = arith.constant 0 : index
    %99 = vector.load %arg6[%c0_110, %c0_111, %c0_112] : memref<1x32x4xbf16, #tpu.memory_space<vmem>>, vector<1x32x4xbf16>
    %100 = vector.shape_cast %99 : vector<1x32x4xbf16> to vector<32x4xbf16>
    %101 = arith.extf %100 : vector<32x4xbf16> to vector<32x4xf32>
    %102 = arith.addf %98, %101 : vector<32x4xf32>
    %103 = arith.truncf %102 : vector<32x4xf32> to vector<32x4xbf16>
    %c0_113 = arith.constant 0 : index
    %c0_114 = arith.constant 0 : index
    %c0_115 = arith.constant 0 : index
    %104 = vector.load %arg7[%c0_113, %c0_114, %c0_115] : memref<1x32x4xbf16, #tpu.memory_space<vmem>>, vector<1x32x4xbf16>
    %105 = vector.shape_cast %104 : vector<1x32x4xbf16> to vector<32x4xbf16>
    %106 = vector.shape_cast %103 : vector<32x4xbf16> to vector<1x32x4xbf16>
    tpu.vector_store %arg7[%c0_113, %c0_114, %c0_115], %106 {strides = array<i32>} : memref<1x32x4xbf16, #tpu.memory_space<vmem>>, vector<1x32x4xbf16>,
    return
  }
  func.func @transform_0(%arg0: i32, %arg1: i32) -> (i32, i32, i32, i32) {
    %c0_i32 = arith.constant 0 : i32
    %c0_i32_0 = arith.constant 0 : i32
    %c0_i32_1 = arith.constant 0 : i32
    %c0_i32_2 = arith.constant 0 : i32
    return %arg0, %c0_i32, %c0_i32_0, %c0_i32_1 : i32, i32, i32, i32
  }
  func.func @transform_1(%arg0: i32, %arg1: i32) -> (i32, i32, i32) {
    %c0_i32 = arith.constant 0 : i32
    %c0_i32_0 = arith.constant 0 : i32
    %c0_i32_1 = arith.constant 0 : i32
    %c0_i32_2 = arith.constant 0 : i32
    return %c0_i32, %c0_i32_0, %c0_i32_1 : i32, i32, i32
  }
  func.func @transform_2(%arg0: i32, %arg1: i32) -> (i32, i32) {
    %c0_i32 = arith.constant 0 : i32
    %c0_i32_0 = arith.constant 0 : i32
    %c0_i32_1 = arith.constant 0 : i32
    return %c0_i32, %c0_i32_0 : i32, i32
  }
  func.func @transform_3(%arg0: i32, %arg1: i32) -> (i32, i32) {
    %c0_i32 = arith.constant 0 : i32
    %c0_i32_0 = arith.constant 0 : i32
    %c0_i32_1 = arith.constant 0 : i32
    return %c0_i32, %c0_i32_0 : i32, i32
  }
  func.func @transform_4(%arg0: i32, %arg1: i32) -> (i32, i32, i32) {
    %c0_i32 = arith.constant 0 : i32
    %c0_i32_0 = arith.constant 0 : i32
    return %arg0, %c0_i32, %arg1 : i32, i32, i32
  }
  func.func @transform_5(%arg0: i32, %arg1: i32) -> (i32, i32, i32) {
    %c0_i32 = arith.constant 0 : i32
    %c0_i32_0 = arith.constant 0 : i32
    return %arg0, %c0_i32, %arg1 : i32, i32, i32
  }
}

module attributes {stable_mosaic.version = 11 : i64} {
  func.func @_conv_kernel(%arg0: i32, %arg1: i32, %arg2: memref<1x1x32x18xbf16, #tpu.memory_space<vmem>>, %arg3: memref<15x32x32xbf16, #tpu.memory_space<vmem>>, %arg4: memref<32x1xf32, #tpu.memory_space<vmem>>, %arg5: memref<32x1xf32, #tpu.memory_space<vmem>>, %arg6: memref<1x32x4xbf16, #tpu.memory_space<vmem>>) attributes {dimension_semantics = [#tpu.dimension_semantics<parallel>, #tpu.dimension_semantics<arbitrary>], iteration_bounds = array<i64: 2, 1>, scalar_prefetch = 0 : i64, scratch_operands = 0 : i64, tpu.core_type = #tpu.core_type<tc>, window_params = [{transform_indices = @transform_0, window_bounds = array<i64: 1, 1, 32, 18>}, {pipeline_mode = #tpu.pipeline_mode<synchronous>, transform_indices = @transform_1, window_bounds = array<i64: 15, 32, 32>}, {pipeline_mode = #tpu.pipeline_mode<synchronous>, transform_indices = @transform_2, window_bounds = array<i64: 32, 1>}, {pipeline_mode = #tpu.pipeline_mode<synchronous>, transform_indices = @transform_3, window_bounds = array<i64: 32, 1>}, {transform_indices = @transform_4, window_bounds = array<i64: 1, 32, 4>}]} {
    %cst = arith.constant 0.000000e+00 : f32
    %0 = vector.broadcast %cst : f32 to vector<32x4xf32>
    %c0 = arith.constant 0 : index
    %c0_0 = arith.constant 0 : index
    %c0_1 = arith.constant 0 : index
    %c0_2 = arith.constant 0 : index
    %1 = vector.load %arg2[%c0, %c0_0, %c0_1, %c0_2] : memref<1x1x32x18xbf16, #tpu.memory_space<vmem>>, vector<1x1x32x4xbf16>
    %2 = vector.shape_cast %1 : vector<1x1x32x4xbf16> to vector<32x4xbf16>
    %c0_3 = arith.constant 0 : index
    %c0_4 = arith.constant 0 : index
    %c0_5 = arith.constant 0 : index
    %3 = vector.load %arg3[%c0_3, %c0_4, %c0_5] : memref<15x32x32xbf16, #tpu.memory_space<vmem>>, vector<1x32x32xbf16>
    %4 = vector.shape_cast %3 : vector<1x32x32xbf16> to vector<32x32xbf16>
    %cst_6 = arith.constant dense<0.000000e+00> : vector<32x4xf32>
    %5 = tpu.matmul %4, %2, %cst_6 {dimension_numbers = #tpu.dot_dimension_numbers<[1], [0], [0], [1], [0, 0, 1, 1], [], []>} : vector<32x32xbf16>, vector<32x4xbf16>, vector<32x4xf32> -> vector<32x4xf32>
    %6 = arith.addf %0, %5 : vector<32x4xf32>
    %c0_7 = arith.constant 0 : index
    %c0_8 = arith.constant 0 : index
    %c0_9 = arith.constant 0 : index
    %c1 = arith.constant 1 : index
    %7 = vector.load %arg2[%c0_7, %c0_8, %c0_9, %c1] : memref<1x1x32x18xbf16, #tpu.memory_space<vmem>>, vector<1x1x32x4xbf16>
    %8 = vector.shape_cast %7 : vector<1x1x32x4xbf16> to vector<32x4xbf16>
    %c1_10 = arith.constant 1 : index
    %c0_11 = arith.constant 0 : index
    %c0_12 = arith.constant 0 : index
    %9 = vector.load %arg3[%c1_10, %c0_11, %c0_12] : memref<15x32x32xbf16, #tpu.memory_space<vmem>>, vector<1x32x32xbf16>
    %10 = vector.shape_cast %9 : vector<1x32x32xbf16> to vector<32x32xbf16>
    %cst_13 = arith.constant dense<0.000000e+00> : vector<32x4xf32>
    %11 = tpu.matmul %10, %8, %cst_13 {dimension_numbers = #tpu.dot_dimension_numbers<[1], [0], [0], [1], [0, 0, 1, 1], [], []>} : vector<32x32xbf16>, vector<32x4xbf16>, vector<32x4xf32> -> vector<32x4xf32>
    %12 = arith.addf %6, %11 : vector<32x4xf32>
    %c0_14 = arith.constant 0 : index
    %c0_15 = arith.constant 0 : index
    %c0_16 = arith.constant 0 : index
    %c2 = arith.constant 2 : index
    %13 = vector.load %arg2[%c0_14, %c0_15, %c0_16, %c2] : memref<1x1x32x18xbf16, #tpu.memory_space<vmem>>, vector<1x1x32x4xbf16>
    %14 = vector.shape_cast %13 : vector<1x1x32x4xbf16> to vector<32x4xbf16>
    %c2_17 = arith.constant 2 : index
    %c0_18 = arith.constant 0 : index
    %c0_19 = arith.constant 0 : index
    %15 = vector.load %arg3[%c2_17, %c0_18, %c0_19] : memref<15x32x32xbf16, #tpu.memory_space<vmem>>, vector<1x32x32xbf16>
    %16 = vector.shape_cast %15 : vector<1x32x32xbf16> to vector<32x32xbf16>
    %cst_20 = arith.constant dense<0.000000e+00> : vector<32x4xf32>
    %17 = tpu.matmul %16, %14, %cst_20 {dimension_numbers = #tpu.dot_dimension_numbers<[1], [0], [0], [1], [0, 0, 1, 1], [], []>} : vector<32x32xbf16>, vector<32x4xbf16>, vector<32x4xf32> -> vector<32x4xf32>
    %18 = arith.addf %12, %17 : vector<32x4xf32>
    %c0_21 = arith.constant 0 : index
    %c0_22 = arith.constant 0 : index
    %c0_23 = arith.constant 0 : index
    %c3 = arith.constant 3 : index
    %19 = vector.load %arg2[%c0_21, %c0_22, %c0_23, %c3] : memref<1x1x32x18xbf16, #tpu.memory_space<vmem>>, vector<1x1x32x4xbf16>
    %20 = vector.shape_cast %19 : vector<1x1x32x4xbf16> to vector<32x4xbf16>
    %c3_24 = arith.constant 3 : index
    %c0_25 = arith.constant 0 : index
    %c0_26 = arith.constant 0 : index
    %21 = vector.load %arg3[%c3_24, %c0_25, %c0_26] : memref<15x32x32xbf16, #tpu.memory_space<vmem>>, vector<1x32x32xbf16>
    %22 = vector.shape_cast %21 : vector<1x32x32xbf16> to vector<32x32xbf16>
    %cst_27 = arith.constant dense<0.000000e+00> : vector<32x4xf32>
    %23 = tpu.matmul %22, %20, %cst_27 {dimension_numbers = #tpu.dot_dimension_numbers<[1], [0], [0], [1], [0, 0, 1, 1], [], []>} : vector<32x32xbf16>, vector<32x4xbf16>, vector<32x4xf32> -> vector<32x4xf32>
    %24 = arith.addf %18, %23 : vector<32x4xf32>
    %c0_28 = arith.constant 0 : index
    %c0_29 = arith.constant 0 : index
    %c0_30 = arith.constant 0 : index
    %c4 = arith.constant 4 : index
    %25 = vector.load %arg2[%c0_28, %c0_29, %c0_30, %c4] : memref<1x1x32x18xbf16, #tpu.memory_space<vmem>>, vector<1x1x32x4xbf16>
    %26 = vector.shape_cast %25 : vector<1x1x32x4xbf16> to vector<32x4xbf16>
    %c4_31 = arith.constant 4 : index
    %c0_32 = arith.constant 0 : index
    %c0_33 = arith.constant 0 : index
    %27 = vector.load %arg3[%c4_31, %c0_32, %c0_33] : memref<15x32x32xbf16, #tpu.memory_space<vmem>>, vector<1x32x32xbf16>
    %28 = vector.shape_cast %27 : vector<1x32x32xbf16> to vector<32x32xbf16>
    %cst_34 = arith.constant dense<0.000000e+00> : vector<32x4xf32>
    %29 = tpu.matmul %28, %26, %cst_34 {dimension_numbers = #tpu.dot_dimension_numbers<[1], [0], [0], [1], [0, 0, 1, 1], [], []>} : vector<32x32xbf16>, vector<32x4xbf16>, vector<32x4xf32> -> vector<32x4xf32>
    %30 = arith.addf %24, %29 : vector<32x4xf32>
    %c0_35 = arith.constant 0 : index
    %c0_36 = arith.constant 0 : index
    %c0_37 = arith.constant 0 : index
    %c5 = arith.constant 5 : index
    %31 = vector.load %arg2[%c0_35, %c0_36, %c0_37, %c5] : memref<1x1x32x18xbf16, #tpu.memory_space<vmem>>, vector<1x1x32x4xbf16>
    %32 = vector.shape_cast %31 : vector<1x1x32x4xbf16> to vector<32x4xbf16>
    %c5_38 = arith.constant 5 : index
    %c0_39 = arith.constant 0 : index
    %c0_40 = arith.constant 0 : index
    %33 = vector.load %arg3[%c5_38, %c0_39, %c0_40] : memref<15x32x32xbf16, #tpu.memory_space<vmem>>, vector<1x32x32xbf16>
    %34 = vector.shape_cast %33 : vector<1x32x32xbf16> to vector<32x32xbf16>
    %cst_41 = arith.constant dense<0.000000e+00> : vector<32x4xf32>
    %35 = tpu.matmul %34, %32, %cst_41 {dimension_numbers = #tpu.dot_dimension_numbers<[1], [0], [0], [1], [0, 0, 1, 1], [], []>} : vector<32x32xbf16>, vector<32x4xbf16>, vector<32x4xf32> -> vector<32x4xf32>
    %36 = arith.addf %30, %35 : vector<32x4xf32>
    %c0_42 = arith.constant 0 : index
    %c0_43 = arith.constant 0 : index
    %c0_44 = arith.constant 0 : index
    %c6 = arith.constant 6 : index
    %37 = vector.load %arg2[%c0_42, %c0_43, %c0_44, %c6] : memref<1x1x32x18xbf16, #tpu.memory_space<vmem>>, vector<1x1x32x4xbf16>
    %38 = vector.shape_cast %37 : vector<1x1x32x4xbf16> to vector<32x4xbf16>
    %c6_45 = arith.constant 6 : index
    %c0_46 = arith.constant 0 : index
    %c0_47 = arith.constant 0 : index
    %39 = vector.load %arg3[%c6_45, %c0_46, %c0_47] : memref<15x32x32xbf16, #tpu.memory_space<vmem>>, vector<1x32x32xbf16>
    %40 = vector.shape_cast %39 : vector<1x32x32xbf16> to vector<32x32xbf16>
    %cst_48 = arith.constant dense<0.000000e+00> : vector<32x4xf32>
    %41 = tpu.matmul %40, %38, %cst_48 {dimension_numbers = #tpu.dot_dimension_numbers<[1], [0], [0], [1], [0, 0, 1, 1], [], []>} : vector<32x32xbf16>, vector<32x4xbf16>, vector<32x4xf32> -> vector<32x4xf32>
    %42 = arith.addf %36, %41 : vector<32x4xf32>
    %c0_49 = arith.constant 0 : index
    %c0_50 = arith.constant 0 : index
    %c0_51 = arith.constant 0 : index
    %c7 = arith.constant 7 : index
    %43 = vector.load %arg2[%c0_49, %c0_50, %c0_51, %c7] : memref<1x1x32x18xbf16, #tpu.memory_space<vmem>>, vector<1x1x32x4xbf16>
    %44 = vector.shape_cast %43 : vector<1x1x32x4xbf16> to vector<32x4xbf16>
    %c7_52 = arith.constant 7 : index
    %c0_53 = arith.constant 0 : index
    %c0_54 = arith.constant 0 : index
    %45 = vector.load %arg3[%c7_52, %c0_53, %c0_54] : memref<15x32x32xbf16, #tpu.memory_space<vmem>>, vector<1x32x32xbf16>
    %46 = vector.shape_cast %45 : vector<1x32x32xbf16> to vector<32x32xbf16>
    %cst_55 = arith.constant dense<0.000000e+00> : vector<32x4xf32>
    %47 = tpu.matmul %46, %44, %cst_55 {dimension_numbers = #tpu.dot_dimension_numbers<[1], [0], [0], [1], [0, 0, 1, 1], [], []>} : vector<32x32xbf16>, vector<32x4xbf16>, vector<32x4xf32> -> vector<32x4xf32>
    %48 = arith.addf %42, %47 : vector<32x4xf32>
    %c0_56 = arith.constant 0 : index
    %c0_57 = arith.constant 0 : index
    %c0_58 = arith.constant 0 : index
    %c8 = arith.constant 8 : index
    %49 = vector.load %arg2[%c0_56, %c0_57, %c0_58, %c8] : memref<1x1x32x18xbf16, #tpu.memory_space<vmem>>, vector<1x1x32x4xbf16>
    %50 = vector.shape_cast %49 : vector<1x1x32x4xbf16> to vector<32x4xbf16>
    %c8_59 = arith.constant 8 : index
    %c0_60 = arith.constant 0 : index
    %c0_61 = arith.constant 0 : index
    %51 = vector.load %arg3[%c8_59, %c0_60, %c0_61] : memref<15x32x32xbf16, #tpu.memory_space<vmem>>, vector<1x32x32xbf16>
    %52 = vector.shape_cast %51 : vector<1x32x32xbf16> to vector<32x32xbf16>
    %cst_62 = arith.constant dense<0.000000e+00> : vector<32x4xf32>
    %53 = tpu.matmul %52, %50, %cst_62 {dimension_numbers = #tpu.dot_dimension_numbers<[1], [0], [0], [1], [0, 0, 1, 1], [], []>} : vector<32x32xbf16>, vector<32x4xbf16>, vector<32x4xf32> -> vector<32x4xf32>
    %54 = arith.addf %48, %53 : vector<32x4xf32>
    %c0_63 = arith.constant 0 : index
    %c0_64 = arith.constant 0 : index
    %c0_65 = arith.constant 0 : index
    %c9 = arith.constant 9 : index
    %55 = vector.load %arg2[%c0_63, %c0_64, %c0_65, %c9] : memref<1x1x32x18xbf16, #tpu.memory_space<vmem>>, vector<1x1x32x4xbf16>
    %56 = vector.shape_cast %55 : vector<1x1x32x4xbf16> to vector<32x4xbf16>
    %c9_66 = arith.constant 9 : index
    %c0_67 = arith.constant 0 : index
    %c0_68 = arith.constant 0 : index
    %57 = vector.load %arg3[%c9_66, %c0_67, %c0_68] : memref<15x32x32xbf16, #tpu.memory_space<vmem>>, vector<1x32x32xbf16>
    %58 = vector.shape_cast %57 : vector<1x32x32xbf16> to vector<32x32xbf16>
    %cst_69 = arith.constant dense<0.000000e+00> : vector<32x4xf32>
    %59 = tpu.matmul %58, %56, %cst_69 {dimension_numbers = #tpu.dot_dimension_numbers<[1], [0], [0], [1], [0, 0, 1, 1], [], []>} : vector<32x32xbf16>, vector<32x4xbf16>, vector<32x4xf32> -> vector<32x4xf32>
    %60 = arith.addf %54, %59 : vector<32x4xf32>
    %c0_70 = arith.constant 0 : index
    %c0_71 = arith.constant 0 : index
    %c0_72 = arith.constant 0 : index
    %c10 = arith.constant 10 : index
    %61 = vector.load %arg2[%c0_70, %c0_71, %c0_72, %c10] : memref<1x1x32x18xbf16, #tpu.memory_space<vmem>>, vector<1x1x32x4xbf16>
    %62 = vector.shape_cast %61 : vector<1x1x32x4xbf16> to vector<32x4xbf16>
    %c10_73 = arith.constant 10 : index
    %c0_74 = arith.constant 0 : index
    %c0_75 = arith.constant 0 : index
    %63 = vector.load %arg3[%c10_73, %c0_74, %c0_75] : memref<15x32x32xbf16, #tpu.memory_space<vmem>>, vector<1x32x32xbf16>
    %64 = vector.shape_cast %63 : vector<1x32x32xbf16> to vector<32x32xbf16>
    %cst_76 = arith.constant dense<0.000000e+00> : vector<32x4xf32>
    %65 = tpu.matmul %64, %62, %cst_76 {dimension_numbers = #tpu.dot_dimension_numbers<[1], [0], [0], [1], [0, 0, 1, 1], [], []>} : vector<32x32xbf16>, vector<32x4xbf16>, vector<32x4xf32> -> vector<32x4xf32>
    %66 = arith.addf %60, %65 : vector<32x4xf32>
    %c0_77 = arith.constant 0 : index
    %c0_78 = arith.constant 0 : index
    %c0_79 = arith.constant 0 : index
    %c11 = arith.constant 11 : index
    %67 = vector.load %arg2[%c0_77, %c0_78, %c0_79, %c11] : memref<1x1x32x18xbf16, #tpu.memory_space<vmem>>, vector<1x1x32x4xbf16>
    %68 = vector.shape_cast %67 : vector<1x1x32x4xbf16> to vector<32x4xbf16>
    %c11_80 = arith.constant 11 : index
    %c0_81 = arith.constant 0 : index
    %c0_82 = arith.constant 0 : index
    %69 = vector.load %arg3[%c11_80, %c0_81, %c0_82] : memref<15x32x32xbf16, #tpu.memory_space<vmem>>, vector<1x32x32xbf16>
    %70 = vector.shape_cast %69 : vector<1x32x32xbf16> to vector<32x32xbf16>
    %cst_83 = arith.constant dense<0.000000e+00> : vector<32x4xf32>
    %71 = tpu.matmul %70, %68, %cst_83 {dimension_numbers = #tpu.dot_dimension_numbers<[1], [0], [0], [1], [0, 0, 1, 1], [], []>} : vector<32x32xbf16>, vector<32x4xbf16>, vector<32x4xf32> -> vector<32x4xf32>
    %72 = arith.addf %66, %71 : vector<32x4xf32>
    %c0_84 = arith.constant 0 : index
    %c0_85 = arith.constant 0 : index
    %c0_86 = arith.constant 0 : index
    %c12 = arith.constant 12 : index
    %73 = vector.load %arg2[%c0_84, %c0_85, %c0_86, %c12] : memref<1x1x32x18xbf16, #tpu.memory_space<vmem>>, vector<1x1x32x4xbf16>
    %74 = vector.shape_cast %73 : vector<1x1x32x4xbf16> to vector<32x4xbf16>
    %c12_87 = arith.constant 12 : index
    %c0_88 = arith.constant 0 : index
    %c0_89 = arith.constant 0 : index
    %75 = vector.load %arg3[%c12_87, %c0_88, %c0_89] : memref<15x32x32xbf16, #tpu.memory_space<vmem>>, vector<1x32x32xbf16>
    %76 = vector.shape_cast %75 : vector<1x32x32xbf16> to vector<32x32xbf16>
    %cst_90 = arith.constant dense<0.000000e+00> : vector<32x4xf32>
    %77 = tpu.matmul %76, %74, %cst_90 {dimension_numbers = #tpu.dot_dimension_numbers<[1], [0], [0], [1], [0, 0, 1, 1], [], []>} : vector<32x32xbf16>, vector<32x4xbf16>, vector<32x4xf32> -> vector<32x4xf32>
    %78 = arith.addf %72, %77 : vector<32x4xf32>
    %c0_91 = arith.constant 0 : index
    %c0_92 = arith.constant 0 : index
    %c0_93 = arith.constant 0 : index
    %c13 = arith.constant 13 : index
    %79 = vector.load %arg2[%c0_91, %c0_92, %c0_93, %c13] : memref<1x1x32x18xbf16, #tpu.memory_space<vmem>>, vector<1x1x32x4xbf16>
    %80 = vector.shape_cast %79 : vector<1x1x32x4xbf16> to vector<32x4xbf16>
    %c13_94 = arith.constant 13 : index
    %c0_95 = arith.constant 0 : index
    %c0_96 = arith.constant 0 : index
    %81 = vector.load %arg3[%c13_94, %c0_95, %c0_96] : memref<15x32x32xbf16, #tpu.memory_space<vmem>>, vector<1x32x32xbf16>
    %82 = vector.shape_cast %81 : vector<1x32x32xbf16> to vector<32x32xbf16>
    %cst_97 = arith.constant dense<0.000000e+00> : vector<32x4xf32>
    %83 = tpu.matmul %82, %80, %cst_97 {dimension_numbers = #tpu.dot_dimension_numbers<[1], [0], [0], [1], [0, 0, 1, 1], [], []>} : vector<32x32xbf16>, vector<32x4xbf16>, vector<32x4xf32> -> vector<32x4xf32>
    %84 = arith.addf %78, %83 : vector<32x4xf32>
    %c0_98 = arith.constant 0 : index
    %c0_99 = arith.constant 0 : index
    %c0_100 = arith.constant 0 : index
    %c14 = arith.constant 14 : index
    %85 = vector.load %arg2[%c0_98, %c0_99, %c0_100, %c14] : memref<1x1x32x18xbf16, #tpu.memory_space<vmem>>, vector<1x1x32x4xbf16>
    %86 = vector.shape_cast %85 : vector<1x1x32x4xbf16> to vector<32x4xbf16>
    %c14_101 = arith.constant 14 : index
    %c0_102 = arith.constant 0 : index
    %c0_103 = arith.constant 0 : index
    %87 = vector.load %arg3[%c14_101, %c0_102, %c0_103] : memref<15x32x32xbf16, #tpu.memory_space<vmem>>, vector<1x32x32xbf16>
    %88 = vector.shape_cast %87 : vector<1x32x32xbf16> to vector<32x32xbf16>
    %cst_104 = arith.constant dense<0.000000e+00> : vector<32x4xf32>
    %89 = tpu.matmul %88, %86, %cst_104 {dimension_numbers = #tpu.dot_dimension_numbers<[1], [0], [0], [1], [0, 0, 1, 1], [], []>} : vector<32x32xbf16>, vector<32x4xbf16>, vector<32x4xf32> -> vector<32x4xf32>
    %90 = arith.addf %84, %89 : vector<32x4xf32>
    %c0_105 = arith.constant 0 : index
    %c0_106 = arith.constant 0 : index
    %91 = vector.load %arg4[%c0_105, %c0_106] : memref<32x1xf32, #tpu.memory_space<vmem>>, vector<32x1xf32>
    %92 = vector.broadcast %91 : vector<32x1xf32> to vector<32x4xf32>
    %93 = arith.mulf %90, %92 : vector<32x4xf32>
    %c0_107 = arith.constant 0 : index
    %c0_108 = arith.constant 0 : index
    %94 = vector.load %arg5[%c0_107, %c0_108] : memref<32x1xf32, #tpu.memory_space<vmem>>, vector<32x1xf32>
    %95 = vector.broadcast %94 : vector<32x1xf32> to vector<32x4xf32>
    %96 = arith.addf %93, %95 : vector<32x4xf32>
    %cst_109 = arith.constant 0.000000e+00 : f32
    %97 = vector.broadcast %cst_109 : f32 to vector<32x4xf32>
    %98 = arith.maximumf %96, %97 : vector<32x4xf32>
    %99 = arith.truncf %98 : vector<32x4xf32> to vector<32x4xbf16>
    %c0_110 = arith.constant 0 : index
    %c0_111 = arith.constant 0 : index
    %c0_112 = arith.constant 0 : index
    %100 = vector.load %arg6[%c0_110, %c0_111, %c0_112] : memref<1x32x4xbf16, #tpu.memory_space<vmem>>, vector<1x32x4xbf16>
    %101 = vector.shape_cast %100 : vector<1x32x4xbf16> to vector<32x4xbf16>
    %102 = vector.shape_cast %99 : vector<32x4xbf16> to vector<1x32x4xbf16>
    tpu.vector_store %arg6[%c0_110, %c0_111, %c0_112], %102 {strides = array<i32>} : memref<1x32x4xbf16, #tpu.memory_space<vmem>>, vector<1x32x4xbf16>,
    return
  }
  func.func @transform_0(%arg0: i32, %arg1: i32) -> (i32, i32, i32, i32) {
    %c0_i32 = arith.constant 0 : i32
    %c0_i32_0 = arith.constant 0 : i32
    %c0_i32_1 = arith.constant 0 : i32
    %c0_i32_2 = arith.constant 0 : i32
    return %arg0, %c0_i32, %c0_i32_0, %c0_i32_1 : i32, i32, i32, i32
  }
  func.func @transform_1(%arg0: i32, %arg1: i32) -> (i32, i32, i32) {
    %c0_i32 = arith.constant 0 : i32
    %c0_i32_0 = arith.constant 0 : i32
    %c0_i32_1 = arith.constant 0 : i32
    %c0_i32_2 = arith.constant 0 : i32
    return %c0_i32, %c0_i32_0, %c0_i32_1 : i32, i32, i32
  }
  func.func @transform_2(%arg0: i32, %arg1: i32) -> (i32, i32) {
    %c0_i32 = arith.constant 0 : i32
    %c0_i32_0 = arith.constant 0 : i32
    %c0_i32_1 = arith.constant 0 : i32
    return %c0_i32, %c0_i32_0 : i32, i32
  }
  func.func @transform_3(%arg0: i32, %arg1: i32) -> (i32, i32) {
    %c0_i32 = arith.constant 0 : i32
    %c0_i32_0 = arith.constant 0 : i32
    %c0_i32_1 = arith.constant 0 : i32
    return %c0_i32, %c0_i32_0 : i32, i32
  }
  func.func @transform_4(%arg0: i32, %arg1: i32) -> (i32, i32, i32) {
    %c0_i32 = arith.constant 0 : i32
    %c0_i32_0 = arith.constant 0 : i32
    return %arg0, %c0_i32, %arg1 : i32, i32, i32
  }
}

module attributes {stable_mosaic.version = 11 : i64} {
  func.func @_mm_bias_kernel(%arg0: i32, %arg1: memref<8x32xbf16, #tpu.memory_space<vmem>>, %arg2: memref<32x192xbf16, #tpu.memory_space<vmem>>, %arg3: memref<1x192xf32, #tpu.memory_space<vmem>>, %arg4: memref<8x192xbf16, #tpu.memory_space<vmem>>) attributes {dimension_semantics = [#tpu.dimension_semantics<parallel>], iteration_bounds = array<i64: 1>, scalar_prefetch = 0 : i64, scratch_operands = 0 : i64, tpu.core_type = #tpu.core_type<tc>, window_params = [{transform_indices = @transform_0, window_bounds = array<i64: 8, 32>}, {pipeline_mode = #tpu.pipeline_mode<synchronous>, transform_indices = @transform_1, window_bounds = array<i64: 32, 192>}, {pipeline_mode = #tpu.pipeline_mode<synchronous>, transform_indices = @transform_2, window_bounds = array<i64: 1, 192>}, {transform_indices = @transform_3, window_bounds = array<i64: 8, 192>}]} {
    %c0 = arith.constant 0 : index
    %c0_0 = arith.constant 0 : index
    %0 = vector.load %arg1[%c0, %c0_0] : memref<8x32xbf16, #tpu.memory_space<vmem>>, vector<8x32xbf16>
    %c0_1 = arith.constant 0 : index
    %c0_2 = arith.constant 0 : index
    %1 = vector.load %arg2[%c0_1, %c0_2] : memref<32x192xbf16, #tpu.memory_space<vmem>>, vector<32x192xbf16>
    %cst = arith.constant dense<0.000000e+00> : vector<8x192xf32>
    %2 = tpu.matmul %0, %1, %cst {dimension_numbers = #tpu.dot_dimension_numbers<[1], [0], [0], [1], [0, 0, 1, 1], [], []>} : vector<8x32xbf16>, vector<32x192xbf16>, vector<8x192xf32> -> vector<8x192xf32>
    %c0_3 = arith.constant 0 : index
    %c0_4 = arith.constant 0 : index
    %3 = vector.load %arg3[%c0_3, %c0_4] : memref<1x192xf32, #tpu.memory_space<vmem>>, vector<1x192xf32>
    %4 = vector.broadcast %3 : vector<1x192xf32> to vector<8x192xf32>
    %5 = arith.addf %2, %4 : vector<8x192xf32>
    %6 = arith.truncf %5 : vector<8x192xf32> to vector<8x192xbf16>
    %c0_5 = arith.constant 0 : index
    %c0_6 = arith.constant 0 : index
    %7 = vector.load %arg4[%c0_5, %c0_6] : memref<8x192xbf16, #tpu.memory_space<vmem>>, vector<8x192xbf16>
    tpu.vector_store %arg4[%c0_5, %c0_6], %6 {strides = array<i32>} : memref<8x192xbf16, #tpu.memory_space<vmem>>, vector<8x192xbf16>,
    return
  }
  func.func @transform_0(%arg0: i32) -> (i32, i32) {
    %c0_i32 = arith.constant 0 : i32
    %c0_i32_0 = arith.constant 0 : i32
    return %arg0, %c0_i32 : i32, i32
  }
  func.func @transform_1(%arg0: i32) -> (i32, i32) {
    %c0_i32 = arith.constant 0 : i32
    %c0_i32_0 = arith.constant 0 : i32
    %c0_i32_1 = arith.constant 0 : i32
    return %c0_i32, %c0_i32_0 : i32, i32
  }
  func.func @transform_2(%arg0: i32) -> (i32, i32) {
    %c0_i32 = arith.constant 0 : i32
    %c0_i32_0 = arith.constant 0 : i32
    %c0_i32_1 = arith.constant 0 : i32
    return %c0_i32, %c0_i32_0 : i32, i32
  }
  func.func @transform_3(%arg0: i32) -> (i32, i32) {
    %c0_i32 = arith.constant 0 : i32
    %c0_i32_0 = arith.constant 0 : i32
    return %arg0, %c0_i32 : i32, i32
  }
}

module attributes {stable_mosaic.version = 11 : i64} {
  func.func @_bigru_kernel(%arg0: memref<4x2x192xbf16, #tpu.memory_space<vmem>>, %arg1: memref<64x192xbf16, #tpu.memory_space<vmem>>, %arg2: memref<1x64xf32, #tpu.memory_space<vmem>>, %arg3: memref<4x2x32xf32, #tpu.memory_space<vmem>>, %arg4: memref<4x2x32xf32, #tpu.memory_space<vmem>>, %arg5: memref<2x64xf32, #tpu.memory_space<vmem>>) attributes {dimension_semantics = [], scalar_prefetch = 0 : i64, scratch_operands = 1 : i64, tpu.core_type = #tpu.core_type<tc>} {
    %cst = arith.constant 0.000000e+00 : f32
    %0 = vector.broadcast %cst : f32 to vector<2x64xf32>
    %c0 = arith.constant 0 : index
    %c0_0 = arith.constant 0 : index
    %1 = vector.load %arg5[%c0, %c0_0] : memref<2x64xf32, #tpu.memory_space<vmem>>, vector<2x64xf32>
    tpu.vector_store %arg5[%c0, %c0_0], %0 {strides = array<i32>} : memref<2x64xf32, #tpu.memory_space<vmem>>, vector<2x64xf32>,
    %c0_i32 = arith.constant 0 : i32
    %c4_i32 = arith.constant 4 : i32
    %2 = arith.addi %c0_i32, %c4_i32 : i32
    %c1_i32 = arith.constant 1 : i32
    scf.for %arg6 = %c0_i32 to %2 step %c1_i32  : i32 {
      %c1_i32_2 = arith.constant 1 : i32
      %3 = arith.muli %arg6, %c1_i32_2 : i32
      %c0_i32_3 = arith.constant 0 : i32
      %4 = arith.addi %c0_i32_3, %3 : i32
      %c0_4 = arith.constant 0 : index
      %c0_5 = arith.constant 0 : index
      %5 = vector.load %arg5[%c0_4, %c0_5] : memref<2x64xf32, #tpu.memory_space<vmem>>, vector<2x64xf32>
      %6 = arith.truncf %5 : vector<2x64xf32> to vector<2x64xbf16>
      %c0_6 = arith.constant 0 : index
      %c0_7 = arith.constant 0 : index
      %7 = vector.load %arg1[%c0_6, %c0_7] : memref<64x192xbf16, #tpu.memory_space<vmem>>, vector<64x192xbf16>
      %cst_8 = arith.constant dense<0.000000e+00> : vector<2x192xf32>
      %8 = tpu.matmul %6, %7, %cst_8 {dimension_numbers = #tpu.dot_dimension_numbers<[1], [0], [0], [1], [0, 0, 1, 1], [], []>} : vector<2x64xbf16>, vector<64x192xbf16>, vector<2x192xf32> -> vector<2x192xf32>
      %9 = arith.index_cast %4 : i32 to index
      %c0_9 = arith.constant 0 : index
      %c0_10 = arith.constant 0 : index
      %10 = vector.load %arg0[%9, %c0_9, %c0_10] : memref<4x2x192xbf16, #tpu.memory_space<vmem>>, vector<1x2x192xbf16>
      %11 = vector.shape_cast %10 : vector<1x2x192xbf16> to vector<2x192xbf16>
      %12 = arith.extf %11 : vector<2x192xbf16> to vector<2x192xf32>
      %c3_i32 = arith.constant 3 : i32
      %13 = arith.subi %c3_i32, %4 : i32
      %14 = arith.index_cast %13 : i32 to index
      %c0_11 = arith.constant 0 : index
      %c0_12 = arith.constant 0 : index
      %15 = vector.load %arg0[%14, %c0_11, %c0_12] : memref<4x2x192xbf16, #tpu.memory_space<vmem>>, vector<1x2x192xbf16>
      %16 = vector.shape_cast %15 : vector<1x2x192xbf16> to vector<2x192xbf16>
      %17 = arith.extf %16 : vector<2x192xbf16> to vector<2x192xf32>
      %18 = vector.extract_strided_slice %12 {offsets = [0, 0], sizes = [2, 96], strides = [1, 1]} : vector<2x192xf32> to vector<2x96xf32>
      %19 = vector.extract_strided_slice %8 {offsets = [0, 0], sizes = [2, 96], strides = [1, 1]} : vector<2x192xf32> to vector<2x96xf32>
      %c0_13 = arith.constant 0 : index
      %c0_14 = arith.constant 0 : index
      %20 = vector.load %arg2[%c0_13, %c0_14] : memref<1x64xf32, #tpu.memory_space<vmem>>, vector<1x32xf32>
      %21 = vector.extract_strided_slice %5 {offsets = [0, 0], sizes = [2, 32], strides = [1, 1]} : vector<2x64xf32> to vector<2x32xf32>
      %22 = vector.extract_strided_slice %18 {offsets = [0, 0], sizes = [2, 32], strides = [1, 1]} : vector<2x96xf32> to vector<2x32xf32>
      %23 = vector.extract_strided_slice %19 {offsets = [0, 0], sizes = [2, 32], strides = [1, 1]} : vector<2x96xf32> to vector<2x32xf32>
      %24 = arith.addf %22, %23 : vector<2x32xf32>
      %25 = arith.negf %24 : vector<2x32xf32>
      %26 = math.exp %25 : vector<2x32xf32>
      %cst_15 = arith.constant 1.000000e+00 : f32
      %27 = vector.broadcast %cst_15 : f32 to vector<2x32xf32>
      %28 = arith.addf %27, %26 : vector<2x32xf32>
      %29 = arith.divf %27, %28 : vector<2x32xf32>
      %30 = vector.extract_strided_slice %18 {offsets = [0, 32], sizes = [2, 32], strides = [1, 1]} : vector<2x96xf32> to vector<2x32xf32>
      %31 = vector.extract_strided_slice %19 {offsets = [0, 32], sizes = [2, 32], strides = [1, 1]} : vector<2x96xf32> to vector<2x32xf32>
      %32 = arith.addf %30, %31 : vector<2x32xf32>
      %33 = arith.negf %32 : vector<2x32xf32>
      %34 = math.exp %33 : vector<2x32xf32>
      %cst_16 = arith.constant 1.000000e+00 : f32
      %35 = vector.broadcast %cst_16 : f32 to vector<2x32xf32>
      %36 = arith.addf %35, %34 : vector<2x32xf32>
      %37 = arith.divf %35, %36 : vector<2x32xf32>
      %38 = vector.extract_strided_slice %18 {offsets = [0, 64], sizes = [2, 32], strides = [1, 1]} : vector<2x96xf32> to vector<2x32xf32>
      %39 = vector.extract_strided_slice %19 {offsets = [0, 64], sizes = [2, 32], strides = [1, 1]} : vector<2x96xf32> to vector<2x32xf32>
      %40 = vector.broadcast %20 : vector<1x32xf32> to vector<2x32xf32>
      %41 = arith.addf %39, %40 : vector<2x32xf32>
      %42 = arith.mulf %29, %41 : vector<2x32xf32>
      %43 = arith.addf %38, %42 : vector<2x32xf32>
      %44 = math.tanh %43 : vector<2x32xf32>
      %cst_17 = arith.constant 1.000000e+00 : f32
      %45 = vector.broadcast %cst_17 : f32 to vector<2x32xf32>
      %46 = arith.subf %45, %37 : vector<2x32xf32>
      %47 = arith.mulf %46, %44 : vector<2x32xf32>
      %48 = arith.mulf %37, %21 : vector<2x32xf32>
      %49 = arith.addf %47, %48 : vector<2x32xf32>
      %50 = vector.extract_strided_slice %17 {offsets = [0, 96], sizes = [2, 96], strides = [1, 1]} : vector<2x192xf32> to vector<2x96xf32>
      %51 = vector.extract_strided_slice %8 {offsets = [0, 96], sizes = [2, 96], strides = [1, 1]} : vector<2x192xf32> to vector<2x96xf32>
      %c0_18 = arith.constant 0 : index
      %c32 = arith.constant 32 : index
      %52 = vector.load %arg2[%c0_18, %c32] : memref<1x64xf32, #tpu.memory_space<vmem>>, vector<1x32xf32>
      %53 = vector.extract_strided_slice %5 {offsets = [0, 32], sizes = [2, 32], strides = [1, 1]} : vector<2x64xf32> to vector<2x32xf32>
      %54 = vector.extract_strided_slice %50 {offsets = [0, 0], sizes = [2, 32], strides = [1, 1]} : vector<2x96xf32> to vector<2x32xf32>
      %55 = vector.extract_strided_slice %51 {offsets = [0, 0], sizes = [2, 32], strides = [1, 1]} : vector<2x96xf32> to vector<2x32xf32>
      %56 = arith.addf %54, %55 : vector<2x32xf32>
      %57 = arith.negf %56 : vector<2x32xf32>
      %58 = math.exp %57 : vector<2x32xf32>
      %cst_19 = arith.constant 1.000000e+00 : f32
      %59 = vector.broadcast %cst_19 : f32 to vector<2x32xf32>
      %60 = arith.addf %59, %58 : vector<2x32xf32>
      %61 = arith.divf %59, %60 : vector<2x32xf32>
      %62 = vector.extract_strided_slice %50 {offsets = [0, 32], sizes = [2, 32], strides = [1, 1]} : vector<2x96xf32> to vector<2x32xf32>
      %63 = vector.extract_strided_slice %51 {offsets = [0, 32], sizes = [2, 32], strides = [1, 1]} : vector<2x96xf32> to vector<2x32xf32>
      %64 = arith.addf %62, %63 : vector<2x32xf32>
      %65 = arith.negf %64 : vector<2x32xf32>
      %66 = math.exp %65 : vector<2x32xf32>
      %cst_20 = arith.constant 1.000000e+00 : f32
      %67 = vector.broadcast %cst_20 : f32 to vector<2x32xf32>
      %68 = arith.addf %67, %66 : vector<2x32xf32>
      %69 = arith.divf %67, %68 : vector<2x32xf32>
      %70 = vector.extract_strided_slice %50 {offsets = [0, 64], sizes = [2, 32], strides = [1, 1]} : vector<2x96xf32> to vector<2x32xf32>
      %71 = vector.extract_strided_slice %51 {offsets = [0, 64], sizes = [2, 32], strides = [1, 1]} : vector<2x96xf32> to vector<2x32xf32>
      %72 = vector.broadcast %52 : vector<1x32xf32> to vector<2x32xf32>
      %73 = arith.addf %71, %72 : vector<2x32xf32>
      %74 = arith.mulf %61, %73 : vector<2x32xf32>
      %75 = arith.addf %70, %74 : vector<2x32xf32>
      %76 = math.tanh %75 : vector<2x32xf32>
      %cst_21 = arith.constant 1.000000e+00 : f32
      %77 = vector.broadcast %cst_21 : f32 to vector<2x32xf32>
      %78 = arith.subf %77, %69 : vector<2x32xf32>
      %79 = arith.mulf %78, %76 : vector<2x32xf32>
      %80 = arith.mulf %69, %53 : vector<2x32xf32>
      %81 = arith.addf %79, %80 : vector<2x32xf32>
      %82 = arith.index_cast %4 : i32 to index
      %c0_22 = arith.constant 0 : index
      %c0_23 = arith.constant 0 : index
      %83 = vector.load %arg3[%82, %c0_22, %c0_23] : memref<4x2x32xf32, #tpu.memory_space<vmem>>, vector<1x2x32xf32>
      %84 = vector.shape_cast %83 : vector<1x2x32xf32> to vector<2x32xf32>
      %85 = vector.shape_cast %49 : vector<2x32xf32> to vector<1x2x32xf32>
      tpu.vector_store %arg3[%82, %c0_22, %c0_23], %85 {strides = array<i32>} : memref<4x2x32xf32, #tpu.memory_space<vmem>>, vector<1x2x32xf32>,
      %c3_i32_24 = arith.constant 3 : i32
      %86 = arith.subi %c3_i32_24, %4 : i32
      %87 = arith.index_cast %86 : i32 to index
      %c0_25 = arith.constant 0 : index
      %c0_26 = arith.constant 0 : index
      %88 = vector.load %arg4[%87, %c0_25, %c0_26] : memref<4x2x32xf32, #tpu.memory_space<vmem>>, vector<1x2x32xf32>
      %89 = vector.shape_cast %88 : vector<1x2x32xf32> to vector<2x32xf32>
      %90 = vector.shape_cast %81 : vector<2x32xf32> to vector<1x2x32xf32>
      tpu.vector_store %arg4[%87, %c0_25, %c0_26], %90 {strides = array<i32>} : memref<4x2x32xf32, #tpu.memory_space<vmem>>, vector<1x2x32xf32>,
      %91 = tpu.concatenate %49, %81 in 1 : vector<2x32xf32>, vector<2x32xf32> -> vector<2x64xf32>
      %c0_27 = arith.constant 0 : index
      %c0_28 = arith.constant 0 : index
      %92 = vector.load %arg5[%c0_27, %c0_28] : memref<2x64xf32, #tpu.memory_space<vmem>>, vector<2x64xf32>
      tpu.vector_store %arg5[%c0_27, %c0_28], %91 {strides = array<i32>} : memref<2x64xf32, #tpu.memory_space<vmem>>, vector<2x64xf32>,
    }
    %c4_i32_1 = arith.constant 4 : i32
    return
  }
}

module attributes {stable_mosaic.version = 11 : i64} {
  func.func @_mm_bias_kernel(%arg0: i32, %arg1: memref<8x64xbf16, #tpu.memory_space<vmem>>, %arg2: memref<64x32xbf16, #tpu.memory_space<vmem>>, %arg3: memref<1x32xf32, #tpu.memory_space<vmem>>, %arg4: memref<8x32xbf16, #tpu.memory_space<vmem>>) attributes {dimension_semantics = [#tpu.dimension_semantics<parallel>], iteration_bounds = array<i64: 1>, scalar_prefetch = 0 : i64, scratch_operands = 0 : i64, tpu.core_type = #tpu.core_type<tc>, window_params = [{transform_indices = @transform_0, window_bounds = array<i64: 8, 64>}, {pipeline_mode = #tpu.pipeline_mode<synchronous>, transform_indices = @transform_1, window_bounds = array<i64: 64, 32>}, {pipeline_mode = #tpu.pipeline_mode<synchronous>, transform_indices = @transform_2, window_bounds = array<i64: 1, 32>}, {transform_indices = @transform_3, window_bounds = array<i64: 8, 32>}]} {
    %c0 = arith.constant 0 : index
    %c0_0 = arith.constant 0 : index
    %0 = vector.load %arg1[%c0, %c0_0] : memref<8x64xbf16, #tpu.memory_space<vmem>>, vector<8x64xbf16>
    %c0_1 = arith.constant 0 : index
    %c0_2 = arith.constant 0 : index
    %1 = vector.load %arg2[%c0_1, %c0_2] : memref<64x32xbf16, #tpu.memory_space<vmem>>, vector<64x32xbf16>
    %cst = arith.constant dense<0.000000e+00> : vector<8x32xf32>
    %2 = tpu.matmul %0, %1, %cst {dimension_numbers = #tpu.dot_dimension_numbers<[1], [0], [0], [1], [0, 0, 1, 1], [], []>} : vector<8x64xbf16>, vector<64x32xbf16>, vector<8x32xf32> -> vector<8x32xf32>
    %c0_3 = arith.constant 0 : index
    %c0_4 = arith.constant 0 : index
    %3 = vector.load %arg3[%c0_3, %c0_4] : memref<1x32xf32, #tpu.memory_space<vmem>>, vector<1x32xf32>
    %4 = vector.broadcast %3 : vector<1x32xf32> to vector<8x32xf32>
    %5 = arith.addf %2, %4 : vector<8x32xf32>
    %6 = arith.truncf %5 : vector<8x32xf32> to vector<8x32xbf16>
    %c0_5 = arith.constant 0 : index
    %c0_6 = arith.constant 0 : index
    %7 = vector.load %arg4[%c0_5, %c0_6] : memref<8x32xbf16, #tpu.memory_space<vmem>>, vector<8x32xbf16>
    tpu.vector_store %arg4[%c0_5, %c0_6], %6 {strides = array<i32>} : memref<8x32xbf16, #tpu.memory_space<vmem>>, vector<8x32xbf16>,
    return
  }
  func.func @transform_0(%arg0: i32) -> (i32, i32) {
    %c0_i32 = arith.constant 0 : i32
    %c0_i32_0 = arith.constant 0 : i32
    return %arg0, %c0_i32 : i32, i32
  }
  func.func @transform_1(%arg0: i32) -> (i32, i32) {
    %c0_i32 = arith.constant 0 : i32
    %c0_i32_0 = arith.constant 0 : i32
    %c0_i32_1 = arith.constant 0 : i32
    return %c0_i32, %c0_i32_0 : i32, i32
  }
  func.func @transform_2(%arg0: i32) -> (i32, i32) {
    %c0_i32 = arith.constant 0 : i32
    %c0_i32_0 = arith.constant 0 : i32
    %c0_i32_1 = arith.constant 0 : i32
    return %c0_i32, %c0_i32_0 : i32, i32
  }
  func.func @transform_3(%arg0: i32) -> (i32, i32) {
    %c0_i32 = arith.constant 0 : i32
    %c0_i32_0 = arith.constant 0 : i32
    return %arg0, %c0_i32 : i32, i32
  }
}

module attributes {stable_mosaic.version = 11 : i64} {
  func.func @_conv_kernel(%arg0: i32, %arg1: i32, %arg2: memref<1x1x32x22xbf16, #tpu.memory_space<vmem>>, %arg3: memref<15x16x32xbf16, #tpu.memory_space<vmem>>, %arg4: memref<16x1xf32, #tpu.memory_space<vmem>>, %arg5: memref<16x1xf32, #tpu.memory_space<vmem>>, %arg6: memref<1x16x8xbf16, #tpu.memory_space<vmem>>, %arg7: memref<1x16x8xbf16, #tpu.memory_space<vmem>>) attributes {dimension_semantics = [#tpu.dimension_semantics<parallel>, #tpu.dimension_semantics<arbitrary>], iteration_bounds = array<i64: 2, 1>, scalar_prefetch = 0 : i64, scratch_operands = 0 : i64, tpu.core_type = #tpu.core_type<tc>, window_params = [{transform_indices = @transform_0, window_bounds = array<i64: 1, 1, 32, 22>}, {pipeline_mode = #tpu.pipeline_mode<synchronous>, transform_indices = @transform_1, window_bounds = array<i64: 15, 16, 32>}, {pipeline_mode = #tpu.pipeline_mode<synchronous>, transform_indices = @transform_2, window_bounds = array<i64: 16, 1>}, {pipeline_mode = #tpu.pipeline_mode<synchronous>, transform_indices = @transform_3, window_bounds = array<i64: 16, 1>}, {transform_indices = @transform_4, window_bounds = array<i64: 1, 16, 8>}, {transform_indices = @transform_5, window_bounds = array<i64: 1, 16, 8>}]} {
    %cst = arith.constant 0.000000e+00 : f32
    %0 = vector.broadcast %cst : f32 to vector<16x8xf32>
    %c0 = arith.constant 0 : index
    %c0_0 = arith.constant 0 : index
    %c0_1 = arith.constant 0 : index
    %c0_2 = arith.constant 0 : index
    %1 = vector.load %arg2[%c0, %c0_0, %c0_1, %c0_2] : memref<1x1x32x22xbf16, #tpu.memory_space<vmem>>, vector<1x1x32x8xbf16>
    %2 = vector.shape_cast %1 : vector<1x1x32x8xbf16> to vector<32x8xbf16>
    %c0_3 = arith.constant 0 : index
    %c0_4 = arith.constant 0 : index
    %c0_5 = arith.constant 0 : index
    %3 = vector.load %arg3[%c0_3, %c0_4, %c0_5] : memref<15x16x32xbf16, #tpu.memory_space<vmem>>, vector<1x16x32xbf16>
    %4 = vector.shape_cast %3 : vector<1x16x32xbf16> to vector<16x32xbf16>
    %cst_6 = arith.constant dense<0.000000e+00> : vector<16x8xf32>
    %5 = tpu.matmul %4, %2, %cst_6 {dimension_numbers = #tpu.dot_dimension_numbers<[1], [0], [0], [1], [0, 0, 1, 1], [], []>} : vector<16x32xbf16>, vector<32x8xbf16>, vector<16x8xf32> -> vector<16x8xf32>
    %6 = arith.addf %0, %5 : vector<16x8xf32>
    %c0_7 = arith.constant 0 : index
    %c0_8 = arith.constant 0 : index
    %c0_9 = arith.constant 0 : index
    %c1 = arith.constant 1 : index
    %7 = vector.load %arg2[%c0_7, %c0_8, %c0_9, %c1] : memref<1x1x32x22xbf16, #tpu.memory_space<vmem>>, vector<1x1x32x8xbf16>
    %8 = vector.shape_cast %7 : vector<1x1x32x8xbf16> to vector<32x8xbf16>
    %c1_10 = arith.constant 1 : index
    %c0_11 = arith.constant 0 : index
    %c0_12 = arith.constant 0 : index
    %9 = vector.load %arg3[%c1_10, %c0_11, %c0_12] : memref<15x16x32xbf16, #tpu.memory_space<vmem>>, vector<1x16x32xbf16>
    %10 = vector.shape_cast %9 : vector<1x16x32xbf16> to vector<16x32xbf16>
    %cst_13 = arith.constant dense<0.000000e+00> : vector<16x8xf32>
    %11 = tpu.matmul %10, %8, %cst_13 {dimension_numbers = #tpu.dot_dimension_numbers<[1], [0], [0], [1], [0, 0, 1, 1], [], []>} : vector<16x32xbf16>, vector<32x8xbf16>, vector<16x8xf32> -> vector<16x8xf32>
    %12 = arith.addf %6, %11 : vector<16x8xf32>
    %c0_14 = arith.constant 0 : index
    %c0_15 = arith.constant 0 : index
    %c0_16 = arith.constant 0 : index
    %c2 = arith.constant 2 : index
    %13 = vector.load %arg2[%c0_14, %c0_15, %c0_16, %c2] : memref<1x1x32x22xbf16, #tpu.memory_space<vmem>>, vector<1x1x32x8xbf16>
    %14 = vector.shape_cast %13 : vector<1x1x32x8xbf16> to vector<32x8xbf16>
    %c2_17 = arith.constant 2 : index
    %c0_18 = arith.constant 0 : index
    %c0_19 = arith.constant 0 : index
    %15 = vector.load %arg3[%c2_17, %c0_18, %c0_19] : memref<15x16x32xbf16, #tpu.memory_space<vmem>>, vector<1x16x32xbf16>
    %16 = vector.shape_cast %15 : vector<1x16x32xbf16> to vector<16x32xbf16>
    %cst_20 = arith.constant dense<0.000000e+00> : vector<16x8xf32>
    %17 = tpu.matmul %16, %14, %cst_20 {dimension_numbers = #tpu.dot_dimension_numbers<[1], [0], [0], [1], [0, 0, 1, 1], [], []>} : vector<16x32xbf16>, vector<32x8xbf16>, vector<16x8xf32> -> vector<16x8xf32>
    %18 = arith.addf %12, %17 : vector<16x8xf32>
    %c0_21 = arith.constant 0 : index
    %c0_22 = arith.constant 0 : index
    %c0_23 = arith.constant 0 : index
    %c3 = arith.constant 3 : index
    %19 = vector.load %arg2[%c0_21, %c0_22, %c0_23, %c3] : memref<1x1x32x22xbf16, #tpu.memory_space<vmem>>, vector<1x1x32x8xbf16>
    %20 = vector.shape_cast %19 : vector<1x1x32x8xbf16> to vector<32x8xbf16>
    %c3_24 = arith.constant 3 : index
    %c0_25 = arith.constant 0 : index
    %c0_26 = arith.constant 0 : index
    %21 = vector.load %arg3[%c3_24, %c0_25, %c0_26] : memref<15x16x32xbf16, #tpu.memory_space<vmem>>, vector<1x16x32xbf16>
    %22 = vector.shape_cast %21 : vector<1x16x32xbf16> to vector<16x32xbf16>
    %cst_27 = arith.constant dense<0.000000e+00> : vector<16x8xf32>
    %23 = tpu.matmul %22, %20, %cst_27 {dimension_numbers = #tpu.dot_dimension_numbers<[1], [0], [0], [1], [0, 0, 1, 1], [], []>} : vector<16x32xbf16>, vector<32x8xbf16>, vector<16x8xf32> -> vector<16x8xf32>
    %24 = arith.addf %18, %23 : vector<16x8xf32>
    %c0_28 = arith.constant 0 : index
    %c0_29 = arith.constant 0 : index
    %c0_30 = arith.constant 0 : index
    %c4 = arith.constant 4 : index
    %25 = vector.load %arg2[%c0_28, %c0_29, %c0_30, %c4] : memref<1x1x32x22xbf16, #tpu.memory_space<vmem>>, vector<1x1x32x8xbf16>
    %26 = vector.shape_cast %25 : vector<1x1x32x8xbf16> to vector<32x8xbf16>
    %c4_31 = arith.constant 4 : index
    %c0_32 = arith.constant 0 : index
    %c0_33 = arith.constant 0 : index
    %27 = vector.load %arg3[%c4_31, %c0_32, %c0_33] : memref<15x16x32xbf16, #tpu.memory_space<vmem>>, vector<1x16x32xbf16>
    %28 = vector.shape_cast %27 : vector<1x16x32xbf16> to vector<16x32xbf16>
    %cst_34 = arith.constant dense<0.000000e+00> : vector<16x8xf32>
    %29 = tpu.matmul %28, %26, %cst_34 {dimension_numbers = #tpu.dot_dimension_numbers<[1], [0], [0], [1], [0, 0, 1, 1], [], []>} : vector<16x32xbf16>, vector<32x8xbf16>, vector<16x8xf32> -> vector<16x8xf32>
    %30 = arith.addf %24, %29 : vector<16x8xf32>
    %c0_35 = arith.constant 0 : index
    %c0_36 = arith.constant 0 : index
    %c0_37 = arith.constant 0 : index
    %c5 = arith.constant 5 : index
    %31 = vector.load %arg2[%c0_35, %c0_36, %c0_37, %c5] : memref<1x1x32x22xbf16, #tpu.memory_space<vmem>>, vector<1x1x32x8xbf16>
    %32 = vector.shape_cast %31 : vector<1x1x32x8xbf16> to vector<32x8xbf16>
    %c5_38 = arith.constant 5 : index
    %c0_39 = arith.constant 0 : index
    %c0_40 = arith.constant 0 : index
    %33 = vector.load %arg3[%c5_38, %c0_39, %c0_40] : memref<15x16x32xbf16, #tpu.memory_space<vmem>>, vector<1x16x32xbf16>
    %34 = vector.shape_cast %33 : vector<1x16x32xbf16> to vector<16x32xbf16>
    %cst_41 = arith.constant dense<0.000000e+00> : vector<16x8xf32>
    %35 = tpu.matmul %34, %32, %cst_41 {dimension_numbers = #tpu.dot_dimension_numbers<[1], [0], [0], [1], [0, 0, 1, 1], [], []>} : vector<16x32xbf16>, vector<32x8xbf16>, vector<16x8xf32> -> vector<16x8xf32>
    %36 = arith.addf %30, %35 : vector<16x8xf32>
    %c0_42 = arith.constant 0 : index
    %c0_43 = arith.constant 0 : index
    %c0_44 = arith.constant 0 : index
    %c6 = arith.constant 6 : index
    %37 = vector.load %arg2[%c0_42, %c0_43, %c0_44, %c6] : memref<1x1x32x22xbf16, #tpu.memory_space<vmem>>, vector<1x1x32x8xbf16>
    %38 = vector.shape_cast %37 : vector<1x1x32x8xbf16> to vector<32x8xbf16>
    %c6_45 = arith.constant 6 : index
    %c0_46 = arith.constant 0 : index
    %c0_47 = arith.constant 0 : index
    %39 = vector.load %arg3[%c6_45, %c0_46, %c0_47] : memref<15x16x32xbf16, #tpu.memory_space<vmem>>, vector<1x16x32xbf16>
    %40 = vector.shape_cast %39 : vector<1x16x32xbf16> to vector<16x32xbf16>
    %cst_48 = arith.constant dense<0.000000e+00> : vector<16x8xf32>
    %41 = tpu.matmul %40, %38, %cst_48 {dimension_numbers = #tpu.dot_dimension_numbers<[1], [0], [0], [1], [0, 0, 1, 1], [], []>} : vector<16x32xbf16>, vector<32x8xbf16>, vector<16x8xf32> -> vector<16x8xf32>
    %42 = arith.addf %36, %41 : vector<16x8xf32>
    %c0_49 = arith.constant 0 : index
    %c0_50 = arith.constant 0 : index
    %c0_51 = arith.constant 0 : index
    %c7 = arith.constant 7 : index
    %43 = vector.load %arg2[%c0_49, %c0_50, %c0_51, %c7] : memref<1x1x32x22xbf16, #tpu.memory_space<vmem>>, vector<1x1x32x8xbf16>
    %44 = vector.shape_cast %43 : vector<1x1x32x8xbf16> to vector<32x8xbf16>
    %c7_52 = arith.constant 7 : index
    %c0_53 = arith.constant 0 : index
    %c0_54 = arith.constant 0 : index
    %45 = vector.load %arg3[%c7_52, %c0_53, %c0_54] : memref<15x16x32xbf16, #tpu.memory_space<vmem>>, vector<1x16x32xbf16>
    %46 = vector.shape_cast %45 : vector<1x16x32xbf16> to vector<16x32xbf16>
    %cst_55 = arith.constant dense<0.000000e+00> : vector<16x8xf32>
    %47 = tpu.matmul %46, %44, %cst_55 {dimension_numbers = #tpu.dot_dimension_numbers<[1], [0], [0], [1], [0, 0, 1, 1], [], []>} : vector<16x32xbf16>, vector<32x8xbf16>, vector<16x8xf32> -> vector<16x8xf32>
    %48 = arith.addf %42, %47 : vector<16x8xf32>
    %c0_56 = arith.constant 0 : index
    %c0_57 = arith.constant 0 : index
    %c0_58 = arith.constant 0 : index
    %c8 = arith.constant 8 : index
    %49 = vector.load %arg2[%c0_56, %c0_57, %c0_58, %c8] : memref<1x1x32x22xbf16, #tpu.memory_space<vmem>>, vector<1x1x32x8xbf16>
    %50 = vector.shape_cast %49 : vector<1x1x32x8xbf16> to vector<32x8xbf16>
    %c8_59 = arith.constant 8 : index
    %c0_60 = arith.constant 0 : index
    %c0_61 = arith.constant 0 : index
    %51 = vector.load %arg3[%c8_59, %c0_60, %c0_61] : memref<15x16x32xbf16, #tpu.memory_space<vmem>>, vector<1x16x32xbf16>
    %52 = vector.shape_cast %51 : vector<1x16x32xbf16> to vector<16x32xbf16>
    %cst_62 = arith.constant dense<0.000000e+00> : vector<16x8xf32>
    %53 = tpu.matmul %52, %50, %cst_62 {dimension_numbers = #tpu.dot_dimension_numbers<[1], [0], [0], [1], [0, 0, 1, 1], [], []>} : vector<16x32xbf16>, vector<32x8xbf16>, vector<16x8xf32> -> vector<16x8xf32>
    %54 = arith.addf %48, %53 : vector<16x8xf32>
    %c0_63 = arith.constant 0 : index
    %c0_64 = arith.constant 0 : index
    %c0_65 = arith.constant 0 : index
    %c9 = arith.constant 9 : index
    %55 = vector.load %arg2[%c0_63, %c0_64, %c0_65, %c9] : memref<1x1x32x22xbf16, #tpu.memory_space<vmem>>, vector<1x1x32x8xbf16>
    %56 = vector.shape_cast %55 : vector<1x1x32x8xbf16> to vector<32x8xbf16>
    %c9_66 = arith.constant 9 : index
    %c0_67 = arith.constant 0 : index
    %c0_68 = arith.constant 0 : index
    %57 = vector.load %arg3[%c9_66, %c0_67, %c0_68] : memref<15x16x32xbf16, #tpu.memory_space<vmem>>, vector<1x16x32xbf16>
    %58 = vector.shape_cast %57 : vector<1x16x32xbf16> to vector<16x32xbf16>
    %cst_69 = arith.constant dense<0.000000e+00> : vector<16x8xf32>
    %59 = tpu.matmul %58, %56, %cst_69 {dimension_numbers = #tpu.dot_dimension_numbers<[1], [0], [0], [1], [0, 0, 1, 1], [], []>} : vector<16x32xbf16>, vector<32x8xbf16>, vector<16x8xf32> -> vector<16x8xf32>
    %60 = arith.addf %54, %59 : vector<16x8xf32>
    %c0_70 = arith.constant 0 : index
    %c0_71 = arith.constant 0 : index
    %c0_72 = arith.constant 0 : index
    %c10 = arith.constant 10 : index
    %61 = vector.load %arg2[%c0_70, %c0_71, %c0_72, %c10] : memref<1x1x32x22xbf16, #tpu.memory_space<vmem>>, vector<1x1x32x8xbf16>
    %62 = vector.shape_cast %61 : vector<1x1x32x8xbf16> to vector<32x8xbf16>
    %c10_73 = arith.constant 10 : index
    %c0_74 = arith.constant 0 : index
    %c0_75 = arith.constant 0 : index
    %63 = vector.load %arg3[%c10_73, %c0_74, %c0_75] : memref<15x16x32xbf16, #tpu.memory_space<vmem>>, vector<1x16x32xbf16>
    %64 = vector.shape_cast %63 : vector<1x16x32xbf16> to vector<16x32xbf16>
    %cst_76 = arith.constant dense<0.000000e+00> : vector<16x8xf32>
    %65 = tpu.matmul %64, %62, %cst_76 {dimension_numbers = #tpu.dot_dimension_numbers<[1], [0], [0], [1], [0, 0, 1, 1], [], []>} : vector<16x32xbf16>, vector<32x8xbf16>, vector<16x8xf32> -> vector<16x8xf32>
    %66 = arith.addf %60, %65 : vector<16x8xf32>
    %c0_77 = arith.constant 0 : index
    %c0_78 = arith.constant 0 : index
    %c0_79 = arith.constant 0 : index
    %c11 = arith.constant 11 : index
    %67 = vector.load %arg2[%c0_77, %c0_78, %c0_79, %c11] : memref<1x1x32x22xbf16, #tpu.memory_space<vmem>>, vector<1x1x32x8xbf16>
    %68 = vector.shape_cast %67 : vector<1x1x32x8xbf16> to vector<32x8xbf16>
    %c11_80 = arith.constant 11 : index
    %c0_81 = arith.constant 0 : index
    %c0_82 = arith.constant 0 : index
    %69 = vector.load %arg3[%c11_80, %c0_81, %c0_82] : memref<15x16x32xbf16, #tpu.memory_space<vmem>>, vector<1x16x32xbf16>
    %70 = vector.shape_cast %69 : vector<1x16x32xbf16> to vector<16x32xbf16>
    %cst_83 = arith.constant dense<0.000000e+00> : vector<16x8xf32>
    %71 = tpu.matmul %70, %68, %cst_83 {dimension_numbers = #tpu.dot_dimension_numbers<[1], [0], [0], [1], [0, 0, 1, 1], [], []>} : vector<16x32xbf16>, vector<32x8xbf16>, vector<16x8xf32> -> vector<16x8xf32>
    %72 = arith.addf %66, %71 : vector<16x8xf32>
    %c0_84 = arith.constant 0 : index
    %c0_85 = arith.constant 0 : index
    %c0_86 = arith.constant 0 : index
    %c12 = arith.constant 12 : index
    %73 = vector.load %arg2[%c0_84, %c0_85, %c0_86, %c12] : memref<1x1x32x22xbf16, #tpu.memory_space<vmem>>, vector<1x1x32x8xbf16>
    %74 = vector.shape_cast %73 : vector<1x1x32x8xbf16> to vector<32x8xbf16>
    %c12_87 = arith.constant 12 : index
    %c0_88 = arith.constant 0 : index
    %c0_89 = arith.constant 0 : index
    %75 = vector.load %arg3[%c12_87, %c0_88, %c0_89] : memref<15x16x32xbf16, #tpu.memory_space<vmem>>, vector<1x16x32xbf16>
    %76 = vector.shape_cast %75 : vector<1x16x32xbf16> to vector<16x32xbf16>
    %cst_90 = arith.constant dense<0.000000e+00> : vector<16x8xf32>
    %77 = tpu.matmul %76, %74, %cst_90 {dimension_numbers = #tpu.dot_dimension_numbers<[1], [0], [0], [1], [0, 0, 1, 1], [], []>} : vector<16x32xbf16>, vector<32x8xbf16>, vector<16x8xf32> -> vector<16x8xf32>
    %78 = arith.addf %72, %77 : vector<16x8xf32>
    %c0_91 = arith.constant 0 : index
    %c0_92 = arith.constant 0 : index
    %c0_93 = arith.constant 0 : index
    %c13 = arith.constant 13 : index
    %79 = vector.load %arg2[%c0_91, %c0_92, %c0_93, %c13] : memref<1x1x32x22xbf16, #tpu.memory_space<vmem>>, vector<1x1x32x8xbf16>
    %80 = vector.shape_cast %79 : vector<1x1x32x8xbf16> to vector<32x8xbf16>
    %c13_94 = arith.constant 13 : index
    %c0_95 = arith.constant 0 : index
    %c0_96 = arith.constant 0 : index
    %81 = vector.load %arg3[%c13_94, %c0_95, %c0_96] : memref<15x16x32xbf16, #tpu.memory_space<vmem>>, vector<1x16x32xbf16>
    %82 = vector.shape_cast %81 : vector<1x16x32xbf16> to vector<16x32xbf16>
    %cst_97 = arith.constant dense<0.000000e+00> : vector<16x8xf32>
    %83 = tpu.matmul %82, %80, %cst_97 {dimension_numbers = #tpu.dot_dimension_numbers<[1], [0], [0], [1], [0, 0, 1, 1], [], []>} : vector<16x32xbf16>, vector<32x8xbf16>, vector<16x8xf32> -> vector<16x8xf32>
    %84 = arith.addf %78, %83 : vector<16x8xf32>
    %c0_98 = arith.constant 0 : index
    %c0_99 = arith.constant 0 : index
    %c0_100 = arith.constant 0 : index
    %c14 = arith.constant 14 : index
    %85 = vector.load %arg2[%c0_98, %c0_99, %c0_100, %c14] : memref<1x1x32x22xbf16, #tpu.memory_space<vmem>>, vector<1x1x32x8xbf16>
    %86 = vector.shape_cast %85 : vector<1x1x32x8xbf16> to vector<32x8xbf16>
    %c14_101 = arith.constant 14 : index
    %c0_102 = arith.constant 0 : index
    %c0_103 = arith.constant 0 : index
    %87 = vector.load %arg3[%c14_101, %c0_102, %c0_103] : memref<15x16x32xbf16, #tpu.memory_space<vmem>>, vector<1x16x32xbf16>
    %88 = vector.shape_cast %87 : vector<1x16x32xbf16> to vector<16x32xbf16>
    %cst_104 = arith.constant dense<0.000000e+00> : vector<16x8xf32>
    %89 = tpu.matmul %88, %86, %cst_104 {dimension_numbers = #tpu.dot_dimension_numbers<[1], [0], [0], [1], [0, 0, 1, 1], [], []>} : vector<16x32xbf16>, vector<32x8xbf16>, vector<16x8xf32> -> vector<16x8xf32>
    %90 = arith.addf %84, %89 : vector<16x8xf32>
    %c0_105 = arith.constant 0 : index
    %c0_106 = arith.constant 0 : index
    %91 = vector.load %arg4[%c0_105, %c0_106] : memref<16x1xf32, #tpu.memory_space<vmem>>, vector<16x1xf32>
    %92 = vector.broadcast %91 : vector<16x1xf32> to vector<16x8xf32>
    %93 = arith.mulf %90, %92 : vector<16x8xf32>
    %c0_107 = arith.constant 0 : index
    %c0_108 = arith.constant 0 : index
    %94 = vector.load %arg5[%c0_107, %c0_108] : memref<16x1xf32, #tpu.memory_space<vmem>>, vector<16x1xf32>
    %95 = vector.broadcast %94 : vector<16x1xf32> to vector<16x8xf32>
    %96 = arith.addf %93, %95 : vector<16x8xf32>
    %cst_109 = arith.constant 0.000000e+00 : f32
    %97 = vector.broadcast %cst_109 : f32 to vector<16x8xf32>
    %98 = arith.maximumf %96, %97 : vector<16x8xf32>
    %c0_110 = arith.constant 0 : index
    %c0_111 = arith.constant 0 : index
    %c0_112 = arith.constant 0 : index
    %99 = vector.load %arg6[%c0_110, %c0_111, %c0_112] : memref<1x16x8xbf16, #tpu.memory_space<vmem>>, vector<1x16x8xbf16>
    %100 = vector.shape_cast %99 : vector<1x16x8xbf16> to vector<16x8xbf16>
    %101 = arith.extf %100 : vector<16x8xbf16> to vector<16x8xf32>
    %102 = arith.addf %98, %101 : vector<16x8xf32>
    %103 = arith.truncf %102 : vector<16x8xf32> to vector<16x8xbf16>
    %c0_113 = arith.constant 0 : index
    %c0_114 = arith.constant 0 : index
    %c0_115 = arith.constant 0 : index
    %104 = vector.load %arg7[%c0_113, %c0_114, %c0_115] : memref<1x16x8xbf16, #tpu.memory_space<vmem>>, vector<1x16x8xbf16>
    %105 = vector.shape_cast %104 : vector<1x16x8xbf16> to vector<16x8xbf16>
    %106 = vector.shape_cast %103 : vector<16x8xbf16> to vector<1x16x8xbf16>
    tpu.vector_store %arg7[%c0_113, %c0_114, %c0_115], %106 {strides = array<i32>} : memref<1x16x8xbf16, #tpu.memory_space<vmem>>, vector<1x16x8xbf16>,
    return
  }
  func.func @transform_0(%arg0: i32, %arg1: i32) -> (i32, i32, i32, i32) {
    %c0_i32 = arith.constant 0 : i32
    %c0_i32_0 = arith.constant 0 : i32
    %c0_i32_1 = arith.constant 0 : i32
    %c0_i32_2 = arith.constant 0 : i32
    return %arg0, %c0_i32, %c0_i32_0, %c0_i32_1 : i32, i32, i32, i32
  }
  func.func @transform_1(%arg0: i32, %arg1: i32) -> (i32, i32, i32) {
    %c0_i32 = arith.constant 0 : i32
    %c0_i32_0 = arith.constant 0 : i32
    %c0_i32_1 = arith.constant 0 : i32
    %c0_i32_2 = arith.constant 0 : i32
    return %c0_i32, %c0_i32_0, %c0_i32_1 : i32, i32, i32
  }
  func.func @transform_2(%arg0: i32, %arg1: i32) -> (i32, i32) {
    %c0_i32 = arith.constant 0 : i32
    %c0_i32_0 = arith.constant 0 : i32
    %c0_i32_1 = arith.constant 0 : i32
    return %c0_i32, %c0_i32_0 : i32, i32
  }
  func.func @transform_3(%arg0: i32, %arg1: i32) -> (i32, i32) {
    %c0_i32 = arith.constant 0 : i32
    %c0_i32_0 = arith.constant 0 : i32
    %c0_i32_1 = arith.constant 0 : i32
    return %c0_i32, %c0_i32_0 : i32, i32
  }
  func.func @transform_4(%arg0: i32, %arg1: i32) -> (i32, i32, i32) {
    %c0_i32 = arith.constant 0 : i32
    %c0_i32_0 = arith.constant 0 : i32
    return %arg0, %c0_i32, %arg1 : i32, i32, i32
  }
  func.func @transform_5(%arg0: i32, %arg1: i32) -> (i32, i32, i32) {
    %c0_i32 = arith.constant 0 : i32
    %c0_i32_0 = arith.constant 0 : i32
    return %arg0, %c0_i32, %arg1 : i32, i32, i32
  }
}

module attributes {stable_mosaic.version = 11 : i64} {
  func.func @_mm_bias_kernel(%arg0: i32, %arg1: memref<16x16xbf16, #tpu.memory_space<vmem>>, %arg2: memref<16x96xbf16, #tpu.memory_space<vmem>>, %arg3: memref<1x96xf32, #tpu.memory_space<vmem>>, %arg4: memref<16x96xbf16, #tpu.memory_space<vmem>>) attributes {dimension_semantics = [#tpu.dimension_semantics<parallel>], iteration_bounds = array<i64: 1>, scalar_prefetch = 0 : i64, scratch_operands = 0 : i64, tpu.core_type = #tpu.core_type<tc>, window_params = [{transform_indices = @transform_0, window_bounds = array<i64: 16, 16>}, {pipeline_mode = #tpu.pipeline_mode<synchronous>, transform_indices = @transform_1, window_bounds = array<i64: 16, 96>}, {pipeline_mode = #tpu.pipeline_mode<synchronous>, transform_indices = @transform_2, window_bounds = array<i64: 1, 96>}, {transform_indices = @transform_3, window_bounds = array<i64: 16, 96>}]} {
    %c0 = arith.constant 0 : index
    %c0_0 = arith.constant 0 : index
    %0 = vector.load %arg1[%c0, %c0_0] : memref<16x16xbf16, #tpu.memory_space<vmem>>, vector<16x16xbf16>
    %c0_1 = arith.constant 0 : index
    %c0_2 = arith.constant 0 : index
    %1 = vector.load %arg2[%c0_1, %c0_2] : memref<16x96xbf16, #tpu.memory_space<vmem>>, vector<16x96xbf16>
    %cst = arith.constant dense<0.000000e+00> : vector<16x96xf32>
    %2 = tpu.matmul %0, %1, %cst {dimension_numbers = #tpu.dot_dimension_numbers<[1], [0], [0], [1], [0, 0, 1, 1], [], []>} : vector<16x16xbf16>, vector<16x96xbf16>, vector<16x96xf32> -> vector<16x96xf32>
    %c0_3 = arith.constant 0 : index
    %c0_4 = arith.constant 0 : index
    %3 = vector.load %arg3[%c0_3, %c0_4] : memref<1x96xf32, #tpu.memory_space<vmem>>, vector<1x96xf32>
    %4 = vector.broadcast %3 : vector<1x96xf32> to vector<16x96xf32>
    %5 = arith.addf %2, %4 : vector<16x96xf32>
    %6 = arith.truncf %5 : vector<16x96xf32> to vector<16x96xbf16>
    %c0_5 = arith.constant 0 : index
    %c0_6 = arith.constant 0 : index
    %7 = vector.load %arg4[%c0_5, %c0_6] : memref<16x96xbf16, #tpu.memory_space<vmem>>, vector<16x96xbf16>
    tpu.vector_store %arg4[%c0_5, %c0_6], %6 {strides = array<i32>} : memref<16x96xbf16, #tpu.memory_space<vmem>>, vector<16x96xbf16>,
    return
  }
  func.func @transform_0(%arg0: i32) -> (i32, i32) {
    %c0_i32 = arith.constant 0 : i32
    %c0_i32_0 = arith.constant 0 : i32
    return %arg0, %c0_i32 : i32, i32
  }
  func.func @transform_1(%arg0: i32) -> (i32, i32) {
    %c0_i32 = arith.constant 0 : i32
    %c0_i32_0 = arith.constant 0 : i32
    %c0_i32_1 = arith.constant 0 : i32
    return %c0_i32, %c0_i32_0 : i32, i32
  }
  func.func @transform_2(%arg0: i32) -> (i32, i32) {
    %c0_i32 = arith.constant 0 : i32
    %c0_i32_0 = arith.constant 0 : i32
    %c0_i32_1 = arith.constant 0 : i32
    return %c0_i32, %c0_i32_0 : i32, i32
  }
  func.func @transform_3(%arg0: i32) -> (i32, i32) {
    %c0_i32 = arith.constant 0 : i32
    %c0_i32_0 = arith.constant 0 : i32
    return %arg0, %c0_i32 : i32, i32
  }
}

module attributes {stable_mosaic.version = 11 : i64} {
  func.func @_bigru_kernel(%arg0: memref<8x2x96xbf16, #tpu.memory_space<vmem>>, %arg1: memref<32x96xbf16, #tpu.memory_space<vmem>>, %arg2: memref<1x32xf32, #tpu.memory_space<vmem>>, %arg3: memref<8x2x16xf32, #tpu.memory_space<vmem>>, %arg4: memref<8x2x16xf32, #tpu.memory_space<vmem>>, %arg5: memref<2x32xf32, #tpu.memory_space<vmem>>) attributes {dimension_semantics = [], scalar_prefetch = 0 : i64, scratch_operands = 1 : i64, tpu.core_type = #tpu.core_type<tc>} {
    %cst = arith.constant 0.000000e+00 : f32
    %0 = vector.broadcast %cst : f32 to vector<2x32xf32>
    %c0 = arith.constant 0 : index
    %c0_0 = arith.constant 0 : index
    %1 = vector.load %arg5[%c0, %c0_0] : memref<2x32xf32, #tpu.memory_space<vmem>>, vector<2x32xf32>
    tpu.vector_store %arg5[%c0, %c0_0], %0 {strides = array<i32>} : memref<2x32xf32, #tpu.memory_space<vmem>>, vector<2x32xf32>,
    %c0_i32 = arith.constant 0 : i32
    %c8_i32 = arith.constant 8 : i32
    %2 = arith.addi %c0_i32, %c8_i32 : i32
    %c1_i32 = arith.constant 1 : i32
    scf.for %arg6 = %c0_i32 to %2 step %c1_i32  : i32 {
      %c1_i32_2 = arith.constant 1 : i32
      %3 = arith.muli %arg6, %c1_i32_2 : i32
      %c0_i32_3 = arith.constant 0 : i32
      %4 = arith.addi %c0_i32_3, %3 : i32
      %c0_4 = arith.constant 0 : index
      %c0_5 = arith.constant 0 : index
      %5 = vector.load %arg5[%c0_4, %c0_5] : memref<2x32xf32, #tpu.memory_space<vmem>>, vector<2x32xf32>
      %6 = arith.truncf %5 : vector<2x32xf32> to vector<2x32xbf16>
      %c0_6 = arith.constant 0 : index
      %c0_7 = arith.constant 0 : index
      %7 = vector.load %arg1[%c0_6, %c0_7] : memref<32x96xbf16, #tpu.memory_space<vmem>>, vector<32x96xbf16>
      %cst_8 = arith.constant dense<0.000000e+00> : vector<2x96xf32>
      %8 = tpu.matmul %6, %7, %cst_8 {dimension_numbers = #tpu.dot_dimension_numbers<[1], [0], [0], [1], [0, 0, 1, 1], [], []>} : vector<2x32xbf16>, vector<32x96xbf16>, vector<2x96xf32> -> vector<2x96xf32>
      %9 = arith.index_cast %4 : i32 to index
      %c0_9 = arith.constant 0 : index
      %c0_10 = arith.constant 0 : index
      %10 = vector.load %arg0[%9, %c0_9, %c0_10] : memref<8x2x96xbf16, #tpu.memory_space<vmem>>, vector<1x2x96xbf16>
      %11 = vector.shape_cast %10 : vector<1x2x96xbf16> to vector<2x96xbf16>
      %12 = arith.extf %11 : vector<2x96xbf16> to vector<2x96xf32>
      %c7_i32 = arith.constant 7 : i32
      %13 = arith.subi %c7_i32, %4 : i32
      %14 = arith.index_cast %13 : i32 to index
      %c0_11 = arith.constant 0 : index
      %c0_12 = arith.constant 0 : index
      %15 = vector.load %arg0[%14, %c0_11, %c0_12] : memref<8x2x96xbf16, #tpu.memory_space<vmem>>, vector<1x2x96xbf16>
      %16 = vector.shape_cast %15 : vector<1x2x96xbf16> to vector<2x96xbf16>
      %17 = arith.extf %16 : vector<2x96xbf16> to vector<2x96xf32>
      %18 = vector.extract_strided_slice %12 {offsets = [0, 0], sizes = [2, 48], strides = [1, 1]} : vector<2x96xf32> to vector<2x48xf32>
      %19 = vector.extract_strided_slice %8 {offsets = [0, 0], sizes = [2, 48], strides = [1, 1]} : vector<2x96xf32> to vector<2x48xf32>
      %c0_13 = arith.constant 0 : index
      %c0_14 = arith.constant 0 : index
      %20 = vector.load %arg2[%c0_13, %c0_14] : memref<1x32xf32, #tpu.memory_space<vmem>>, vector<1x16xf32>
      %21 = vector.extract_strided_slice %5 {offsets = [0, 0], sizes = [2, 16], strides = [1, 1]} : vector<2x32xf32> to vector<2x16xf32>
      %22 = vector.extract_strided_slice %18 {offsets = [0, 0], sizes = [2, 16], strides = [1, 1]} : vector<2x48xf32> to vector<2x16xf32>
      %23 = vector.extract_strided_slice %19 {offsets = [0, 0], sizes = [2, 16], strides = [1, 1]} : vector<2x48xf32> to vector<2x16xf32>
      %24 = arith.addf %22, %23 : vector<2x16xf32>
      %25 = arith.negf %24 : vector<2x16xf32>
      %26 = math.exp %25 : vector<2x16xf32>
      %cst_15 = arith.constant 1.000000e+00 : f32
      %27 = vector.broadcast %cst_15 : f32 to vector<2x16xf32>
      %28 = arith.addf %27, %26 : vector<2x16xf32>
      %29 = arith.divf %27, %28 : vector<2x16xf32>
      %30 = vector.extract_strided_slice %18 {offsets = [0, 16], sizes = [2, 16], strides = [1, 1]} : vector<2x48xf32> to vector<2x16xf32>
      %31 = vector.extract_strided_slice %19 {offsets = [0, 16], sizes = [2, 16], strides = [1, 1]} : vector<2x48xf32> to vector<2x16xf32>
      %32 = arith.addf %30, %31 : vector<2x16xf32>
      %33 = arith.negf %32 : vector<2x16xf32>
      %34 = math.exp %33 : vector<2x16xf32>
      %cst_16 = arith.constant 1.000000e+00 : f32
      %35 = vector.broadcast %cst_16 : f32 to vector<2x16xf32>
      %36 = arith.addf %35, %34 : vector<2x16xf32>
      %37 = arith.divf %35, %36 : vector<2x16xf32>
      %38 = vector.extract_strided_slice %18 {offsets = [0, 32], sizes = [2, 16], strides = [1, 1]} : vector<2x48xf32> to vector<2x16xf32>
      %39 = vector.extract_strided_slice %19 {offsets = [0, 32], sizes = [2, 16], strides = [1, 1]} : vector<2x48xf32> to vector<2x16xf32>
      %40 = vector.broadcast %20 : vector<1x16xf32> to vector<2x16xf32>
      %41 = arith.addf %39, %40 : vector<2x16xf32>
      %42 = arith.mulf %29, %41 : vector<2x16xf32>
      %43 = arith.addf %38, %42 : vector<2x16xf32>
      %44 = math.tanh %43 : vector<2x16xf32>
      %cst_17 = arith.constant 1.000000e+00 : f32
      %45 = vector.broadcast %cst_17 : f32 to vector<2x16xf32>
      %46 = arith.subf %45, %37 : vector<2x16xf32>
      %47 = arith.mulf %46, %44 : vector<2x16xf32>
      %48 = arith.mulf %37, %21 : vector<2x16xf32>
      %49 = arith.addf %47, %48 : vector<2x16xf32>
      %50 = vector.extract_strided_slice %17 {offsets = [0, 48], sizes = [2, 48], strides = [1, 1]} : vector<2x96xf32> to vector<2x48xf32>
      %51 = vector.extract_strided_slice %8 {offsets = [0, 48], sizes = [2, 48], strides = [1, 1]} : vector<2x96xf32> to vector<2x48xf32>
      %c0_18 = arith.constant 0 : index
      %c16 = arith.constant 16 : index
      %52 = vector.load %arg2[%c0_18, %c16] : memref<1x32xf32, #tpu.memory_space<vmem>>, vector<1x16xf32>
      %53 = vector.extract_strided_slice %5 {offsets = [0, 16], sizes = [2, 16], strides = [1, 1]} : vector<2x32xf32> to vector<2x16xf32>
      %54 = vector.extract_strided_slice %50 {offsets = [0, 0], sizes = [2, 16], strides = [1, 1]} : vector<2x48xf32> to vector<2x16xf32>
      %55 = vector.extract_strided_slice %51 {offsets = [0, 0], sizes = [2, 16], strides = [1, 1]} : vector<2x48xf32> to vector<2x16xf32>
      %56 = arith.addf %54, %55 : vector<2x16xf32>
      %57 = arith.negf %56 : vector<2x16xf32>
      %58 = math.exp %57 : vector<2x16xf32>
      %cst_19 = arith.constant 1.000000e+00 : f32
      %59 = vector.broadcast %cst_19 : f32 to vector<2x16xf32>
      %60 = arith.addf %59, %58 : vector<2x16xf32>
      %61 = arith.divf %59, %60 : vector<2x16xf32>
      %62 = vector.extract_strided_slice %50 {offsets = [0, 16], sizes = [2, 16], strides = [1, 1]} : vector<2x48xf32> to vector<2x16xf32>
      %63 = vector.extract_strided_slice %51 {offsets = [0, 16], sizes = [2, 16], strides = [1, 1]} : vector<2x48xf32> to vector<2x16xf32>
      %64 = arith.addf %62, %63 : vector<2x16xf32>
      %65 = arith.negf %64 : vector<2x16xf32>
      %66 = math.exp %65 : vector<2x16xf32>
      %cst_20 = arith.constant 1.000000e+00 : f32
      %67 = vector.broadcast %cst_20 : f32 to vector<2x16xf32>
      %68 = arith.addf %67, %66 : vector<2x16xf32>
      %69 = arith.divf %67, %68 : vector<2x16xf32>
      %70 = vector.extract_strided_slice %50 {offsets = [0, 32], sizes = [2, 16], strides = [1, 1]} : vector<2x48xf32> to vector<2x16xf32>
      %71 = vector.extract_strided_slice %51 {offsets = [0, 32], sizes = [2, 16], strides = [1, 1]} : vector<2x48xf32> to vector<2x16xf32>
      %72 = vector.broadcast %52 : vector<1x16xf32> to vector<2x16xf32>
      %73 = arith.addf %71, %72 : vector<2x16xf32>
      %74 = arith.mulf %61, %73 : vector<2x16xf32>
      %75 = arith.addf %70, %74 : vector<2x16xf32>
      %76 = math.tanh %75 : vector<2x16xf32>
      %cst_21 = arith.constant 1.000000e+00 : f32
      %77 = vector.broadcast %cst_21 : f32 to vector<2x16xf32>
      %78 = arith.subf %77, %69 : vector<2x16xf32>
      %79 = arith.mulf %78, %76 : vector<2x16xf32>
      %80 = arith.mulf %69, %53 : vector<2x16xf32>
      %81 = arith.addf %79, %80 : vector<2x16xf32>
      %82 = arith.index_cast %4 : i32 to index
      %c0_22 = arith.constant 0 : index
      %c0_23 = arith.constant 0 : index
      %83 = vector.load %arg3[%82, %c0_22, %c0_23] : memref<8x2x16xf32, #tpu.memory_space<vmem>>, vector<1x2x16xf32>
      %84 = vector.shape_cast %83 : vector<1x2x16xf32> to vector<2x16xf32>
      %85 = vector.shape_cast %49 : vector<2x16xf32> to vector<1x2x16xf32>
      tpu.vector_store %arg3[%82, %c0_22, %c0_23], %85 {strides = array<i32>} : memref<8x2x16xf32, #tpu.memory_space<vmem>>, vector<1x2x16xf32>,
      %c7_i32_24 = arith.constant 7 : i32
      %86 = arith.subi %c7_i32_24, %4 : i32
      %87 = arith.index_cast %86 : i32 to index
      %c0_25 = arith.constant 0 : index
      %c0_26 = arith.constant 0 : index
      %88 = vector.load %arg4[%87, %c0_25, %c0_26] : memref<8x2x16xf32, #tpu.memory_space<vmem>>, vector<1x2x16xf32>
      %89 = vector.shape_cast %88 : vector<1x2x16xf32> to vector<2x16xf32>
      %90 = vector.shape_cast %81 : vector<2x16xf32> to vector<1x2x16xf32>
      tpu.vector_store %arg4[%87, %c0_25, %c0_26], %90 {strides = array<i32>} : memref<8x2x16xf32, #tpu.memory_space<vmem>>, vector<1x2x16xf32>,
      %91 = tpu.concatenate %49, %81 in 1 : vector<2x16xf32>, vector<2x16xf32> -> vector<2x32xf32>
      %c0_27 = arith.constant 0 : index
      %c0_28 = arith.constant 0 : index
      %92 = vector.load %arg5[%c0_27, %c0_28] : memref<2x32xf32, #tpu.memory_space<vmem>>, vector<2x32xf32>
      tpu.vector_store %arg5[%c0_27, %c0_28], %91 {strides = array<i32>} : memref<2x32xf32, #tpu.memory_space<vmem>>, vector<2x32xf32>,
    }
    %c8_i32_1 = arith.constant 8 : i32
    return
  }
}

module attributes {stable_mosaic.version = 11 : i64} {
  func.func @_mm_bias_kernel(%arg0: i32, %arg1: memref<16x32xbf16, #tpu.memory_space<vmem>>, %arg2: memref<32x16xbf16, #tpu.memory_space<vmem>>, %arg3: memref<1x16xf32, #tpu.memory_space<vmem>>, %arg4: memref<16x16xbf16, #tpu.memory_space<vmem>>) attributes {dimension_semantics = [#tpu.dimension_semantics<parallel>], iteration_bounds = array<i64: 1>, scalar_prefetch = 0 : i64, scratch_operands = 0 : i64, tpu.core_type = #tpu.core_type<tc>, window_params = [{transform_indices = @transform_0, window_bounds = array<i64: 16, 32>}, {pipeline_mode = #tpu.pipeline_mode<synchronous>, transform_indices = @transform_1, window_bounds = array<i64: 32, 16>}, {pipeline_mode = #tpu.pipeline_mode<synchronous>, transform_indices = @transform_2, window_bounds = array<i64: 1, 16>}, {transform_indices = @transform_3, window_bounds = array<i64: 16, 16>}]} {
    %c0 = arith.constant 0 : index
    %c0_0 = arith.constant 0 : index
    %0 = vector.load %arg1[%c0, %c0_0] : memref<16x32xbf16, #tpu.memory_space<vmem>>, vector<16x32xbf16>
    %c0_1 = arith.constant 0 : index
    %c0_2 = arith.constant 0 : index
    %1 = vector.load %arg2[%c0_1, %c0_2] : memref<32x16xbf16, #tpu.memory_space<vmem>>, vector<32x16xbf16>
    %cst = arith.constant dense<0.000000e+00> : vector<16x16xf32>
    %2 = tpu.matmul %0, %1, %cst {dimension_numbers = #tpu.dot_dimension_numbers<[1], [0], [0], [1], [0, 0, 1, 1], [], []>} : vector<16x32xbf16>, vector<32x16xbf16>, vector<16x16xf32> -> vector<16x16xf32>
    %c0_3 = arith.constant 0 : index
    %c0_4 = arith.constant 0 : index
    %3 = vector.load %arg3[%c0_3, %c0_4] : memref<1x16xf32, #tpu.memory_space<vmem>>, vector<1x16xf32>
    %4 = vector.broadcast %3 : vector<1x16xf32> to vector<16x16xf32>
    %5 = arith.addf %2, %4 : vector<16x16xf32>
    %6 = arith.truncf %5 : vector<16x16xf32> to vector<16x16xbf16>
    %c0_5 = arith.constant 0 : index
    %c0_6 = arith.constant 0 : index
    %7 = vector.load %arg4[%c0_5, %c0_6] : memref<16x16xbf16, #tpu.memory_space<vmem>>, vector<16x16xbf16>
    tpu.vector_store %arg4[%c0_5, %c0_6], %6 {strides = array<i32>} : memref<16x16xbf16, #tpu.memory_space<vmem>>, vector<16x16xbf16>,
    return
  }
  func.func @transform_0(%arg0: i32) -> (i32, i32) {
    %c0_i32 = arith.constant 0 : i32
    %c0_i32_0 = arith.constant 0 : i32
    return %arg0, %c0_i32 : i32, i32
  }
  func.func @transform_1(%arg0: i32) -> (i32, i32) {
    %c0_i32 = arith.constant 0 : i32
    %c0_i32_0 = arith.constant 0 : i32
    %c0_i32_1 = arith.constant 0 : i32
    return %c0_i32, %c0_i32_0 : i32, i32
  }
  func.func @transform_2(%arg0: i32) -> (i32, i32) {
    %c0_i32 = arith.constant 0 : i32
    %c0_i32_0 = arith.constant 0 : i32
    %c0_i32_1 = arith.constant 0 : i32
    return %c0_i32, %c0_i32_0 : i32, i32
  }
  func.func @transform_3(%arg0: i32) -> (i32, i32) {
    %c0_i32 = arith.constant 0 : i32
    %c0_i32_0 = arith.constant 0 : i32
    return %arg0, %c0_i32 : i32, i32
  }
}

module attributes {stable_mosaic.version = 11 : i64} {
  func.func @_conv_kernel(%arg0: i32, %arg1: i32, %arg2: memref<1x1x16x30xbf16, #tpu.memory_space<vmem>>, %arg3: memref<15x8x16xbf16, #tpu.memory_space<vmem>>, %arg4: memref<8x1xf32, #tpu.memory_space<vmem>>, %arg5: memref<8x1xf32, #tpu.memory_space<vmem>>, %arg6: memref<1x8x16xbf16, #tpu.memory_space<vmem>>, %arg7: memref<1x8x16xbf16, #tpu.memory_space<vmem>>) attributes {dimension_semantics = [#tpu.dimension_semantics<parallel>, #tpu.dimension_semantics<arbitrary>], iteration_bounds = array<i64: 2, 1>, scalar_prefetch = 0 : i64, scratch_operands = 0 : i64, tpu.core_type = #tpu.core_type<tc>, window_params = [{transform_indices = @transform_0, window_bounds = array<i64: 1, 1, 16, 30>}, {pipeline_mode = #tpu.pipeline_mode<synchronous>, transform_indices = @transform_1, window_bounds = array<i64: 15, 8, 16>}, {pipeline_mode = #tpu.pipeline_mode<synchronous>, transform_indices = @transform_2, window_bounds = array<i64: 8, 1>}, {pipeline_mode = #tpu.pipeline_mode<synchronous>, transform_indices = @transform_3, window_bounds = array<i64: 8, 1>}, {transform_indices = @transform_4, window_bounds = array<i64: 1, 8, 16>}, {transform_indices = @transform_5, window_bounds = array<i64: 1, 8, 16>}]} {
    %cst = arith.constant 0.000000e+00 : f32
    %0 = vector.broadcast %cst : f32 to vector<8x16xf32>
    %c0 = arith.constant 0 : index
    %c0_0 = arith.constant 0 : index
    %c0_1 = arith.constant 0 : index
    %c0_2 = arith.constant 0 : index
    %1 = vector.load %arg2[%c0, %c0_0, %c0_1, %c0_2] : memref<1x1x16x30xbf16, #tpu.memory_space<vmem>>, vector<1x1x16x16xbf16>
    %2 = vector.shape_cast %1 : vector<1x1x16x16xbf16> to vector<16x16xbf16>
    %c0_3 = arith.constant 0 : index
    %c0_4 = arith.constant 0 : index
    %c0_5 = arith.constant 0 : index
    %3 = vector.load %arg3[%c0_3, %c0_4, %c0_5] : memref<15x8x16xbf16, #tpu.memory_space<vmem>>, vector<1x8x16xbf16>
    %4 = vector.shape_cast %3 : vector<1x8x16xbf16> to vector<8x16xbf16>
    %cst_6 = arith.constant dense<0.000000e+00> : vector<8x16xf32>
    %5 = tpu.matmul %4, %2, %cst_6 {dimension_numbers = #tpu.dot_dimension_numbers<[1], [0], [0], [1], [0, 0, 1, 1], [], []>} : vector<8x16xbf16>, vector<16x16xbf16>, vector<8x16xf32> -> vector<8x16xf32>
    %6 = arith.addf %0, %5 : vector<8x16xf32>
    %c0_7 = arith.constant 0 : index
    %c0_8 = arith.constant 0 : index
    %c0_9 = arith.constant 0 : index
    %c1 = arith.constant 1 : index
    %7 = vector.load %arg2[%c0_7, %c0_8, %c0_9, %c1] : memref<1x1x16x30xbf16, #tpu.memory_space<vmem>>, vector<1x1x16x16xbf16>
    %8 = vector.shape_cast %7 : vector<1x1x16x16xbf16> to vector<16x16xbf16>
    %c1_10 = arith.constant 1 : index
    %c0_11 = arith.constant 0 : index
    %c0_12 = arith.constant 0 : index
    %9 = vector.load %arg3[%c1_10, %c0_11, %c0_12] : memref<15x8x16xbf16, #tpu.memory_space<vmem>>, vector<1x8x16xbf16>
    %10 = vector.shape_cast %9 : vector<1x8x16xbf16> to vector<8x16xbf16>
    %cst_13 = arith.constant dense<0.000000e+00> : vector<8x16xf32>
    %11 = tpu.matmul %10, %8, %cst_13 {dimension_numbers = #tpu.dot_dimension_numbers<[1], [0], [0], [1], [0, 0, 1, 1], [], []>} : vector<8x16xbf16>, vector<16x16xbf16>, vector<8x16xf32> -> vector<8x16xf32>
    %12 = arith.addf %6, %11 : vector<8x16xf32>
    %c0_14 = arith.constant 0 : index
    %c0_15 = arith.constant 0 : index
    %c0_16 = arith.constant 0 : index
    %c2 = arith.constant 2 : index
    %13 = vector.load %arg2[%c0_14, %c0_15, %c0_16, %c2] : memref<1x1x16x30xbf16, #tpu.memory_space<vmem>>, vector<1x1x16x16xbf16>
    %14 = vector.shape_cast %13 : vector<1x1x16x16xbf16> to vector<16x16xbf16>
    %c2_17 = arith.constant 2 : index
    %c0_18 = arith.constant 0 : index
    %c0_19 = arith.constant 0 : index
    %15 = vector.load %arg3[%c2_17, %c0_18, %c0_19] : memref<15x8x16xbf16, #tpu.memory_space<vmem>>, vector<1x8x16xbf16>
    %16 = vector.shape_cast %15 : vector<1x8x16xbf16> to vector<8x16xbf16>
    %cst_20 = arith.constant dense<0.000000e+00> : vector<8x16xf32>
    %17 = tpu.matmul %16, %14, %cst_20 {dimension_numbers = #tpu.dot_dimension_numbers<[1], [0], [0], [1], [0, 0, 1, 1], [], []>} : vector<8x16xbf16>, vector<16x16xbf16>, vector<8x16xf32> -> vector<8x16xf32>
    %18 = arith.addf %12, %17 : vector<8x16xf32>
    %c0_21 = arith.constant 0 : index
    %c0_22 = arith.constant 0 : index
    %c0_23 = arith.constant 0 : index
    %c3 = arith.constant 3 : index
    %19 = vector.load %arg2[%c0_21, %c0_22, %c0_23, %c3] : memref<1x1x16x30xbf16, #tpu.memory_space<vmem>>, vector<1x1x16x16xbf16>
    %20 = vector.shape_cast %19 : vector<1x1x16x16xbf16> to vector<16x16xbf16>
    %c3_24 = arith.constant 3 : index
    %c0_25 = arith.constant 0 : index
    %c0_26 = arith.constant 0 : index
    %21 = vector.load %arg3[%c3_24, %c0_25, %c0_26] : memref<15x8x16xbf16, #tpu.memory_space<vmem>>, vector<1x8x16xbf16>
    %22 = vector.shape_cast %21 : vector<1x8x16xbf16> to vector<8x16xbf16>
    %cst_27 = arith.constant dense<0.000000e+00> : vector<8x16xf32>
    %23 = tpu.matmul %22, %20, %cst_27 {dimension_numbers = #tpu.dot_dimension_numbers<[1], [0], [0], [1], [0, 0, 1, 1], [], []>} : vector<8x16xbf16>, vector<16x16xbf16>, vector<8x16xf32> -> vector<8x16xf32>
    %24 = arith.addf %18, %23 : vector<8x16xf32>
    %c0_28 = arith.constant 0 : index
    %c0_29 = arith.constant 0 : index
    %c0_30 = arith.constant 0 : index
    %c4 = arith.constant 4 : index
    %25 = vector.load %arg2[%c0_28, %c0_29, %c0_30, %c4] : memref<1x1x16x30xbf16, #tpu.memory_space<vmem>>, vector<1x1x16x16xbf16>
    %26 = vector.shape_cast %25 : vector<1x1x16x16xbf16> to vector<16x16xbf16>
    %c4_31 = arith.constant 4 : index
    %c0_32 = arith.constant 0 : index
    %c0_33 = arith.constant 0 : index
    %27 = vector.load %arg3[%c4_31, %c0_32, %c0_33] : memref<15x8x16xbf16, #tpu.memory_space<vmem>>, vector<1x8x16xbf16>
    %28 = vector.shape_cast %27 : vector<1x8x16xbf16> to vector<8x16xbf16>
    %cst_34 = arith.constant dense<0.000000e+00> : vector<8x16xf32>
    %29 = tpu.matmul %28, %26, %cst_34 {dimension_numbers = #tpu.dot_dimension_numbers<[1], [0], [0], [1], [0, 0, 1, 1], [], []>} : vector<8x16xbf16>, vector<16x16xbf16>, vector<8x16xf32> -> vector<8x16xf32>
    %30 = arith.addf %24, %29 : vector<8x16xf32>
    %c0_35 = arith.constant 0 : index
    %c0_36 = arith.constant 0 : index
    %c0_37 = arith.constant 0 : index
    %c5 = arith.constant 5 : index
    %31 = vector.load %arg2[%c0_35, %c0_36, %c0_37, %c5] : memref<1x1x16x30xbf16, #tpu.memory_space<vmem>>, vector<1x1x16x16xbf16>
    %32 = vector.shape_cast %31 : vector<1x1x16x16xbf16> to vector<16x16xbf16>
    %c5_38 = arith.constant 5 : index
    %c0_39 = arith.constant 0 : index
    %c0_40 = arith.constant 0 : index
    %33 = vector.load %arg3[%c5_38, %c0_39, %c0_40] : memref<15x8x16xbf16, #tpu.memory_space<vmem>>, vector<1x8x16xbf16>
    %34 = vector.shape_cast %33 : vector<1x8x16xbf16> to vector<8x16xbf16>
    %cst_41 = arith.constant dense<0.000000e+00> : vector<8x16xf32>
    %35 = tpu.matmul %34, %32, %cst_41 {dimension_numbers = #tpu.dot_dimension_numbers<[1], [0], [0], [1], [0, 0, 1, 1], [], []>} : vector<8x16xbf16>, vector<16x16xbf16>, vector<8x16xf32> -> vector<8x16xf32>
    %36 = arith.addf %30, %35 : vector<8x16xf32>
    %c0_42 = arith.constant 0 : index
    %c0_43 = arith.constant 0 : index
    %c0_44 = arith.constant 0 : index
    %c6 = arith.constant 6 : index
    %37 = vector.load %arg2[%c0_42, %c0_43, %c0_44, %c6] : memref<1x1x16x30xbf16, #tpu.memory_space<vmem>>, vector<1x1x16x16xbf16>
    %38 = vector.shape_cast %37 : vector<1x1x16x16xbf16> to vector<16x16xbf16>
    %c6_45 = arith.constant 6 : index
    %c0_46 = arith.constant 0 : index
    %c0_47 = arith.constant 0 : index
    %39 = vector.load %arg3[%c6_45, %c0_46, %c0_47] : memref<15x8x16xbf16, #tpu.memory_space<vmem>>, vector<1x8x16xbf16>
    %40 = vector.shape_cast %39 : vector<1x8x16xbf16> to vector<8x16xbf16>
    %cst_48 = arith.constant dense<0.000000e+00> : vector<8x16xf32>
    %41 = tpu.matmul %40, %38, %cst_48 {dimension_numbers = #tpu.dot_dimension_numbers<[1], [0], [0], [1], [0, 0, 1, 1], [], []>} : vector<8x16xbf16>, vector<16x16xbf16>, vector<8x16xf32> -> vector<8x16xf32>
    %42 = arith.addf %36, %41 : vector<8x16xf32>
    %c0_49 = arith.constant 0 : index
    %c0_50 = arith.constant 0 : index
    %c0_51 = arith.constant 0 : index
    %c7 = arith.constant 7 : index
    %43 = vector.load %arg2[%c0_49, %c0_50, %c0_51, %c7] : memref<1x1x16x30xbf16, #tpu.memory_space<vmem>>, vector<1x1x16x16xbf16>
    %44 = vector.shape_cast %43 : vector<1x1x16x16xbf16> to vector<16x16xbf16>
    %c7_52 = arith.constant 7 : index
    %c0_53 = arith.constant 0 : index
    %c0_54 = arith.constant 0 : index
    %45 = vector.load %arg3[%c7_52, %c0_53, %c0_54] : memref<15x8x16xbf16, #tpu.memory_space<vmem>>, vector<1x8x16xbf16>
    %46 = vector.shape_cast %45 : vector<1x8x16xbf16> to vector<8x16xbf16>
    %cst_55 = arith.constant dense<0.000000e+00> : vector<8x16xf32>
    %47 = tpu.matmul %46, %44, %cst_55 {dimension_numbers = #tpu.dot_dimension_numbers<[1], [0], [0], [1], [0, 0, 1, 1], [], []>} : vector<8x16xbf16>, vector<16x16xbf16>, vector<8x16xf32> -> vector<8x16xf32>
    %48 = arith.addf %42, %47 : vector<8x16xf32>
    %c0_56 = arith.constant 0 : index
    %c0_57 = arith.constant 0 : index
    %c0_58 = arith.constant 0 : index
    %c8 = arith.constant 8 : index
    %49 = vector.load %arg2[%c0_56, %c0_57, %c0_58, %c8] : memref<1x1x16x30xbf16, #tpu.memory_space<vmem>>, vector<1x1x16x16xbf16>
    %50 = vector.shape_cast %49 : vector<1x1x16x16xbf16> to vector<16x16xbf16>
    %c8_59 = arith.constant 8 : index
    %c0_60 = arith.constant 0 : index
    %c0_61 = arith.constant 0 : index
    %51 = vector.load %arg3[%c8_59, %c0_60, %c0_61] : memref<15x8x16xbf16, #tpu.memory_space<vmem>>, vector<1x8x16xbf16>
    %52 = vector.shape_cast %51 : vector<1x8x16xbf16> to vector<8x16xbf16>
    %cst_62 = arith.constant dense<0.000000e+00> : vector<8x16xf32>
    %53 = tpu.matmul %52, %50, %cst_62 {dimension_numbers = #tpu.dot_dimension_numbers<[1], [0], [0], [1], [0, 0, 1, 1], [], []>} : vector<8x16xbf16>, vector<16x16xbf16>, vector<8x16xf32> -> vector<8x16xf32>
    %54 = arith.addf %48, %53 : vector<8x16xf32>
    %c0_63 = arith.constant 0 : index
    %c0_64 = arith.constant 0 : index
    %c0_65 = arith.constant 0 : index
    %c9 = arith.constant 9 : index
    %55 = vector.load %arg2[%c0_63, %c0_64, %c0_65, %c9] : memref<1x1x16x30xbf16, #tpu.memory_space<vmem>>, vector<1x1x16x16xbf16>
    %56 = vector.shape_cast %55 : vector<1x1x16x16xbf16> to vector<16x16xbf16>
    %c9_66 = arith.constant 9 : index
    %c0_67 = arith.constant 0 : index
    %c0_68 = arith.constant 0 : index
    %57 = vector.load %arg3[%c9_66, %c0_67, %c0_68] : memref<15x8x16xbf16, #tpu.memory_space<vmem>>, vector<1x8x16xbf16>
    %58 = vector.shape_cast %57 : vector<1x8x16xbf16> to vector<8x16xbf16>
    %cst_69 = arith.constant dense<0.000000e+00> : vector<8x16xf32>
    %59 = tpu.matmul %58, %56, %cst_69 {dimension_numbers = #tpu.dot_dimension_numbers<[1], [0], [0], [1], [0, 0, 1, 1], [], []>} : vector<8x16xbf16>, vector<16x16xbf16>, vector<8x16xf32> -> vector<8x16xf32>
    %60 = arith.addf %54, %59 : vector<8x16xf32>
    %c0_70 = arith.constant 0 : index
    %c0_71 = arith.constant 0 : index
    %c0_72 = arith.constant 0 : index
    %c10 = arith.constant 10 : index
    %61 = vector.load %arg2[%c0_70, %c0_71, %c0_72, %c10] : memref<1x1x16x30xbf16, #tpu.memory_space<vmem>>, vector<1x1x16x16xbf16>
    %62 = vector.shape_cast %61 : vector<1x1x16x16xbf16> to vector<16x16xbf16>
    %c10_73 = arith.constant 10 : index
    %c0_74 = arith.constant 0 : index
    %c0_75 = arith.constant 0 : index
    %63 = vector.load %arg3[%c10_73, %c0_74, %c0_75] : memref<15x8x16xbf16, #tpu.memory_space<vmem>>, vector<1x8x16xbf16>
    %64 = vector.shape_cast %63 : vector<1x8x16xbf16> to vector<8x16xbf16>
    %cst_76 = arith.constant dense<0.000000e+00> : vector<8x16xf32>
    %65 = tpu.matmul %64, %62, %cst_76 {dimension_numbers = #tpu.dot_dimension_numbers<[1], [0], [0], [1], [0, 0, 1, 1], [], []>} : vector<8x16xbf16>, vector<16x16xbf16>, vector<8x16xf32> -> vector<8x16xf32>
    %66 = arith.addf %60, %65 : vector<8x16xf32>
    %c0_77 = arith.constant 0 : index
    %c0_78 = arith.constant 0 : index
    %c0_79 = arith.constant 0 : index
    %c11 = arith.constant 11 : index
    %67 = vector.load %arg2[%c0_77, %c0_78, %c0_79, %c11] : memref<1x1x16x30xbf16, #tpu.memory_space<vmem>>, vector<1x1x16x16xbf16>
    %68 = vector.shape_cast %67 : vector<1x1x16x16xbf16> to vector<16x16xbf16>
    %c11_80 = arith.constant 11 : index
    %c0_81 = arith.constant 0 : index
    %c0_82 = arith.constant 0 : index
    %69 = vector.load %arg3[%c11_80, %c0_81, %c0_82] : memref<15x8x16xbf16, #tpu.memory_space<vmem>>, vector<1x8x16xbf16>
    %70 = vector.shape_cast %69 : vector<1x8x16xbf16> to vector<8x16xbf16>
    %cst_83 = arith.constant dense<0.000000e+00> : vector<8x16xf32>
    %71 = tpu.matmul %70, %68, %cst_83 {dimension_numbers = #tpu.dot_dimension_numbers<[1], [0], [0], [1], [0, 0, 1, 1], [], []>} : vector<8x16xbf16>, vector<16x16xbf16>, vector<8x16xf32> -> vector<8x16xf32>
    %72 = arith.addf %66, %71 : vector<8x16xf32>
    %c0_84 = arith.constant 0 : index
    %c0_85 = arith.constant 0 : index
    %c0_86 = arith.constant 0 : index
    %c12 = arith.constant 12 : index
    %73 = vector.load %arg2[%c0_84, %c0_85, %c0_86, %c12] : memref<1x1x16x30xbf16, #tpu.memory_space<vmem>>, vector<1x1x16x16xbf16>
    %74 = vector.shape_cast %73 : vector<1x1x16x16xbf16> to vector<16x16xbf16>
    %c12_87 = arith.constant 12 : index
    %c0_88 = arith.constant 0 : index
    %c0_89 = arith.constant 0 : index
    %75 = vector.load %arg3[%c12_87, %c0_88, %c0_89] : memref<15x8x16xbf16, #tpu.memory_space<vmem>>, vector<1x8x16xbf16>
    %76 = vector.shape_cast %75 : vector<1x8x16xbf16> to vector<8x16xbf16>
    %cst_90 = arith.constant dense<0.000000e+00> : vector<8x16xf32>
    %77 = tpu.matmul %76, %74, %cst_90 {dimension_numbers = #tpu.dot_dimension_numbers<[1], [0], [0], [1], [0, 0, 1, 1], [], []>} : vector<8x16xbf16>, vector<16x16xbf16>, vector<8x16xf32> -> vector<8x16xf32>
    %78 = arith.addf %72, %77 : vector<8x16xf32>
    %c0_91 = arith.constant 0 : index
    %c0_92 = arith.constant 0 : index
    %c0_93 = arith.constant 0 : index
    %c13 = arith.constant 13 : index
    %79 = vector.load %arg2[%c0_91, %c0_92, %c0_93, %c13] : memref<1x1x16x30xbf16, #tpu.memory_space<vmem>>, vector<1x1x16x16xbf16>
    %80 = vector.shape_cast %79 : vector<1x1x16x16xbf16> to vector<16x16xbf16>
    %c13_94 = arith.constant 13 : index
    %c0_95 = arith.constant 0 : index
    %c0_96 = arith.constant 0 : index
    %81 = vector.load %arg3[%c13_94, %c0_95, %c0_96] : memref<15x8x16xbf16, #tpu.memory_space<vmem>>, vector<1x8x16xbf16>
    %82 = vector.shape_cast %81 : vector<1x8x16xbf16> to vector<8x16xbf16>
    %cst_97 = arith.constant dense<0.000000e+00> : vector<8x16xf32>
    %83 = tpu.matmul %82, %80, %cst_97 {dimension_numbers = #tpu.dot_dimension_numbers<[1], [0], [0], [1], [0, 0, 1, 1], [], []>} : vector<8x16xbf16>, vector<16x16xbf16>, vector<8x16xf32> -> vector<8x16xf32>
    %84 = arith.addf %78, %83 : vector<8x16xf32>
    %c0_98 = arith.constant 0 : index
    %c0_99 = arith.constant 0 : index
    %c0_100 = arith.constant 0 : index
    %c14 = arith.constant 14 : index
    %85 = vector.load %arg2[%c0_98, %c0_99, %c0_100, %c14] : memref<1x1x16x30xbf16, #tpu.memory_space<vmem>>, vector<1x1x16x16xbf16>
    %86 = vector.shape_cast %85 : vector<1x1x16x16xbf16> to vector<16x16xbf16>
    %c14_101 = arith.constant 14 : index
    %c0_102 = arith.constant 0 : index
    %c0_103 = arith.constant 0 : index
    %87 = vector.load %arg3[%c14_101, %c0_102, %c0_103] : memref<15x8x16xbf16, #tpu.memory_space<vmem>>, vector<1x8x16xbf16>
    %88 = vector.shape_cast %87 : vector<1x8x16xbf16> to vector<8x16xbf16>
    %cst_104 = arith.constant dense<0.000000e+00> : vector<8x16xf32>
    %89 = tpu.matmul %88, %86, %cst_104 {dimension_numbers = #tpu.dot_dimension_numbers<[1], [0], [0], [1], [0, 0, 1, 1], [], []>} : vector<8x16xbf16>, vector<16x16xbf16>, vector<8x16xf32> -> vector<8x16xf32>
    %90 = arith.addf %84, %89 : vector<8x16xf32>
    %c0_105 = arith.constant 0 : index
    %c0_106 = arith.constant 0 : index
    %91 = vector.load %arg4[%c0_105, %c0_106] : memref<8x1xf32, #tpu.memory_space<vmem>>, vector<8x1xf32>
    %92 = vector.broadcast %91 : vector<8x1xf32> to vector<8x16xf32>
    %93 = arith.mulf %90, %92 : vector<8x16xf32>
    %c0_107 = arith.constant 0 : index
    %c0_108 = arith.constant 0 : index
    %94 = vector.load %arg5[%c0_107, %c0_108] : memref<8x1xf32, #tpu.memory_space<vmem>>, vector<8x1xf32>
    %95 = vector.broadcast %94 : vector<8x1xf32> to vector<8x16xf32>
    %96 = arith.addf %93, %95 : vector<8x16xf32>
    %cst_109 = arith.constant 0.000000e+00 : f32
    %97 = vector.broadcast %cst_109 : f32 to vector<8x16xf32>
    %98 = arith.maximumf %96, %97 : vector<8x16xf32>
    %c0_110 = arith.constant 0 : index
    %c0_111 = arith.constant 0 : index
    %c0_112 = arith.constant 0 : index
    %99 = vector.load %arg6[%c0_110, %c0_111, %c0_112] : memref<1x8x16xbf16, #tpu.memory_space<vmem>>, vector<1x8x16xbf16>
    %100 = vector.shape_cast %99 : vector<1x8x16xbf16> to vector<8x16xbf16>
    %101 = arith.extf %100 : vector<8x16xbf16> to vector<8x16xf32>
    %102 = arith.addf %98, %101 : vector<8x16xf32>
    %103 = arith.truncf %102 : vector<8x16xf32> to vector<8x16xbf16>
    %c0_113 = arith.constant 0 : index
    %c0_114 = arith.constant 0 : index
    %c0_115 = arith.constant 0 : index
    %104 = vector.load %arg7[%c0_113, %c0_114, %c0_115] : memref<1x8x16xbf16, #tpu.memory_space<vmem>>, vector<1x8x16xbf16>
    %105 = vector.shape_cast %104 : vector<1x8x16xbf16> to vector<8x16xbf16>
    %106 = vector.shape_cast %103 : vector<8x16xbf16> to vector<1x8x16xbf16>
    tpu.vector_store %arg7[%c0_113, %c0_114, %c0_115], %106 {strides = array<i32>} : memref<1x8x16xbf16, #tpu.memory_space<vmem>>, vector<1x8x16xbf16>,
    return
  }
  func.func @transform_0(%arg0: i32, %arg1: i32) -> (i32, i32, i32, i32) {
    %c0_i32 = arith.constant 0 : i32
    %c0_i32_0 = arith.constant 0 : i32
    %c0_i32_1 = arith.constant 0 : i32
    %c0_i32_2 = arith.constant 0 : i32
    return %arg0, %c0_i32, %c0_i32_0, %c0_i32_1 : i32, i32, i32, i32
  }
  func.func @transform_1(%arg0: i32, %arg1: i32) -> (i32, i32, i32) {
    %c0_i32 = arith.constant 0 : i32
    %c0_i32_0 = arith.constant 0 : i32
    %c0_i32_1 = arith.constant 0 : i32
    %c0_i32_2 = arith.constant 0 : i32
    return %c0_i32, %c0_i32_0, %c0_i32_1 : i32, i32, i32
  }
  func.func @transform_2(%arg0: i32, %arg1: i32) -> (i32, i32) {
    %c0_i32 = arith.constant 0 : i32
    %c0_i32_0 = arith.constant 0 : i32
    %c0_i32_1 = arith.constant 0 : i32
    return %c0_i32, %c0_i32_0 : i32, i32
  }
  func.func @transform_3(%arg0: i32, %arg1: i32) -> (i32, i32) {
    %c0_i32 = arith.constant 0 : i32
    %c0_i32_0 = arith.constant 0 : i32
    %c0_i32_1 = arith.constant 0 : i32
    return %c0_i32, %c0_i32_0 : i32, i32
  }
  func.func @transform_4(%arg0: i32, %arg1: i32) -> (i32, i32, i32) {
    %c0_i32 = arith.constant 0 : i32
    %c0_i32_0 = arith.constant 0 : i32
    return %arg0, %c0_i32, %arg1 : i32, i32, i32
  }
  func.func @transform_5(%arg0: i32, %arg1: i32) -> (i32, i32, i32) {
    %c0_i32 = arith.constant 0 : i32
    %c0_i32_0 = arith.constant 0 : i32
    return %arg0, %c0_i32, %arg1 : i32, i32, i32
  }
}

module attributes {stable_mosaic.version = 11 : i64} {
  func.func @_conv_kernel(%arg0: i32, %arg1: i32, %arg2: memref<1x1x8x16xbf16, #tpu.memory_space<vmem>>, %arg3: memref<1x1x8xbf16, #tpu.memory_space<vmem>>, %arg4: memref<1x1xf32, #tpu.memory_space<vmem>>, %arg5: memref<1x1xf32, #tpu.memory_space<vmem>>, %arg6: memref<1x1x16xf32, #tpu.memory_space<vmem>>) attributes {dimension_semantics = [#tpu.dimension_semantics<parallel>, #tpu.dimension_semantics<arbitrary>], iteration_bounds = array<i64: 2, 1>, scalar_prefetch = 0 : i64, scratch_operands = 0 : i64, tpu.core_type = #tpu.core_type<tc>, window_params = [{transform_indices = @transform_0, window_bounds = array<i64: 1, 1, 8, 16>}, {pipeline_mode = #tpu.pipeline_mode<synchronous>, transform_indices = @transform_1, window_bounds = array<i64: 1, 1, 8>}, {pipeline_mode = #tpu.pipeline_mode<synchronous>, transform_indices = @transform_2, window_bounds = array<i64: 1, 1>}, {pipeline_mode = #tpu.pipeline_mode<synchronous>, transform_indices = @transform_3, window_bounds = array<i64: 1, 1>}, {transform_indices = @transform_4, window_bounds = array<i64: 1, 1, 16>}]} {
    %cst = arith.constant 0.000000e+00 : f32
    %0 = vector.broadcast %cst : f32 to vector<1x16xf32>
    %c0 = arith.constant 0 : index
    %c0_0 = arith.constant 0 : index
    %c0_1 = arith.constant 0 : index
    %c0_2 = arith.constant 0 : index
    %1 = vector.load %arg2[%c0, %c0_0, %c0_1, %c0_2] : memref<1x1x8x16xbf16, #tpu.memory_space<vmem>>, vector<1x1x8x16xbf16>
    %2 = vector.shape_cast %1 : vector<1x1x8x16xbf16> to vector<8x16xbf16>
    %c0_3 = arith.constant 0 : index
    %c0_4 = arith.constant 0 : index
    %c0_5 = arith.constant 0 : index
    %3 = vector.load %arg3[%c0_3, %c0_4, %c0_5] : memref<1x1x8xbf16, #tpu.memory_space<vmem>>, vector<1x1x8xbf16>
    %4 = vector.shape_cast %3 : vector<1x1x8xbf16> to vector<1x8xbf16>
    %cst_6 = arith.constant dense<0.000000e+00> : vector<1x16xf32>
    %5 = tpu.matmul %4, %2, %cst_6 {dimension_numbers = #tpu.dot_dimension_numbers<[1], [0], [0], [1], [0, 0, 1, 1], [], []>} : vector<1x8xbf16>, vector<8x16xbf16>, vector<1x16xf32> -> vector<1x16xf32>
    %6 = arith.addf %0, %5 : vector<1x16xf32>
    %c0_7 = arith.constant 0 : index
    %c0_8 = arith.constant 0 : index
    %7 = vector.load %arg4[%c0_7, %c0_8] : memref<1x1xf32, #tpu.memory_space<vmem>>, vector<1x1xf32>
    %8 = vector.broadcast %7 : vector<1x1xf32> to vector<1x16xf32>
    %9 = arith.mulf %6, %8 : vector<1x16xf32>
    %c0_9 = arith.constant 0 : index
    %c0_10 = arith.constant 0 : index
    %10 = vector.load %arg5[%c0_9, %c0_10] : memref<1x1xf32, #tpu.memory_space<vmem>>, vector<1x1xf32>
    %11 = vector.broadcast %10 : vector<1x1xf32> to vector<1x16xf32>
    %12 = arith.addf %9, %11 : vector<1x16xf32>
    %c0_11 = arith.constant 0 : index
    %c0_12 = arith.constant 0 : index
    %c0_13 = arith.constant 0 : index
    %13 = vector.load %arg6[%c0_11, %c0_12, %c0_13] : memref<1x1x16xf32, #tpu.memory_space<vmem>>, vector<1x1x16xf32>
    %14 = vector.shape_cast %13 : vector<1x1x16xf32> to vector<1x16xf32>
    %15 = vector.shape_cast %12 : vector<1x16xf32> to vector<1x1x16xf32>
    tpu.vector_store %arg6[%c0_11, %c0_12, %c0_13], %15 {strides = array<i32>} : memref<1x1x16xf32, #tpu.memory_space<vmem>>, vector<1x1x16xf32>,
    return
  }
  func.func @transform_0(%arg0: i32, %arg1: i32) -> (i32, i32, i32, i32) {
    %c0_i32 = arith.constant 0 : i32
    %c0_i32_0 = arith.constant 0 : i32
    %c0_i32_1 = arith.constant 0 : i32
    %c0_i32_2 = arith.constant 0 : i32
    return %arg0, %c0_i32, %c0_i32_0, %c0_i32_1 : i32, i32, i32, i32
  }
  func.func @transform_1(%arg0: i32, %arg1: i32) -> (i32, i32, i32) {
    %c0_i32 = arith.constant 0 : i32
    %c0_i32_0 = arith.constant 0 : i32
    %c0_i32_1 = arith.constant 0 : i32
    %c0_i32_2 = arith.constant 0 : i32
    return %c0_i32, %c0_i32_0, %c0_i32_1 : i32, i32, i32
  }
  func.func @transform_2(%arg0: i32, %arg1: i32) -> (i32, i32) {
    %c0_i32 = arith.constant 0 : i32
    %c0_i32_0 = arith.constant 0 : i32
    %c0_i32_1 = arith.constant 0 : i32
    return %c0_i32, %c0_i32_0 : i32, i32
  }
  func.func @transform_3(%arg0: i32, %arg1: i32) -> (i32, i32) {
    %c0_i32 = arith.constant 0 : i32
    %c0_i32_0 = arith.constant 0 : i32
    %c0_i32_1 = arith.constant 0 : i32
    return %c0_i32, %c0_i32_0 : i32, i32
  }
  func.func @transform_4(%arg0: i32, %arg1: i32) -> (i32, i32, i32) {
    %c0_i32 = arith.constant 0 : i32
    %c0_i32_0 = arith.constant 0 : i32
    return %arg0, %c0_i32, %arg1 : i32, i32, i32
  }
}

</mosaic_0001>

<bundles_post_ra>
// kernel: freqnet_forward.30
= control target key start
LH: loop header
LB: loop body
LE: loop exit
PB: predicated region body
PF: predicated region fallthrough
CT: control target
= control target key end

     0   :  { %s867_s15 = smov 0   ;;  %s869_s16 = smov 0   ;;  %s1007_s0 = inlined_call_operand.vmem [shape: bf16[2,1,1,30], index: 0, kind: input, shape index: {}]   ;;  %s1008_s1 = inlined_call_operand.vmem [shape: bf16[15,8,1], index: 1, kind: input, shape index: {}]   ;;  %s1009_s2 = inlined_call_operand.vmem [shape: f32[8,1], index: 2, kind: input, shape index: {}]   ;;  %s1010_s3 = inlined_call_operand.vmem [shape: f32[8,1], index: 3, kind: input, shape index: {}]   ;;  %s1011_s4 = inlined_call_operand.vmem [shape: bf16[2,8,16], index: 4, kind: output, shape index: {}]  }
   0x1   :  { %s871_s17 = smov 0  }
   0x2 LB: > { %s26_s18 = sadd.s32 1, %s821_s16  ;;  %p729_p0 = scmp.ge.s32.totalorder %s825_s17, 1  ;;  %s825_s17 = sphi %s871_s17, %s14_s17   ;;  %s821_s16 = sphi %s869_s16, %s1013_s16   ;;  %s817_s15 = sphi %s867_s15, %s1012_s15  }
   0x3   : > { %p28_p1 = scmp.ge.s32.totalorder %s26_s18, 2  ;;  %p174_p2 = scmp.lt.s32.totalorder %s825_s17, 3 }
   0x5   : > { %s1015_s18 = smov (%p28_p1, %s26_s18), 0  ;;  %p175_p3 = pnand %p729_p0, %p174_p2 }
   0x6   : > { %p200_p4 = scmp.lt.s32.totalorder (!%p175_p3), %s817_s15, 1  ;;  %s827_s22 = smov (!%p175_p3), 126  }
   0x7   : > { %178 = sbr.rel (%p175_p3) target bundleno = 378 (0x17a), region = 36  ;;  %s828_s23 = smov (!%p175_p3), 127  }
   0x8   : > { %s829_s24 = smov (!%p175_p3), 125   ;;  %s830_s25 = smov (!%p175_p3), 124  }
   0x9   : > { %s831_s26 = smov (!%p175_p3), 123   ;;  %s832_s27 = smov (!%p175_p3), 122  }
   0xa   : > { %s833_s28 = smov (!%p175_p3), 121   ;;  %s834_s29 = smov (!%p175_p3), 120  }
   0xb   : > { %s835_s30 = smov (!%p175_p3), 119   ;;  %s836_s5 = smov (!%p175_p3), 118  }
   0xc   : > { %s1017_s15 = smov (!%p200_p4, %s817_s15), 1  ;;  %s837_s6 = smov 117   ;;  %v840_v27 = vmov 0   ;;  %vm225_vm0 = vcmask 1040384   ;;  %v212_v31 = vld [vmem:[%s1008_s1] sm:$0xf] }
   0xd   : > { %s891_s21 = scalar_lea.vmem %s1007_s0, %s1017_s15  ;;  %s838_s7 = smov 116   ;;  %802 = vset.pattern.permute.xlu0 %v840_v27  ;;  %801 = vset.pattern.permute.xlu2 %v840_v27  ;;  %v910_v29 = vsel %vm225_vm0, 65535, %v840_v27  ;;  %vm221_vm1 = vcmask 7168   ;;  %v734_v37 = vld [vmem:[%s1008_s1 + $0x8] sm:$0xf]  ;;  %v646_v59 = vld [vmem:[%s1010_s3] sm:$0xff] }
   0xe   : > { %v894_v0 = vld [vmem:[%s891_s21] sm:$0x1]  ;;  %s839_s8 = smov 115   ;;  %s841_s9 = smov 114   ;;  %v740_v43 = vld [vmem:[%s1008_s1 + $0x14] sm:$0xf] }
   0xf   : > { %216 = vst [vmem:[#allocation1] ss:$9 sm:$0xff] %v894_v0  ;;  %v262_v1 = vld [vmem:[%s891_s21] sm:$0x1]  ;;  %v247_v30 = vand.u32 %v910_v29, %v894_v0  ;;  %v731_v44 = vld [vmem:[%s1008_s1 + $0x4] sm:$0xf] }
  0x10   : > { %v291_v3 = vld [vmem:[%s891_s21] sm:$0x1]  ;;  %v736_v45 = vld [vmem:[%s1008_s1 + $0xc] sm:$0xf]  ;;  %v738_v48 = vld [vmem:[%s1008_s1 + $0x10] sm:$0xf] }
  0x11   : > { %v320_v5 = vld [vmem:[%s891_s21] sm:$0x1]  ;;  %256 = vmatpush.bf16.msra.mxu1 %v247_v30  ;;  %v742_v51 = vld [vmem:[%s1008_s1 + $0x18] sm:$0xf]  ;;  %v744_v54 = vld [vmem:[%s1008_s1 + $0x1c] sm:$0xf] }
  0x12   : > { %v349_v7 = vld [vmem:[%s891_s21] sm:$0x1]  ;;  %v748_v58 = vld [vmem:[%s1008_s1 + $0x24] sm:$0xf]  ;;  %v750_v63 = vld [vmem:[%s1008_s1 + $0x28] sm:$0xf] }
  0x13   : > { %v378_v9 = vld [vmem:[%s891_s21] sm:$0x1]  ;;  %vm655_vm2 = vcmask 125952  }
  0x14   : > { %v407_v11 = vld [vmem:[%s891_s21] sm:$0x1]  ;;  %733 = vmatmul.msk.bf16.vlgmr.msra.gmra.mxu1 %vm221_vm1, %v212_v31 }
  0x15   : > { %v436_v13 = vld [vmem:[%s891_s21] sm:$0x1] }
  0x16   : > { %v217_v2 = vld [vmem:[#allocation1] sm:$0xff] }
  0x17   : > { %266 = vst [vmem:[#allocation1] ss:$9 sm:$0xff] %v262_v1  ;;  %v465_v15 = vld [vmem:[%s891_s21] sm:$0x1] }
  0x18   : > { %v494_v17 = vld [vmem:[%s891_s21] sm:$0x1] }
  0x19   : > { %v523_v19 = vld [vmem:[%s891_s21] sm:$0x1] }
  0x1a   : > { %v552_v21 = vld [vmem:[%s891_s21] sm:$0x1] }
  0x1b   : > { %v581_v23 = vld [vmem:[%s891_s21] sm:$0x1] }
  0x1c   : > { %v610_v25 = vld [vmem:[%s891_s21] sm:$0x1] }
  0x1d   : > { %v746_v55 = vld [vmem:[%s1008_s1 + $0x20] sm:$0xf] }
  0x1e   : > { %v267_v4 = vld [vmem:[#allocation1] sm:$0xff] }
  0x1f   : > { %269 = vrot.lane.b32.xlu0 %v267_v4, %s827_s22  ;;  %295 = vst [vmem:[#allocation1] ss:$9 sm:$0xff] %v291_v3  ;;  %v639_v60 = vld [vmem:[%s1009_s2] sm:$0xff]  ;;  %v752_v4 = vld [vmem:[%s1008_s1 + $0x2c] sm:$0xf] }
  0x26   : > { %v296_v6 = vld [vmem:[#allocation1] sm:$0xff] }
  0x27   : > { %219 = vrot.lane.b32.xlu0 %v217_v2, %s828_s23  ;;  %298 = vrot.lane.b32.xlu1 %v296_v6, %s829_s24  ;;  %324 = vst [vmem:[#allocation1] ss:$9 sm:$0xff] %v320_v5 }
  0x2e   : > { %v325_v8 = vld [vmem:[#allocation1] sm:$0xff] }
  0x2f   : > { %353 = vst [vmem:[#allocation1] ss:$9 sm:$0xff] %v349_v7  ;;  %327 = vrot.lane.b32.xlu2 %v325_v8, %s830_s25  ;;  %v754_v7 = vld [vmem:[%s1008_s1 + $0x30] sm:$0xf]  ;;  %v758_v8 = vld [vmem:[%s1008_s1 + $0x38] sm:$0xf] }
  0x36   : > { %v354_v10 = vld [vmem:[#allocation1] sm:$0xff] }
  0x37   : > { %382 = vst [vmem:[#allocation1] ss:$9 sm:$0xff] %v378_v9  ;;  %356 = vrot.lane.b32.xlu2 %v354_v10, %s831_s26  ;;  %s730_s26 = sshll.u32 %s1017_s15, 2 }
  0x3e   : > { %v383_v12 = vld [vmem:[#allocation1] sm:$0xff] }
  0x3f   : > { %385 = vrot.lane.b32.xlu1 %v383_v12, %s832_s27  ;;  %411 = vst [vmem:[#allocation1] ss:$9 sm:$0xff] %v407_v11  ;;  %v756_v11 = vld [vmem:[%s1008_s1 + $0x34] sm:$0xf] }
  0x46   : > { %v412_v14 = vld [vmem:[#allocation1] sm:$0xff] }
  0x47   : > { %414 = vrot.lane.b32.xlu0 %v412_v14, %s833_s28  ;;  %440 = vst [vmem:[#allocation1] ss:$9 sm:$0xff] %v436_v13 }
  0x4e   : > { %v441_v16 = vld [vmem:[#allocation1] sm:$0xff] }
  0x4f   : > { %469 = vst [vmem:[#allocation1] ss:$9 sm:$0xff] %v465_v15  ;;  %443 = vrot.lane.b32.xlu2 %v441_v16, %s834_s29  ;;  %s209_s29 = scalar_lea.vmem %s1011_s4, %s730_s26 }
  0x56   : > { %v470_v18 = vld [vmem:[#allocation1] sm:$0xff] }
  0x57   : > { %498 = vst [vmem:[#allocation1] ss:$9 sm:$0xff] %v494_v17  ;;  %472 = vrot.lane.b32.xlu0 %v470_v18, %s835_s30 }
  0x5e   : > { %v499_v20 = vld [vmem:[#allocation1] sm:$0xff] }
  0x5f   : > { %501 = vrot.lane.b32.xlu1 %v499_v20, %s836_s5  ;;  %527 = vst [vmem:[#allocation1] ss:$9 sm:$0xff] %v523_v19 }
  0x66   : > { %v528_v22 = vld [vmem:[#allocation1] sm:$0xff] }
  0x67   : > { %530 = vrot.lane.b32.xlu1 %v528_v22, %s837_s6  ;;  %556 = vst [vmem:[#allocation1] ss:$9 sm:$0xff] %v552_v21 }
  0x6e   : > { %v557_v24 = vld [vmem:[#allocation1] sm:$0xff] }
  0x6f   : > { %559 = vrot.lane.b32.xlu0 %v557_v24, %s838_s7  ;;  %585 = vst [vmem:[#allocation1] ss:$9 sm:$0xff] %v581_v23 }
  0x76   : > { %v586_v26 = vld [vmem:[#allocation1] sm:$0xff] }
  0x77   : > { %588 = vrot.lane.b32.xlu1 %v586_v26, %s839_s8  ;;  %614 = vst [vmem:[#allocation1] ss:$9 sm:$0xff] %v610_v25  ;;  %649 = vperm.xlu0 %802, %v646_v59  }
  0x7e   : > { %v615_v28 = vld [vmem:[#allocation1] sm:$0xff] }
  0x7f   : > { %617 = vrot.lane.b32.xlu2 %v615_v28, %s841_s9 }
  0x87   : > { %642 = vperm.xlu2 %801, %v639_v60  }
  0x89   : > { %v328_v32 = vpop.permute.xlu2 %327 }
  0x8a   : > { %v333_v40 = vand.u32 %v328_v32, %v910_v29 }
  0x91   : > { %v270_v33 = vpop.permute.xlu0 %269  ;;  %v357_v35 = vpop.permute.xlu2 %356 }
  0x92   : > { %v275_v34 = vand.u32 %v270_v33, %v910_v29  ;;  %v362_v36 = vand.u32 %v357_v35, %v910_v29  ;;  %v258_v12 = vpop.f32.mrf.mxu1 }
  0x94   : > { %284 = vmatpush.bf16.msra.mxu2 %v275_v34  ;;  %371 = vmatpush.bf16.msrb.mxu1 %v362_v36 }
  0x97   : > { %735 = vmatmul.msk.bf16.vlgmr.msra.gmra.mxu2 %vm221_vm1, %v734_v37  ;;  %741 = vmatmul.msk.bf16.vlgmr.msrb.gmra.mxu1 %vm221_vm1, %v740_v43 }
  0x99   : > { %v220_v38 = vpop.permute.xlu0 %219  ;;  %v299_v39 = vpop.permute.xlu1 %298 }
  0x9a   : > { %v229_v41 = vand.u32 %v910_v29, %v220_v38  ;;  %v304_v42 = vand.u32 %v299_v39, %v910_v29  ;;  %v260_v13 = vpop.f32.mrf.mxu1 }
  0x9c   : > { %238 = vmatpush.bf16.msra.mxu0 %v229_v41  ;;  %313 = vmatpush.bf16.msra.mxu3 %v304_v42 }
  0x9f   : > { %732 = vmatmul.msk.bf16.vlgmr.msra.gmra.mxu0 %vm221_vm1, %v731_v44  ;;  %737 = vmatmul.msk.bf16.vlgmr.msra.gmra.mxu3 %vm221_vm1, %v736_v45 }
  0xa0   : > { %342 = vmatpush.bf16.msrb.mxu0 %v333_v40 }
  0xa9   : > { %v444_v46 = vpop.permute.xlu2 %443 }
  0xaa   : > { %v449_v47 = vand.u32 %v444_v46, %v910_v29 }
  0xac   : > { %458 = vmatpush.bf16.msra.mxu0 %v449_v47 }
  0xaf   : > { %739 = vmatmul.msk.bf16.vlgmr.msrb.gmra.mxu0 %vm221_vm1, %v738_v48 }
  0xb1   : > { %v386_v49 = vpop.permute.xlu1 %385 }
  0xb2   : > { %v391_v50 = vand.u32 %v386_v49, %v910_v29 }
  0xb4   : > { %400 = vmatpush.bf16.msrb.mxu2 %v391_v50 }
  0xb7   : > { %743 = vmatmul.msk.bf16.vlgmr.msrb.gmra.mxu2 %vm221_vm1, %v742_v51 }
  0xb9   : > { %v415_v52 = vpop.permute.xlu0 %414 }
  0xba   : > { %v420_v53 = vand.u32 %v415_v52, %v910_v29 }
  0xbc   : > { %429 = vmatpush.bf16.msrb.mxu3 %v420_v53 }
  0xbf   : > { %745 = vmatmul.msk.bf16.vlgmr.msrb.gmra.mxu3 %vm221_vm1, %v744_v54  ;;  %747 = vmatmul.msk.bf16.vlgmr.msra.gmra.mxu0 %vm221_vm1, %v746_v55 }
  0xc9   : > { %v473_v56 = vpop.permute.xlu0 %472 }
  0xca   : > { %v478_v57 = vand.u32 %v473_v56, %v910_v29 }
  0xcc   : > { %487 = vmatpush.bf16.msra.mxu1 %v478_v57 }
  0xcf   : > { %749 = vmatmul.msk.bf16.vlgmr.msra.gmra.mxu1 %vm221_vm1, %v748_v58 }
  0xd1   : > { %v502_v61 = vpop.permute.xlu1 %501 }
  0xd2   : > { %v507_v62 = vand.u32 %v502_v61, %v910_v29 }
  0xd4   : > { %516 = vmatpush.bf16.msra.mxu2 %v507_v62 }
  0xd7   : > { %751 = vmatmul.msk.bf16.vlgmr.msra.gmra.mxu2 %vm221_vm1, %v750_v63 }
  0xd9   : > { %v531_v0 = vpop.permute.xlu1 %530  ;;  %v618_v1 = vpop.permute.xlu2 %617 }
  0xda   : > { %v536_v2 = vand.u32 %v531_v0, %v910_v29  ;;  %v623_v3 = vand.u32 %v618_v1, %v910_v29 }
  0xdc   : > { %545 = vmatpush.bf16.msra.mxu3 %v536_v2  ;;  %632 = vmatpush.bf16.msrb.mxu2 %v623_v3 }
  0xdf   : > { %753 = vmatmul.msk.bf16.vlgmr.msra.gmra.mxu3 %vm221_vm1, %v752_v4 }
  0xe1   : > { %v560_v5 = vpop.permute.xlu0 %559  ;;  %v643_v53 = vpop.permute.xlu2 %642 }
  0xe2   : > { %v565_v6 = vand.u32 %v560_v5, %v910_v29 }
  0xe4   : > { %574 = vmatpush.bf16.msrb.mxu0 %v565_v6 }
  0xe7   : > { %755 = vmatmul.msk.bf16.vlgmr.msrb.gmra.mxu0 %vm221_vm1, %v754_v7  ;;  %759 = vmatmul.msk.bf16.vlgmr.msrb.gmra.mxu2 %vm221_vm1, %v758_v8 }
  0xe9   : > { %v589_v9 = vpop.permute.xlu1 %588  ;;  %v650_v55 = vpop.permute.xlu0 %649 }
  0xea   : > { %v594_v10 = vand.u32 %v589_v9, %v910_v29 }
  0xec   : > { %603 = vmatpush.bf16.msrb.mxu1 %v594_v10 }
  0xef   : > { %757 = vmatmul.msk.bf16.vlgmr.msrb.gmra.mxu1 %vm221_vm1, %v756_v11 }
 0x114   : > { %v373_v14 = vpop.f32.mrf.mxu1 }
 0x11a   : > { %v286_v15 = vpop.f32.mrf.mxu2 }
 0x11c   : > { %v240_v16 = vpop.f32.mrf.mxu0  ;;  %v375_v17 = vpop.f32.mrf.mxu1 }
 0x11d   : > { %v259_v18 = vadd.f32 %v258_v12, %v240_v16 }
 0x11f   : > { %v290_v22 = vadd.f32 %v286_v15, %v259_v18 }
 0x122   : > { %v288_v19 = vpop.f32.mrf.mxu2  ;;  %v315_v20 = vpop.f32.mrf.mxu3 }
 0x123   : > { %v319_v23 = vadd.f32 %v315_v20, %v290_v22 }
 0x124   : > { %v242_v21 = vpop.f32.mrf.mxu0 }
 0x12a   : > { %v317_v24 = vpop.f32.mrf.mxu3 }
 0x12c   : > { %v344_v25 = vpop.f32.mrf.mxu0 }
 0x12d   : > { %v348_v26 = vadd.f32 %v344_v25, %v319_v23 }
 0x12f   : > { %v377_v27 = vadd.f32 %v373_v14, %v348_v26 }
 0x134   : > { %v346_v28 = vpop.f32.mrf.mxu0 }
 0x13a   : > { %v402_v29 = vpop.f32.mrf.mxu2 }
 0x13b   : > { %v406_v37 = vadd.f32 %v402_v29, %v377_v27 }
 0x13c   : > { %v460_v30 = vpop.f32.mrf.mxu0 }
 0x142   : > { %v404_v31 = vpop.f32.mrf.mxu2  ;;  %v431_v32 = vpop.f32.mrf.mxu3 }
 0x143   : > { %v435_v39 = vadd.f32 %v431_v32, %v406_v37 }
 0x144   : > { %v462_v33 = vpop.f32.mrf.mxu0 }
 0x145   : > { %v464_v40 = vadd.f32 %v460_v30, %v435_v39 }
 0x14a   : > { %v433_v34 = vpop.f32.mrf.mxu3 }
 0x14c   : > { %v489_v35 = vpop.f32.mrf.mxu1 }
 0x14d   : > { %v493_v43 = vadd.f32 %v489_v35, %v464_v40 }
 0x154   : > { %v491_v36 = vpop.f32.mrf.mxu1 }
 0x15a   : > { %v518_v38 = vpop.f32.mrf.mxu2 }
 0x15b   : > { %v522_v45 = vadd.f32 %v518_v38, %v493_v43 }
 0x162   : > { %v547_v41 = vpop.f32.mrf.mxu3  ;;  %v520_v42 = vpop.f32.mrf.mxu2 }
 0x163   : > { %v551_v46 = vadd.f32 %v547_v41, %v522_v45 }
 0x164   : > { %v576_v44 = vpop.f32.mrf.mxu0 }
 0x165   : > { %v580_v49 = vadd.f32 %v576_v44, %v551_v46 }
 0x16a   : > { %v634_v47 = vpop.f32.mrf.mxu2  ;;  %v549_v48 = vpop.f32.mrf.mxu3 }
 0x16c   : > { %v605_v50 = vpop.f32.mrf.mxu1  ;;  %v578_v51 = vpop.f32.mrf.mxu0 }
 0x16d   : > { %v609_v52 = vadd.f32 %v605_v50, %v580_v49 }
 0x16f   : > { %v638_v54 = vadd.f32 %v634_v47, %v609_v52 }
 0x171   : > { %v645_v56 = vmul.f32 %v643_v53, %v638_v54 }
 0x172   : > { %v636_v57 = vpop.f32.mrf.mxu2 }
 0x173   : > { %v652_v58 = vadd.f32 %v650_v55, %v645_v56 }
 0x174   : > { %v607_v59 = vpop.f32.mrf.mxu1 }
 0x175   : > { %v653_v60 = vmax.f32 %v652_v58, 0.0 }
 0x177   : > { %v654_v61 = vpack.c.bf16 %v653_v60, %v653_v60 }
 0x179   : > { %656 = vst.msk [vmem:[%s209_s29] sm:$0xf] %vm655_vm2, %v654_v61 }
 0x17a PF: > { %s14_s17 = sadd.s32 1, %s825_s17   ;;  %s1012_s15 = smov %s821_s16 }
 0x17b   : > { %p11_p5 = scmp.ge.s32.totalorder %s14_s17, 4   ;;  %s1013_s16 = smov %s1015_s18 }
 0x17d   :  { %13 = sbr.rel (!%p11_p5) target bundleno = 2 (0x2), region = 80 }

// kernel: freqnet_forward.32
= control target key start
LH: loop header
LB: loop body
LE: loop exit
PB: predicated region body
PF: predicated region fallthrough
CT: control target
= control target key end

     0   :  { %s886_s18 = smov 0   ;;  %s888_s19 = smov 0   ;;  %s1008_s0 = inlined_call_operand.vmem [shape: bf16[2,1,8,30], index: 0, kind: input, shape index: {}]   ;;  %s1009_s1 = inlined_call_operand.vmem [shape: bf16[15,8,8], index: 1, kind: input, shape index: {}]   ;;  %s1010_s2 = inlined_call_operand.vmem [shape: f32[8,1], index: 2, kind: input, shape index: {}]   ;;  %s1011_s3 = inlined_call_operand.vmem [shape: f32[8,1], index: 3, kind: input, shape index: {}]   ;;  %s1012_s4 = inlined_call_operand.vmem [shape: bf16[2,8,16], index: 4, kind: input, shape index: {}]   ;;  %s1013_s5 = inlined_call_operand.vmem [shape: bf16[2,8,16], index: 5, kind: output, shape index: {}]  }
   0x1   :  { %s890_s20 = smov 0  }
   0x2 LB: > { %s27_s21 = sadd.s32 1, %s835_s19  ;;  %p741_p0 = scmp.ge.s32.totalorder %s839_s20, 1  ;;  %s839_s20 = sphi %s890_s20, %s15_s20   ;;  %s835_s19 = sphi %s888_s19, %s1015_s19   ;;  %s831_s18 = sphi %s886_s18, %s1014_s18  }
   0x3   : > { %p29_p1 = scmp.ge.s32.totalorder %s27_s21, 2  ;;  %p214_p2 = scmp.lt.s32.totalorder %s839_s20, 3 }
   0x5   : > { %s1017_s21 = smov (%p29_p1, %s27_s21), 0  ;;  %p215_p3 = pnand %p741_p0, %p214_p2 }
   0x6   : > { %p250_p4 = scmp.lt.s32.totalorder (!%p215_p3), %s831_s18, 1  ;;  %s841_s26 = smov (!%p215_p3), 126  }
   0x7   : > { %218 = sbr.rel (%p215_p3) target bundleno = 338 (0x152), region = 40  ;;  %s842_s27 = smov (!%p215_p3), 125  }
   0x8   : > { %s843_s28 = smov (!%p215_p3), 124   ;;  %s844_s29 = smov (!%p215_p3), 127  }
   0x9   : > { %s845_s30 = smov (!%p215_p3), 122   ;;  %s846_s6 = smov (!%p215_p3), 123  }
   0xa   : > { %s847_s7 = smov (!%p215_p3), 121   ;;  %s848_s8 = smov (!%p215_p3), 118  }
   0xb   : > { %s849_s9 = smov (!%p215_p3), 120   ;;  %s850_s10 = smov (!%p215_p3), 119  }
   0xc   : > { %s1019_s18 = smov (!%p250_p4, %s831_s18), 1  ;;  %s851_s11 = smov 117   ;;  %vm282_vm0 = vcmask 1043456   ;;  %vm278_vm1 = vcmask 64512   ;;  %v270_v4 = vld [vmem:[%s1009_s1] sm:$0xf] }
   0xd   : > { %s904_s22 = sshll.u32 %s1019_s18, 2  ;;  %s852_s12 = smov 114   ;;  %v754_v8 = vld [vmem:[%s1009_s1 + $0x14] sm:$0xf]  ;;  %v748_v13 = vld [vmem:[%s1009_s1 + $0x8] sm:$0xf] }
   0xe   : > { %s253_s25 = scalar_lea.vmem %s1008_s0, %s904_s22  ;;  %s853_s13 = smov 116   ;;  %v750_v14 = vld [vmem:[%s1009_s1 + $0xc] sm:$0xf]  ;;  %v745_v21 = vld [vmem:[%s1009_s1 + $0x4] sm:$0xf]  ;;  %v855_v39 = vmov 0  }
   0xf   : > { %v269_v0 = vld [vmem:[%s253_s25] sm:$0xf]  ;;  %s854_s14 = smov 115   ;;  %v756_v28 = vld [vmem:[%s1009_s1 + $0x18] sm:$0xf]  ;;  %816 = vset.pattern.permute.xlu0 %v855_v39  ;;  %815 = vset.pattern.permute.xlu2 %v855_v39  ;;  %vm649_vm2 = vcmask 125952  }
  0x10   : > { %v274_v1 = vunpack.c.l.b16 %v269_v0  ;;  %v303_v3 = vsel %vm282_vm0, %v269_v0, 0  ;;  %v758_v29 = vld [vmem:[%s1009_s1 + $0x1c] sm:$0xf]  ;;  %v752_v35 = vld [vmem:[%s1009_s1 + $0x10] sm:$0xf]  ;;  %v637_v37 = vld [vmem:[%s1011_s3] sm:$0xff] }
  0x11   : > { %312 = vmatpush.bf16.msra.mxu1 %v303_v3  ;;  %v762_v36 = vld [vmem:[%s1009_s1 + $0x24] sm:$0xf]  ;;  %v764_v44 = vld [vmem:[%s1009_s1 + $0x28] sm:$0xf]  ;;  %v766_v45 = vld [vmem:[%s1009_s1 + $0x2c] sm:$0xf] }
  0x12   : > { %v275_v2 = vpack.c.b16 %v274_v1, %v274_v1  ;;  %v630_v38 = vld [vmem:[%s1010_s2] sm:$0xff]  ;;  %v770_v47 = vld [vmem:[%s1009_s1 + $0x34] sm:$0xf]  ;;  %v772_v48 = vld [vmem:[%s1009_s1 + $0x38] sm:$0xf] }
  0x13   : > { %v760_v46 = vld [vmem:[%s1009_s1 + $0x20] sm:$0xf]  ;;  %v768_v49 = vld [vmem:[%s1009_s1 + $0x30] sm:$0xf] }
  0x14   : > { %320 = vrot.lane.b32.xlu0 %v275_v2, %s841_s26  ;;  %344 = vrot.lane.b32.xlu1 %v275_v2, %s842_s27 }
  0x15   : > { %368 = vrot.lane.b32.xlu2 %v275_v2, %s843_s28  ;;  %747 = vmatmul.msk.bf16.vlgmr.msra.gmra.mxu1 %vm278_vm1, %v270_v4 }
  0x1c   : > { %276 = vrot.lane.b32.xlu0 %v275_v2, %s844_s29  ;;  %416 = vrot.lane.b32.xlu1 %v275_v2, %s845_s30 }
  0x1d   : > { %392 = vrot.lane.b32.xlu2 %v275_v2, %s846_s6 }
  0x24   : > { %440 = vrot.lane.b32.xlu0 %v275_v2, %s847_s7  ;;  %512 = vrot.lane.b32.xlu1 %v275_v2, %s848_s8 }
  0x25   : > { %464 = vrot.lane.b32.xlu2 %v275_v2, %s849_s9  ;;  %s260_s9 = scalar_lea.vmem %s1012_s4, %s904_s22 }
  0x2c   : > { %488 = vrot.lane.b32.xlu0 %v275_v2, %s850_s10  ;;  %536 = vrot.lane.b32.xlu1 %v275_v2, %s851_s11 }
  0x2d   : > { %608 = vrot.lane.b32.xlu2 %v275_v2, %s852_s12  ;;  %s267_s12 = scalar_lea.vmem %s1013_s5, %s904_s22 }
  0x34   : > { %560 = vrot.lane.b32.xlu0 %v275_v2, %s853_s13  ;;  %584 = vrot.lane.b32.xlu1 %v275_v2, %s854_s14 }
  0x35   : > { %633 = vperm.xlu2 %815, %v630_v38  }
  0x3c   : > { %640 = vperm.xlu0 %816, %v637_v37  }
  0x6f   : > { %v369_v5 = vpop.permute.xlu2 %368 }
  0x70   : > { %v374_v18 = vsel %vm282_vm0, %v369_v5, 0 }
  0x77   : > { %v393_v6 = vpop.permute.xlu2 %392 }
  0x78   : > { %v398_v7 = vsel %vm282_vm0, %v393_v6, 0 }
  0x79   : > { %407 = vmatpush.bf16.msrb.mxu1 %v398_v7 }
  0x7c   : > { %755 = vmatmul.msk.bf16.vlgmr.msrb.gmra.mxu1 %vm278_vm1, %v754_v8 }
  0x7f   : > { %v465_v15 = vpop.permute.xlu2 %464 }
  0x80   : > { %v470_v22 = vsel %vm282_vm0, %v465_v15, 0 }
  0x86   : > { %v321_v9 = vpop.permute.xlu0 %320  ;;  %v345_v10 = vpop.permute.xlu1 %344 }
  0x87   : > { %v326_v11 = vsel %vm282_vm0, %v321_v9, 0  ;;  %v350_v12 = vsel %vm282_vm0, %v345_v10, 0  ;;  %v609_v23 = vpop.permute.xlu2 %608 }
  0x88   : > { %335 = vmatpush.bf16.msra.mxu2 %v326_v11  ;;  %359 = vmatpush.bf16.msra.mxu3 %v350_v12  ;;  %v614_v30 = vsel %vm282_vm0, %v609_v23, 0 }
  0x8b   : > { %749 = vmatmul.msk.bf16.vlgmr.msra.gmra.mxu2 %vm278_vm1, %v748_v13  ;;  %751 = vmatmul.msk.bf16.vlgmr.msra.gmra.mxu3 %vm278_vm1, %v750_v14 }
  0x8e   : > { %v277_v16 = vpop.permute.xlu0 %276  ;;  %v417_v17 = vpop.permute.xlu1 %416 }
  0x8f   : > { %v284_v19 = vsel %vm282_vm0, %v277_v16, 0  ;;  %v422_v20 = vsel %vm282_vm0, %v417_v17, 0 }
  0x90   : > { %293 = vmatpush.bf16.msra.mxu0 %v284_v19  ;;  %431 = vmatpush.bf16.msrb.mxu2 %v422_v20 }
  0x92   : > { %v314_v50 = vpop.f32.mrf.mxu1 }
  0x93   : > { %746 = vmatmul.msk.bf16.vlgmr.msra.gmra.mxu0 %vm278_vm1, %v745_v21 }
  0x94   : > { %383 = vmatpush.bf16.msrb.mxu0 %v374_v18 }
  0x96   : > { %v441_v24 = vpop.permute.xlu0 %440  ;;  %v513_v25 = vpop.permute.xlu1 %512 }
  0x97   : > { %v446_v26 = vsel %vm282_vm0, %v441_v24, 0  ;;  %v518_v27 = vsel %vm282_vm0, %v513_v25, 0 }
  0x98   : > { %479 = vmatpush.bf16.msra.mxu0 %v470_v22  ;;  %455 = vmatpush.bf16.msrb.mxu3 %v446_v26 }
  0x99   : > { %527 = vmatpush.bf16.msra.mxu2 %v518_v27  ;;  %v634_v27 = vpop.permute.xlu2 %633 }
  0x9a   : > { %v316_v51 = vpop.f32.mrf.mxu1 }
  0x9b   : > { %757 = vmatmul.msk.bf16.vlgmr.msrb.gmra.mxu2 %vm278_vm1, %v756_v28  ;;  %759 = vmatmul.msk.bf16.vlgmr.msrb.gmra.mxu3 %vm278_vm1, %v758_v29 }
  0x9d   : > { %623 = vmatpush.bf16.msrb.mxu2 %v614_v30  ;;  %v645_v30 = vld [vmem:[%s260_s9] sm:$0xf] }
  0x9e   : > { %v489_v31 = vpop.permute.xlu0 %488  ;;  %v537_v32 = vpop.permute.xlu1 %536 }
  0x9f   : > { %v494_v33 = vsel %vm282_vm0, %v489_v31, 0  ;;  %v542_v34 = vsel %vm282_vm0, %v537_v32, 0 }
  0xa0   : > { %503 = vmatpush.bf16.msra.mxu1 %v494_v33  ;;  %551 = vmatpush.bf16.msra.mxu3 %v542_v34  ;;  %v646_v34 = vunpack.c.l.bf16 %v645_v30 }
  0xa3   : > { %753 = vmatmul.msk.bf16.vlgmr.msrb.gmra.mxu0 %vm278_vm1, %v752_v35  ;;  %763 = vmatmul.msk.bf16.vlgmr.msra.gmra.mxu1 %vm278_vm1, %v762_v36 }
  0xa6   : > { %v561_v40 = vpop.permute.xlu0 %560  ;;  %v585_v41 = vpop.permute.xlu1 %584 }
  0xa7   : > { %v566_v42 = vsel %vm282_vm0, %v561_v40, 0  ;;  %v590_v43 = vsel %vm282_vm0, %v585_v41, 0 }
  0xa8   : > { %575 = vmatpush.bf16.msrb.mxu0 %v566_v42  ;;  %599 = vmatpush.bf16.msrb.mxu1 %v590_v43 }
  0xab   : > { %765 = vmatmul.msk.bf16.vlgmr.msra.gmra.mxu2 %vm278_vm1, %v764_v44  ;;  %767 = vmatmul.msk.bf16.vlgmr.msra.gmra.mxu3 %vm278_vm1, %v766_v45 }
  0xae   : > { %v641_v31 = vpop.permute.xlu0 %640 }
  0xb3   : > { %761 = vmatmul.msk.bf16.vlgmr.msra.gmra.mxu0 %vm278_vm1, %v760_v46  ;;  %771 = vmatmul.msk.bf16.vlgmr.msrb.gmra.mxu1 %vm278_vm1, %v770_v47 }
  0xbb   : > { %773 = vmatmul.msk.bf16.vlgmr.msrb.gmra.mxu2 %vm278_vm1, %v772_v48 }
  0xc3   : > { %769 = vmatmul.msk.bf16.vlgmr.msrb.gmra.mxu0 %vm278_vm1, %v768_v49 }
  0xf9   : > { %v409_v52 = vpop.f32.mrf.mxu1 }
 0x101   : > { %v411_v53 = vpop.f32.mrf.mxu1 }
 0x10e   : > { %v337_v54 = vpop.f32.mrf.mxu2  ;;  %v361_v55 = vpop.f32.mrf.mxu3 }
 0x110   : > { %v295_v56 = vpop.f32.mrf.mxu0 }
 0x111   : > { %v315_v60 = vadd.f32 %v314_v50, %v295_v56 }
 0x113   : > { %v341_v63 = vadd.f32 %v337_v54, %v315_v60 }
 0x115   : > { %v365_v2 = vadd.f32 %v361_v55, %v341_v63 }
 0x116   : > { %v339_v57 = vpop.f32.mrf.mxu2  ;;  %v363_v58 = vpop.f32.mrf.mxu3 }
 0x118   : > { %v297_v59 = vpop.f32.mrf.mxu0 }
 0x11e   : > { %v433_v61 = vpop.f32.mrf.mxu2  ;;  %v457_v62 = vpop.f32.mrf.mxu3 }
 0x120   : > { %v385_v0 = vpop.f32.mrf.mxu0  ;;  %v505_v1 = vpop.f32.mrf.mxu1 }
 0x121   : > { %v389_v3 = vadd.f32 %v385_v0, %v365_v2 }
 0x123   : > { %v413_v8 = vadd.f32 %v409_v52, %v389_v3 }
 0x125   : > { %v437_v9 = vadd.f32 %v433_v61, %v413_v8 }
 0x126   : > { %v435_v4 = vpop.f32.mrf.mxu2  ;;  %v459_v5 = vpop.f32.mrf.mxu3 }
 0x127   : > { %v461_v14 = vadd.f32 %v457_v62, %v437_v9 }
 0x128   : > { %v387_v6 = vpop.f32.mrf.mxu0  ;;  %v507_v7 = vpop.f32.mrf.mxu1 }
 0x12e   : > { %v529_v10 = vpop.f32.mrf.mxu2  ;;  %v553_v11 = vpop.f32.mrf.mxu3 }
 0x130   : > { %v481_v12 = vpop.f32.mrf.mxu0  ;;  %v601_v13 = vpop.f32.mrf.mxu1 }
 0x131   : > { %v485_v15 = vadd.f32 %v481_v12, %v461_v14 }
 0x133   : > { %v509_v18 = vadd.f32 %v505_v1, %v485_v15 }
 0x135   : > { %v533_v21 = vadd.f32 %v529_v10, %v509_v18 }
 0x136   : > { %v531_v16 = vpop.f32.mrf.mxu2  ;;  %v555_v17 = vpop.f32.mrf.mxu3 }
 0x137   : > { %v557_v23 = vadd.f32 %v553_v11, %v533_v21 }
 0x138   : > { %v483_v19 = vpop.f32.mrf.mxu0  ;;  %v603_v20 = vpop.f32.mrf.mxu1 }
 0x13e   : > { %v625_v22 = vpop.f32.mrf.mxu2 }
 0x140   : > { %v577_v24 = vpop.f32.mrf.mxu0 }
 0x141   : > { %v581_v25 = vadd.f32 %v577_v24, %v557_v23 }
 0x143   : > { %v605_v26 = vadd.f32 %v601_v13, %v581_v25 }
 0x145   : > { %v629_v28 = vadd.f32 %v625_v22, %v605_v26 }
 0x146   : > { %v627_v29 = vpop.f32.mrf.mxu2 }
 0x147   : > { %v636_v32 = vmul.f32 %v634_v27, %v629_v28 }
 0x148   : > { %v579_v33 = vpop.f32.mrf.mxu0 }
 0x149   : > { %v643_v35 = vadd.f32 %v641_v31, %v636_v32 }
 0x14b   : > { %v644_v36 = vmax.f32 %v643_v35, 0.0 }
 0x14d   : > { %v647_v37 = vadd.f32 %v646_v34, %v644_v36 }
 0x14f   : > { %v648_v38 = vpack.c.bf16 %v647_v37, %v647_v37 }
 0x151   : > { %650 = vst.msk [vmem:[%s267_s12] sm:$0xf] %vm649_vm2, %v648_v38 }
 0x152 PF: > { %s15_s20 = sadd.s32 1, %s839_s20   ;;  %s1014_s18 = smov %s835_s19 }
 0x153   : > { %p12_p5 = scmp.ge.s32.totalorder %s15_s20, 4   ;;  %s1015_s19 = smov %s1017_s21 }
 0x155   :  { %14 = sbr.rel (!%p12_p5) target bundleno = 2 (0x2), region = 87 }

// kernel: freqnet_forward.31
= control target key start
LH: loop header
LB: loop body
LE: loop exit
PB: predicated region body
PF: predicated region fallthrough
CT: control target
= control target key end

     0   :  { %s807_s15 = smov 0   ;;  %s809_s16 = smov 0   ;;  %s928_s0 = inlined_call_operand.vmem [shape: bf16[2,1,8,30], index: 0, kind: input, shape index: {}]   ;;  %s929_s1 = inlined_call_operand.vmem [shape: bf16[15,8,8], index: 1, kind: input, shape index: {}]   ;;  %s930_s2 = inlined_call_operand.vmem [shape: f32[8,1], index: 2, kind: input, shape index: {}]   ;;  %s931_s3 = inlined_call_operand.vmem [shape: f32[8,1], index: 3, kind: input, shape index: {}]   ;;  %s932_s4 = inlined_call_operand.vmem [shape: bf16[2,8,16], index: 4, kind: output, shape index: {}]  }
   0x1   :  { %s811_s17 = smov 0  }
   0x2 LB: > { %s26_s18 = sadd.s32 1, %s761_s16  ;;  %p668_p0 = scmp.ge.s32.totalorder %s765_s17, 1  ;;  %s765_s17 = sphi %s811_s17, %s14_s17   ;;  %s761_s16 = sphi %s809_s16, %s934_s16   ;;  %s757_s15 = sphi %s807_s15, %s933_s15  }
   0x3   : > { %p28_p1 = scmp.ge.s32.totalorder %s26_s18, 2  ;;  %p175_p2 = scmp.lt.s32.totalorder %s765_s17, 3 }
   0x5   : > { %s936_s18 = smov (%p28_p1, %s26_s18), 0  ;;  %p176_p3 = pnand %p668_p0, %p175_p2 }
   0x6   : > { %p202_p4 = scmp.lt.s32.totalorder (!%p176_p3), %s757_s15, 1  ;;  %s767_s23 = smov (!%p176_p3), 126  }
   0x7   : > { %179 = sbr.rel (%p176_p3) target bundleno = 336 (0x150), region = 36  ;;  %s768_s24 = smov (!%p176_p3), 125  }
   0x8   : > { %s769_s25 = smov (!%p176_p3), 124   ;;  %s770_s26 = smov (!%p176_p3), 127  }
   0x9   : > { %s771_s27 = smov (!%p176_p3), 122   ;;  %s772_s28 = smov (!%p176_p3), 123  }
   0xa   : > { %s773_s29 = smov (!%p176_p3), 121   ;;  %s774_s30 = smov (!%p176_p3), 118  }
   0xb   : > { %s775_s5 = smov (!%p176_p3), 120   ;;  %s776_s6 = smov (!%p176_p3), 119  }
   0xc   : > { %s938_s15 = smov (!%p202_p4, %s757_s15), 1  ;;  %s777_s7 = smov 117   ;;  %vm227_vm0 = vcmask 1043456   ;;  %vm223_vm1 = vcmask 64512   ;;  %v215_v4 = vld [vmem:[%s929_s1] sm:$0xf] }
   0xd   : > { %s669_s19 = sshll.u32 %s938_s15, 2  ;;  %s778_s8 = smov 114   ;;  %v680_v8 = vld [vmem:[%s929_s1 + $0x14] sm:$0xf]  ;;  %v674_v13 = vld [vmem:[%s929_s1 + $0x8] sm:$0xf] }
   0xe   : > { %s205_s22 = scalar_lea.vmem %s928_s0, %s669_s19  ;;  %s779_s9 = smov 116   ;;  %v676_v14 = vld [vmem:[%s929_s1 + $0xc] sm:$0xf]  ;;  %v671_v21 = vld [vmem:[%s929_s1 + $0x4] sm:$0xf]  ;;  %v781_v39 = vmov 0  }
   0xf   : > { %v214_v0 = vld [vmem:[%s205_s22] sm:$0xf]  ;;  %s780_s10 = smov 115   ;;  %v682_v28 = vld [vmem:[%s929_s1 + $0x18] sm:$0xf]  ;;  %742 = vset.pattern.permute.xlu0 %v781_v39  ;;  %741 = vset.pattern.permute.xlu2 %v781_v39  ;;  %vm591_vm2 = vcmask 125952  }
  0x10   : > { %v219_v1 = vunpack.c.l.b16 %v214_v0  ;;  %v248_v3 = vsel %vm227_vm0, %v214_v0, 0  ;;  %v684_v29 = vld [vmem:[%s929_s1 + $0x1c] sm:$0xf]  ;;  %v678_v35 = vld [vmem:[%s929_s1 + $0x10] sm:$0xf]  ;;  %v582_v37 = vld [vmem:[%s931_s3] sm:$0xff] }
  0x11   : > { %257 = vmatpush.bf16.msra.mxu1 %v248_v3  ;;  %v688_v36 = vld [vmem:[%s929_s1 + $0x24] sm:$0xf]  ;;  %v690_v44 = vld [vmem:[%s929_s1 + $0x28] sm:$0xf]  ;;  %v692_v45 = vld [vmem:[%s929_s1 + $0x2c] sm:$0xf] }
  0x12   : > { %v220_v2 = vpack.c.b16 %v219_v1, %v219_v1  ;;  %v575_v38 = vld [vmem:[%s930_s2] sm:$0xff]  ;;  %v696_v47 = vld [vmem:[%s929_s1 + $0x34] sm:$0xf]  ;;  %v698_v48 = vld [vmem:[%s929_s1 + $0x38] sm:$0xf] }
  0x13   : > { %v686_v46 = vld [vmem:[%s929_s1 + $0x20] sm:$0xf]  ;;  %v694_v49 = vld [vmem:[%s929_s1 + $0x30] sm:$0xf] }
  0x14   : > { %265 = vrot.lane.b32.xlu0 %v220_v2, %s767_s23  ;;  %289 = vrot.lane.b32.xlu1 %v220_v2, %s768_s24 }
  0x15   : > { %313 = vrot.lane.b32.xlu2 %v220_v2, %s769_s25  ;;  %673 = vmatmul.msk.bf16.vlgmr.msra.gmra.mxu1 %vm223_vm1, %v215_v4 }
  0x1c   : > { %221 = vrot.lane.b32.xlu0 %v220_v2, %s770_s26  ;;  %361 = vrot.lane.b32.xlu1 %v220_v2, %s771_s27 }
  0x1d   : > { %337 = vrot.lane.b32.xlu2 %v220_v2, %s772_s28 }
  0x24   : > { %385 = vrot.lane.b32.xlu0 %v220_v2, %s773_s29  ;;  %457 = vrot.lane.b32.xlu1 %v220_v2, %s774_s30 }
  0x25   : > { %409 = vrot.lane.b32.xlu2 %v220_v2, %s775_s5  ;;  %s212_s5 = scalar_lea.vmem %s932_s4, %s669_s19 }
  0x2c   : > { %433 = vrot.lane.b32.xlu0 %v220_v2, %s776_s6  ;;  %481 = vrot.lane.b32.xlu1 %v220_v2, %s777_s7 }
  0x2d   : > { %553 = vrot.lane.b32.xlu2 %v220_v2, %s778_s8 }
  0x34   : > { %505 = vrot.lane.b32.xlu0 %v220_v2, %s779_s9  ;;  %529 = vrot.lane.b32.xlu1 %v220_v2, %s780_s10 }
  0x35   : > { %578 = vperm.xlu2 %741, %v575_v38  }
  0x3c   : > { %585 = vperm.xlu0 %742, %v582_v37  }
  0x6f   : > { %v314_v5 = vpop.permute.xlu2 %313 }
  0x70   : > { %v319_v18 = vsel %vm227_vm0, %v314_v5, 0 }
  0x77   : > { %v338_v6 = vpop.permute.xlu2 %337 }
  0x78   : > { %v343_v7 = vsel %vm227_vm0, %v338_v6, 0 }
  0x79   : > { %352 = vmatpush.bf16.msrb.mxu1 %v343_v7 }
  0x7c   : > { %681 = vmatmul.msk.bf16.vlgmr.msrb.gmra.mxu1 %vm223_vm1, %v680_v8 }
  0x7f   : > { %v410_v15 = vpop.permute.xlu2 %409 }
  0x80   : > { %v415_v22 = vsel %vm227_vm0, %v410_v15, 0 }
  0x86   : > { %v266_v9 = vpop.permute.xlu0 %265  ;;  %v290_v10 = vpop.permute.xlu1 %289 }
  0x87   : > { %v271_v11 = vsel %vm227_vm0, %v266_v9, 0  ;;  %v295_v12 = vsel %vm227_vm0, %v290_v10, 0  ;;  %v554_v23 = vpop.permute.xlu2 %553 }
  0x88   : > { %280 = vmatpush.bf16.msra.mxu2 %v271_v11  ;;  %304 = vmatpush.bf16.msra.mxu3 %v295_v12  ;;  %v559_v30 = vsel %vm227_vm0, %v554_v23, 0 }
  0x8b   : > { %675 = vmatmul.msk.bf16.vlgmr.msra.gmra.mxu2 %vm223_vm1, %v674_v13  ;;  %677 = vmatmul.msk.bf16.vlgmr.msra.gmra.mxu3 %vm223_vm1, %v676_v14 }
  0x8e   : > { %v222_v16 = vpop.permute.xlu0 %221  ;;  %v362_v17 = vpop.permute.xlu1 %361 }
  0x8f   : > { %v229_v19 = vsel %vm227_vm0, %v222_v16, 0  ;;  %v367_v20 = vsel %vm227_vm0, %v362_v17, 0 }
  0x90   : > { %238 = vmatpush.bf16.msra.mxu0 %v229_v19  ;;  %376 = vmatpush.bf16.msrb.mxu2 %v367_v20 }
  0x92   : > { %v259_v50 = vpop.f32.mrf.mxu1 }
  0x93   : > { %672 = vmatmul.msk.bf16.vlgmr.msra.gmra.mxu0 %vm223_vm1, %v671_v21 }
  0x94   : > { %328 = vmatpush.bf16.msrb.mxu0 %v319_v18 }
  0x96   : > { %v386_v24 = vpop.permute.xlu0 %385  ;;  %v458_v25 = vpop.permute.xlu1 %457 }
  0x97   : > { %v391_v26 = vsel %vm227_vm0, %v386_v24, 0  ;;  %v463_v27 = vsel %vm227_vm0, %v458_v25, 0 }
  0x98   : > { %424 = vmatpush.bf16.msra.mxu0 %v415_v22  ;;  %400 = vmatpush.bf16.msrb.mxu3 %v391_v26 }
  0x99   : > { %472 = vmatpush.bf16.msra.mxu2 %v463_v27  ;;  %v579_v27 = vpop.permute.xlu2 %578 }
  0x9a   : > { %v261_v51 = vpop.f32.mrf.mxu1 }
  0x9b   : > { %683 = vmatmul.msk.bf16.vlgmr.msrb.gmra.mxu2 %vm223_vm1, %v682_v28  ;;  %685 = vmatmul.msk.bf16.vlgmr.msrb.gmra.mxu3 %vm223_vm1, %v684_v29 }
  0x9d   : > { %568 = vmatpush.bf16.msrb.mxu2 %v559_v30 }
  0x9e   : > { %v434_v31 = vpop.permute.xlu0 %433  ;;  %v482_v32 = vpop.permute.xlu1 %481 }
  0x9f   : > { %v439_v33 = vsel %vm227_vm0, %v434_v31, 0  ;;  %v487_v34 = vsel %vm227_vm0, %v482_v32, 0 }
  0xa0   : > { %448 = vmatpush.bf16.msra.mxu1 %v439_v33  ;;  %496 = vmatpush.bf16.msra.mxu3 %v487_v34 }
  0xa3   : > { %679 = vmatmul.msk.bf16.vlgmr.msrb.gmra.mxu0 %vm223_vm1, %v678_v35  ;;  %689 = vmatmul.msk.bf16.vlgmr.msra.gmra.mxu1 %vm223_vm1, %v688_v36 }
  0xa6   : > { %v506_v40 = vpop.permute.xlu0 %505  ;;  %v530_v41 = vpop.permute.xlu1 %529 }
  0xa7   : > { %v511_v42 = vsel %vm227_vm0, %v506_v40, 0  ;;  %v535_v43 = vsel %vm227_vm0, %v530_v41, 0 }
  0xa8   : > { %520 = vmatpush.bf16.msrb.mxu0 %v511_v42  ;;  %544 = vmatpush.bf16.msrb.mxu1 %v535_v43 }
  0xab   : > { %691 = vmatmul.msk.bf16.vlgmr.msra.gmra.mxu2 %vm223_vm1, %v690_v44  ;;  %693 = vmatmul.msk.bf16.vlgmr.msra.gmra.mxu3 %vm223_vm1, %v692_v45 }
  0xae   : > { %v586_v30 = vpop.permute.xlu0 %585 }
  0xb3   : > { %687 = vmatmul.msk.bf16.vlgmr.msra.gmra.mxu0 %vm223_vm1, %v686_v46  ;;  %697 = vmatmul.msk.bf16.vlgmr.msrb.gmra.mxu1 %vm223_vm1, %v696_v47 }
  0xbb   : > { %699 = vmatmul.msk.bf16.vlgmr.msrb.gmra.mxu2 %vm223_vm1, %v698_v48 }
  0xc3   : > { %695 = vmatmul.msk.bf16.vlgmr.msrb.gmra.mxu0 %vm223_vm1, %v694_v49 }
  0xf9   : > { %v354_v52 = vpop.f32.mrf.mxu1 }
 0x101   : > { %v356_v53 = vpop.f32.mrf.mxu1 }
 0x10e   : > { %v282_v54 = vpop.f32.mrf.mxu2  ;;  %v306_v55 = vpop.f32.mrf.mxu3 }
 0x110   : > { %v240_v56 = vpop.f32.mrf.mxu0 }
 0x111   : > { %v260_v60 = vadd.f32 %v259_v50, %v240_v56 }
 0x113   : > { %v286_v63 = vadd.f32 %v282_v54, %v260_v60 }
 0x115   : > { %v310_v2 = vadd.f32 %v306_v55, %v286_v63 }
 0x116   : > { %v284_v57 = vpop.f32.mrf.mxu2  ;;  %v308_v58 = vpop.f32.mrf.mxu3 }
 0x118   : > { %v242_v59 = vpop.f32.mrf.mxu0 }
 0x11e   : > { %v378_v61 = vpop.f32.mrf.mxu2  ;;  %v402_v62 = vpop.f32.mrf.mxu3 }
 0x120   : > { %v330_v0 = vpop.f32.mrf.mxu0  ;;  %v450_v1 = vpop.f32.mrf.mxu1 }
 0x121   : > { %v334_v3 = vadd.f32 %v330_v0, %v310_v2 }
 0x123   : > { %v358_v8 = vadd.f32 %v354_v52, %v334_v3 }
 0x125   : > { %v382_v9 = vadd.f32 %v378_v61, %v358_v8 }
 0x126   : > { %v380_v4 = vpop.f32.mrf.mxu2  ;;  %v404_v5 = vpop.f32.mrf.mxu3 }
 0x127   : > { %v406_v14 = vadd.f32 %v402_v62, %v382_v9 }
 0x128   : > { %v332_v6 = vpop.f32.mrf.mxu0  ;;  %v452_v7 = vpop.f32.mrf.mxu1 }
 0x12e   : > { %v474_v10 = vpop.f32.mrf.mxu2  ;;  %v498_v11 = vpop.f32.mrf.mxu3 }
 0x130   : > { %v426_v12 = vpop.f32.mrf.mxu0  ;;  %v546_v13 = vpop.f32.mrf.mxu1 }
 0x131   : > { %v430_v15 = vadd.f32 %v426_v12, %v406_v14 }
 0x133   : > { %v454_v18 = vadd.f32 %v450_v1, %v430_v15 }
 0x135   : > { %v478_v21 = vadd.f32 %v474_v10, %v454_v18 }
 0x136   : > { %v476_v16 = vpop.f32.mrf.mxu2  ;;  %v500_v17 = vpop.f32.mrf.mxu3 }
 0x137   : > { %v502_v23 = vadd.f32 %v498_v11, %v478_v21 }
 0x138   : > { %v428_v19 = vpop.f32.mrf.mxu0  ;;  %v548_v20 = vpop.f32.mrf.mxu1 }
 0x13e   : > { %v570_v22 = vpop.f32.mrf.mxu2 }
 0x140   : > { %v522_v24 = vpop.f32.mrf.mxu0 }
 0x141   : > { %v526_v25 = vadd.f32 %v522_v24, %v502_v23 }
 0x143   : > { %v550_v26 = vadd.f32 %v546_v13, %v526_v25 }
 0x145   : > { %v574_v28 = vadd.f32 %v570_v22, %v550_v26 }
 0x146   : > { %v572_v29 = vpop.f32.mrf.mxu2 }
 0x147   : > { %v581_v31 = vmul.f32 %v579_v27, %v574_v28 }
 0x148   : > { %v524_v32 = vpop.f32.mrf.mxu0 }
 0x149   : > { %v588_v33 = vadd.f32 %v586_v30, %v581_v31 }
 0x14b   : > { %v589_v34 = vmax.f32 %v588_v33, 0.0 }
 0x14d   : > { %v590_v35 = vpack.c.bf16 %v589_v34, %v589_v34 }
 0x14f   : > { %592 = vst.msk [vmem:[%s212_s5] sm:$0xf] %vm591_vm2, %v590_v35 }
 0x150 PF: > { %s14_s17 = sadd.s32 1, %s765_s17   ;;  %s933_s15 = smov %s761_s16 }
 0x151   : > { %p11_p5 = scmp.ge.s32.totalorder %s14_s17, 4   ;;  %s934_s16 = smov %s936_s18 }
 0x153   :  { %13 = sbr.rel (!%p11_p5) target bundleno = 2 (0x2), region = 80 }

// kernel: freqnet_forward.33
= control target key start
LH: loop header
LB: loop body
LE: loop exit
PB: predicated region body
PF: predicated region fallthrough
CT: control target
= control target key end

     0   :  { %s1037_s15 = smov 0   ;;  %s1039_s16 = smov 0   ;;  %s1164_s0 = inlined_call_operand.vmem [shape: bf16[2,2,8,15], index: 0, kind: input, shape index: {}]   ;;  %s1165_s1 = inlined_call_operand.vmem [shape: bf16[15,16,8], index: 1, kind: input, shape index: {}]   ;;  %s1166_s2 = inlined_call_operand.vmem [shape: f32[16,1], index: 2, kind: input, shape index: {}]   ;;  %s1167_s3 = inlined_call_operand.vmem [shape: f32[16,1], index: 3, kind: input, shape index: {}]   ;;  %s1168_s4 = inlined_call_operand.vmem [shape: bf16[2,16,8], index: 4, kind: output, shape index: {}]  }
   0x1   :  { %s1041_s17 = smov 0  }
   0x2 LB: > { %s26_s18 = sadd.s32 1, %s998_s16  ;;  %p817_p0 = scmp.ge.s32.totalorder %s1002_s17, 1  ;;  %s1002_s17 = sphi %s1041_s17, %s14_s17   ;;  %s998_s16 = sphi %s1039_s16, %s1170_s16   ;;  %s994_s15 = sphi %s1037_s15, %s1169_s15  }
   0x3   : > { %p28_p1 = scmp.ge.s32.totalorder %s26_s18, 2  ;;  %p176_p2 = scmp.lt.s32.totalorder %s1002_s17, 3 }
   0x5   : > { %s1172_s18 = smov (%p28_p1, %s26_s18), 0  ;;  %p177_p3 = pnand %p817_p0, %p176_p2 }
   0x6   : > { %p205_p4 = scmp.lt.s32.totalorder (!%p177_p3), %s994_s15, 1  ;;  %s1004_s23 = smov (!%p177_p3), 125  }
   0x7   : > { %180 = sbr.rel (%p177_p3) target bundleno = 338 (0x152), region = 36  ;;  %s1005_s24 = smov (!%p177_p3), 127  }
   0x8   : > { %s1006_s25 = smov (!%p177_p3), 126   ;;  %s1007_s26 = smov (!%p177_p3), 123  }
   0x9   : > { %s1008_s27 = smov (!%p177_p3), 124   ;;  %s1009_s28 = smov (!%p177_p3), 121  }
   0xa   : > { %s1010_s29 = smov (!%p177_p3), 122  }
   0xc   : > { %s1174_s15 = smov (!%p205_p4, %s994_s15), 1  ;;  %vm236_vm0 = vcmask 1043456   ;;  %v931_v8 = vld [vmem:[%s1165_s1 + $0x8] sm:$0xff]  ;;  %v930_v9 = vld [vmem:[%s1165_s1] sm:$0xff]  ;;  %vm232_vm1 = vcmask 64512   ;;  %v932_v21 = vld [vmem:[%s1165_s1 + $0x10] sm:$0xff] }
   0xd   : > { %s928_s19 = sshll.u32 %s1174_s15, 3  ;;  %v935_v12 = vld [vmem:[%s1165_s1 + $0x28] sm:$0xff]  ;;  %v933_v27 = vld [vmem:[%s1165_s1 + $0x18] sm:$0xff]  ;;  %v934_v28 = vld [vmem:[%s1165_s1 + $0x20] sm:$0xff]  ;;  %v1011_v38 = vmov 0   ;;  %vm733_vm2 = vcmask 60416  }
   0xe   : > { %s209_s22 = scalar_lea.vmem %s1164_s0, %s928_s19  ;;  %v939_v16 = vld [vmem:[%s1165_s1 + $0x48] sm:$0xff]  ;;  %v936_v33 = vld [vmem:[%s1165_s1 + $0x30] sm:$0xff]  ;;  %v701_v36 = vld [vmem:[%s1166_s2] sm:$0xff]  ;;  %977 = vset.pattern.permute.xlu1 %v1011_v38  ;;  %979 = vset.pattern.permute.xlu0 %v1011_v38 }
   0xf   : > { %v219_v0 = vld [vmem:[%s209_s22] sm:$0xf]  ;;  %v822_v1 = vld [vmem:[%s209_s22 + $0x4] sm:$0xf]  ;;  %v702_v39 = vld [vmem:[%s1166_s2 + $0x8] sm:$0xff]  ;;  %978 = vset.pattern.permute.xlu2 %v1011_v38 }
  0x10   : > { %v288_v2 = vunpack.c.l.b16 %v219_v0  ;;  %v323_v3 = vunpack.c.l.b16 %v822_v1  ;;  %v238_v6 = vsel %vm236_vm0, %v822_v1, 0  ;;  %v263_v7 = vsel %vm236_vm0, %v219_v0, 0  ;;  %v715_v37 = vld [vmem:[%s1167_s3] sm:$0xff]  ;;  %v937_v42 = vld [vmem:[%s1165_s1 + $0x38] sm:$0xff]  ;;  %v716_v46 = vld [vmem:[%s1167_s3 + $0x8] sm:$0xff] }
  0x11   : > { %247 = vmatpush.bf16.msra.mxu0 %v238_v6  ;;  %272 = vmatpush.bf16.msra.mxu1 %v263_v7  ;;  %v938_v44 = vld [vmem:[%s1165_s1 + $0x40] sm:$0xff]  ;;  %v940_v48 = vld [vmem:[%s1165_s1 + $0x50] sm:$0xff]  ;;  %v943_v50 = vld [vmem:[%s1165_s1 + $0x68] sm:$0xff] }
  0x12   : > { %v289_v4 = vpack.c.b16 %v288_v2, %v288_v2  ;;  %v324_v5 = vpack.c.b16 %v323_v3, %v323_v3  ;;  %v941_v51 = vld [vmem:[%s1165_s1 + $0x58] sm:$0xff]  ;;  %v942_v52 = vld [vmem:[%s1165_s1 + $0x60] sm:$0xff]  ;;  %v944_v53 = vld [vmem:[%s1165_s1 + $0x70] sm:$0xff] }
  0x14   : > { %421 = vrot.lane.b32.xlu1 %v289_v4, %s1004_s23  ;;  %290 = vrot.lane.b32.xlu0 %v289_v4, %s1005_s24 }
  0x15   : > { %389 = vrot.lane.b32.xlu2 %v324_v5, %s1006_s25  ;;  %829 = vmatmul.msk.bf16.vlgmr.msra.gmra.mxu0 %vm232_vm1, %v931_v8 }
  0x16   : > { %834 = vmatmul.msk.bf16.vlgmr.msra.gmra.mxu1 %vm232_vm1, %v930_v9 }
  0x1c   : > { %357 = vrot.lane.b32.xlu1 %v289_v4, %s1006_s25  ;;  %325 = vrot.lane.b32.xlu0 %v324_v5, %s1005_s24 }
  0x1d   : > { %453 = vrot.lane.b32.xlu2 %v324_v5, %s1004_s23 }
  0x24   : > { %549 = vrot.lane.b32.xlu0 %v289_v4, %s1007_s26  ;;  %485 = vrot.lane.b32.xlu1 %v289_v4, %s1008_s27 }
  0x25   : > { %517 = vrot.lane.b32.xlu2 %v324_v5, %s1008_s27 }
  0x2c   : > { %581 = vrot.lane.b32.xlu0 %v324_v5, %s1007_s26  ;;  %677 = vrot.lane.b32.xlu1 %v289_v4, %s1009_s28  ;;  %s217_s28 = scalar_lea.vmem %s1168_s4, %s928_s19 }
  0x2d   : > { %613 = vrot.lane.b32.xlu2 %v289_v4, %s1010_s29 }
  0x34   : > { %645 = vrot.lane.b32.xlu0 %v324_v5, %s1010_s29  ;;  %705 = vperm.xlu1 %977, %v701_v36  }
  0x35   : > { %710 = vperm.xlu2 %978, %v702_v39  }
  0x3c   : > { %719 = vperm.xlu0 %979, %v715_v37   ;;  %724 = vperm.xlu1 %977, %v716_v46  }
  0x6f   : > { %v390_v10 = vpop.permute.xlu2 %389 }
  0x70   : > { %v395_v11 = vsel %vm236_vm0, %v390_v10, 0 }
  0x71   : > { %404 = vmatpush.bf16.msrb.mxu1 %v395_v11 }
  0x74   : > { %862 = vmatmul.msk.bf16.vlgmr.msrb.gmra.mxu1 %vm232_vm1, %v935_v12 }
  0x77   : > { %v454_v13 = vpop.permute.xlu2 %453 }
  0x78   : > { %v459_v24 = vsel %vm236_vm0, %v454_v13, 0 }
  0x7f   : > { %v518_v14 = vpop.permute.xlu2 %517 }
  0x80   : > { %v523_v15 = vsel %vm236_vm0, %v518_v14, 0 }
  0x81   : > { %532 = vmatpush.bf16.msra.mxu1 %v523_v15 }
  0x84   : > { %890 = vmatmul.msk.bf16.vlgmr.msra.gmra.mxu1 %vm232_vm1, %v939_v16 }
  0x86   : > { %v422_v17 = vpop.permute.xlu1 %421  ;;  %v291_v18 = vpop.permute.xlu0 %290 }
  0x87   : > { %v296_v19 = vsel %vm236_vm0, %v291_v18, 0  ;;  %v427_v20 = vsel %vm236_vm0, %v422_v17, 0  ;;  %v614_v29 = vpop.permute.xlu2 %613 }
  0x88   : > { %305 = vmatpush.bf16.msra.mxu2 %v296_v19  ;;  %v619_v32 = vsel %vm236_vm0, %v614_v29, 0 }
  0x8b   : > { %841 = vmatmul.msk.bf16.vlgmr.msra.gmra.mxu2 %vm232_vm1, %v932_v21 }
  0x8c   : > { %436 = vmatpush.bf16.msrb.mxu2 %v427_v20 }
  0x8e   : > { %v358_v22 = vpop.permute.xlu1 %357  ;;  %v326_v23 = vpop.permute.xlu0 %325 }
  0x8f   : > { %v331_v25 = vsel %vm236_vm0, %v326_v23, 0  ;;  %v363_v26 = vsel %vm236_vm0, %v358_v22, 0 }
  0x90   : > { %340 = vmatpush.bf16.msra.mxu3 %v331_v25  ;;  %372 = vmatpush.bf16.msrb.mxu0 %v363_v26 }
  0x92   : > { %v249_v54 = vpop.f32.mrf.mxu0 }
  0x93   : > { %848 = vmatmul.msk.bf16.vlgmr.msra.gmra.mxu3 %vm232_vm1, %v933_v27  ;;  %855 = vmatmul.msk.bf16.vlgmr.msrb.gmra.mxu0 %vm232_vm1, %v934_v28  ;;  %v274_v55 = vpop.f32.mrf.mxu1 }
  0x94   : > { %468 = vmatpush.bf16.msrb.mxu3 %v459_v24  ;;  %v275_v0 = vadd.f32 %v274_v55, %v249_v54 }
  0x96   : > { %v550_v30 = vpop.permute.xlu0 %549  ;;  %v486_v31 = vpop.permute.xlu1 %485 }
  0x97   : > { %v555_v34 = vsel %vm236_vm0, %v550_v30, 0  ;;  %v491_v35 = vsel %vm236_vm0, %v486_v31, 0 }
  0x98   : > { %564 = vmatpush.bf16.msra.mxu2 %v555_v34  ;;  %500 = vmatpush.bf16.msra.mxu0 %v491_v35 }
  0x9a   : > { %v251_v56 = vpop.f32.mrf.mxu0 }
  0x9b   : > { %869 = vmatmul.msk.bf16.vlgmr.msrb.gmra.mxu2 %vm232_vm1, %v936_v33  ;;  %v276_v57 = vpop.f32.mrf.mxu1 }
  0x9c   : > { %628 = vmatpush.bf16.msrb.mxu0 %v619_v32  ;;  %v277_v7 = vadd.f32 %v276_v57, %v251_v56 }
  0x9e   : > { %v582_v40 = vpop.permute.xlu0 %581  ;;  %v678_v41 = vpop.permute.xlu1 %677 }
  0x9f   : > { %v587_v43 = vsel %vm236_vm0, %v582_v40, 0  ;;  %v683_v45 = vsel %vm236_vm0, %v678_v41, 0 }
  0xa0   : > { %596 = vmatpush.bf16.msra.mxu3 %v587_v43  ;;  %692 = vmatpush.bf16.msrb.mxu2 %v683_v45 }
  0xa3   : > { %876 = vmatmul.msk.bf16.vlgmr.msrb.gmra.mxu3 %vm232_vm1, %v937_v42  ;;  %883 = vmatmul.msk.bf16.vlgmr.msra.gmra.mxu0 %vm232_vm1, %v938_v44 }
  0xa6   : > { %v646_v47 = vpop.permute.xlu0 %645  ;;  %v706_v40 = vpop.permute.xlu1 %705 }
  0xa7   : > { %v651_v49 = vsel %vm236_vm0, %v646_v47, 0 }
  0xa8   : > { %660 = vmatpush.bf16.msrb.mxu1 %v651_v49 }
  0xab   : > { %897 = vmatmul.msk.bf16.vlgmr.msra.gmra.mxu2 %vm232_vm1, %v940_v48  ;;  %918 = vmatmul.msk.bf16.vlgmr.msrb.gmra.mxu1 %vm232_vm1, %v943_v50 }
  0xae   : > { %v720_v44 = vpop.permute.xlu0 %719  ;;  %v725_v56 = vpop.permute.xlu1 %724 }
  0xb3   : > { %904 = vmatmul.msk.bf16.vlgmr.msra.gmra.mxu3 %vm232_vm1, %v941_v51  ;;  %911 = vmatmul.msk.bf16.vlgmr.msrb.gmra.mxu0 %vm232_vm1, %v942_v52  ;;  %v711_v52 = vpop.permute.xlu2 %710 }
  0xbb   : > { %925 = vmatmul.msk.bf16.vlgmr.msrb.gmra.mxu2 %vm232_vm1, %v944_v53 }
  0xf1   : > { %v406_v60 = vpop.f32.mrf.mxu1 }
  0xf9   : > { %v408_v1 = vpop.f32.mrf.mxu1 }
 0x101   : > { %v534_v10 = vpop.f32.mrf.mxu1 }
 0x109   : > { %v536_v23 = vpop.f32.mrf.mxu1 }
 0x10e   : > { %v307_v58 = vpop.f32.mrf.mxu2 }
 0x10f   : > { %v312_v2 = vadd.f32 %v307_v58, %v275_v0 }
 0x110   : > { %v374_v59 = vpop.f32.mrf.mxu0 }
 0x116   : > { %v309_v61 = vpop.f32.mrf.mxu2  ;;  %v342_v62 = vpop.f32.mrf.mxu3 }
 0x117   : > { %v347_v5 = vadd.f32 %v342_v62, %v312_v2  ;;  %v313_v9 = vadd.f32 %v309_v61, %v277_v7 }
 0x118   : > { %v376_v63 = vpop.f32.mrf.mxu0 }
 0x119   : > { %v379_v8 = vadd.f32 %v374_v59, %v347_v5 }
 0x11b   : > { %v411_v13 = vadd.f32 %v406_v60, %v379_v8 }
 0x11e   : > { %v344_v3 = vpop.f32.mrf.mxu3  ;;  %v438_v4 = vpop.f32.mrf.mxu2 }
 0x11f   : > { %v348_v14 = vadd.f32 %v344_v3, %v313_v9  ;;  %v443_v15 = vadd.f32 %v438_v4, %v411_v13 }
 0x120   : > { %v502_v6 = vpop.f32.mrf.mxu0 }
 0x121   : > { %v380_v16 = vadd.f32 %v376_v63, %v348_v14 }
 0x123   : > { %v412_v21 = vadd.f32 %v408_v1, %v380_v16 }
 0x126   : > { %v440_v11 = vpop.f32.mrf.mxu2  ;;  %v470_v12 = vpop.f32.mrf.mxu3 }
 0x127   : > { %v475_v17 = vadd.f32 %v470_v12, %v443_v15  ;;  %v444_v24 = vadd.f32 %v440_v11, %v412_v21 }
 0x128   : > { %v504_v18 = vpop.f32.mrf.mxu0  ;;  %v662_v34 = vpop.f32.mrf.mxu1 }
 0x129   : > { %v507_v22 = vadd.f32 %v502_v6, %v475_v17 }
 0x12b   : > { %v539_v25 = vadd.f32 %v534_v10, %v507_v22 }
 0x12e   : > { %v472_v19 = vpop.f32.mrf.mxu3  ;;  %v566_v20 = vpop.f32.mrf.mxu2 }
 0x12f   : > { %v476_v26 = vadd.f32 %v472_v19, %v444_v24  ;;  %v571_v27 = vadd.f32 %v566_v20, %v539_v25 }
 0x130   : > { %v630_v28 = vpop.f32.mrf.mxu0  ;;  %v664_v48 = vpop.f32.mrf.mxu1 }
 0x131   : > { %v508_v31 = vadd.f32 %v504_v18, %v476_v26 }
 0x133   : > { %v540_v35 = vadd.f32 %v536_v23, %v508_v31 }
 0x136   : > { %v568_v29 = vpop.f32.mrf.mxu2  ;;  %v598_v30 = vpop.f32.mrf.mxu3 }
 0x137   : > { %v603_v32 = vadd.f32 %v598_v30, %v571_v27  ;;  %v572_v36 = vadd.f32 %v568_v29, %v540_v35 }
 0x138   : > { %v632_v43 = vpop.f32.mrf.mxu0 }
 0x139   : > { %v635_v33 = vadd.f32 %v630_v28, %v603_v32 }
 0x13b   : > { %v667_v37 = vadd.f32 %v662_v34, %v635_v33 }
 0x13e   : > { %v600_v38 = vpop.f32.mrf.mxu3  ;;  %v694_v39 = vpop.f32.mrf.mxu2 }
 0x13f   : > { %v604_v41 = vadd.f32 %v600_v38, %v572_v36  ;;  %v699_v42 = vadd.f32 %v694_v39, %v667_v37 }
 0x141   : > { %v636_v45 = vadd.f32 %v632_v43, %v604_v41  ;;  %v713_v46 = vmul.f32 %v706_v40, %v699_v42 }
 0x143   : > { %v727_v47 = vadd.f32 %v720_v44, %v713_v46  ;;  %v668_v49 = vadd.f32 %v664_v48, %v636_v45 }
 0x145   : > { %v729_v50 = vmax.f32 %v727_v47, 0.0 }
 0x146   : > { %v696_v51 = vpop.f32.mrf.mxu2 }
 0x147   : > { %v731_v53 = vpack.c.bf16 %v729_v50, %v729_v50  ;;  %v700_v54 = vadd.f32 %v696_v51, %v668_v49 }
 0x149   : > { %734 = vst.msk [vmem:[%s217_s28] sm:$0xf] %vm733_vm2, %v731_v53  ;;  %v714_v55 = vmul.f32 %v711_v52, %v700_v54 }
 0x14b   : > { %v728_v57 = vadd.f32 %v725_v56, %v714_v55 }
 0x14d   : > { %v730_v58 = vmax.f32 %v728_v57, 0.0 }
 0x14f   : > { %v732_v59 = vpack.c.bf16 %v730_v58, %v730_v58 }
 0x151   : > { %735 = vst.msk [vmem:[%s217_s28 + $0x4] sm:$0xf] %vm733_vm2, %v732_v59 }
 0x152 PF: > { %s14_s17 = sadd.s32 1, %s1002_s17   ;;  %s1169_s15 = smov %s998_s16 }
 0x153   : > { %p11_p5 = scmp.ge.s32.totalorder %s14_s17, 4   ;;  %s1170_s16 = smov %s1172_s18 }
 0x155   :  { %13 = sbr.rel (!%p11_p5) target bundleno = 2 (0x2), region = 81 }

// kernel: freqnet_forward.36
= control target key start
LH: loop header
LB: loop body
LE: loop exit
PB: predicated region body
PF: predicated region fallthrough
CT: control target
= control target key end

     0   :  { %s1024_s15 = smov 0   ;;  %s1026_s16 = smov 0   ;;  %s1136_s0 = inlined_call_operand.vmem [shape: bf16[2,1,16,22], index: 0, kind: input, shape index: {}]   ;;  %s1137_s1 = inlined_call_operand.vmem [shape: bf16[15,16,16], index: 1, kind: input, shape index: {}]   ;;  %s1138_s2 = inlined_call_operand.vmem [shape: f32[16,1], index: 2, kind: input, shape index: {}]   ;;  %s1139_s3 = inlined_call_operand.vmem [shape: f32[16,1], index: 3, kind: input, shape index: {}]   ;;  %s1140_s4 = inlined_call_operand.vmem [shape: bf16[2,16,8], index: 4, kind: output, shape index: {}]  }
   0x1   :  { %s1028_s17 = smov 0  }
   0x2 LB: > { %s26_s18 = sadd.s32 1, %s978_s16  ;;  %p786_p0 = scmp.ge.s32.totalorder %s982_s17, 1  ;;  %s982_s17 = sphi %s1028_s17, %s14_s17   ;;  %s978_s16 = sphi %s1026_s16, %s1142_s16   ;;  %s974_s15 = sphi %s1024_s15, %s1141_s15  }
   0x3   : > { %p28_p1 = scmp.ge.s32.totalorder %s26_s18, 2  ;;  %p176_p2 = scmp.lt.s32.totalorder %s982_s17, 3 }
   0x5   : > { %s1144_s18 = smov (%p28_p1, %s26_s18), 0  ;;  %p177_p3 = pnand %p786_p0, %p176_p2 }
   0x6   : > { %p205_p4 = scmp.lt.s32.totalorder (!%p177_p3), %s974_s15, 1  ;;  %s984_s23 = smov (!%p177_p3), 126  }
   0x7   : > { %180 = sbr.rel (%p177_p3) target bundleno = 339 (0x153), region = 36  ;;  %s985_s24 = smov (!%p177_p3), 125  }
   0x8   : > { %s986_s25 = smov (!%p177_p3), 124   ;;  %s987_s26 = smov (!%p177_p3), 127  }
   0x9   : > { %s988_s27 = smov (!%p177_p3), 122   ;;  %s989_s28 = smov (!%p177_p3), 123  }
   0xa   : > { %s990_s29 = smov (!%p177_p3), 121   ;;  %s991_s30 = smov (!%p177_p3), 118  }
   0xb   : > { %s992_s5 = smov (!%p177_p3), 120   ;;  %s993_s6 = smov (!%p177_p3), 119  }
   0xc   : > { %s1146_s15 = smov (!%p205_p4, %s974_s15), 1  ;;  %s994_s7 = smov 117   ;;  %v903_v1 = vld [vmem:[%s1137_s1] sm:$0xff]  ;;  %vm239_vm0 = vcmask 130048   ;;  %v908_v4 = vld [vmem:[%s1137_s1 + $0x28] sm:$0xff]  ;;  %v905_v7 = vld [vmem:[%s1137_s1 + $0x10] sm:$0xff] }
   0xd   : > { %s900_s19 = sshll.u32 %s1146_s15, 3  ;;  %s995_s8 = smov 114   ;;  %v906_v8 = vld [vmem:[%s1137_s1 + $0x18] sm:$0xff]  ;;  %v904_v12 = vld [vmem:[%s1137_s1 + $0x8] sm:$0xff]  ;;  %v909_v14 = vld [vmem:[%s1137_s1 + $0x30] sm:$0xff]  ;;  %v998_v24 = vmov 0  }
   0xe   : > { %s209_s22 = scalar_lea.vmem %s1136_s0, %s900_s19  ;;  %s996_s9 = smov 116   ;;  %v910_v16 = vld [vmem:[%s1137_s1 + $0x38] sm:$0xff]  ;;  %v907_v18 = vld [vmem:[%s1137_s1 + $0x20] sm:$0xff]  ;;  %v912_v21 = vld [vmem:[%s1137_s1 + $0x48] sm:$0xff]  ;;  %959 = vset.pattern.permute.xlu1 %v998_v24  ;;  %958 = vset.pattern.permute.xlu0 %v998_v24  ;;  %vm702_vm1 = vcmask 60416  }
   0xf   : > { %v902_v0 = vld [vmem:[%s209_s22] sm:$0xff]  ;;  %s997_s10 = smov 115   ;;  %v671_v23 = vld [vmem:[%s1138_s2 + $0x8] sm:$0xff]  ;;  %957 = vset.pattern.permute.xlu2 %v998_v24  ;;  %v913_v26 = vld [vmem:[%s1137_s1 + $0x50] sm:$0xff] }
  0x10   : > { %288 = vrot.lane.b32.xlu0 %v902_v0, %s984_s23  ;;  %318 = vrot.lane.b32.xlu1 %v902_v0, %s985_s24  ;;  %v684_v22 = vld [vmem:[%s1139_s3] sm:$0xff]  ;;  %v914_v28 = vld [vmem:[%s1137_s1 + $0x58] sm:$0xff] }
  0x11   : > { %348 = vrot.lane.b32.xlu2 %v902_v0, %s986_s25  ;;  %273 = vmatpush.bf16.msra.mxu1 %v902_v0  ;;  %v670_v25 = vld [vmem:[%s1138_s2] sm:$0xff]  ;;  %v685_v30 = vld [vmem:[%s1139_s3 + $0x8] sm:$0xff]  ;;  %v917_v33 = vld [vmem:[%s1137_s1 + $0x70] sm:$0xff] }
  0x12   : > { %v911_v31 = vld [vmem:[%s1137_s1 + $0x40] sm:$0xff]  ;;  %v916_v32 = vld [vmem:[%s1137_s1 + $0x68] sm:$0xff] }
  0x13   : > { %v915_v34 = vld [vmem:[%s1137_s1 + $0x60] sm:$0xff] }
  0x14   : > { %806 = vmatmul.msk.bf16.vlgmr.msra.gmra.mxu1 %vm239_vm0, %v903_v1 }
  0x18   : > { %236 = vrot.lane.b32.xlu0 %v902_v0, %s987_s26  ;;  %408 = vrot.lane.b32.xlu1 %v902_v0, %s988_s27 }
  0x19   : > { %378 = vrot.lane.b32.xlu2 %v902_v0, %s989_s28 }
  0x20   : > { %438 = vrot.lane.b32.xlu0 %v902_v0, %s990_s29  ;;  %528 = vrot.lane.b32.xlu1 %v902_v0, %s991_s30 }
  0x21   : > { %468 = vrot.lane.b32.xlu2 %v902_v0, %s992_s5 }
  0x28   : > { %498 = vrot.lane.b32.xlu0 %v902_v0, %s993_s6  ;;  %558 = vrot.lane.b32.xlu1 %v902_v0, %s994_s7 }
  0x29   : > { %648 = vrot.lane.b32.xlu2 %v902_v0, %s995_s8 }
  0x30   : > { %588 = vrot.lane.b32.xlu0 %v902_v0, %s996_s9  ;;  %618 = vrot.lane.b32.xlu1 %v902_v0, %s997_s10  ;;  %s217_s9 = scalar_lea.vmem %s1140_s4, %s900_s19 }
  0x31   : > { %674 = vperm.xlu2 %957, %v670_v25  }
  0x38   : > { %688 = vperm.xlu1 %959, %v684_v22   ;;  %679 = vperm.xlu0 %958, %v671_v23  }
  0x39   : > { %693 = vperm.xlu2 %957, %v685_v30  }
  0x6b   : > { %v349_v2 = vpop.permute.xlu2 %348 }
  0x73   : > { %v379_v3 = vpop.permute.xlu2 %378 }
  0x74   : > { %391 = vmatpush.bf16.msrb.mxu1 %v379_v3 }
  0x77   : > { %834 = vmatmul.msk.bf16.vlgmr.msrb.gmra.mxu1 %vm239_vm0, %v908_v4 }
  0x7b   : > { %v469_v9 = vpop.permute.xlu2 %468 }
  0x82   : > { %v289_v5 = vpop.permute.xlu0 %288  ;;  %v319_v6 = vpop.permute.xlu1 %318 }
  0x83   : > { %301 = vmatpush.bf16.msra.mxu2 %v289_v5  ;;  %331 = vmatpush.bf16.msra.mxu3 %v319_v6  ;;  %v649_v17 = vpop.permute.xlu2 %648 }
  0x86   : > { %813 = vmatmul.msk.bf16.vlgmr.msra.gmra.mxu2 %vm239_vm0, %v905_v7  ;;  %820 = vmatmul.msk.bf16.vlgmr.msra.gmra.mxu3 %vm239_vm0, %v906_v8 }
  0x8a   : > { %v237_v10 = vpop.permute.xlu0 %236  ;;  %v409_v11 = vpop.permute.xlu1 %408 }
  0x8b   : > { %250 = vmatpush.bf16.msra.mxu0 %v237_v10  ;;  %421 = vmatpush.bf16.msrb.mxu2 %v409_v11  ;;  %v675_v22 = vpop.permute.xlu2 %674 }
  0x8e   : > { %801 = vmatmul.msk.bf16.vlgmr.msra.gmra.mxu0 %vm239_vm0, %v904_v12 }
  0x8f   : > { %361 = vmatpush.bf16.msrb.mxu0 %v349_v2 }
  0x91   : > { %v275_v35 = vpop.f32.mrf.mxu1 }
  0x92   : > { %v439_v13 = vpop.permute.xlu0 %438  ;;  %v529_v15 = vpop.permute.xlu1 %528 }
  0x93   : > { %481 = vmatpush.bf16.msra.mxu0 %v469_v9  ;;  %451 = vmatpush.bf16.msrb.mxu3 %v439_v13 }
  0x94   : > { %541 = vmatpush.bf16.msra.mxu2 %v529_v15 }
  0x96   : > { %841 = vmatmul.msk.bf16.vlgmr.msrb.gmra.mxu2 %vm239_vm0, %v909_v14  ;;  %848 = vmatmul.msk.bf16.vlgmr.msrb.gmra.mxu3 %vm239_vm0, %v910_v16 }
  0x98   : > { %661 = vmatpush.bf16.msrb.mxu2 %v649_v17 }
  0x99   : > { %v277_v37 = vpop.f32.mrf.mxu1 }
  0x9a   : > { %v499_v19 = vpop.permute.xlu0 %498  ;;  %v559_v20 = vpop.permute.xlu1 %558 }
  0x9b   : > { %511 = vmatpush.bf16.msra.mxu1 %v499_v19  ;;  %571 = vmatpush.bf16.msra.mxu3 %v559_v20 }
  0x9e   : > { %827 = vmatmul.msk.bf16.vlgmr.msrb.gmra.mxu0 %vm239_vm0, %v907_v18  ;;  %862 = vmatmul.msk.bf16.vlgmr.msra.gmra.mxu1 %vm239_vm0, %v912_v21 }
  0xa2   : > { %v589_v27 = vpop.permute.xlu0 %588  ;;  %v619_v29 = vpop.permute.xlu1 %618 }
  0xa3   : > { %601 = vmatpush.bf16.msrb.mxu0 %v589_v27  ;;  %631 = vmatpush.bf16.msrb.mxu1 %v619_v29 }
  0xa6   : > { %869 = vmatmul.msk.bf16.vlgmr.msra.gmra.mxu2 %vm239_vm0, %v913_v26  ;;  %876 = vmatmul.msk.bf16.vlgmr.msra.gmra.mxu3 %vm239_vm0, %v914_v28 }
  0xaa   : > { %v689_v23 = vpop.permute.xlu1 %688 }
  0xae   : > { %855 = vmatmul.msk.bf16.vlgmr.msra.gmra.mxu0 %vm239_vm0, %v911_v31  ;;  %890 = vmatmul.msk.bf16.vlgmr.msrb.gmra.mxu1 %vm239_vm0, %v916_v32 }
  0xb6   : > { %897 = vmatmul.msk.bf16.vlgmr.msrb.gmra.mxu2 %vm239_vm0, %v917_v33  ;;  %v680_v33 = vpop.permute.xlu0 %679 }
  0xbe   : > { %883 = vmatmul.msk.bf16.vlgmr.msrb.gmra.mxu0 %vm239_vm0, %v915_v34 }
  0xf4   : > { %v393_v42 = vpop.f32.mrf.mxu1 }
  0xfc   : > { %v395_v48 = vpop.f32.mrf.mxu1 }
 0x109   : > { %v303_v36 = vpop.f32.mrf.mxu2  ;;  %v333_v39 = vpop.f32.mrf.mxu3 }
 0x10b   : > { %v252_v38 = vpop.f32.mrf.mxu0 }
 0x10c   : > { %v276_v43 = vadd.f32 %v275_v35, %v252_v38 }
 0x10e   : > { %v308_v46 = vadd.f32 %v303_v36, %v276_v43 }
 0x110   : > { %v338_v49 = vadd.f32 %v333_v39, %v308_v46 }
 0x111   : > { %v305_v40 = vpop.f32.mrf.mxu2  ;;  %v335_v44 = vpop.f32.mrf.mxu3 }
 0x113   : > { %v254_v41 = vpop.f32.mrf.mxu0 }
 0x114   : > { %v278_v50 = vadd.f32 %v277_v37, %v254_v41  ;;  %v694_v37 = vpop.permute.xlu2 %693 }
 0x116   : > { %v309_v54 = vadd.f32 %v305_v40, %v278_v50 }
 0x118   : > { %v339_v57 = vadd.f32 %v335_v44, %v309_v54 }
 0x119   : > { %v423_v45 = vpop.f32.mrf.mxu2  ;;  %v453_v53 = vpop.f32.mrf.mxu3 }
 0x11b   : > { %v363_v47 = vpop.f32.mrf.mxu0  ;;  %v513_v58 = vpop.f32.mrf.mxu1 }
 0x11c   : > { %v368_v51 = vadd.f32 %v363_v47, %v338_v49 }
 0x11e   : > { %v398_v56 = vadd.f32 %v393_v42, %v368_v51 }
 0x120   : > { %v428_v59 = vadd.f32 %v423_v45, %v398_v56 }
 0x121   : > { %v425_v52 = vpop.f32.mrf.mxu2  ;;  %v455_v62 = vpop.f32.mrf.mxu3 }
 0x122   : > { %v458_v0 = vadd.f32 %v453_v53, %v428_v59 }
 0x123   : > { %v365_v55 = vpop.f32.mrf.mxu0  ;;  %v515_v4 = vpop.f32.mrf.mxu1 }
 0x124   : > { %v369_v60 = vadd.f32 %v365_v55, %v339_v57 }
 0x126   : > { %v399_v1 = vadd.f32 %v395_v48, %v369_v60 }
 0x128   : > { %v429_v3 = vadd.f32 %v425_v52, %v399_v1 }
 0x129   : > { %v543_v61 = vpop.f32.mrf.mxu2  ;;  %v573_v9 = vpop.f32.mrf.mxu3 }
 0x12a   : > { %v459_v8 = vadd.f32 %v455_v62, %v429_v3 }
 0x12b   : > { %v483_v63 = vpop.f32.mrf.mxu0  ;;  %v633_v14 = vpop.f32.mrf.mxu1 }
 0x12c   : > { %v488_v2 = vadd.f32 %v483_v63, %v458_v0 }
 0x12e   : > { %v518_v5 = vadd.f32 %v513_v58, %v488_v2 }
 0x130   : > { %v548_v10 = vadd.f32 %v543_v61, %v518_v5 }
 0x131   : > { %v545_v6 = vpop.f32.mrf.mxu2  ;;  %v575_v20 = vpop.f32.mrf.mxu3 }
 0x132   : > { %v578_v12 = vadd.f32 %v573_v9, %v548_v10 }
 0x133   : > { %v485_v7 = vpop.f32.mrf.mxu0  ;;  %v635_v29 = vpop.f32.mrf.mxu1 }
 0x134   : > { %v489_v11 = vadd.f32 %v485_v7, %v459_v8 }
 0x136   : > { %v519_v13 = vadd.f32 %v515_v4, %v489_v11 }
 0x138   : > { %v549_v18 = vadd.f32 %v545_v6, %v519_v13 }
 0x139   : > { %v663_v17 = vpop.f32.mrf.mxu2 }
 0x13a   : > { %v579_v24 = vadd.f32 %v575_v20, %v549_v18 }
 0x13b   : > { %v603_v15 = vpop.f32.mrf.mxu0 }
 0x13c   : > { %v608_v16 = vadd.f32 %v603_v15, %v578_v12 }
 0x13e   : > { %v638_v19 = vadd.f32 %v633_v14, %v608_v16 }
 0x140   : > { %v668_v21 = vadd.f32 %v663_v17, %v638_v19 }
 0x141   : > { %v665_v32 = vpop.f32.mrf.mxu2 }
 0x142   : > { %v682_v25 = vmul.f32 %v675_v22, %v668_v21 }
 0x143   : > { %v605_v26 = vpop.f32.mrf.mxu0 }
 0x144   : > { %v696_v27 = vadd.f32 %v689_v23, %v682_v25  ;;  %v609_v28 = vadd.f32 %v605_v26, %v579_v24 }
 0x146   : > { %v698_v30 = vmax.f32 %v696_v27, 0.0  ;;  %v639_v31 = vadd.f32 %v635_v29, %v609_v28 }
 0x148   : > { %v700_v34 = vpack.c.bf16 %v698_v30, %v698_v30  ;;  %v669_v35 = vadd.f32 %v665_v32, %v639_v31 }
 0x14a   : > { %703 = vst.msk [vmem:[%s217_s9] sm:$0xf] %vm702_vm1, %v700_v34  ;;  %v683_v36 = vmul.f32 %v680_v33, %v669_v35 }
 0x14c   : > { %v697_v38 = vadd.f32 %v694_v37, %v683_v36 }
 0x14e   : > { %v699_v39 = vmax.f32 %v697_v38, 0.0 }
 0x150   : > { %v701_v40 = vpack.c.bf16 %v699_v39, %v699_v39 }
 0x152   : > { %704 = vst.msk [vmem:[%s217_s9 + $0x4] sm:$0xf] %vm702_vm1, %v701_v40 }
 0x153 PF: > { %s14_s17 = sadd.s32 1, %s982_s17   ;;  %s1141_s15 = smov %s978_s16 }
 0x154   : > { %p11_p5 = scmp.ge.s32.totalorder %s14_s17, 4   ;;  %s1142_s16 = smov %s1144_s18 }
 0x156   :  { %13 = sbr.rel (!%p11_p5) target bundleno = 2 (0x2), region = 80 }

// kernel: freqnet_forward.35
= control target key start
LH: loop header
LB: loop body
LE: loop exit
PB: predicated region body
PF: predicated region fallthrough
CT: control target
= control target key end

     0   :  { %s1118_s18 = smov 0   ;;  %s1120_s19 = smov 0   ;;  %s1231_s0 = inlined_call_operand.vmem [shape: bf16[2,1,16,22], index: 0, kind: input, shape index: {}]   ;;  %s1232_s1 = inlined_call_operand.vmem [shape: bf16[15,16,16], index: 1, kind: input, shape index: {}]   ;;  %s1233_s2 = inlined_call_operand.vmem [shape: f32[16,1], index: 2, kind: input, shape index: {}]   ;;  %s1234_s3 = inlined_call_operand.vmem [shape: f32[16,1], index: 3, kind: input, shape index: {}]   ;;  %s1235_s4 = inlined_call_operand.vmem [shape: bf16[2,16,8], index: 4, kind: input, shape index: {}]   ;;  %s1236_s5 = inlined_call_operand.vmem [shape: bf16[2,16,8], index: 5, kind: output, shape index: {}]  }
   0x1   :  { %s1122_s20 = smov 0  }
   0x2 LB: > { %s27_s21 = sadd.s32 1, %s1067_s19  ;;  %p868_p0 = scmp.ge.s32.totalorder %s1071_s20, 1  ;;  %s1071_s20 = sphi %s1122_s20, %s15_s20   ;;  %s1067_s19 = sphi %s1120_s19, %s1238_s19   ;;  %s1063_s18 = sphi %s1118_s18, %s1237_s18  }
   0x3   : > { %p29_p1 = scmp.ge.s32.totalorder %s27_s21, 2  ;;  %p216_p2 = scmp.lt.s32.totalorder %s1071_s20, 3 }
   0x5   : > { %s1240_s21 = smov (%p29_p1, %s27_s21), 0  ;;  %p217_p3 = pnand %p868_p0, %p216_p2 }
   0x6   : > { %p255_p4 = scmp.lt.s32.totalorder (!%p217_p3), %s1063_s18, 1  ;;  %s1073_s26 = smov (!%p217_p3), 126  }
   0x7   : > { %220 = sbr.rel (%p217_p3) target bundleno = 341 (0x155), region = 40  ;;  %s1074_s27 = smov (!%p217_p3), 125  }
   0x8   : > { %s1075_s28 = smov (!%p217_p3), 124   ;;  %s1076_s29 = smov (!%p217_p3), 127  }
   0x9   : > { %s1077_s30 = smov (!%p217_p3), 122   ;;  %s1078_s6 = smov (!%p217_p3), 123  }
   0xa   : > { %s1079_s7 = smov (!%p217_p3), 121   ;;  %s1080_s8 = smov (!%p217_p3), 118  }
   0xb   : > { %s1081_s9 = smov (!%p217_p3), 120   ;;  %s1082_s10 = smov (!%p217_p3), 119  }
   0xc   : > { %s1242_s18 = smov (!%p255_p4, %s1063_s18), 1  ;;  %s1083_s11 = smov 117   ;;  %v988_v1 = vld [vmem:[%s1232_s1] sm:$0xff]  ;;  %vm297_vm0 = vcmask 130048   ;;  %v993_v4 = vld [vmem:[%s1232_s1 + $0x28] sm:$0xff]  ;;  %v990_v7 = vld [vmem:[%s1232_s1 + $0x10] sm:$0xff] }
   0xd   : > { %s1136_s22 = sshll.u32 %s1242_s18, 3  ;;  %s1084_s12 = smov 114   ;;  %v991_v8 = vld [vmem:[%s1232_s1 + $0x18] sm:$0xff]  ;;  %v989_v12 = vld [vmem:[%s1232_s1 + $0x8] sm:$0xff]  ;;  %v994_v14 = vld [vmem:[%s1232_s1 + $0x30] sm:$0xff]  ;;  %v1087_v24 = vmov 0  }
   0xe   : > { %s259_s25 = scalar_lea.vmem %s1231_s0, %s1136_s22  ;;  %s1085_s13 = smov 116   ;;  %v995_v16 = vld [vmem:[%s1232_s1 + $0x38] sm:$0xff]  ;;  %v992_v18 = vld [vmem:[%s1232_s1 + $0x20] sm:$0xff]  ;;  %v997_v21 = vld [vmem:[%s1232_s1 + $0x48] sm:$0xff]  ;;  %1048 = vset.pattern.permute.xlu1 %v1087_v24  ;;  %1047 = vset.pattern.permute.xlu0 %v1087_v24  ;;  %vm766_vm1 = vcmask 60416  }
   0xf   : > { %v987_v0 = vld [vmem:[%s259_s25] sm:$0xff]  ;;  %s1086_s14 = smov 115   ;;  %v729_v23 = vld [vmem:[%s1233_s2 + $0x8] sm:$0xff]  ;;  %1046 = vset.pattern.permute.xlu2 %v1087_v24  ;;  %v998_v26 = vld [vmem:[%s1232_s1 + $0x50] sm:$0xff]  ;;  %s275_s16 = scalar_lea.vmem %s1236_s5, %s1136_s22 }
  0x10   : > { %346 = vrot.lane.b32.xlu0 %v987_v0, %s1073_s26  ;;  %376 = vrot.lane.b32.xlu1 %v987_v0, %s1074_s27  ;;  %v742_v22 = vld [vmem:[%s1234_s3] sm:$0xff]  ;;  %v999_v28 = vld [vmem:[%s1232_s1 + $0x58] sm:$0xff] }
  0x11   : > { %406 = vrot.lane.b32.xlu2 %v987_v0, %s1075_s28  ;;  %331 = vmatpush.bf16.msra.mxu1 %v987_v0  ;;  %v728_v25 = vld [vmem:[%s1233_s2] sm:$0xff]  ;;  %v743_v30 = vld [vmem:[%s1234_s3 + $0x8] sm:$0xff]  ;;  %v1002_v33 = vld [vmem:[%s1232_s1 + $0x70] sm:$0xff] }
  0x12   : > { %v996_v31 = vld [vmem:[%s1232_s1 + $0x40] sm:$0xff]  ;;  %v1001_v32 = vld [vmem:[%s1232_s1 + $0x68] sm:$0xff] }
  0x13   : > { %v1000_v34 = vld [vmem:[%s1232_s1 + $0x60] sm:$0xff] }
  0x14   : > { %890 = vmatmul.msk.bf16.vlgmr.msra.gmra.mxu1 %vm297_vm0, %v988_v1 }
  0x18   : > { %294 = vrot.lane.b32.xlu0 %v987_v0, %s1076_s29  ;;  %466 = vrot.lane.b32.xlu1 %v987_v0, %s1077_s30 }
  0x19   : > { %436 = vrot.lane.b32.xlu2 %v987_v0, %s1078_s6 }
  0x20   : > { %496 = vrot.lane.b32.xlu0 %v987_v0, %s1079_s7  ;;  %586 = vrot.lane.b32.xlu1 %v987_v0, %s1080_s8 }
  0x21   : > { %526 = vrot.lane.b32.xlu2 %v987_v0, %s1081_s9 }
  0x28   : > { %556 = vrot.lane.b32.xlu0 %v987_v0, %s1082_s10  ;;  %616 = vrot.lane.b32.xlu1 %v987_v0, %s1083_s11 }
  0x29   : > { %706 = vrot.lane.b32.xlu2 %v987_v0, %s1084_s12 }
  0x30   : > { %646 = vrot.lane.b32.xlu0 %v987_v0, %s1085_s13  ;;  %676 = vrot.lane.b32.xlu1 %v987_v0, %s1086_s14  ;;  %s267_s13 = scalar_lea.vmem %s1235_s4, %s1136_s22 }
  0x31   : > { %732 = vperm.xlu2 %1046, %v728_v25  }
  0x38   : > { %746 = vperm.xlu1 %1048, %v742_v22   ;;  %737 = vperm.xlu0 %1047, %v729_v23   ;;  %v1004_v23 = vld [vmem:[%s267_s13] sm:$0xff]  }
  0x39   : > { %751 = vperm.xlu2 %1046, %v743_v30  }
  0x6b   : > { %v407_v2 = vpop.permute.xlu2 %406 }
  0x73   : > { %v437_v3 = vpop.permute.xlu2 %436 }
  0x74   : > { %449 = vmatpush.bf16.msrb.mxu1 %v437_v3 }
  0x77   : > { %918 = vmatmul.msk.bf16.vlgmr.msrb.gmra.mxu1 %vm297_vm0, %v993_v4 }
  0x7b   : > { %v527_v9 = vpop.permute.xlu2 %526 }
  0x82   : > { %v347_v5 = vpop.permute.xlu0 %346  ;;  %v377_v6 = vpop.permute.xlu1 %376 }
  0x83   : > { %359 = vmatpush.bf16.msra.mxu2 %v347_v5  ;;  %389 = vmatpush.bf16.msra.mxu3 %v377_v6  ;;  %v707_v17 = vpop.permute.xlu2 %706 }
  0x86   : > { %897 = vmatmul.msk.bf16.vlgmr.msra.gmra.mxu2 %vm297_vm0, %v990_v7  ;;  %904 = vmatmul.msk.bf16.vlgmr.msra.gmra.mxu3 %vm297_vm0, %v991_v8 }
  0x8a   : > { %v295_v10 = vpop.permute.xlu0 %294  ;;  %v467_v11 = vpop.permute.xlu1 %466 }
  0x8b   : > { %308 = vmatpush.bf16.msra.mxu0 %v295_v10  ;;  %479 = vmatpush.bf16.msrb.mxu2 %v467_v11  ;;  %v733_v22 = vpop.permute.xlu2 %732 }
  0x8e   : > { %885 = vmatmul.msk.bf16.vlgmr.msra.gmra.mxu0 %vm297_vm0, %v989_v12 }
  0x8f   : > { %419 = vmatpush.bf16.msrb.mxu0 %v407_v2 }
  0x91   : > { %v333_v35 = vpop.f32.mrf.mxu1 }
  0x92   : > { %v497_v13 = vpop.permute.xlu0 %496  ;;  %v587_v15 = vpop.permute.xlu1 %586 }
  0x93   : > { %539 = vmatpush.bf16.msra.mxu0 %v527_v9  ;;  %509 = vmatpush.bf16.msrb.mxu3 %v497_v13 }
  0x94   : > { %599 = vmatpush.bf16.msra.mxu2 %v587_v15 }
  0x96   : > { %925 = vmatmul.msk.bf16.vlgmr.msrb.gmra.mxu2 %vm297_vm0, %v994_v14  ;;  %932 = vmatmul.msk.bf16.vlgmr.msrb.gmra.mxu3 %vm297_vm0, %v995_v16 }
  0x98   : > { %719 = vmatpush.bf16.msrb.mxu2 %v707_v17 }
  0x99   : > { %v335_v37 = vpop.f32.mrf.mxu1 }
  0x9a   : > { %v557_v19 = vpop.permute.xlu0 %556  ;;  %v617_v20 = vpop.permute.xlu1 %616 }
  0x9b   : > { %569 = vmatpush.bf16.msra.mxu1 %v557_v19  ;;  %629 = vmatpush.bf16.msra.mxu3 %v617_v20 }
  0x9e   : > { %911 = vmatmul.msk.bf16.vlgmr.msrb.gmra.mxu0 %vm297_vm0, %v992_v18  ;;  %946 = vmatmul.msk.bf16.vlgmr.msra.gmra.mxu1 %vm297_vm0, %v997_v21 }
  0xa2   : > { %v647_v27 = vpop.permute.xlu0 %646  ;;  %v677_v29 = vpop.permute.xlu1 %676 }
  0xa3   : > { %659 = vmatpush.bf16.msrb.mxu0 %v647_v27  ;;  %689 = vmatpush.bf16.msrb.mxu1 %v677_v29 }
  0xa6   : > { %953 = vmatmul.msk.bf16.vlgmr.msra.gmra.mxu2 %vm297_vm0, %v998_v26  ;;  %960 = vmatmul.msk.bf16.vlgmr.msra.gmra.mxu3 %vm297_vm0, %v999_v28  ;;  %v1005_v28 = vunpack.c.l.bf16 %v1004_v23 }
  0xaa   : > { %v747_v24 = vpop.permute.xlu1 %746 }
  0xae   : > { %939 = vmatmul.msk.bf16.vlgmr.msra.gmra.mxu0 %vm297_vm0, %v996_v31  ;;  %974 = vmatmul.msk.bf16.vlgmr.msrb.gmra.mxu1 %vm297_vm0, %v1001_v32 }
  0xb6   : > { %981 = vmatmul.msk.bf16.vlgmr.msrb.gmra.mxu2 %vm297_vm0, %v1002_v33 }
  0xbe   : > { %967 = vmatmul.msk.bf16.vlgmr.msrb.gmra.mxu0 %vm297_vm0, %v1000_v34 }
  0xf4   : > { %v451_v42 = vpop.f32.mrf.mxu1 }
  0xfc   : > { %v453_v48 = vpop.f32.mrf.mxu1 }
 0x109   : > { %v361_v36 = vpop.f32.mrf.mxu2  ;;  %v391_v39 = vpop.f32.mrf.mxu3 }
 0x10b   : > { %v310_v38 = vpop.f32.mrf.mxu0 }
 0x10c   : > { %v334_v43 = vadd.f32 %v333_v35, %v310_v38  ;;  %v738_v35 = vpop.permute.xlu0 %737 }
 0x10e   : > { %v366_v46 = vadd.f32 %v361_v36, %v334_v43 }
 0x110   : > { %v396_v49 = vadd.f32 %v391_v39, %v366_v46 }
 0x111   : > { %v363_v40 = vpop.f32.mrf.mxu2  ;;  %v393_v44 = vpop.f32.mrf.mxu3 }
 0x113   : > { %v312_v41 = vpop.f32.mrf.mxu0 }
 0x114   : > { %v336_v50 = vadd.f32 %v335_v37, %v312_v41  ;;  %v1006_v41 = vunpack.c.h.bf16 %v1004_v23 }
 0x116   : > { %v367_v54 = vadd.f32 %v363_v40, %v336_v50  ;;  %v752_v40 = vpop.permute.xlu2 %751 }
 0x118   : > { %v397_v57 = vadd.f32 %v393_v44, %v367_v54 }
 0x119   : > { %v481_v45 = vpop.f32.mrf.mxu2  ;;  %v511_v53 = vpop.f32.mrf.mxu3 }
 0x11b   : > { %v421_v47 = vpop.f32.mrf.mxu0  ;;  %v571_v58 = vpop.f32.mrf.mxu1 }
 0x11c   : > { %v426_v51 = vadd.f32 %v421_v47, %v396_v49 }
 0x11e   : > { %v456_v56 = vadd.f32 %v451_v42, %v426_v51 }
 0x120   : > { %v486_v59 = vadd.f32 %v481_v45, %v456_v56 }
 0x121   : > { %v483_v52 = vpop.f32.mrf.mxu2  ;;  %v513_v62 = vpop.f32.mrf.mxu3 }
 0x122   : > { %v516_v0 = vadd.f32 %v511_v53, %v486_v59 }
 0x123   : > { %v423_v55 = vpop.f32.mrf.mxu0  ;;  %v573_v4 = vpop.f32.mrf.mxu1 }
 0x124   : > { %v427_v60 = vadd.f32 %v423_v55, %v397_v57 }
 0x126   : > { %v457_v1 = vadd.f32 %v453_v48, %v427_v60 }
 0x128   : > { %v487_v3 = vadd.f32 %v483_v52, %v457_v1 }
 0x129   : > { %v601_v61 = vpop.f32.mrf.mxu2  ;;  %v631_v9 = vpop.f32.mrf.mxu3 }
 0x12a   : > { %v517_v8 = vadd.f32 %v513_v62, %v487_v3 }
 0x12b   : > { %v541_v63 = vpop.f32.mrf.mxu0  ;;  %v691_v14 = vpop.f32.mrf.mxu1 }
 0x12c   : > { %v546_v2 = vadd.f32 %v541_v63, %v516_v0 }
 0x12e   : > { %v576_v5 = vadd.f32 %v571_v58, %v546_v2 }
 0x130   : > { %v606_v10 = vadd.f32 %v601_v61, %v576_v5 }
 0x131   : > { %v603_v6 = vpop.f32.mrf.mxu2  ;;  %v633_v20 = vpop.f32.mrf.mxu3 }
 0x132   : > { %v636_v12 = vadd.f32 %v631_v9, %v606_v10 }
 0x133   : > { %v543_v7 = vpop.f32.mrf.mxu0  ;;  %v693_v31 = vpop.f32.mrf.mxu1 }
 0x134   : > { %v547_v11 = vadd.f32 %v543_v7, %v517_v8 }
 0x136   : > { %v577_v13 = vadd.f32 %v573_v4, %v547_v11 }
 0x138   : > { %v607_v18 = vadd.f32 %v603_v6, %v577_v13 }
 0x139   : > { %v721_v17 = vpop.f32.mrf.mxu2 }
 0x13a   : > { %v637_v25 = vadd.f32 %v633_v20, %v607_v18 }
 0x13b   : > { %v661_v15 = vpop.f32.mrf.mxu0 }
 0x13c   : > { %v666_v16 = vadd.f32 %v661_v15, %v636_v12 }
 0x13e   : > { %v696_v19 = vadd.f32 %v691_v14, %v666_v16 }
 0x140   : > { %v726_v21 = vadd.f32 %v721_v17, %v696_v19 }
 0x141   : > { %v723_v34 = vpop.f32.mrf.mxu2 }
 0x142   : > { %v740_v26 = vmul.f32 %v733_v22, %v726_v21 }
 0x143   : > { %v663_v27 = vpop.f32.mrf.mxu0 }
 0x144   : > { %v754_v29 = vadd.f32 %v747_v24, %v740_v26  ;;  %v667_v30 = vadd.f32 %v663_v27, %v637_v25 }
 0x146   : > { %v756_v32 = vmax.f32 %v754_v29, 0.0  ;;  %v697_v33 = vadd.f32 %v693_v31, %v667_v30 }
 0x148   : > { %v762_v36 = vadd.f32 %v1005_v28, %v756_v32  ;;  %v727_v37 = vadd.f32 %v723_v34, %v697_v33 }
 0x14a   : > { %v764_v38 = vpack.c.bf16 %v762_v36, %v762_v36  ;;  %v741_v39 = vmul.f32 %v738_v35, %v727_v37 }
 0x14c   : > { %767 = vst.msk [vmem:[%s275_s16] sm:$0xf] %vm766_vm1, %v764_v38  ;;  %v755_v42 = vadd.f32 %v752_v40, %v741_v39 }
 0x14e   : > { %v757_v43 = vmax.f32 %v755_v42, 0.0 }
 0x150   : > { %v763_v44 = vadd.f32 %v1006_v41, %v757_v43 }
 0x152   : > { %v765_v45 = vpack.c.bf16 %v763_v44, %v763_v44 }
 0x154   : > { %768 = vst.msk [vmem:[%s275_s16 + $0x4] sm:$0xf] %vm766_vm1, %v765_v45 }
 0x155 PF: > { %s15_s20 = sadd.s32 1, %s1071_s20   ;;  %s1237_s18 = smov %s1067_s19 }
 0x156   : > { %p12_p5 = scmp.ge.s32.totalorder %s15_s20, 4   ;;  %s1238_s19 = smov %s1240_s21 }
 0x158   :  { %14 = sbr.rel (!%p12_p5) target bundleno = 2 (0x2), region = 87 }

// kernel: freqnet_forward.38
= control target key start
LH: loop header
LB: loop body
LE: loop exit
PB: predicated region body
PF: predicated region fallthrough
CT: control target
= control target key end

     0   :  { %s1427_s15 = smov 0   ;;  %s1429_s16 = smov 0   ;;  %s1621_s0 = inlined_call_operand.vmem [shape: bf16[2,2,16,11], index: 0, kind: input, shape index: {}]   ;;  %s1622_s1 = inlined_call_operand.vmem [shape: bf16[15,32,16], index: 1, kind: input, shape index: {}]   ;;  %s1623_s2 = inlined_call_operand.vmem [shape: f32[32,1], index: 2, kind: input, shape index: {}]   ;;  %s1624_s3 = inlined_call_operand.vmem [shape: f32[32,1], index: 3, kind: input, shape index: {}]   ;;  %s1625_s4 = inlined_call_operand.vmem [shape: bf16[2,32,4], index: 4, kind: output, shape index: {}]  }
   0x1   :  { %s1431_s17 = smov 0  }
   0x2 LB: > { %s26_s18 = sadd.s32 1, %s1388_s16  ;;  %p1077_p0 = scmp.ge.s32.totalorder %s1392_s17, 1  ;;  %s1392_s17 = sphi %s1431_s17, %s14_s17   ;;  %s1388_s16 = sphi %s1429_s16, %s1627_s16   ;;  %s1384_s15 = sphi %s1427_s15, %s1626_s15  }
   0x3   : > { %p28_p1 = scmp.ge.s32.totalorder %s26_s18, 2  ;;  %p176_p2 = scmp.lt.s32.totalorder %s1392_s17, 3 }
   0x5   : > { %s1629_s18 = smov (%p28_p1, %s26_s18), 0  ;;  %p177_p3 = pnand %p1077_p0, %p176_p2 }
   0x6   : > { %p205_p4 = scmp.lt.s32.totalorder (!%p177_p3), %s1384_s15, 1  ;;  %s1394_s23 = smov (!%p177_p3), 127  }
   0x7   : > { %180 = sbr.rel (%p177_p3) target bundleno = 397 (0x18d), region = 36  ;;  %s1395_s24 = smov (!%p177_p3), 125  }
   0x8   : > { %s1396_s27 = smov (!%p177_p3), 126   ;;  %s1397_s6 = smov (!%p177_p3), 123  }
   0x9   : > { %s1398_s7 = smov (!%p177_p3), 124   ;;  %s1399_s8 = smov (!%p177_p3), 121  }
   0xa   : > { %s1400_s9 = smov (!%p177_p3), 122  }
   0xc   : > { %s1631_s15 = smov (!%p205_p4, %s1384_s15), 1  ;;  %v1303_v2 = vld [vmem:[%s1622_s1] sm:$0xff]  ;;  %vm249_vm0 = vcmask 130048   ;;  %v1307_v3 = vld [vmem:[%s1622_s1 + $0x18] sm:$0xff]  ;;  %v1306_v4 = vld [vmem:[%s1622_s1 + $0x10] sm:$0xff]  ;;  %v1401_v39 = vmov 0  }
   0xd   : > { %s1300_s19 = sshll.u32 %s1631_s15, 4  ;;  %v1304_v5 = vld [vmem:[%s1622_s1 + $0x8] sm:$0xff]  ;;  %v1314_v7 = vld [vmem:[%s1622_s1 + $0x50] sm:$0xff]  ;;  %v1308_v11 = vld [vmem:[%s1622_s1 + $0x20] sm:$0xff]  ;;  %1367 = vset.pattern.permute.xlu1 %v1401_v39  ;;  %1369 = vset.pattern.permute.xlu0 %v1401_v39  ;;  %vm991_vm1 = vcmask 27648  }
   0xe   : > { %s209_s22 = scalar_lea.vmem %s1621_s0, %s1300_s19  ;;  %v1315_v12 = vld [vmem:[%s1622_s1 + $0x58] sm:$0xff]  ;;  %v1310_v15 = vld [vmem:[%s1622_s1 + $0x30] sm:$0xff]  ;;  %v1312_v17 = vld [vmem:[%s1622_s1 + $0x40] sm:$0xff]  ;;  %1368 = vset.pattern.permute.xlu2 %v1401_v39 }
   0xf   : > { %v1302_v0 = vld [vmem:[%s209_s22] sm:$0xff]  ;;  %v1305_v1 = vld [vmem:[%s209_s22 + $0x8] sm:$0xff]  ;;  %v1322_v21 = vld [vmem:[%s1622_s1 + $0x90] sm:$0xff] }
  0x10   : > { %331 = vrot.lane.b32.xlu0 %v1302_v0, %s1394_s23  ;;  %519 = vrot.lane.b32.xlu1 %v1302_v0, %s1395_s24  ;;  %v1309_v18 = vld [vmem:[%s1622_s1 + $0x28] sm:$0xff]  ;;  %v1311_v22 = vld [vmem:[%s1622_s1 + $0x38] sm:$0xff] }
  0x11   : > { %472 = vrot.lane.b32.xlu2 %v1305_v1, %s1396_s27  ;;  %304 = vmatpush.bf16.msra.mxu1 %v1302_v0  ;;  %v1313_v23 = vld [vmem:[%s1622_s1 + $0x48] sm:$0xff]  ;;  %v1316_v25 = vld [vmem:[%s1622_s1 + $0x60] sm:$0xff]  ;;  %v1323_v28 = vld [vmem:[%s1622_s1 + $0x98] sm:$0xff] }
  0x12   : > { %1334 = vmatpush.bf16.msra.mxu3 %v1305_v1  ;;  %263 = vmatpush.bf16.msra.mxu0 %v1305_v1  ;;  %v1318_v30 = vld [vmem:[%s1622_s1 + $0x70] sm:$0xff]  ;;  %v1320_v31 = vld [vmem:[%s1622_s1 + $0x80] sm:$0xff]  ;;  %v1317_v32 = vld [vmem:[%s1622_s1 + $0x68] sm:$0xff] }
  0x13   : > { %v1330_v33 = vld [vmem:[%s1622_s1 + $0xd0] sm:$0xff]  ;;  %v1319_v34 = vld [vmem:[%s1622_s1 + $0x78] sm:$0xff]  ;;  %v1321_v35 = vld [vmem:[%s1622_s1 + $0x88] sm:$0xff] }
  0x14   : > { %1114 = vmatmul.msk.bf16.vlgmr.msra.gmra.mxu1 %vm249_vm0, %v1303_v2  ;;  %v1324_v36 = vld [vmem:[%s1622_s1 + $0xa0] sm:$0xff]  ;;  %v1331_v37 = vld [vmem:[%s1622_s1 + $0xd8] sm:$0xff]  ;;  %v1326_v40 = vld [vmem:[%s1622_s1 + $0xb0] sm:$0xff] }
  0x15   : > { %1101 = vmatmul.msk.bf16.vlgmr.msra.gmra.mxu3 %vm249_vm0, %v1307_v3  ;;  %1100 = vmatmul.msk.bf16.vlgmr.msra.gmra.mxu0 %vm249_vm0, %v1306_v4  ;;  %v927_v38 = vld [vmem:[%s1623_s2] sm:$0xff]  ;;  %v1325_v43 = vld [vmem:[%s1622_s1 + $0xa8] sm:$0xff]  ;;  %v930_v44 = vld [vmem:[%s1623_s2 + $0x18] sm:$0xff] }
  0x16   : > { %v1328_v41 = vld [vmem:[%s1622_s1 + $0xc0] sm:$0xff]  ;;  %v929_v45 = vld [vmem:[%s1623_s2 + $0x10] sm:$0xff]  ;;  %v1327_v46 = vld [vmem:[%s1622_s1 + $0xb8] sm:$0xff] }
  0x17   : > { %v1329_v47 = vld [vmem:[%s1622_s1 + $0xc8] sm:$0xff]  ;;  %v1332_v50 = vld [vmem:[%s1622_s1 + $0xe0] sm:$0xff]  ;;  %v958_v55 = vld [vmem:[%s1624_s3 + $0x18] sm:$0xff] }
  0x18   : > { %378 = vrot.lane.b32.xlu0 %v1305_v1, %s1394_s23  ;;  %425 = vrot.lane.b32.xlu1 %v1302_v0, %s1396_s27  ;;  %v956_v49 = vld [vmem:[%s1624_s3 + $0x8] sm:$0xff]  ;;  %v955_v60 = vld [vmem:[%s1624_s3] sm:$0xff] }
  0x19   : > { %566 = vrot.lane.b32.xlu2 %v1305_v1, %s1395_s24  ;;  %v928_v54 = vld [vmem:[%s1623_s2 + $0x8] sm:$0xff]  ;;  %v957_v62 = vld [vmem:[%s1624_s3 + $0x10] sm:$0xff]  ;;  %s1602_s24 = scalar_lea.vmem %s1625_s4, %s1300_s19 }
  0x1a   : > { %v1333_v59 = vld [vmem:[%s1622_s1 + $0xe8] sm:$0xff] }
  0x20   : > { %707 = vrot.lane.b32.xlu0 %v1302_v0, %s1397_s6  ;;  %613 = vrot.lane.b32.xlu1 %v1302_v0, %s1398_s7 }
  0x21   : > { %660 = vrot.lane.b32.xlu2 %v1305_v1, %s1398_s7 }
  0x24   : > { %1115 = vmatmul.msk.bf16.gmra.mxu1 %vm249_vm0, %v1304_v5 }
  0x28   : > { %754 = vrot.lane.b32.xlu0 %v1305_v1, %s1397_s6  ;;  %895 = vrot.lane.b32.xlu1 %v1302_v0, %s1399_s8 }
  0x29   : > { %801 = vrot.lane.b32.xlu2 %v1302_v0, %s1400_s9 }
  0x30   : > { %848 = vrot.lane.b32.xlu0 %v1305_v1, %s1400_s9  ;;  %933 = vperm.xlu1 %1367, %v927_v38  }
  0x31   : > { %938 = vperm.xlu2 %1368, %v928_v54  }
  0x38   : > { %948 = vperm.xlu1 %1367, %v930_v44   ;;  %943 = vperm.xlu0 %1369, %v929_v45  }
  0x39   : > { %961 = vperm.xlu2 %1368, %v955_v60  }
  0x40   : > { %966 = vperm.xlu1 %1367, %v956_v49   ;;  %976 = vperm.xlu0 %1369, %v958_v55  }
  0x41   : > { %971 = vperm.xlu2 %1368, %v957_v62  }
  0x6b   : > { %v473_v6 = vpop.permute.xlu2 %472 }
  0x6c   : > { %488 = vmatpush.bf16.msrb.mxu1 %v473_v6 }
  0x6f   : > { %1170 = vmatmul.msk.bf16.vlgmr.msrb.gmra.mxu1 %vm249_vm0, %v1314_v7 }
  0x73   : > { %v567_v8 = vpop.permute.xlu2 %566 }
  0x7b   : > { %v661_v13 = vpop.permute.xlu2 %660 }
  0x7c   : > { %676 = vmatpush.bf16.msra.mxu1 %v661_v13 }
  0x7f   : > { %1171 = vmatmul.msk.bf16.gmra.mxu1 %vm249_vm0, %v1315_v12 }
  0x82   : > { %v332_v9 = vpop.permute.xlu0 %331  ;;  %v520_v10 = vpop.permute.xlu1 %519 }
  0x83   : > { %347 = vmatpush.bf16.msra.mxu2 %v332_v9  ;;  %v802_v27 = vpop.permute.xlu2 %801 }
  0x86   : > { %1128 = vmatmul.msk.bf16.vlgmr.msra.gmra.mxu2 %vm249_vm0, %v1308_v11 }
  0x87   : > { %535 = vmatpush.bf16.msrb.mxu2 %v520_v10 }
  0x8a   : > { %v379_v14 = vpop.permute.xlu0 %378  ;;  %v426_v16 = vpop.permute.xlu1 %425 }
  0x8b   : > { %394 = vmatpush.bf16.msrb.mxu3 %v379_v14  ;;  %441 = vmatpush.bf16.msrb.mxu0 %v426_v16 }
  0x8e   : > { %1142 = vmatmul.msk.bf16.vlgmr.msrb.gmra.mxu3 %vm249_vm0, %v1310_v15  ;;  %1156 = vmatmul.msk.bf16.vlgmr.msrb.gmra.mxu0 %vm249_vm0, %v1312_v17 }
  0x8f   : > { %582 = vmatpush.bf16.msra.mxu3 %v567_v8  ;;  %1226 = vmatmul.msk.bf16.vlgmr.msra.gmra.mxu1 %vm249_vm0, %v1322_v21 }
  0x91   : > { %v306_v42 = vpop.f32.mrf.mxu1 }
  0x92   : > { %v708_v19 = vpop.permute.xlu0 %707  ;;  %v614_v20 = vpop.permute.xlu1 %613 }
  0x93   : > { %723 = vmatpush.bf16.msra.mxu2 %v708_v19  ;;  %629 = vmatpush.bf16.msra.mxu0 %v614_v20  ;;  %v265_v61 = vpop.f32.mrf.mxu0 }
  0x94   : > { %v307_v0 = vadd.f32 %v306_v42, %v265_v61 }
  0x96   : > { %1129 = vmatmul.msk.bf16.gmra.mxu2 %vm249_vm0, %v1309_v18 }
  0x97   : > { %817 = vmatpush.bf16.msrb.mxu0 %v802_v27 }
  0x98   : > { %v270_v51 = vpop.f32.mrf.mxu3 }
  0x99   : > { %v308_v48 = vpop.f32.mrf.mxu1 }
  0x9a   : > { %v755_v24 = vpop.permute.xlu0 %754  ;;  %v896_v26 = vpop.permute.xlu1 %895 }
  0x9b   : > { %770 = vmatpush.bf16.msrb.mxu3 %v755_v24  ;;  %v267_v63 = vpop.f32.mrf.mxu0 }
  0x9c   : > { %v309_v5 = vadd.f32 %v308_v48, %v267_v63 }
  0x9e   : > { %1143 = vmatmul.msk.bf16.gmra.mxu3 %vm249_vm0, %v1311_v22  ;;  %1157 = vmatmul.msk.bf16.gmra.mxu0 %vm249_vm0, %v1313_v23 }
  0x9f   : > { %1227 = vmatmul.msk.bf16.gmra.mxu1 %vm249_vm0, %v1323_v28 }
  0xa0   : > { %v272_v56 = vpop.f32.mrf.mxu3 }
  0xa1   : > { %v311_v52 = vpop.f32.mrf.mxu1 }
  0xa2   : > { %v849_v29 = vpop.permute.xlu0 %848  ;;  %v312_v53 = vadd.f32 %v311_v52, %v270_v51 }
  0xa3   : > { %864 = vmatpush.bf16.msrb.mxu1 %v849_v29 }
  0xa6   : > { %1184 = vmatmul.msk.bf16.vlgmr.msrb.gmra.mxu2 %vm249_vm0, %v1316_v25 }
  0xa7   : > { %911 = vmatpush.bf16.msrb.mxu2 %v896_v26 }
  0xa9   : > { %v313_v57 = vpop.f32.mrf.mxu1 }
  0xaa   : > { %v314_v58 = vadd.f32 %v313_v57, %v272_v56 }
  0xae   : > { %1198 = vmatmul.msk.bf16.vlgmr.msra.gmra.mxu3 %vm249_vm0, %v1318_v30  ;;  %1212 = vmatmul.msk.bf16.vlgmr.msra.gmra.mxu0 %vm249_vm0, %v1320_v31 }
  0xaf   : > { %1282 = vmatmul.msk.bf16.vlgmr.msrb.gmra.mxu1 %vm249_vm0, %v1330_v33 }
  0xb6   : > { %1185 = vmatmul.msk.bf16.gmra.mxu2 %vm249_vm0, %v1317_v32 }
  0xbe   : > { %1199 = vmatmul.msk.bf16.gmra.mxu3 %vm249_vm0, %v1319_v34  ;;  %1213 = vmatmul.msk.bf16.gmra.mxu0 %vm249_vm0, %v1321_v35 }
  0xbf   : > { %1283 = vmatmul.msk.bf16.gmra.mxu1 %vm249_vm0, %v1331_v37 }
  0xc6   : > { %1240 = vmatmul.msk.bf16.vlgmr.msra.gmra.mxu2 %vm249_vm0, %v1324_v36 }
  0xce   : > { %1254 = vmatmul.msk.bf16.vlgmr.msrb.gmra.mxu3 %vm249_vm0, %v1326_v40  ;;  %1268 = vmatmul.msk.bf16.vlgmr.msrb.gmra.mxu0 %vm249_vm0, %v1328_v41 }
  0xd6   : > { %1241 = vmatmul.msk.bf16.gmra.mxu2 %vm249_vm0, %v1325_v43 }
  0xde   : > { %1255 = vmatmul.msk.bf16.gmra.mxu3 %vm249_vm0, %v1327_v46  ;;  %1269 = vmatmul.msk.bf16.gmra.mxu0 %vm249_vm0, %v1329_v47 }
  0xe6   : > { %1296 = vmatmul.msk.bf16.vlgmr.msrb.gmra.mxu2 %vm249_vm0, %v1332_v50 }
  0xec   : > { %v490_v4 = vpop.f32.mrf.mxu1 }
  0xf4   : > { %v492_v10 = vpop.f32.mrf.mxu1 }
  0xf6   : > { %1297 = vmatmul.msk.bf16.gmra.mxu2 %vm249_vm0, %v1333_v59  ;;  %v934_v59 = vpop.permute.xlu1 %933 }
  0xfc   : > { %v495_v18 = vpop.f32.mrf.mxu1 }
 0x104   : > { %v497_v22 = vpop.f32.mrf.mxu1 }
 0x109   : > { %v349_v1 = vpop.f32.mrf.mxu2 }
 0x10a   : > { %v359_v2 = vadd.f32 %v349_v1, %v307_v0  ;;  %v939_v0 = vpop.permute.xlu2 %938 }
 0x10b   : > { %v443_v3 = vpop.f32.mrf.mxu0 }
 0x10c   : > { %v678_v26 = vpop.f32.mrf.mxu1 }
 0x111   : > { %v351_v6 = vpop.f32.mrf.mxu2  ;;  %v396_v7 = vpop.f32.mrf.mxu3 }
 0x112   : > { %v360_v8 = vadd.f32 %v351_v6, %v309_v5  ;;  %v406_v34 = vadd.f32 %v396_v7, %v359_v2 }
 0x113   : > { %v445_v9 = vpop.f32.mrf.mxu0 }
 0x114   : > { %v680_v30 = vpop.f32.mrf.mxu1  ;;  %v453_v37 = vadd.f32 %v443_v3, %v406_v34 }
 0x116   : > { %v500_v39 = vadd.f32 %v490_v4, %v453_v37 }
 0x119   : > { %v354_v11 = vpop.f32.mrf.mxu2  ;;  %v398_v12 = vpop.f32.mrf.mxu3 }
 0x11a   : > { %v361_v13 = vadd.f32 %v354_v11, %v312_v53  ;;  %v407_v40 = vadd.f32 %v398_v12, %v360_v8 }
 0x11b   : > { %v448_v14 = vpop.f32.mrf.mxu0 }
 0x11c   : > { %v683_v36 = vpop.f32.mrf.mxu1  ;;  %v454_v44 = vadd.f32 %v445_v9, %v407_v40 }
 0x11e   : > { %v501_v48 = vadd.f32 %v492_v10, %v454_v44 }
 0x121   : > { %v356_v15 = vpop.f32.mrf.mxu2  ;;  %v401_v16 = vpop.f32.mrf.mxu3 }
 0x122   : > { %v362_v17 = vadd.f32 %v356_v15, %v314_v58  ;;  %v408_v49 = vadd.f32 %v401_v16, %v361_v13  ;;  %v949_v16 = vpop.permute.xlu1 %948 }
 0x123   : > { %v450_v19 = vpop.f32.mrf.mxu0 }
 0x124   : > { %v685_v46 = vpop.f32.mrf.mxu1  ;;  %v455_v54 = vadd.f32 %v448_v14, %v408_v49 }
 0x126   : > { %v502_v60 = vadd.f32 %v495_v18, %v455_v54 }
 0x129   : > { %v403_v20 = vpop.f32.mrf.mxu3  ;;  %v537_v21 = vpop.f32.mrf.mxu2 }
 0x12a   : > { %v547_v43 = vadd.f32 %v537_v21, %v500_v39  ;;  %v409_v61 = vadd.f32 %v403_v20, %v362_v17  ;;  %v962_v21 = vpop.permute.xlu2 %961 }
 0x12b   : > { %v631_v25 = vpop.f32.mrf.mxu0 }
 0x12c   : > { %v866_v58 = vpop.f32.mrf.mxu1  ;;  %v456_v4 = vadd.f32 %v450_v19, %v409_v61 }
 0x12e   : > { %v503_v10 = vadd.f32 %v497_v22, %v456_v4 }
 0x131   : > { %v539_v23 = vpop.f32.mrf.mxu2  ;;  %v584_v24 = vpop.f32.mrf.mxu3 }
 0x132   : > { %v594_v45 = vadd.f32 %v584_v24, %v547_v43  ;;  %v548_v52 = vadd.f32 %v539_v23, %v501_v48  ;;  %v972_v54 = vpop.permute.xlu2 %971 }
 0x133   : > { %v633_v29 = vpop.f32.mrf.mxu0 }
 0x134   : > { %v641_v50 = vadd.f32 %v631_v25, %v594_v45  ;;  %v868_v14 = vpop.f32.mrf.mxu1 }
 0x136   : > { %v688_v55 = vadd.f32 %v678_v26, %v641_v50 }
 0x139   : > { %v542_v27 = vpop.f32.mrf.mxu2  ;;  %v586_v28 = vpop.f32.mrf.mxu3 }
 0x13a   : > { %v595_v56 = vadd.f32 %v586_v28, %v548_v52  ;;  %v549_v3 = vadd.f32 %v542_v27, %v502_v60 }
 0x13b   : > { %v636_v33 = vpop.f32.mrf.mxu0 }
 0x13c   : > { %v642_v62 = vadd.f32 %v633_v29, %v595_v56 }
 0x13e   : > { %v689_v5 = vadd.f32 %v680_v30, %v642_v62 }
 0x141   : > { %v544_v31 = vpop.f32.mrf.mxu2  ;;  %v589_v32 = vpop.f32.mrf.mxu3 }
 0x142   : > { %v596_v6 = vadd.f32 %v589_v32, %v549_v3  ;;  %v550_v17 = vadd.f32 %v544_v31, %v503_v10 }
 0x143   : > { %v638_v41 = vpop.f32.mrf.mxu0 }
 0x144   : > { %v643_v11 = vadd.f32 %v636_v33, %v596_v6 }
 0x146   : > { %v690_v23 = vadd.f32 %v683_v36, %v643_v11  ;;  %v967_v36 = vpop.permute.xlu1 %966 }
 0x149   : > { %v725_v35 = vpop.f32.mrf.mxu2  ;;  %v591_v38 = vpop.f32.mrf.mxu3 }
 0x14a   : > { %v735_v57 = vadd.f32 %v725_v35, %v688_v55  ;;  %v597_v24 = vadd.f32 %v591_v38, %v550_v17  ;;  %v871_v35 = vpop.f32.mrf.mxu1 }
 0x14b   : > { %v819_v53 = vpop.f32.mrf.mxu0 }
 0x14c   : > { %v644_v29 = vadd.f32 %v638_v41, %v597_v24 }
 0x14e   : > { %v691_v37 = vadd.f32 %v685_v46, %v644_v29 }
 0x151   : > { %v727_v42 = vpop.f32.mrf.mxu2  ;;  %v772_v47 = vpop.f32.mrf.mxu3 }
 0x152   : > { %v782_v63 = vadd.f32 %v772_v47, %v735_v57  ;;  %v736_v9 = vadd.f32 %v727_v42, %v689_v5 }
 0x153   : > { %v821_v8 = vpop.f32.mrf.mxu0 }
 0x154   : > { %v829_v7 = vadd.f32 %v819_v53, %v782_v63  ;;  %v873_v53 = vpop.f32.mrf.mxu1 }
 0x156   : > { %v876_v12 = vadd.f32 %v866_v58, %v829_v7 }
 0x159   : > { %v730_v51 = vpop.f32.mrf.mxu2  ;;  %v774_v1 = vpop.f32.mrf.mxu3 }
 0x15a   : > { %v783_v13 = vadd.f32 %v774_v1, %v736_v9  ;;  %v737_v26 = vadd.f32 %v730_v51, %v690_v23  ;;  %v944_v51 = vpop.permute.xlu0 %943 }
 0x15b   : > { %v824_v28 = vpop.f32.mrf.mxu0 }
 0x15c   : > { %v830_v19 = vadd.f32 %v821_v8, %v783_v13 }
 0x15e   : > { %v877_v22 = vadd.f32 %v868_v14, %v830_v19 }
 0x161   : > { %v732_v2 = vpop.f32.mrf.mxu2  ;;  %v777_v20 = vpop.f32.mrf.mxu3 }
 0x162   : > { %v784_v30 = vadd.f32 %v777_v20, %v737_v26  ;;  %v738_v41 = vadd.f32 %v732_v2, %v691_v37  ;;  %v977_v62 = vpop.permute.xlu0 %976 }
 0x163   : > { %v826_v47 = vpop.f32.mrf.mxu0 }
 0x164   : > { %v831_v38 = vadd.f32 %v824_v28, %v784_v30 }
 0x166   : > { %v878_v43 = vadd.f32 %v871_v35, %v831_v38 }
 0x169   : > { %v913_v15 = vpop.f32.mrf.mxu2  ;;  %v779_v40 = vpop.f32.mrf.mxu3 }
 0x16a   : > { %v923_v18 = vadd.f32 %v913_v15, %v876_v12  ;;  %v785_v44 = vadd.f32 %v779_v40, %v738_v41 }
 0x16c   : > { %v951_v25 = vmul.f32 %v934_v59, %v923_v18  ;;  %v832_v52 = vadd.f32 %v826_v47, %v785_v44 }
 0x16e   : > { %v979_v27 = vadd.f32 %v962_v21, %v951_v25  ;;  %v879_v56 = vadd.f32 %v873_v53, %v832_v52 }
 0x170   : > { %v983_v32 = vmax.f32 %v979_v27, 0.0 }
 0x171   : > { %v915_v31 = vpop.f32.mrf.mxu2 }
 0x172   : > { %v987_v33 = vpack.c.bf16 %v983_v32, %v983_v32  ;;  %v924_v34 = vadd.f32 %v915_v31, %v877_v22 }
 0x174   : > { %992 = vst.msk [vmem:[%s1602_s24] sm:$0xf] %vm991_vm1, %v987_v33  ;;  %v952_v39 = vmul.f32 %v939_v0, %v924_v34 }
 0x176   : > { %v980_v42 = vadd.f32 %v967_v36, %v952_v39 }
 0x178   : > { %v984_v45 = vmax.f32 %v980_v42, 0.0 }
 0x179   : > { %v918_v48 = vpop.f32.mrf.mxu2 }
 0x17a   : > { %v988_v49 = vpack.c.bf16 %v984_v45, %v984_v45  ;;  %v925_v50 = vadd.f32 %v918_v48, %v878_v43 }
 0x17c   : > { %993 = vst.msk [vmem:[%s1602_s24 + $0x4] sm:$0xf] %vm991_vm1, %v988_v49  ;;  %v953_v46 = vmul.f32 %v944_v51, %v925_v50 }
 0x17e   : > { %v981_v55 = vadd.f32 %v972_v54, %v953_v46 }
 0x180   : > { %v985_v57 = vmax.f32 %v981_v55, 0.0 }
 0x181   : > { %v920_v58 = vpop.f32.mrf.mxu2 }
 0x182   : > { %v989_v59 = vpack.c.bf16 %v985_v57, %v985_v57  ;;  %v926_v60 = vadd.f32 %v920_v58, %v879_v56 }
 0x184   : > { %994 = vst.msk [vmem:[%s1602_s24 + $0x8] sm:$0xf] %vm991_vm1, %v989_v59  ;;  %v954_v61 = vmul.f32 %v949_v16, %v926_v60 }
 0x186   : > { %v982_v63 = vadd.f32 %v977_v62, %v954_v61 }
 0x188   : > { %v986_v0 = vmax.f32 %v982_v63, 0.0 }
 0x18a   : > { %v990_v1 = vpack.c.bf16 %v986_v0, %v986_v0 }
 0x18c   : > { %995 = vst.msk [vmem:[%s1602_s24 + $0xc] sm:$0xf] %vm991_vm1, %v990_v1 }
 0x18d PF: > { %s14_s17 = sadd.s32 1, %s1392_s17   ;;  %s1626_s15 = smov %s1388_s16 }
 0x18e   : > { %p11_p5 = scmp.ge.s32.totalorder %s14_s17, 4   ;;  %s1627_s16 = smov %s1629_s18 }
 0x190   :  { %13 = sbr.rel (!%p11_p5) target bundleno = 2 (0x2), region = 81 }

// kernel: freqnet_forward.40
= control target key start
LH: loop header
LB: loop body
LE: loop exit
PB: predicated region body
PF: predicated region fallthrough
CT: control target
= control target key end

     0   :  { %s1589_s18 = smov 0   ;;  %s1591_s19 = smov 0   ;;  %s1788_s0 = inlined_call_operand.vmem [shape: bf16[2,1,32,18], index: 0, kind: input, shape index: {}]   ;;  %s1789_s1 = inlined_call_operand.vmem [shape: bf16[15,32,32], index: 1, kind: input, shape index: {}]   ;;  %s1790_s2 = inlined_call_operand.vmem [shape: f32[32,1], index: 2, kind: input, shape index: {}]   ;;  %s1791_s3 = inlined_call_operand.vmem [shape: f32[32,1], index: 3, kind: input, shape index: {}]   ;;  %s1792_s4 = inlined_call_operand.vmem [shape: bf16[2,32,4], index: 4, kind: input, shape index: {}]   ;;  %s1793_s5 = inlined_call_operand.vmem [shape: bf16[2,32,4], index: 5, kind: output, shape index: {}]  }
   0x1   :  { %s1593_s20 = smov 0  }
   0x2 LB: > { %s27_s21 = sadd.s32 1, %s1538_s19  ;;  %p1209_p0 = scmp.ge.s32.totalorder %s1542_s20, 1  ;;  %s1542_s20 = sphi %s1593_s20, %s15_s20   ;;  %s1538_s19 = sphi %s1591_s19, %s1795_s19   ;;  %s1534_s18 = sphi %s1589_s18, %s1794_s18  }
   0x3   : > { %p29_p1 = scmp.ge.s32.totalorder %s27_s21, 2  ;;  %p216_p2 = scmp.lt.s32.totalorder %s1542_s20, 3 }
   0x5   : > { %s1797_s21 = smov (%p29_p1, %s27_s21), 0  ;;  %p217_p3 = pnand %p1209_p0, %p216_p2 }
   0x6   : > { %p255_p4 = scmp.lt.s32.totalorder (!%p217_p3), %s1534_s18, 1  ;;  %s1544_s26 = smov (!%p217_p3), 127  }
   0x7   : > { %220 = sbr.rel (%p217_p3) target bundleno = 407 (0x197), region = 40  ;;  %s1545_s27 = smov (!%p217_p3), 126  }
   0x8   : > { %s1546_s28 = smov (!%p217_p3), 125   ;;  %s1547_s29 = smov (!%p217_p3), 122  }
   0x9   : > { %s1548_s30 = smov (!%p217_p3), 124   ;;  %s1549_s6 = smov (!%p217_p3), 123  }
   0xa   : > { %s1550_s7 = smov (!%p217_p3), 121   ;;  %s1551_s8 = smov (!%p217_p3), 118  }
   0xb   : > { %s1552_s9 = smov (!%p217_p3), 120   ;;  %s1553_s10 = smov (!%p217_p3), 119  }
   0xc   : > { %s1799_s18 = smov (!%p255_p4, %s1534_s18), 1  ;;  %s1554_s11 = smov 117   ;;  %v1437_v2 = vld [vmem:[%s1789_s1] sm:$0xff]  ;;  %vm316_vm0 = vcmask 261120   ;;  %v1438_v5 = vld [vmem:[%s1789_s1 + $0x8] sm:$0xff]  ;;  %v1447_v10 = vld [vmem:[%s1789_s1 + $0x50] sm:$0xff] }
   0xd   : > { %s1607_s22 = sshll.u32 %s1799_s18, 4  ;;  %s1555_s12 = smov 114   ;;  %v1440_v13 = vld [vmem:[%s1789_s1 + $0x18] sm:$0xff]  ;;  %v1441_v14 = vld [vmem:[%s1789_s1 + $0x20] sm:$0xff]  ;;  %v1439_v15 = vld [vmem:[%s1789_s1 + $0x10] sm:$0xff]  ;;  %v1558_v52 = vmov 0  }
   0xe   : > { %s259_s25 = scalar_lea.vmem %s1788_s0, %s1607_s22  ;;  %s1556_s13 = smov 116   ;;  %v1448_v18 = vld [vmem:[%s1789_s1 + $0x58] sm:$0xff]  ;;  %v1442_v20 = vld [vmem:[%s1789_s1 + $0x28] sm:$0xff]  ;;  %v1443_v21 = vld [vmem:[%s1789_s1 + $0x30] sm:$0xff]  ;;  %1517 = vset.pattern.permute.xlu1 %v1558_v52  ;;  %1519 = vset.pattern.permute.xlu0 %v1558_v52  ;;  %vm1105_vm1 = vcmask 27648  }
   0xf   : > { %v1436_v0 = vld [vmem:[%s259_s25 + $0x8] sm:$0xff]  ;;  %v1435_v1 = vld [vmem:[%s259_s25] sm:$0xff]  ;;  %s1557_s14 = smov 115   ;;  %v1444_v29 = vld [vmem:[%s1789_s1 + $0x38] sm:$0xff]  ;;  %1518 = vset.pattern.permute.xlu2 %v1558_v52 }
  0x10   : > { %312 = vrot.lane.b32.xlu1 %v1436_v0, %s1544_s26  ;;  %396 = vrot.lane.b32.xlu0 %v1436_v0, %s1545_s27  ;;  %v1445_v24 = vld [vmem:[%s1789_s1 + $0x40] sm:$0xff]  ;;  %v1446_v33 = vld [vmem:[%s1789_s1 + $0x48] sm:$0xff] }
  0x11   : > { %446 = vrot.lane.b32.xlu2 %v1436_v0, %s1546_s28  ;;  %366 = vmatpush.bf16.msra.mxu1 %v1436_v0  ;;  %v1449_v30 = vld [vmem:[%s1789_s1 + $0x60] sm:$0xff]  ;;  %v1455_v36 = vld [vmem:[%s1789_s1 + $0x90] sm:$0xff]  ;;  %v1450_v38 = vld [vmem:[%s1789_s1 + $0x68] sm:$0xff] }
  0x12   : > { %v1451_v39 = vld [vmem:[%s1789_s1 + $0x70] sm:$0xff]  ;;  %v1453_v42 = vld [vmem:[%s1789_s1 + $0x80] sm:$0xff]  ;;  %v1456_v45 = vld [vmem:[%s1789_s1 + $0x98] sm:$0xff] }
  0x13   : > { %v1452_v47 = vld [vmem:[%s1789_s1 + $0x78] sm:$0xff]  ;;  %v1457_v48 = vld [vmem:[%s1789_s1 + $0xa0] sm:$0xff]  ;;  %v1454_v50 = vld [vmem:[%s1789_s1 + $0x88] sm:$0xff] }
  0x14   : > { %v1029_v51 = vld [vmem:[%s1790_s2] sm:$0xff]  ;;  %v1463_v53 = vld [vmem:[%s1789_s1 + $0xd0] sm:$0xff]  ;;  %v1458_v54 = vld [vmem:[%s1789_s1 + $0xa8] sm:$0xff] }
  0x15   : > { %367 = vmatpush.bf16.msra.mxu1 %v1435_v1  ;;  %v1459_v55 = vld [vmem:[%s1789_s1 + $0xb0] sm:$0xff]  ;;  %v1461_v56 = vld [vmem:[%s1789_s1 + $0xc0] sm:$0xff]  ;;  %v1032_v57 = vld [vmem:[%s1790_s2 + $0x18] sm:$0xff] }
  0x16   : > { %v1464_v58 = vld [vmem:[%s1789_s1 + $0xd8] sm:$0xff]  ;;  %v1058_v59 = vld [vmem:[%s1791_s3 + $0x8] sm:$0xff]  ;;  %v1465_v61 = vld [vmem:[%s1789_s1 + $0xe0] sm:$0xff] }
  0x17   : > { %v1460_v60 = vld [vmem:[%s1789_s1 + $0xb8] sm:$0xff]  ;;  %v1462_v62 = vld [vmem:[%s1789_s1 + $0xc8] sm:$0xff]  ;;  %v1031_v63 = vld [vmem:[%s1790_s2 + $0x10] sm:$0xff] }
  0x18   : > { %310 = vrot.lane.b32.xlu1 %v1435_v1, %s1544_s26  ;;  %394 = vrot.lane.b32.xlu0 %v1435_v1, %s1545_s27 }
  0x19   : > { %444 = vrot.lane.b32.xlu2 %v1435_v1, %s1546_s28  ;;  %1246 = vmatmul.msk.bf16.vlgmr.msra.gmra.mxu1 %vm316_vm0, %v1437_v2  ;;  %v1060_v2 = vld [vmem:[%s1791_s3 + $0x18] sm:$0xff] }
  0x20   : > { %596 = vrot.lane.b32.xlu0 %v1436_v0, %s1547_s29  ;;  %496 = vrot.lane.b32.xlu1 %v1436_v0, %s1548_s30 }
  0x21   : > { %546 = vrot.lane.b32.xlu2 %v1436_v0, %s1549_s6 }
  0x28   : > { %494 = vrot.lane.b32.xlu1 %v1435_v1, %s1548_s30  ;;  %594 = vrot.lane.b32.xlu0 %v1435_v1, %s1547_s29 }
  0x29   : > { %544 = vrot.lane.b32.xlu2 %v1435_v1, %s1549_s6  ;;  %1247 = vmatmul.msk.bf16.gmra.mxu1 %vm316_vm0, %v1438_v5  ;;  %v1057_v5 = vld [vmem:[%s1791_s3] sm:$0xff] }
  0x30   : > { %646 = vrot.lane.b32.xlu0 %v1436_v0, %s1550_s7  ;;  %644 = vrot.lane.b32.xlu1 %v1435_v1, %s1550_s7 }
  0x31   : > { %796 = vrot.lane.b32.xlu2 %v1436_v0, %s1551_s8 }
  0x38   : > { %696 = vrot.lane.b32.xlu0 %v1436_v0, %s1552_s9  ;;  %746 = vrot.lane.b32.xlu1 %v1436_v0, %s1553_s10 }
  0x39   : > { %794 = vrot.lane.b32.xlu2 %v1435_v1, %s1551_s8 }
  0x40   : > { %694 = vrot.lane.b32.xlu0 %v1435_v1, %s1552_s9  ;;  %744 = vrot.lane.b32.xlu1 %v1435_v1, %s1553_s10  ;;  %s1761_s9 = scalar_lea.vmem %s1792_s4, %s1607_s22 }
  0x41   : > { %846 = vrot.lane.b32.xlu2 %v1436_v0, %s1554_s11 }
  0x48   : > { %844 = vrot.lane.b32.xlu0 %v1435_v1, %s1554_s11  ;;  %996 = vrot.lane.b32.xlu1 %v1436_v0, %s1555_s12 }
  0x49   : > { %896 = vrot.lane.b32.xlu2 %v1436_v0, %s1556_s13 }
  0x50   : > { %946 = vrot.lane.b32.xlu0 %v1436_v0, %s1557_s14  ;;  %994 = vrot.lane.b32.xlu1 %v1435_v1, %s1555_s12  ;;  %s1768_s12 = scalar_lea.vmem %s1793_s5, %s1607_s22 }
  0x51   : > { %894 = vrot.lane.b32.xlu2 %v1435_v1, %s1556_s13 }
  0x58   : > { %944 = vrot.lane.b32.xlu0 %v1435_v1, %s1557_s14  ;;  %1035 = vperm.xlu1 %1517, %v1029_v51   ;;  %v1030_v1 = vld [vmem:[%s1790_s2 + $0x8] sm:$0xff] }
  0x59   : > { %1040 = vperm.xlu2 %1518, %v1030_v1  }
  0x60   : > { %1050 = vperm.xlu1 %1517, %v1032_v57   ;;  %1045 = vperm.xlu0 %1519, %v1031_v63  }
  0x61   : > { %1063 = vperm.xlu2 %1518, %v1057_v5  }
  0x68   : > { %1068 = vperm.xlu1 %1517, %v1058_v59   ;;  %1078 = vperm.xlu0 %1519, %v1060_v2  }
  0x6b   : > { %v447_v3 = vpop.permute.xlu2 %446 }
  0x73   : > { %v445_v4 = vpop.permute.xlu2 %444 }
  0x7b   : > { %v547_v6 = vpop.permute.xlu2 %546 }
  0x7c   : > { %562 = vmatpush.bf16.msrb.mxu1 %v547_v6  ;;  %v1059_v6 = vld [vmem:[%s1791_s3 + $0x10] sm:$0xff] }
  0x7d   : > { %1073 = vperm.xlu2 %1518, %v1059_v6  }
  0x82   : > { %v313_v7 = vpop.permute.xlu1 %312  ;;  %v397_v8 = vpop.permute.xlu0 %396 }
  0x83   : > { %412 = vmatpush.bf16.msra.mxu2 %v397_v8  ;;  %1476 = vmatpush.bf16.msra.mxu3 %v313_v7  ;;  %v545_v9 = vpop.permute.xlu2 %544 }
  0x84   : > { %329 = vmatpush.bf16.msra.mxu0 %v313_v7  ;;  %563 = vmatpush.bf16.msrb.mxu1 %v545_v9 }
  0x87   : > { %1302 = vmatmul.msk.bf16.vlgmr.msrb.gmra.mxu1 %vm316_vm0, %v1447_v10 }
  0x8a   : > { %v311_v11 = vpop.permute.xlu1 %310  ;;  %v395_v12 = vpop.permute.xlu0 %394 }
  0x8b   : > { %1477 = vmatpush.bf16.msra.mxu3 %v311_v11  ;;  %413 = vmatpush.bf16.msra.mxu2 %v395_v12  ;;  %v797_v19 = vpop.permute.xlu2 %796 }
  0x8c   : > { %330 = vmatpush.bf16.msra.mxu0 %v311_v11 }
  0x8e   : > { %1237 = vmatmul.msk.bf16.vlgmr.msra.gmra.mxu3 %vm316_vm0, %v1440_v13  ;;  %1260 = vmatmul.msk.bf16.vlgmr.msra.gmra.mxu2 %vm316_vm0, %v1441_v14 }
  0x8f   : > { %462 = vmatpush.bf16.msrb.mxu3 %v447_v3  ;;  %1236 = vmatmul.msk.bf16.vlgmr.msra.gmra.mxu0 %vm316_vm0, %v1439_v15  ;;  %v1466_v3 = vld [vmem:[%s1789_s1 + $0xe8] sm:$0xff] }
  0x92   : > { %v597_v16 = vpop.permute.xlu0 %596  ;;  %v497_v17 = vpop.permute.xlu1 %496 }
  0x93   : > { %463 = vmatpush.bf16.msrb.mxu3 %v445_v4  ;;  %612 = vmatpush.bf16.msrb.mxu2 %v597_v16  ;;  %v795_v25 = vpop.permute.xlu2 %794 }
  0x94   : > { %512 = vmatpush.bf16.msrb.mxu0 %v497_v17 }
  0x96   : > { %v369_v0 = vpop.f32.mrf.mxu1 }
  0x97   : > { %1303 = vmatmul.msk.bf16.gmra.mxu1 %vm316_vm0, %v1448_v18 }
  0x9a   : > { %v495_v22 = vpop.permute.xlu1 %494  ;;  %v595_v23 = vpop.permute.xlu0 %594 }
  0x9b   : > { %513 = vmatpush.bf16.msrb.mxu0 %v495_v22  ;;  %613 = vmatpush.bf16.msrb.mxu2 %v595_v23  ;;  %v847_v28 = vpop.permute.xlu2 %846 }
  0x9e   : > { %1261 = vmatmul.msk.bf16.gmra.mxu2 %vm316_vm0, %v1442_v20  ;;  %1274 = vmatmul.msk.bf16.vlgmr.msrb.gmra.mxu3 %vm316_vm0, %v1443_v21  ;;  %v371_v4 = vpop.f32.mrf.mxu1 }
  0x9f   : > { %812 = vmatpush.bf16.msra.mxu2 %v797_v19  ;;  %1288 = vmatmul.msk.bf16.vlgmr.msrb.gmra.mxu0 %vm316_vm0, %v1445_v24 }
  0xa2   : > { %v647_v26 = vpop.permute.xlu0 %646  ;;  %v645_v27 = vpop.permute.xlu1 %644 }
  0xa3   : > { %813 = vmatpush.bf16.msra.mxu2 %v795_v25  ;;  %662 = vmatpush.bf16.msra.mxu3 %v647_v26  ;;  %v897_v37 = vpop.permute.xlu2 %896 }
  0xa6   : > { %v374_v7 = vpop.f32.mrf.mxu1 }
  0xa7   : > { %663 = vmatpush.bf16.msra.mxu3 %v645_v27 }
  0xaa   : > { %v697_v31 = vpop.permute.xlu0 %696  ;;  %v747_v32 = vpop.permute.xlu1 %746 }
  0xab   : > { %862 = vmatpush.bf16.msrb.mxu3 %v847_v28  ;;  %712 = vmatpush.bf16.msra.mxu0 %v697_v31  ;;  %v895_v43 = vpop.permute.xlu2 %894 }
  0xac   : > { %762 = vmatpush.bf16.msra.mxu1 %v747_v32 }
  0xae   : > { %1275 = vmatmul.msk.bf16.gmra.mxu3 %vm316_vm0, %v1444_v29  ;;  %1316 = vmatmul.msk.bf16.vlgmr.msrb.gmra.mxu2 %vm316_vm0, %v1449_v30  ;;  %v376_v10 = vpop.f32.mrf.mxu1 }
  0xaf   : > { %1289 = vmatmul.msk.bf16.gmra.mxu0 %vm316_vm0, %v1446_v33 }
  0xb2   : > { %v695_v34 = vpop.permute.xlu0 %694  ;;  %v745_v35 = vpop.permute.xlu1 %744 }
  0xb3   : > { %713 = vmatpush.bf16.msra.mxu0 %v695_v34  ;;  %763 = vmatpush.bf16.msra.mxu1 %v745_v35 }
  0xb6   : > { %1358 = vmatmul.msk.bf16.vlgmr.msra.gmra.mxu1 %vm316_vm0, %v1455_v36 }
  0xb7   : > { %912 = vmatpush.bf16.msrb.mxu0 %v897_v37 }
  0xba   : > { %v845_v40 = vpop.permute.xlu0 %844  ;;  %v997_v41 = vpop.permute.xlu1 %996 }
  0xbb   : > { %863 = vmatpush.bf16.msrb.mxu3 %v845_v40  ;;  %1012 = vmatpush.bf16.msrb.mxu2 %v997_v41 }
  0xbc   : > { %913 = vmatpush.bf16.msrb.mxu0 %v895_v43 }
  0xbe   : > { %1317 = vmatmul.msk.bf16.gmra.mxu2 %vm316_vm0, %v1450_v38  ;;  %1330 = vmatmul.msk.bf16.vlgmr.msra.gmra.mxu3 %vm316_vm0, %v1451_v39 }
  0xbf   : > { %1344 = vmatmul.msk.bf16.vlgmr.msra.gmra.mxu0 %vm316_vm0, %v1453_v42 }
  0xc2   : > { %v947_v44 = vpop.permute.xlu0 %946  ;;  %v995_v46 = vpop.permute.xlu1 %994 }
  0xc3   : > { %962 = vmatpush.bf16.msrb.mxu1 %v947_v44  ;;  %1013 = vmatpush.bf16.msrb.mxu2 %v995_v46 }
  0xc6   : > { %1359 = vmatmul.msk.bf16.gmra.mxu1 %vm316_vm0, %v1456_v45 }
  0xca   : > { %v945_v49 = vpop.permute.xlu0 %944 }
  0xcb   : > { %963 = vmatpush.bf16.msrb.mxu1 %v945_v49 }
  0xce   : > { %1331 = vmatmul.msk.bf16.gmra.mxu3 %vm316_vm0, %v1452_v47  ;;  %1372 = vmatmul.msk.bf16.vlgmr.msra.gmra.mxu2 %vm316_vm0, %v1457_v48 }
  0xcf   : > { %1345 = vmatmul.msk.bf16.gmra.mxu0 %vm316_vm0, %v1454_v50 }
  0xd6   : > { %1414 = vmatmul.msk.bf16.vlgmr.msrb.gmra.mxu1 %vm316_vm0, %v1463_v53 }
  0xde   : > { %1373 = vmatmul.msk.bf16.gmra.mxu2 %vm316_vm0, %v1458_v54  ;;  %1386 = vmatmul.msk.bf16.vlgmr.msrb.gmra.mxu3 %vm316_vm0, %v1459_v55 }
  0xdf   : > { %1400 = vmatmul.msk.bf16.vlgmr.msrb.gmra.mxu0 %vm316_vm0, %v1461_v56 }
  0xe6   : > { %1415 = vmatmul.msk.bf16.gmra.mxu1 %vm316_vm0, %v1464_v58 }
  0xee   : > { %1387 = vmatmul.msk.bf16.gmra.mxu3 %vm316_vm0, %v1460_v60  ;;  %1428 = vmatmul.msk.bf16.vlgmr.msrb.gmra.mxu2 %vm316_vm0, %v1465_v61 }
  0xef   : > { %1401 = vmatmul.msk.bf16.gmra.mxu0 %vm316_vm0, %v1462_v62 }
  0xfe   : > { %1429 = vmatmul.msk.bf16.gmra.mxu2 %vm316_vm0, %v1466_v3 }
 0x104   : > { %v565_v16 = vpop.f32.mrf.mxu1 }
 0x10c   : > { %v332_v8 = vpop.f32.mrf.mxu0  ;;  %v567_v23 = vpop.f32.mrf.mxu1 }
 0x10d   : > { %v370_v9 = vadd.f32 %v369_v0, %v332_v8 }
 0x111   : > { %v337_v11 = vpop.f32.mrf.mxu3  ;;  %v415_v12 = vpop.f32.mrf.mxu2 }
 0x112   : > { %v425_v13 = vadd.f32 %v415_v12, %v370_v9  ;;  %v375_v14 = vadd.f32 %v374_v7, %v337_v11  ;;  %v1036_v9 = vpop.permute.xlu1 %1035 }
 0x114   : > { %v334_v15 = vpop.f32.mrf.mxu0  ;;  %v570_v31 = vpop.f32.mrf.mxu1 }
 0x115   : > { %v372_v17 = vadd.f32 %v371_v4, %v334_v15  ;;  %v1041_v15 = vpop.permute.xlu2 %1040 }
 0x119   : > { %v339_v18 = vpop.f32.mrf.mxu3  ;;  %v417_v19 = vpop.f32.mrf.mxu2 }
 0x11a   : > { %v426_v20 = vadd.f32 %v417_v19, %v372_v17  ;;  %v377_v21 = vadd.f32 %v376_v10, %v339_v18 }
 0x11c   : > { %v515_v22 = vpop.f32.mrf.mxu0  ;;  %v572_v36 = vpop.f32.mrf.mxu1 }
 0x121   : > { %v420_v24 = vpop.f32.mrf.mxu2  ;;  %v465_v25 = vpop.f32.mrf.mxu3 }
 0x122   : > { %v427_v26 = vadd.f32 %v420_v24, %v375_v14  ;;  %v475_v48 = vadd.f32 %v465_v25, %v425_v13 }
 0x124   : > { %v517_v27 = vpop.f32.mrf.mxu0  ;;  %v525_v52 = vadd.f32 %v515_v22, %v475_v48 }
 0x126   : > { %v575_v53 = vadd.f32 %v565_v16, %v525_v52 }
 0x129   : > { %v422_v28 = vpop.f32.mrf.mxu2  ;;  %v467_v29 = vpop.f32.mrf.mxu3 }
 0x12a   : > { %v428_v30 = vadd.f32 %v422_v28, %v377_v21  ;;  %v476_v54 = vadd.f32 %v467_v29, %v426_v20  ;;  %v1051_v29 = vpop.permute.xlu1 %1050 }
 0x12c   : > { %v520_v32 = vpop.f32.mrf.mxu0  ;;  %v526_v59 = vadd.f32 %v517_v27, %v476_v54 }
 0x12e   : > { %v576_v62 = vadd.f32 %v567_v23, %v526_v59 }
 0x131   : > { %v470_v33 = vpop.f32.mrf.mxu3  ;;  %v615_v34 = vpop.f32.mrf.mxu2 }
 0x132   : > { %v625_v58 = vadd.f32 %v615_v34, %v575_v53  ;;  %v477_v63 = vadd.f32 %v470_v33, %v427_v26  ;;  %v1069_v53 = vpop.permute.xlu1 %1068 }
 0x133   : > { %v765_v40 = vpop.f32.mrf.mxu1 }
 0x134   : > { %v522_v35 = vpop.f32.mrf.mxu0  ;;  %v527_v5 = vadd.f32 %v520_v32, %v477_v63 }
 0x136   : > { %v577_v11 = vadd.f32 %v570_v31, %v527_v5 }
 0x139   : > { %v472_v37 = vpop.f32.mrf.mxu3  ;;  %v617_v38 = vpop.f32.mrf.mxu2 }
 0x13a   : > { %v626_v3 = vadd.f32 %v617_v38, %v576_v62  ;;  %v478_v12 = vadd.f32 %v472_v37, %v428_v30  ;;  %v1064_v37 = vpop.permute.xlu2 %1063 }
 0x13b   : > { %v767_v44 = vpop.f32.mrf.mxu1 }
 0x13c   : > { %v715_v39 = vpop.f32.mrf.mxu0  ;;  %v528_v19 = vadd.f32 %v522_v35, %v478_v12  ;;  %v1468_v35 = vld [vmem:[%s1761_s9] sm:$0xff]  }
 0x13e   : > { %v578_v25 = vadd.f32 %v572_v36, %v528_v19 }
 0x141   : > { %v620_v41 = vpop.f32.mrf.mxu2  ;;  %v665_v42 = vpop.f32.mrf.mxu3 }
 0x142   : > { %v675_v60 = vadd.f32 %v665_v42, %v625_v58  ;;  %v627_v18 = vadd.f32 %v620_v41, %v577_v11  ;;  %v1469_v42 = vunpack.c.l.bf16 %v1468_v35  ;;  %v1074_v11 = vpop.permute.xlu2 %1073 }
 0x143   : > { %v770_v51 = vpop.f32.mrf.mxu1 }
 0x144   : > { %v717_v43 = vpop.f32.mrf.mxu0  ;;  %v725_v0 = vadd.f32 %v715_v39, %v675_v60  ;;  %v1470_v60 = vunpack.c.h.bf16 %v1468_v35 }
 0x146   : > { %v775_v6 = vadd.f32 %v765_v40, %v725_v0 }
 0x149   : > { %v622_v45 = vpop.f32.mrf.mxu2  ;;  %v667_v46 = vpop.f32.mrf.mxu3 }
 0x14a   : > { %v676_v7 = vadd.f32 %v667_v46, %v626_v3  ;;  %v628_v32 = vadd.f32 %v622_v45, %v578_v25 }
 0x14b   : > { %v772_v61 = vpop.f32.mrf.mxu1 }
 0x14c   : > { %v720_v47 = vpop.f32.mrf.mxu0  ;;  %v726_v13 = vadd.f32 %v717_v43, %v676_v7 }
 0x14e   : > { %v776_v20 = vadd.f32 %v767_v44, %v726_v13 }
 0x151   : > { %v670_v49 = vpop.f32.mrf.mxu3  ;;  %v815_v50 = vpop.f32.mrf.mxu2 }
 0x152   : > { %v825_v8 = vadd.f32 %v815_v50, %v775_v6  ;;  %v677_v21 = vadd.f32 %v670_v49, %v627_v18  ;;  %v1475_v6 = vld [vmem:[%s1761_s9 + $0x8] sm:$0xff]  }
 0x153   : > { %v965_v10 = vpop.f32.mrf.mxu1  ;;  %v1473_v12 = vunpack.c.l.bf16 %v1475_v6 }
 0x154   : > { %v722_v55 = vpop.f32.mrf.mxu0  ;;  %v727_v26 = vadd.f32 %v720_v47, %v677_v21 }
 0x156   : > { %v777_v38 = vadd.f32 %v770_v51, %v727_v26 }
 0x159   : > { %v672_v56 = vpop.f32.mrf.mxu3  ;;  %v817_v57 = vpop.f32.mrf.mxu2 }
 0x15a   : > { %v826_v24 = vadd.f32 %v817_v57, %v776_v20  ;;  %v678_v36 = vadd.f32 %v672_v56, %v628_v32 }
 0x15b   : > { %v967_v30 = vpop.f32.mrf.mxu1 }
 0x15c   : > { %v915_v4 = vpop.f32.mrf.mxu0  ;;  %v728_v46 = vadd.f32 %v722_v55, %v678_v36 }
 0x15e   : > { %v778_v54 = vadd.f32 %v772_v61, %v728_v46  ;;  %v1046_v61 = vpop.permute.xlu0 %1045 }
 0x161   : > { %v820_v1 = vpop.f32.mrf.mxu2  ;;  %v865_v2 = vpop.f32.mrf.mxu3 }
 0x162   : > { %v875_v14 = vadd.f32 %v865_v2, %v825_v8  ;;  %v827_v41 = vadd.f32 %v820_v1, %v777_v38 }
 0x163   : > { %v970_v51 = vpop.f32.mrf.mxu1 }
 0x164   : > { %v925_v22 = vadd.f32 %v915_v4, %v875_v14  ;;  %v917_v23 = vpop.f32.mrf.mxu0 }
 0x166   : > { %v975_v27 = vadd.f32 %v965_v10, %v925_v22  ;;  %v1079_v21 = vpop.permute.xlu0 %1078  ;;  %v1474_v22 = vunpack.c.h.bf16 %v1475_v6 }
 0x169   : > { %v822_v16 = vpop.f32.mrf.mxu2  ;;  %v867_v17 = vpop.f32.mrf.mxu3 }
 0x16a   : > { %v876_v28 = vadd.f32 %v867_v17, %v826_v24  ;;  %v828_v59 = vadd.f32 %v822_v16, %v778_v54 }
 0x16b   : > { %v972_v10 = vpop.f32.mrf.mxu1 }
 0x16c   : > { %v926_v39 = vadd.f32 %v917_v23, %v876_v28  ;;  %v920_v44 = vpop.f32.mrf.mxu0 }
 0x16e   : > { %v976_v47 = vadd.f32 %v967_v30, %v926_v39 }
 0x171   : > { %v1015_v31 = vpop.f32.mrf.mxu2  ;;  %v870_v34 = vpop.f32.mrf.mxu3 }
 0x172   : > { %v1025_v33 = vadd.f32 %v1015_v31, %v975_v27  ;;  %v877_v48 = vadd.f32 %v870_v34, %v827_v41 }
 0x174   : > { %v1053_v40 = vmul.f32 %v1036_v9, %v1025_v33  ;;  %v927_v56 = vadd.f32 %v920_v44, %v877_v48  ;;  %v922_v2 = vpop.f32.mrf.mxu0 }
 0x176   : > { %v1081_v43 = vadd.f32 %v1064_v37, %v1053_v40  ;;  %v977_v63 = vadd.f32 %v970_v51, %v927_v56 }
 0x178   : > { %v1085_v49 = vmax.f32 %v1081_v43, 0.0 }
 0x179   : > { %v1017_v50 = vpop.f32.mrf.mxu2  ;;  %v872_v58 = vpop.f32.mrf.mxu3 }
 0x17a   : > { %v1097_v52 = vadd.f32 %v1469_v42, %v1085_v49  ;;  %v1026_v45 = vadd.f32 %v1017_v50, %v976_v47  ;;  %v878_v0 = vadd.f32 %v872_v58, %v828_v59 }
 0x17c   : > { %v1101_v57 = vpack.c.bf16 %v1097_v52, %v1097_v52  ;;  %v1054_v55 = vmul.f32 %v1041_v15, %v1026_v45  ;;  %v928_v7 = vadd.f32 %v922_v2, %v878_v0 }
 0x17e   : > { %1106 = vst.msk [vmem:[%s1768_s12] sm:$0xf] %vm1105_vm1, %v1101_v57  ;;  %v1082_v62 = vadd.f32 %v1069_v53, %v1054_v55  ;;  %v978_v14 = vadd.f32 %v972_v10, %v928_v7 }
 0x180   : > { %v1086_v1 = vmax.f32 %v1082_v62, 0.0 }
 0x181   : > { %v1020_v3 = vpop.f32.mrf.mxu2 }
 0x182   : > { %v1098_v4 = vadd.f32 %v1470_v60, %v1086_v1  ;;  %v1027_v5 = vadd.f32 %v1020_v3, %v977_v63 }
 0x184   : > { %v1102_v8 = vpack.c.bf16 %v1098_v4, %v1098_v4  ;;  %v1055_v9 = vmul.f32 %v1046_v61, %v1027_v5 }
 0x186   : > { %1107 = vst.msk [vmem:[%s1768_s12 + $0x4] sm:$0xf] %vm1105_vm1, %v1102_v8  ;;  %v1083_v13 = vadd.f32 %v1074_v11, %v1055_v9 }
 0x188   : > { %v1087_v15 = vmax.f32 %v1083_v13, 0.0 }
 0x189   : > { %v1022_v16 = vpop.f32.mrf.mxu2 }
 0x18a   : > { %v1099_v17 = vadd.f32 %v1473_v12, %v1087_v15  ;;  %v1028_v18 = vadd.f32 %v1022_v16, %v978_v14 }
 0x18c   : > { %v1103_v19 = vpack.c.bf16 %v1099_v17, %v1099_v17  ;;  %v1056_v20 = vmul.f32 %v1051_v29, %v1028_v18 }
 0x18e   : > { %1108 = vst.msk [vmem:[%s1768_s12 + $0x8] sm:$0xf] %vm1105_vm1, %v1103_v19  ;;  %v1084_v23 = vadd.f32 %v1079_v21, %v1056_v20 }
 0x190   : > { %v1088_v24 = vmax.f32 %v1084_v23, 0.0 }
 0x192   : > { %v1100_v25 = vadd.f32 %v1474_v22, %v1088_v24 }
 0x194   : > { %v1104_v26 = vpack.c.bf16 %v1100_v25, %v1100_v25 }
 0x196   : > { %1109 = vst.msk [vmem:[%s1768_s12 + $0xc] sm:$0xf] %vm1105_vm1, %v1104_v26 }
 0x197 PF: > { %s15_s20 = sadd.s32 1, %s1542_s20   ;;  %s1794_s18 = smov %s1538_s19 }
 0x198   : > { %p12_p5 = scmp.ge.s32.totalorder %s15_s20, 4   ;;  %s1795_s19 = smov %s1797_s21 }
 0x19a   :  { %14 = sbr.rel (!%p12_p5) target bundleno = 2 (0x2), region = 87 }

// kernel: freqnet_forward.47
= control target key start
LH: loop header
LB: loop body
LE: loop exit
PB: predicated region body
PF: predicated region fallthrough
CT: control target
= control target key end

     0   :  { %vm46_vm0 = vcmask 261120   ;;  %vm77_vm1 = vcmask 1043456   ;;  %vm78_vm2 = vcmask 523268   ;;  %s160_s1 = inlined_call_operand.vmem [shape: bf16[32,192], index: 1, kind: input, shape index: {}]   ;;  %s161_s0 = inlined_call_operand.vmem [shape: bf16[8,32], index: 0, kind: input, shape index: {}]   ;;  %s162_s2 = inlined_call_operand.vmem [shape: f32[1,192], index: 2, kind: input, shape index: {}]   ;;  %s163_s3 = inlined_call_operand.vmem [shape: bf16[8,192], index: 3, kind: output, shape index: {}]  }
   0x1   :  { %v95_v0 = vld [vmem:[%s160_s1 + $0x10] sm:$0xf]  ;;  %v106_v1 = vld [vmem:[%s160_s1 + $0x14] sm:$0xf0]  ;;  %v105_v2 = vld [vmem:[%s160_s1 + $0x14] sm:$0xf] }
   0x2   :  { %v96_v3 = vor.u32 %v106_v1, %v95_v0  ;;  %v97_v4 = vld [vmem:[%s160_s1 + $0x18] sm:$0xf0]  ;;  %v87_v5 = vld [vmem:[%s160_s1] sm:$0xf]  ;;  %v104_v6 = vld [vmem:[%s160_s1 + $0x4] sm:$0xf0] }
   0x3   :  { %v100_v7 = vor.u32 %v105_v2, %v97_v4  ;;  %v103_v8 = vld [vmem:[%s160_s1 + $0x4] sm:$0xf]  ;;  %v89_v9 = vld [vmem:[%s160_s1 + $0x8] sm:$0xf0]  ;;  %v88_v10 = vor.u32 %v104_v6, %v87_v5  ;;  %v15_v12 = vld [vmem:[%s161_s0] sm:$0xf] }
   0x4   :  { %56 = vmatpush.bf16.msra.mxu0 %v96_v3  ;;  %v92_v11 = vor.u32 %v103_v8, %v89_v9  ;;  %v20_v13 = vld [vmem:[%s162_s2] sm:$0x3]  ;;  %vm79_vm3 = vmor %vm78_vm2, %vm77_vm1 }
   0x5   :  { %69 = vmatpush.bf16.msra.mxu1 %v100_v7  ;;  %v22_v14 = vperm.slane %v20_v13, 0  ;;  %v23_v15 = vperm.slane %v20_v13, 1 }
   0x8   :  { %57 = vmatpush.bf16.msra.mxu0 %v88_v10 }
   0x9   :  { %70 = vmatpush.bf16.msra.mxu1 %v92_v11 }
   0xb   :  { %101 = vmatmul.msk.bf16.vlgmr.msra.gmra.mxu0 %vm46_vm0, %v15_v12 }
   0xc   :  { %102 = vmatmul.msk.bf16.vlgmr.msra.gmra.mxu1 %vm46_vm0, %v15_v12 }
  0x88   :  { %v59_v16 = vpop.f32.mrf.mxu0 }
  0x89   :  { %v60_v17 = vadd.f32 %v59_v16, %v22_v14  ;;  %v72_v18 = vpop.f32.mrf.mxu1 }
  0x8a   :  { %v73_v19 = vadd.f32 %v72_v18, %v23_v15 }
  0x8c   :  { %v76_v20 = vpack.c.bf16 %v73_v19, %v60_v17 }
  0x8e   :  { %80 = vst.msk [vmem:[%s163_s3] sm:$0xff] %vm79_vm3, %v76_v20 }
  0x90   :  { %v61_v21 = vpop.f32.mrf.mxu0 }
  0x91   :  { %v74_v22 = vpop.f32.mrf.mxu1 }

// kernel: freqnet_forward.41
= control target key start
LH: loop header
LB: loop body
LE: loop exit
PB: predicated region body
PF: predicated region fallthrough
CT: control target
= control target key end

     0   :  { %s1484_s15 = smov 0   ;;  %s1486_s16 = smov 0   ;;  %s1678_s0 = inlined_call_operand.vmem [shape: bf16[2,1,32,18], index: 0, kind: input, shape index: {}]   ;;  %s1679_s1 = inlined_call_operand.vmem [shape: bf16[15,32,32], index: 1, kind: input, shape index: {}]   ;;  %s1680_s2 = inlined_call_operand.vmem [shape: f32[32,1], index: 2, kind: input, shape index: {}]   ;;  %s1681_s3 = inlined_call_operand.vmem [shape: f32[32,1], index: 3, kind: input, shape index: {}]   ;;  %s1682_s4 = inlined_call_operand.vmem [shape: bf16[2,32,4], index: 4, kind: output, shape index: {}]  }
   0x1   :  { %s1488_s17 = smov 0  }
   0x2 LB: > { %s26_s18 = sadd.s32 1, %s1438_s16  ;;  %p1121_p0 = scmp.ge.s32.totalorder %s1442_s17, 1  ;;  %s1442_s17 = sphi %s1488_s17, %s14_s17   ;;  %s1438_s16 = sphi %s1486_s16, %s1684_s16   ;;  %s1434_s15 = sphi %s1484_s15, %s1683_s15  }
   0x3   : > { %p28_p1 = scmp.ge.s32.totalorder %s26_s18, 2  ;;  %p176_p2 = scmp.lt.s32.totalorder %s1442_s17, 3 }
   0x5   : > { %s1686_s18 = smov (%p28_p1, %s26_s18), 0  ;;  %p177_p3 = pnand %p1121_p0, %p176_p2 }
   0x6   : > { %p205_p4 = scmp.lt.s32.totalorder (!%p177_p3), %s1434_s15, 1  ;;  %s1444_s23 = smov (!%p177_p3), 127  }
   0x7   : > { %180 = sbr.rel (%p177_p3) target bundleno = 405 (0x195), region = 36  ;;  %s1445_s24 = smov (!%p177_p3), 126  }
   0x8   : > { %s1446_s25 = smov (!%p177_p3), 125   ;;  %s1447_s26 = smov (!%p177_p3), 122  }
   0x9   : > { %s1448_s27 = smov (!%p177_p3), 124   ;;  %s1449_s28 = smov (!%p177_p3), 123  }
   0xa   : > { %s1450_s29 = smov (!%p177_p3), 121   ;;  %s1451_s30 = smov (!%p177_p3), 118  }
   0xb   : > { %s1452_s5 = smov (!%p177_p3), 120   ;;  %s1453_s6 = smov (!%p177_p3), 119  }
   0xc   : > { %s1688_s15 = smov (!%p205_p4, %s1434_s15), 1  ;;  %s1454_s7 = smov 117   ;;  %v1346_v2 = vld [vmem:[%s1679_s1] sm:$0xff]  ;;  %vm258_vm0 = vcmask 261120   ;;  %v1347_v5 = vld [vmem:[%s1679_s1 + $0x8] sm:$0xff]  ;;  %v1356_v10 = vld [vmem:[%s1679_s1 + $0x50] sm:$0xff] }
   0xd   : > { %s1342_s19 = sshll.u32 %s1688_s15, 4  ;;  %s1455_s8 = smov 114   ;;  %v1349_v13 = vld [vmem:[%s1679_s1 + $0x18] sm:$0xff]  ;;  %v1350_v14 = vld [vmem:[%s1679_s1 + $0x20] sm:$0xff]  ;;  %v1348_v15 = vld [vmem:[%s1679_s1 + $0x10] sm:$0xff]  ;;  %v1458_v52 = vmov 0  }
   0xe   : > { %s209_s22 = scalar_lea.vmem %s1678_s0, %s1342_s19  ;;  %s1456_s9 = smov 116   ;;  %v1357_v18 = vld [vmem:[%s1679_s1 + $0x58] sm:$0xff]  ;;  %v1351_v20 = vld [vmem:[%s1679_s1 + $0x28] sm:$0xff]  ;;  %v1352_v21 = vld [vmem:[%s1679_s1 + $0x30] sm:$0xff]  ;;  %1417 = vset.pattern.permute.xlu1 %v1458_v52  ;;  %1419 = vset.pattern.permute.xlu0 %v1458_v52  ;;  %vm1035_vm1 = vcmask 27648  }
   0xf   : > { %v1345_v0 = vld [vmem:[%s209_s22 + $0x8] sm:$0xff]  ;;  %v1344_v1 = vld [vmem:[%s209_s22] sm:$0xff]  ;;  %s1457_s10 = smov 115   ;;  %v1353_v29 = vld [vmem:[%s1679_s1 + $0x38] sm:$0xff]  ;;  %1418 = vset.pattern.permute.xlu2 %v1458_v52 }
  0x10   : > { %254 = vrot.lane.b32.xlu1 %v1345_v0, %s1444_s23  ;;  %338 = vrot.lane.b32.xlu0 %v1345_v0, %s1445_s24  ;;  %v1354_v24 = vld [vmem:[%s1679_s1 + $0x40] sm:$0xff]  ;;  %v1355_v33 = vld [vmem:[%s1679_s1 + $0x48] sm:$0xff] }
  0x11   : > { %388 = vrot.lane.b32.xlu2 %v1345_v0, %s1446_s25  ;;  %308 = vmatpush.bf16.msra.mxu1 %v1345_v0  ;;  %v1358_v30 = vld [vmem:[%s1679_s1 + $0x60] sm:$0xff]  ;;  %v1364_v36 = vld [vmem:[%s1679_s1 + $0x90] sm:$0xff]  ;;  %v1359_v38 = vld [vmem:[%s1679_s1 + $0x68] sm:$0xff] }
  0x12   : > { %v1360_v39 = vld [vmem:[%s1679_s1 + $0x70] sm:$0xff]  ;;  %v1362_v42 = vld [vmem:[%s1679_s1 + $0x80] sm:$0xff]  ;;  %v1365_v45 = vld [vmem:[%s1679_s1 + $0x98] sm:$0xff] }
  0x13   : > { %v1361_v47 = vld [vmem:[%s1679_s1 + $0x78] sm:$0xff]  ;;  %v1366_v48 = vld [vmem:[%s1679_s1 + $0xa0] sm:$0xff]  ;;  %v1363_v50 = vld [vmem:[%s1679_s1 + $0x88] sm:$0xff] }
  0x14   : > { %v971_v51 = vld [vmem:[%s1680_s2] sm:$0xff]  ;;  %v1372_v53 = vld [vmem:[%s1679_s1 + $0xd0] sm:$0xff]  ;;  %v1367_v54 = vld [vmem:[%s1679_s1 + $0xa8] sm:$0xff] }
  0x15   : > { %309 = vmatpush.bf16.msra.mxu1 %v1344_v1  ;;  %v1368_v55 = vld [vmem:[%s1679_s1 + $0xb0] sm:$0xff]  ;;  %v1370_v56 = vld [vmem:[%s1679_s1 + $0xc0] sm:$0xff]  ;;  %v974_v57 = vld [vmem:[%s1680_s2 + $0x18] sm:$0xff] }
  0x16   : > { %v1373_v58 = vld [vmem:[%s1679_s1 + $0xd8] sm:$0xff]  ;;  %v1000_v59 = vld [vmem:[%s1681_s3 + $0x8] sm:$0xff]  ;;  %v1374_v61 = vld [vmem:[%s1679_s1 + $0xe0] sm:$0xff] }
  0x17   : > { %v1369_v60 = vld [vmem:[%s1679_s1 + $0xb8] sm:$0xff]  ;;  %v1371_v62 = vld [vmem:[%s1679_s1 + $0xc8] sm:$0xff]  ;;  %v973_v63 = vld [vmem:[%s1680_s2 + $0x10] sm:$0xff] }
  0x18   : > { %252 = vrot.lane.b32.xlu1 %v1344_v1, %s1444_s23  ;;  %336 = vrot.lane.b32.xlu0 %v1344_v1, %s1445_s24 }
  0x19   : > { %386 = vrot.lane.b32.xlu2 %v1344_v1, %s1446_s25  ;;  %1156 = vmatmul.msk.bf16.vlgmr.msra.gmra.mxu1 %vm258_vm0, %v1346_v2  ;;  %v1002_v2 = vld [vmem:[%s1681_s3 + $0x18] sm:$0xff] }
  0x20   : > { %538 = vrot.lane.b32.xlu0 %v1345_v0, %s1447_s26  ;;  %438 = vrot.lane.b32.xlu1 %v1345_v0, %s1448_s27 }
  0x21   : > { %488 = vrot.lane.b32.xlu2 %v1345_v0, %s1449_s28 }
  0x28   : > { %436 = vrot.lane.b32.xlu1 %v1344_v1, %s1448_s27  ;;  %536 = vrot.lane.b32.xlu0 %v1344_v1, %s1447_s26 }
  0x29   : > { %486 = vrot.lane.b32.xlu2 %v1344_v1, %s1449_s28  ;;  %1157 = vmatmul.msk.bf16.gmra.mxu1 %vm258_vm0, %v1347_v5  ;;  %v999_v5 = vld [vmem:[%s1681_s3] sm:$0xff] }
  0x30   : > { %588 = vrot.lane.b32.xlu0 %v1345_v0, %s1450_s29  ;;  %586 = vrot.lane.b32.xlu1 %v1344_v1, %s1450_s29 }
  0x31   : > { %738 = vrot.lane.b32.xlu2 %v1345_v0, %s1451_s30 }
  0x38   : > { %638 = vrot.lane.b32.xlu0 %v1345_v0, %s1452_s5  ;;  %688 = vrot.lane.b32.xlu1 %v1345_v0, %s1453_s6 }
  0x39   : > { %736 = vrot.lane.b32.xlu2 %v1344_v1, %s1451_s30 }
  0x40   : > { %636 = vrot.lane.b32.xlu0 %v1344_v1, %s1452_s5  ;;  %686 = vrot.lane.b32.xlu1 %v1344_v1, %s1453_s6  ;;  %s1659_s5 = scalar_lea.vmem %s1682_s4, %s1342_s19 }
  0x41   : > { %788 = vrot.lane.b32.xlu2 %v1345_v0, %s1454_s7 }
  0x48   : > { %786 = vrot.lane.b32.xlu0 %v1344_v1, %s1454_s7  ;;  %938 = vrot.lane.b32.xlu1 %v1345_v0, %s1455_s8 }
  0x49   : > { %838 = vrot.lane.b32.xlu2 %v1345_v0, %s1456_s9 }
  0x50   : > { %888 = vrot.lane.b32.xlu0 %v1345_v0, %s1457_s10  ;;  %936 = vrot.lane.b32.xlu1 %v1344_v1, %s1455_s8 }
  0x51   : > { %836 = vrot.lane.b32.xlu2 %v1344_v1, %s1456_s9 }
  0x58   : > { %886 = vrot.lane.b32.xlu0 %v1344_v1, %s1457_s10  ;;  %977 = vperm.xlu1 %1417, %v971_v51   ;;  %v972_v1 = vld [vmem:[%s1680_s2 + $0x8] sm:$0xff] }
  0x59   : > { %982 = vperm.xlu2 %1418, %v972_v1  }
  0x60   : > { %992 = vperm.xlu1 %1417, %v974_v57   ;;  %987 = vperm.xlu0 %1419, %v973_v63  }
  0x61   : > { %1005 = vperm.xlu2 %1418, %v999_v5  }
  0x68   : > { %1010 = vperm.xlu1 %1417, %v1000_v59   ;;  %1020 = vperm.xlu0 %1419, %v1002_v2  }
  0x6b   : > { %v389_v3 = vpop.permute.xlu2 %388 }
  0x73   : > { %v387_v4 = vpop.permute.xlu2 %386 }
  0x7b   : > { %v489_v6 = vpop.permute.xlu2 %488 }
  0x7c   : > { %504 = vmatpush.bf16.msrb.mxu1 %v489_v6  ;;  %v1001_v6 = vld [vmem:[%s1681_s3 + $0x10] sm:$0xff] }
  0x7d   : > { %1015 = vperm.xlu2 %1418, %v1001_v6  }
  0x82   : > { %v255_v7 = vpop.permute.xlu1 %254  ;;  %v339_v8 = vpop.permute.xlu0 %338 }
  0x83   : > { %354 = vmatpush.bf16.msra.mxu2 %v339_v8  ;;  %1376 = vmatpush.bf16.msra.mxu3 %v255_v7  ;;  %v487_v9 = vpop.permute.xlu2 %486 }
  0x84   : > { %271 = vmatpush.bf16.msra.mxu0 %v255_v7  ;;  %505 = vmatpush.bf16.msrb.mxu1 %v487_v9 }
  0x87   : > { %1212 = vmatmul.msk.bf16.vlgmr.msrb.gmra.mxu1 %vm258_vm0, %v1356_v10 }
  0x8a   : > { %v253_v11 = vpop.permute.xlu1 %252  ;;  %v337_v12 = vpop.permute.xlu0 %336 }
  0x8b   : > { %1377 = vmatpush.bf16.msra.mxu3 %v253_v11  ;;  %355 = vmatpush.bf16.msra.mxu2 %v337_v12  ;;  %v739_v19 = vpop.permute.xlu2 %738 }
  0x8c   : > { %272 = vmatpush.bf16.msra.mxu0 %v253_v11 }
  0x8e   : > { %1147 = vmatmul.msk.bf16.vlgmr.msra.gmra.mxu3 %vm258_vm0, %v1349_v13  ;;  %1170 = vmatmul.msk.bf16.vlgmr.msra.gmra.mxu2 %vm258_vm0, %v1350_v14 }
  0x8f   : > { %404 = vmatpush.bf16.msrb.mxu3 %v389_v3  ;;  %1146 = vmatmul.msk.bf16.vlgmr.msra.gmra.mxu0 %vm258_vm0, %v1348_v15  ;;  %v1375_v3 = vld [vmem:[%s1679_s1 + $0xe8] sm:$0xff] }
  0x92   : > { %v539_v16 = vpop.permute.xlu0 %538  ;;  %v439_v17 = vpop.permute.xlu1 %438 }
  0x93   : > { %405 = vmatpush.bf16.msrb.mxu3 %v387_v4  ;;  %554 = vmatpush.bf16.msrb.mxu2 %v539_v16  ;;  %v737_v25 = vpop.permute.xlu2 %736 }
  0x94   : > { %454 = vmatpush.bf16.msrb.mxu0 %v439_v17 }
  0x96   : > { %v311_v0 = vpop.f32.mrf.mxu1 }
  0x97   : > { %1213 = vmatmul.msk.bf16.gmra.mxu1 %vm258_vm0, %v1357_v18 }
  0x9a   : > { %v437_v22 = vpop.permute.xlu1 %436  ;;  %v537_v23 = vpop.permute.xlu0 %536 }
  0x9b   : > { %455 = vmatpush.bf16.msrb.mxu0 %v437_v22  ;;  %555 = vmatpush.bf16.msrb.mxu2 %v537_v23  ;;  %v789_v28 = vpop.permute.xlu2 %788 }
  0x9e   : > { %1171 = vmatmul.msk.bf16.gmra.mxu2 %vm258_vm0, %v1351_v20  ;;  %1184 = vmatmul.msk.bf16.vlgmr.msrb.gmra.mxu3 %vm258_vm0, %v1352_v21  ;;  %v313_v4 = vpop.f32.mrf.mxu1 }
  0x9f   : > { %754 = vmatpush.bf16.msra.mxu2 %v739_v19  ;;  %1198 = vmatmul.msk.bf16.vlgmr.msrb.gmra.mxu0 %vm258_vm0, %v1354_v24 }
  0xa2   : > { %v589_v26 = vpop.permute.xlu0 %588  ;;  %v587_v27 = vpop.permute.xlu1 %586 }
  0xa3   : > { %755 = vmatpush.bf16.msra.mxu2 %v737_v25  ;;  %604 = vmatpush.bf16.msra.mxu3 %v589_v26  ;;  %v839_v37 = vpop.permute.xlu2 %838 }
  0xa6   : > { %v316_v7 = vpop.f32.mrf.mxu1 }
  0xa7   : > { %605 = vmatpush.bf16.msra.mxu3 %v587_v27 }
  0xaa   : > { %v639_v31 = vpop.permute.xlu0 %638  ;;  %v689_v32 = vpop.permute.xlu1 %688 }
  0xab   : > { %804 = vmatpush.bf16.msrb.mxu3 %v789_v28  ;;  %654 = vmatpush.bf16.msra.mxu0 %v639_v31  ;;  %v837_v43 = vpop.permute.xlu2 %836 }
  0xac   : > { %704 = vmatpush.bf16.msra.mxu1 %v689_v32 }
  0xae   : > { %1185 = vmatmul.msk.bf16.gmra.mxu3 %vm258_vm0, %v1353_v29  ;;  %1226 = vmatmul.msk.bf16.vlgmr.msrb.gmra.mxu2 %vm258_vm0, %v1358_v30  ;;  %v318_v10 = vpop.f32.mrf.mxu1 }
  0xaf   : > { %1199 = vmatmul.msk.bf16.gmra.mxu0 %vm258_vm0, %v1355_v33 }
  0xb2   : > { %v637_v34 = vpop.permute.xlu0 %636  ;;  %v687_v35 = vpop.permute.xlu1 %686 }
  0xb3   : > { %655 = vmatpush.bf16.msra.mxu0 %v637_v34  ;;  %705 = vmatpush.bf16.msra.mxu1 %v687_v35 }
  0xb6   : > { %1268 = vmatmul.msk.bf16.vlgmr.msra.gmra.mxu1 %vm258_vm0, %v1364_v36 }
  0xb7   : > { %854 = vmatpush.bf16.msrb.mxu0 %v839_v37 }
  0xba   : > { %v787_v40 = vpop.permute.xlu0 %786  ;;  %v939_v41 = vpop.permute.xlu1 %938 }
  0xbb   : > { %805 = vmatpush.bf16.msrb.mxu3 %v787_v40  ;;  %954 = vmatpush.bf16.msrb.mxu2 %v939_v41 }
  0xbc   : > { %855 = vmatpush.bf16.msrb.mxu0 %v837_v43 }
  0xbe   : > { %1227 = vmatmul.msk.bf16.gmra.mxu2 %vm258_vm0, %v1359_v38  ;;  %1240 = vmatmul.msk.bf16.vlgmr.msra.gmra.mxu3 %vm258_vm0, %v1360_v39 }
  0xbf   : > { %1254 = vmatmul.msk.bf16.vlgmr.msra.gmra.mxu0 %vm258_vm0, %v1362_v42 }
  0xc2   : > { %v889_v44 = vpop.permute.xlu0 %888  ;;  %v937_v46 = vpop.permute.xlu1 %936 }
  0xc3   : > { %904 = vmatpush.bf16.msrb.mxu1 %v889_v44  ;;  %955 = vmatpush.bf16.msrb.mxu2 %v937_v46 }
  0xc6   : > { %1269 = vmatmul.msk.bf16.gmra.mxu1 %vm258_vm0, %v1365_v45 }
  0xca   : > { %v887_v49 = vpop.permute.xlu0 %886 }
  0xcb   : > { %905 = vmatpush.bf16.msrb.mxu1 %v887_v49 }
  0xce   : > { %1241 = vmatmul.msk.bf16.gmra.mxu3 %vm258_vm0, %v1361_v47  ;;  %1282 = vmatmul.msk.bf16.vlgmr.msra.gmra.mxu2 %vm258_vm0, %v1366_v48 }
  0xcf   : > { %1255 = vmatmul.msk.bf16.gmra.mxu0 %vm258_vm0, %v1363_v50 }
  0xd6   : > { %1324 = vmatmul.msk.bf16.vlgmr.msrb.gmra.mxu1 %vm258_vm0, %v1372_v53 }
  0xde   : > { %1283 = vmatmul.msk.bf16.gmra.mxu2 %vm258_vm0, %v1367_v54  ;;  %1296 = vmatmul.msk.bf16.vlgmr.msrb.gmra.mxu3 %vm258_vm0, %v1368_v55 }
  0xdf   : > { %1310 = vmatmul.msk.bf16.vlgmr.msrb.gmra.mxu0 %vm258_vm0, %v1370_v56 }
  0xe6   : > { %1325 = vmatmul.msk.bf16.gmra.mxu1 %vm258_vm0, %v1373_v58 }
  0xee   : > { %1297 = vmatmul.msk.bf16.gmra.mxu3 %vm258_vm0, %v1369_v60  ;;  %1338 = vmatmul.msk.bf16.vlgmr.msrb.gmra.mxu2 %vm258_vm0, %v1374_v61 }
  0xef   : > { %1311 = vmatmul.msk.bf16.gmra.mxu0 %vm258_vm0, %v1371_v62 }
  0xfe   : > { %1339 = vmatmul.msk.bf16.gmra.mxu2 %vm258_vm0, %v1375_v3 }
 0x104   : > { %v507_v16 = vpop.f32.mrf.mxu1 }
 0x10c   : > { %v274_v8 = vpop.f32.mrf.mxu0  ;;  %v509_v23 = vpop.f32.mrf.mxu1 }
 0x10d   : > { %v312_v9 = vadd.f32 %v311_v0, %v274_v8 }
 0x111   : > { %v279_v11 = vpop.f32.mrf.mxu3  ;;  %v357_v12 = vpop.f32.mrf.mxu2 }
 0x112   : > { %v367_v13 = vadd.f32 %v357_v12, %v312_v9  ;;  %v317_v14 = vadd.f32 %v316_v7, %v279_v11  ;;  %v978_v9 = vpop.permute.xlu1 %977 }
 0x114   : > { %v276_v15 = vpop.f32.mrf.mxu0  ;;  %v512_v31 = vpop.f32.mrf.mxu1 }
 0x115   : > { %v314_v17 = vadd.f32 %v313_v4, %v276_v15  ;;  %v983_v15 = vpop.permute.xlu2 %982 }
 0x119   : > { %v281_v18 = vpop.f32.mrf.mxu3  ;;  %v359_v19 = vpop.f32.mrf.mxu2 }
 0x11a   : > { %v368_v20 = vadd.f32 %v359_v19, %v314_v17  ;;  %v319_v21 = vadd.f32 %v318_v10, %v281_v18 }
 0x11c   : > { %v457_v22 = vpop.f32.mrf.mxu0  ;;  %v514_v36 = vpop.f32.mrf.mxu1 }
 0x121   : > { %v362_v24 = vpop.f32.mrf.mxu2  ;;  %v407_v25 = vpop.f32.mrf.mxu3 }
 0x122   : > { %v369_v26 = vadd.f32 %v362_v24, %v317_v14  ;;  %v417_v48 = vadd.f32 %v407_v25, %v367_v13 }
 0x124   : > { %v459_v27 = vpop.f32.mrf.mxu0  ;;  %v467_v52 = vadd.f32 %v457_v22, %v417_v48 }
 0x126   : > { %v517_v53 = vadd.f32 %v507_v16, %v467_v52 }
 0x129   : > { %v364_v28 = vpop.f32.mrf.mxu2  ;;  %v409_v29 = vpop.f32.mrf.mxu3 }
 0x12a   : > { %v370_v30 = vadd.f32 %v364_v28, %v319_v21  ;;  %v418_v54 = vadd.f32 %v409_v29, %v368_v20  ;;  %v993_v29 = vpop.permute.xlu1 %992 }
 0x12c   : > { %v462_v32 = vpop.f32.mrf.mxu0  ;;  %v468_v59 = vadd.f32 %v459_v27, %v418_v54 }
 0x12e   : > { %v518_v62 = vadd.f32 %v509_v23, %v468_v59 }
 0x131   : > { %v412_v33 = vpop.f32.mrf.mxu3  ;;  %v557_v34 = vpop.f32.mrf.mxu2 }
 0x132   : > { %v567_v58 = vadd.f32 %v557_v34, %v517_v53  ;;  %v419_v63 = vadd.f32 %v412_v33, %v369_v26 }
 0x133   : > { %v707_v40 = vpop.f32.mrf.mxu1 }
 0x134   : > { %v464_v35 = vpop.f32.mrf.mxu0  ;;  %v469_v5 = vadd.f32 %v462_v32, %v419_v63 }
 0x136   : > { %v519_v11 = vadd.f32 %v512_v31, %v469_v5 }
 0x139   : > { %v414_v37 = vpop.f32.mrf.mxu3  ;;  %v559_v38 = vpop.f32.mrf.mxu2 }
 0x13a   : > { %v568_v3 = vadd.f32 %v559_v38, %v518_v62  ;;  %v420_v12 = vadd.f32 %v414_v37, %v370_v30  ;;  %v1006_v37 = vpop.permute.xlu2 %1005 }
 0x13b   : > { %v709_v44 = vpop.f32.mrf.mxu1 }
 0x13c   : > { %v657_v39 = vpop.f32.mrf.mxu0  ;;  %v470_v19 = vadd.f32 %v464_v35, %v420_v12 }
 0x13e   : > { %v520_v25 = vadd.f32 %v514_v36, %v470_v19 }
 0x141   : > { %v562_v41 = vpop.f32.mrf.mxu2  ;;  %v607_v42 = vpop.f32.mrf.mxu3 }
 0x142   : > { %v617_v60 = vadd.f32 %v607_v42, %v567_v58  ;;  %v569_v18 = vadd.f32 %v562_v41, %v519_v11  ;;  %v1016_v5 = vpop.permute.xlu2 %1015 }
 0x143   : > { %v712_v51 = vpop.f32.mrf.mxu1 }
 0x144   : > { %v659_v43 = vpop.f32.mrf.mxu0  ;;  %v667_v0 = vadd.f32 %v657_v39, %v617_v60 }
 0x146   : > { %v717_v6 = vadd.f32 %v707_v40, %v667_v0 }
 0x149   : > { %v564_v45 = vpop.f32.mrf.mxu2  ;;  %v609_v46 = vpop.f32.mrf.mxu3 }
 0x14a   : > { %v618_v7 = vadd.f32 %v609_v46, %v568_v3  ;;  %v570_v30 = vadd.f32 %v564_v45, %v520_v25 }
 0x14b   : > { %v714_v61 = vpop.f32.mrf.mxu1 }
 0x14c   : > { %v662_v47 = vpop.f32.mrf.mxu0  ;;  %v668_v13 = vadd.f32 %v659_v43, %v618_v7 }
 0x14e   : > { %v718_v20 = vadd.f32 %v709_v44, %v668_v13 }
 0x151   : > { %v612_v49 = vpop.f32.mrf.mxu3  ;;  %v757_v50 = vpop.f32.mrf.mxu2 }
 0x152   : > { %v767_v8 = vadd.f32 %v757_v50, %v717_v6  ;;  %v619_v21 = vadd.f32 %v612_v49, %v569_v18 }
 0x153   : > { %v907_v10 = vpop.f32.mrf.mxu1 }
 0x154   : > { %v664_v55 = vpop.f32.mrf.mxu0  ;;  %v669_v26 = vadd.f32 %v662_v47, %v619_v21 }
 0x156   : > { %v719_v38 = vadd.f32 %v712_v51, %v669_v26  ;;  %v1011_v51 = vpop.permute.xlu1 %1010 }
 0x159   : > { %v614_v56 = vpop.f32.mrf.mxu3  ;;  %v759_v57 = vpop.f32.mrf.mxu2 }
 0x15a   : > { %v768_v24 = vadd.f32 %v759_v57, %v718_v20  ;;  %v620_v39 = vadd.f32 %v614_v56, %v570_v30 }
 0x15b   : > { %v909_v32 = vpop.f32.mrf.mxu1 }
 0x15c   : > { %v857_v4 = vpop.f32.mrf.mxu0  ;;  %v670_v44 = vadd.f32 %v664_v55, %v620_v39 }
 0x15e   : > { %v720_v52 = vadd.f32 %v714_v61, %v670_v44 }
 0x161   : > { %v762_v1 = vpop.f32.mrf.mxu2  ;;  %v807_v2 = vpop.f32.mrf.mxu3 }
 0x162   : > { %v817_v14 = vadd.f32 %v807_v2, %v767_v8  ;;  %v769_v41 = vadd.f32 %v762_v1, %v719_v38  ;;  %v988_v2 = vpop.permute.xlu0 %987 }
 0x163   : > { %v912_v50 = vpop.f32.mrf.mxu1 }
 0x164   : > { %v867_v22 = vadd.f32 %v857_v4, %v817_v14  ;;  %v859_v23 = vpop.f32.mrf.mxu0 }
 0x166   : > { %v917_v27 = vadd.f32 %v907_v10, %v867_v22 }
 0x169   : > { %v764_v16 = vpop.f32.mrf.mxu2  ;;  %v809_v17 = vpop.f32.mrf.mxu3 }
 0x16a   : > { %v818_v28 = vadd.f32 %v809_v17, %v768_v24  ;;  %v770_v56 = vadd.f32 %v764_v16, %v720_v52  ;;  %v1021_v13 = vpop.permute.xlu0 %1020 }
 0x16b   : > { %v914_v4 = vpop.f32.mrf.mxu1 }
 0x16c   : > { %v868_v35 = vadd.f32 %v859_v23, %v818_v28  ;;  %v862_v43 = vpop.f32.mrf.mxu0 }
 0x16e   : > { %v918_v36 = vadd.f32 %v909_v32, %v868_v35 }
 0x171   : > { %v957_v31 = vpop.f32.mrf.mxu2  ;;  %v812_v34 = vpop.f32.mrf.mxu3 }
 0x172   : > { %v967_v33 = vadd.f32 %v957_v31, %v917_v27  ;;  %v819_v46 = vadd.f32 %v812_v34, %v769_v41 }
 0x174   : > { %v995_v40 = vmul.f32 %v978_v9, %v967_v33  ;;  %v869_v53 = vadd.f32 %v862_v43, %v819_v46  ;;  %v864_v62 = vpop.f32.mrf.mxu0 }
 0x176   : > { %v1023_v42 = vadd.f32 %v1006_v37, %v995_v40  ;;  %v919_v58 = vadd.f32 %v912_v50, %v869_v53 }
 0x178   : > { %v1027_v47 = vmax.f32 %v1023_v42, 0.0 }
 0x179   : > { %v959_v45 = vpop.f32.mrf.mxu2  ;;  %v814_v55 = vpop.f32.mrf.mxu3 }
 0x17a   : > { %v1031_v48 = vpack.c.bf16 %v1027_v47, %v1027_v47  ;;  %v968_v49 = vadd.f32 %v959_v45, %v918_v36  ;;  %v820_v59 = vadd.f32 %v814_v55, %v770_v56 }
 0x17c   : > { %1036 = vst.msk [vmem:[%s1659_s5] sm:$0xf] %vm1035_vm1, %v1031_v48  ;;  %v996_v54 = vmul.f32 %v983_v15, %v968_v49  ;;  %v870_v3 = vadd.f32 %v864_v62, %v820_v59 }
 0x17e   : > { %v1024_v57 = vadd.f32 %v1011_v51, %v996_v54  ;;  %v920_v7 = vadd.f32 %v914_v4, %v870_v3 }
 0x180   : > { %v1028_v60 = vmax.f32 %v1024_v57, 0.0 }
 0x181   : > { %v962_v63 = vpop.f32.mrf.mxu2 }
 0x182   : > { %v1032_v0 = vpack.c.bf16 %v1028_v60, %v1028_v60  ;;  %v969_v1 = vadd.f32 %v962_v63, %v919_v58 }
 0x184   : > { %1037 = vst.msk [vmem:[%s1659_s5 + $0x4] sm:$0xf] %vm1035_vm1, %v1032_v0  ;;  %v997_v61 = vmul.f32 %v988_v2, %v969_v1 }
 0x186   : > { %v1025_v6 = vadd.f32 %v1016_v5, %v997_v61 }
 0x188   : > { %v1029_v8 = vmax.f32 %v1025_v6, 0.0 }
 0x189   : > { %v964_v9 = vpop.f32.mrf.mxu2 }
 0x18a   : > { %v1033_v10 = vpack.c.bf16 %v1029_v8, %v1029_v8  ;;  %v970_v11 = vadd.f32 %v964_v9, %v920_v7 }
 0x18c   : > { %1038 = vst.msk [vmem:[%s1659_s5 + $0x8] sm:$0xf] %vm1035_vm1, %v1033_v10  ;;  %v998_v12 = vmul.f32 %v993_v29, %v970_v11 }
 0x18e   : > { %v1026_v14 = vadd.f32 %v1021_v13, %v998_v12 }
 0x190   : > { %v1030_v15 = vmax.f32 %v1026_v14, 0.0 }
 0x192   : > { %v1034_v16 = vpack.c.bf16 %v1030_v15, %v1030_v15 }
 0x194   : > { %1039 = vst.msk [vmem:[%s1659_s5 + $0xc] sm:$0xf] %vm1035_vm1, %v1034_v16 }
 0x195 PF: > { %s14_s17 = sadd.s32 1, %s1442_s17   ;;  %s1683_s15 = smov %s1438_s16 }
 0x196   : > { %p11_p5 = scmp.ge.s32.totalorder %s14_s17, 4   ;;  %s1684_s16 = smov %s1686_s18 }
 0x198   :  { %13 = sbr.rel (!%p11_p5) target bundleno = 2 (0x2), region = 80 }

// kernel: freqnet_forward.48
= control target key start
LH: loop header
LB: loop body
LE: loop exit
PB: predicated region body
PF: predicated region fallthrough
CT: control target
= control target key end

     0   :  { %vm17_vm0 = vcmask 517120   ;;  %v361_v0 = vmov 0.0   ;;  %s391_s15 = smov 0   ;;  %s499_s0 = inlined_call_operand.vmem [shape: bf16[4,2,192], index: 0, kind: input, shape index: {}]   ;;  %s500_s1 = inlined_call_operand.vmem [shape: bf16[64,192], index: 1, kind: input, shape index: {}]   ;;  %s501_s2 = inlined_call_operand.vmem [shape: f32[1,64], index: 2, kind: input, shape index: {}]   ;;  %s502_s3 = inlined_call_operand.vmem [shape: f32[4,2,32], index: 3, kind: output, shape index: {0}]   ;;  %s503_s4 = inlined_call_operand.vmem [shape: f32[4,2,32], index: 4, kind: output, shape index: {1}]  }
   0x1   :  { %18 = vst.msk [vmem:[#allocation2] sm:$0x3] %vm17_vm0, %v361_v0 }
   0x2 LB: > { %v303_v1 = vld [vmem:[%s500_s1 + $0x30] sm:$0xf]  ;;  %v323_v2 = vld [vmem:[%s500_s1 + $0x34] sm:$0xf0]  ;;  %v295_v3 = vld [vmem:[%s500_s1 + $0x20] sm:$0xf]  ;;  %s359_s15 = sphi %s391_s15, %s24_s15  }
   0x3   : > { %v304_v4 = vor.u32 %v323_v2, %v303_v1  ;;  %v321_v5 = vld [vmem:[%s500_s1 + $0x24] sm:$0xf0]  ;;  %v287_v6 = vld [vmem:[%s500_s1 + $0x10] sm:$0xf]  ;;  %v319_v7 = vld [vmem:[%s500_s1 + $0x14] sm:$0xf0] }
   0x4   : > { %v296_v8 = vor.u32 %v321_v5, %v295_v3  ;;  %v417_v9 = vld [vmem:[%s501_s2] ss:$0 sm:$0xff]  ;;  %v322_v10 = vld [vmem:[%s500_s1 + $0x34] sm:$0xf]  ;;  %v305_v11 = vld [vmem:[%s500_s1 + $0x38] sm:$0xf0]  ;;  %v288_v15 = vor.u32 %v319_v7, %v287_v6 }
   0x5   : > { %83 = vmatpush.bf16.msra.mxu0 %v304_v4  ;;  %v320_v12 = vld [vmem:[%s500_s1 + $0x24] sm:$0xf]  ;;  %s362_s10 = smov 64   ;;  %v308_v13 = vor.u32 %v322_v10, %v305_v11  ;;  %v297_v14 = vld [vmem:[%s500_s1 + $0x28] sm:$0xf0]  ;;  %vm75_vm1 = vcmask 523264  }
   0x6   : > { %137 = vrot.lane.b32.xlu0 %v417_v9, %s362_s10  ;;  %v279_v16 = vld [vmem:[%s500_s1] sm:$0xf]  ;;  %v300_v17 = vor.u32 %v320_v12, %v297_v14  ;;  %v317_v18 = vld [vmem:[%s500_s1 + $0x4] sm:$0xf0]  ;;  %v318_v19 = vld [vmem:[%s500_s1 + $0x14] sm:$0xf] }
   0x7   : > { %96 = vmatpush.bf16.msra.mxu1 %v308_v13  ;;  %v289_v20 = vld [vmem:[%s500_s1 + $0x18] sm:$0xf0]  ;;  %v280_v21 = vor.u32 %v317_v18, %v279_v16  ;;  %v316_v24 = vld [vmem:[%s500_s1 + $0x4] sm:$0xf]  ;;  %v281_v25 = vld [vmem:[%s500_s1 + $0x8] sm:$0xf0] }
   0x8   : > { %v445_v22 = vld [vmem:[#allocation2] sm:$0x3]  ;;  %v292_v23 = vor.u32 %v318_v19, %v289_v20  ;;  %v284_v27 = vor.u32 %v316_v24, %v281_v25  ;;  %s311_s26 = sshll.u32 %s359_s15, 1  ;;  %s109_s30 = ssub.s32 3, %s359_s15  ;;  %vm238_vm14 = vcmask 254976   ;;  %vm253_vm15 = vcmask 261120  }
   0x9   : > { %84 = vmatpush.bf16.msra.mxu0 %v296_v8  ;;  %v26_v26 = vpack.c.bf16 %v445_v22, %v445_v22  ;;  %s106_s29 = scalar_lea.vmem %s499_s0, %s311_s26  ;;  %s465_s5 = sshll.u32 %s109_s30, 1 }
   0xa   : > { %v107_v34 = vld [vmem:[%s106_s29] sm:$0x3]  ;;  %s111_s8 = scalar_lea.vmem %s499_s0, %s465_s5  ;;  %s363_s9 = smov 96  }
   0xb   : > { %97 = vmatpush.bf16.msra.mxu1 %v300_v17  ;;  %v108_v35 = vunpack.c.l.bf16 %v107_v34  ;;  %v112_v45 = vld [vmem:[%s111_s8] sm:$0x3]  ;;  %s240_s13 = scalar_lea.vmem %s503_s4, %s465_s5  ;;  %s237_s17 = scalar_lea.vmem %s502_s3, %s311_s26 }
   0xc   : > { %v113_v48 = vunpack.c.l.bf16 %v112_v45  ;;  %s24_s15 = sadd.s32 1, %s359_s15  }
   0xd   : > { %85 = vmatpush.bf16.msra.mxu0 %v288_v15  ;;  %p21_p0 = scmp.ge.s32.totalorder %s24_s15, 4  }
   0xe   : > { %v185_v10 = vrot.slane %v113_v48, 2 }
   0xf   : > { %98 = vmatpush.bf16.msra.mxu1 %v292_v23 }
  0x11   : > { %86 = vmatpush.bf16.msra.mxu0 %v280_v21 }
  0x13   : > { %99 = vmatpush.bf16.msra.mxu1 %v284_v27 }
  0x14   : > { %309 = vmatmul.msk.bf16.vlgmr.msra.gmra.mxu0 %vm75_vm1, %v26_v26 }
  0x16   : > { %310 = vmatmul.msk.bf16.vlgmr.msra.gmra.mxu1 %vm75_vm1, %v26_v26 }
  0x78   : > { %v138_v28 = vpop.permute.xlu0 %137 }
  0x91   : > { %v88_v29 = vpop.f32.mrf.mxu0 }
  0x92   : > { %v140_v30 = vadd.f32 %v138_v28, %v88_v29  ;;  %v115_v36 = vadd.f32 %v108_v35, %v88_v29  ;;  %v164_v55 = vadd.f32 %v113_v48, %v88_v29 }
  0x93   : > { %v456_v31 = vpop.f32.mrf.mxu1 }
  0x94   : > { %142 = vrot.lane.b32.xlu0 %v140_v30, %s362_s10  ;;  %v313_v37 = vmul.f32 -1.442695, %v115_v36  ;;  %v208_v54 = vadd.f32 %v417_v9, %v456_v31  ;;  %v314_v56 = vmul.f32 -1.442695, %v164_v55  ;;  %v187_v11 = vadd.f32 %v185_v10, %v456_v31 }
  0x96   : > { %337 = vpow2.f32 %v313_v37  ;;  %v315_v12 = vmul.f32 -1.442695, %v187_v11 }
  0x99   : > { %v90_v32 = vpop.f32.mrf.mxu0 }
  0x9b   : > { %v103_v33 = vpop.f32.mrf.mxu1 }
  0x9c   : > { %v338_v38 = vpop.eup %337  ;;  %214 = vrot.lane.b32.xlu0 %v113_v48, %s363_s9 }
  0x9d   : > { %v119_v39 = vadd.f32 1.0, %v338_v38 }
  0x9f   : > { %339 = vrcp.f32 %v119_v39  ;;  %v131_v46 = vand.u32 2147483648, %v119_v39  ;;  %vm125_vm3 = vweird.f32 %v119_v39  ;;  %v129_v47 = vand.u32 2147483647, %v119_v39 }
  0xa0   : > { %341 = vpow2.f32 %v314_v56 }
  0xa1   : > { %v132_v50 = vor.u32 1.1754944e-38, %v131_v46  ;;  %vm130_vm5 = vcmp.eq.f32.partialorder %v129_v47, 8.507059e+37 }
  0xa5   : > { %v340_v40 = vpop.eup %339 }
  0xa6   : > { %v121_v41 = vmul.f32 %v340_v40, %v119_v39  ;;  %vm126_vm2 = vweird.f32 %v340_v40  ;;  %v342_v57 = vpop.eup %341 }
  0xa7   : > { %vm127_vm4 = vmor %vm125_vm3, %vm126_vm2  ;;  %v168_v58 = vadd.f32 1.0, %v342_v57 }
  0xa8   : > { %v122_v42 = vsub.f32 1.0, %v121_v41 }
  0xa9   : > { %343 = vrcp.f32 %v168_v58  ;;  %v180_v2 = vand.u32 2147483648, %v168_v58  ;;  %vm174_vm7 = vweird.f32 %v168_v58  ;;  %v178_v3 = vand.u32 2147483647, %v168_v58 }
  0xaa   : > { %v123_v43 = vmul.f32 %v340_v40, %v122_v42 }
  0xab   : > { %v181_v5 = vor.u32 1.1754944e-38, %v180_v2  ;;  %vm179_vm9 = vcmp.eq.f32.partialorder %v178_v3, 8.507059e+37 }
  0xac   : > { %v124_v44 = vadd.f32 %v340_v40, %v123_v43 }
  0xae   : > { %v128_v49 = vsel %vm127_vm4, %v340_v40, %v124_v44 }
  0xaf   : > { %v133_v52 = vsel %vm130_vm5, %v132_v50, %v128_v49  ;;  %v344_v59 = vpop.eup %343 }
  0xb0   : > { %v170_v60 = vmul.f32 %v344_v59, %v168_v58  ;;  %vm175_vm6 = vweird.f32 %v344_v59  ;;  %v152_v16 = vsub.f32 1.0, %v133_v52 }
  0xb1   : > { %vm176_vm8 = vmor %vm174_vm7, %vm175_vm6 }
  0xb2   : > { %v171_v61 = vsub.f32 1.0, %v170_v60 }
  0xb4   : > { %v172_v62 = vmul.f32 %v344_v59, %v171_v61 }
  0xb6   : > { %v173_v1 = vadd.f32 %v344_v59, %v172_v62 }
  0xb8   : > { %v177_v4 = vsel %vm176_vm8, %v344_v59, %v173_v1 }
  0xb9   : > { %v182_v6 = vsel %vm179_vm9, %v181_v5, %v177_v4 }
 0x106   : > { %v143_v51 = vpop.permute.xlu0 %142 }
 0x107   : > { %v145_v53 = vmul.f32 %v143_v51, %v133_v52 }
 0x109   : > { %147 = vrot.lane.b32.xlu1 %v145_v53, %s362_s10 }
 0x111   : > { %210 = vrot.lane.b32.xlu1 %v208_v54, %s362_s10  ;;  %s364_s10 = smov 32  }
 0x17b   : > { %v148_v63 = vpop.permute.xlu1 %147 }
 0x17c   : > { %v150_v0 = vadd.f32 %v148_v63, %v108_v35 }
 0x17e   : > { %345 = vtanh.f32 %v150_v0 }
 0x17f   : > { %347 = vpow2.f32 %v315_v12 }
 0x183   : > { %v211_v7 = vpop.permute.xlu1 %210 }
 0x184   : > { %v346_v8 = vpop.eup %345  ;;  %v213_v9 = vmul.f32 %v211_v7, %v182_v6 }
 0x185   : > { %154 = vrot.lane.b32.xlu2 %v346_v8, %s363_s9  ;;  %v348_v13 = vpop.eup %347 }
 0x186   : > { %219 = vrot.lane.b32.xlu1 %v213_v9, %s364_s10  ;;  %v191_v14 = vadd.f32 1.0, %v348_v13 }
 0x188   : > { %349 = vrcp.f32 %v191_v14  ;;  %vm197_vm10 = vweird.f32 %v191_v14  ;;  %v203_v27 = vand.u32 2147483648, %v191_v14  ;;  %v201_v30 = vand.u32 2147483647, %v191_v14 }
 0x18a   : > { %v204_v32 = vor.u32 1.1754944e-38, %v203_v27  ;;  %vm202_vm13 = vcmp.eq.f32.partialorder %v201_v30, 8.507059e+37 }
 0x18d   : > { %159 = vrot.lane.b32.xlu2 %v445_v22, %s364_s10 }
 0x18e   : > { %v350_v17 = vpop.eup %349 }
 0x18f   : > { %v193_v23 = vmul.f32 %v350_v17, %v191_v14  ;;  %vm198_vm11 = vweird.f32 %v350_v17 }
 0x190   : > { %vm199_vm12 = vmor %vm197_vm10, %vm198_vm11 }
 0x191   : > { %v194_v24 = vsub.f32 1.0, %v193_v23 }
 0x193   : > { %v195_v25 = vmul.f32 %v350_v17, %v194_v24 }
 0x195   : > { %226 = vrot.lane.b32.xlu2 %v445_v22, %s363_s9  ;;  %v215_v22 = vpop.permute.xlu0 %214  ;;  %v196_v29 = vadd.f32 %v350_v17, %v195_v25 }
 0x196   : > { %v216_v28 = vrot.slane %v215_v22, 2 }
 0x197   : > { %v200_v34 = vsel %vm199_vm12, %v350_v17, %v196_v29 }
 0x198   : > { %v205_v36 = vsel %vm202_vm13, %v204_v32, %v200_v34 }
 0x199   : > { %v224_v38 = vsub.f32 1.0, %v205_v36 }
 0x1df   : > { %v155_v15 = vpop.permute.xlu2 %154 }
 0x1e0   : > { %v157_v19 = vmul.f32 %v155_v15, %v152_v16 }
 0x1e7   : > { %v160_v18 = vpop.permute.xlu2 %159 }
 0x1e8   : > { %v162_v20 = vmul.f32 %v160_v18, %v133_v52 }
 0x1ea   : > { %v163_v21 = vadd.f32 %v162_v20, %v157_v19 }
 0x1ec   : > { %232 = vst [vmem:[#allocation1] ss:$4 sm:$0xff] %v163_v21 }
 0x1ef   : > { %v227_v37 = vpop.permute.xlu2 %226 }
 0x1f0   : > { %v229_v40 = vmul.f32 %v227_v37, %v205_v36 }
 0x1f3   : > { %v233_v26 = vld.sshfl [vmem:[#allocation1] sm:$0xff pattern:$0x73625140] }
 0x1f4   : > { %234 = vrot.lane.b32.xlu2 %v233_v26, %s363_s9  ;;  %242 = vst [vmem:[#allocation1] ss:$4 sm:$0xff] %v163_v21 }
 0x1f8   : > { %v220_v31 = vpop.permute.xlu1 %219 }
 0x1f9   : > { %v222_v33 = vadd.f32 %v220_v31, %v216_v28 }
 0x1fb   : > { %351 = vtanh.f32 %v222_v33  ;;  %v243_v35 = vld.sshfl [vmem:[#allocation1] sm:$0xff pattern:$0x73625140] }
 0x1fc   : > { %244 = vrot.lane.b32.xlu0 %v243_v35, %s363_s9 }
 0x201   : > { %v352_v39 = vpop.eup %351 }
 0x202   : > { %v225_v41 = vmul.f32 %v352_v39, %v224_v38 }
 0x204   : > { %v230_v42 = vadd.f32 %v229_v40, %v225_v41 }
 0x206   : > { %248 = vst [vmem:[#allocation1] ss:$4 sm:$0xff] %v230_v42 }
 0x207   : > { %241 = vst.msk [vmem:[%s240_s13] sm:$0x3] %vm238_vm14, %v230_v42 }
 0x20d   : > { %v249_v43 = vld.sshfl [vmem:[#allocation1] sm:$0xff pattern:$0x73625140] }
 0x20e   : > { %250 = vrot.lane.b32.xlu1 %v249_v43, %s364_s10 }
 0x24e   : > { %v235_v44 = vpop.permute.xlu2 %234 }
 0x24f   : > { %239 = vst.msk [vmem:[%s237_s17] sm:$0x3] %vm238_vm14, %v235_v44 }
 0x26e   : > { %v245_v45 = vpop.permute.xlu0 %244 }
 0x27e   :  { %23 = sbr.rel (!%p21_p0) target bundleno = 2 (0x2), region = 51 }
 0x280   : > { %v251_v46 = vpop.permute.xlu1 %250 }
 0x281   : > { %v254_v47 = vsel %vm253_vm15, %v245_v45, %v251_v46 }
 0x282   : > { %255 = vst.msk [vmem:[#allocation2] sm:$0x3] %vm17_vm0, %v254_v47 }

// kernel: freqnet_forward.49
= control target key start
LH: loop header
LB: loop body
LE: loop exit
PB: predicated region body
PF: predicated region fallthrough
CT: control target
= control target key end

     0   :  { %vm52_vm0 = vcmask 523264   ;;  %vm70_vm1 = vcmask 257024   ;;  %s139_s1 = inlined_call_operand.vmem [shape: bf16[64,32], index: 1, kind: input, shape index: {}]   ;;  %s140_s2 = inlined_call_operand.vmem [shape: f32[1,32], index: 2, kind: input, shape index: {}]   ;;  %s141_s0 = inlined_call_operand.vmem [shape: bf16[8,64], index: 0, kind: input, shape index: {}]   ;;  %s142_s3 = inlined_call_operand.vmem [shape: bf16[8,32], index: 3, kind: output, shape index: {}]  }
   0x1   :  { %v96_v0 = vld [vmem:[%s139_s1 + $0x18] sm:$0xff]  ;;  %v95_v1 = vld [vmem:[%s139_s1 + $0x10] sm:$0xff]  ;;  %v94_v2 = vld [vmem:[%s139_s1 + $0x8] sm:$0xff] }
   0x2   :  { %60 = vmatpush.bf16.msra.mxu0 %v96_v0  ;;  %v93_v3 = vld [vmem:[%s139_s1] sm:$0xff] }
   0x3   :  { %v15_v4 = vld [vmem:[%s141_s0] sm:$0xf] }
   0x4   :  { %v97_v5 = vld [vmem:[%s140_s2] ss:$0 sm:$0xff] }
   0x6   :  { %61 = vmatpush.bf16.msra.mxu0 %v95_v1 }
   0xa   :  { %62 = vmatpush.bf16.msra.mxu0 %v94_v2 }
   0xe   :  { %63 = vmatpush.bf16.msra.mxu0 %v93_v3 }
  0x11   :  { %92 = vmatmul.msk.bf16.vlgmr.msra.gmra.mxu0 %vm52_vm0, %v15_v4 }
  0x8e   :  { %v65_v6 = vpop.f32.mrf.mxu0 }
  0x8f   :  { %v66_v7 = vadd.f32 %v97_v5, %v65_v6 }
  0x91   :  { %v69_v8 = vpack.c.bf16 %v66_v7, %v66_v7 }
  0x93   :  { %71 = vst.msk [vmem:[%s142_s3] sm:$0xf] %vm70_vm1, %v69_v8 }
  0x96   :  { %v67_v9 = vpop.f32.mrf.mxu0 }

// kernel: freqnet_forward.53
= control target key start
LH: loop header
LB: loop body
LE: loop exit
PB: predicated region body
PF: predicated region fallthrough
CT: control target
= control target key end

     0   :  { %vm34_vm0 = vcmask 130048   ;;  %vm54_vm1 = vcmask 781312   ;;  %s108_s1 = inlined_call_operand.vmem [shape: bf16[16,96], index: 1, kind: input, shape index: {}]   ;;  %s109_s0 = inlined_call_operand.vmem [shape: bf16[16,16], index: 0, kind: input, shape index: {}]   ;;  %s110_s2 = inlined_call_operand.vmem [shape: f32[1,96], index: 2, kind: input, shape index: {}]   ;;  %s111_s3 = inlined_call_operand.vmem [shape: bf16[16,96], index: 3, kind: output, shape index: {}]  }
   0x1   :  { %v71_v0 = vld [vmem:[%s108_s1] sm:$0xff] }
   0x2   :  { %v70_v1 = vld [vmem:[%s109_s0] sm:$0xff]  ;;  %45 = vmatpush.bf16.msra.mxu0 %v71_v0 }
   0x3   :  { %v72_v2 = vld [vmem:[%s110_s2] ss:$0 sm:$0xff] }
   0x5   :  { %69 = vmatmul.msk.bf16.vlgmr.msra.gmra.mxu0 %vm34_vm0, %v70_v1 }
  0x82   :  { %v47_v3 = vpop.f32.mrf.mxu0 }
  0x83   :  { %v48_v4 = vadd.f32 %v72_v2, %v47_v3 }
  0x85   :  { %v52_v5 = vpack.c.bf16 %v48_v4, %v48_v4 }
  0x87   :  { %55 = vst.msk [vmem:[%s111_s3] sm:$0xf] %vm54_vm1, %v52_v5 }
  0x8a   :  { %v49_v6 = vpop.f32.mrf.mxu0 }
  0x8b   :  { %v50_v7 = vadd.f32 %v72_v2, %v49_v6 }
  0x8d   :  { %v53_v8 = vpack.c.bf16 %v50_v7, %v50_v7 }
  0x8f   :  { %56 = vst.msk [vmem:[%s111_s3 + $0x4] sm:$0xf] %vm54_vm1, %v53_v8 }

// kernel: freqnet_forward.54
= control target key start
LH: loop header
LB: loop body
LE: loop exit
PB: predicated region body
PF: predicated region fallthrough
CT: control target
= control target key end

     0   :  { %vm17_vm0 = vcmask 254976   ;;  %v266_v0 = vmov 0.0   ;;  %s300_s15 = smov 0   ;;  %s348_s0 = inlined_call_operand.vmem [shape: bf16[8,2,96], index: 0, kind: input, shape index: {}]   ;;  %s349_s1 = inlined_call_operand.vmem [shape: bf16[32,96], index: 1, kind: input, shape index: {}]   ;;  %s350_s2 = inlined_call_operand.vmem [shape: f32[1,32], index: 2, kind: input, shape index: {}]   ;;  %s351_s3 = inlined_call_operand.vmem [shape: f32[8,2,16], index: 3, kind: output, shape index: {0}]   ;;  %s352_s4 = inlined_call_operand.vmem [shape: f32[8,2,16], index: 4, kind: output, shape index: {1}]  }
   0x1   :  { %18 = vst.msk [vmem:[#allocation2] sm:$0x3] %vm17_vm0, %v266_v0 }
   0x2 LB: > { %v228_v1 = vld [vmem:[%s349_s1 + $0x8] sm:$0xff]  ;;  %v245_v2 = vld [vmem:[%s350_s2] ss:$0 sm:$0xff]  ;;  %s267_s22 = smov 32   ;;  %vm43_vm1 = vcmask 261120   ;;  %s268_s23 = smov 64   ;;  %s264_s15 = sphi %s300_s15, %s24_s15  }
   0x3   : > { %53 = vmatpush.bf16.msra.mxu0 %v228_v1  ;;  %v227_v3 = vld [vmem:[%s349_s1] sm:$0xff]  ;;  %90 = vrot.lane.b32.xlu0 %v245_v2, %s267_s22  ;;  %s269_s24 = smov 96   ;;  %s270_s25 = smov 16   ;;  %vm171_vm10 = vcmask 123904   ;;  %vm192_vm11 = vcmask 130048  }
   0x4   : > { %s60_s28 = scalar_lea.vmem %s348_s0, %s264_s15  ;;  %s63_s29 = ssub.s32 7, %s264_s15 }
   0x5   : > { %v61_v12 = vld [vmem:[%s60_s28] sm:$0x1]  ;;  %s64_s6 = scalar_lea.vmem %s348_s0, %s63_s29  ;;  %s271_s7 = smov 112  }
   0x6   : > { %v62_v13 = vunpack.c.l.bf16 %v61_v12  ;;  %v65_v15 = vld [vmem:[%s64_s6] sm:$0x1]  ;;  %s272_s8 = smov 48   ;;  %s273_s9 = smov 80  }
   0x7   : > { %54 = vmatpush.bf16.msra.mxu0 %v227_v3  ;;  %v66_v16 = vunpack.c.l.bf16 %v65_v15  ;;  %s225_s10 = sshll.u32 %s264_s15, 1  ;;  %s226_s14 = sshll.u32 %s63_s29, 1 }
   0x8   : > { %v314_v4 = vld [vmem:[#allocation2] sm:$0x3]  ;;  %s170_s13 = scalar_lea.vmem %s351_s3, %s225_s10  ;;  %s180_s18 = scalar_lea.vmem %s352_s4, %s226_s14 }
   0x9   : > { %v26_v5 = vpack.c.bf16 %v314_v4, %v314_v4  ;;  %s24_s15 = sadd.s32 1, %s264_s15  }
   0xa   : > { %p21_p0 = scmp.ge.s32.totalorder %s24_s15, 8  }
   0xb   : > { %222 = vmatmul.msk.bf16.vlgmr.msra.gmra.mxu0 %vm43_vm1, %v26_v5  ;;  %137 = vrot.lane.b32.xlu0 %v245_v2, %s268_s23 }
  0x75   : > { %v91_v6 = vpop.permute.xlu0 %90 }
  0x7d   : > { %v138_v9 = vpop.permute.xlu0 %137 }
  0x88   : > { %v56_v7 = vpop.f32.mrf.mxu0 }
  0x89   : > { %v93_v8 = vadd.f32 %v91_v6, %v56_v7  ;;  %v140_v11 = vadd.f32 %v138_v9, %v56_v7  ;;  %v68_v14 = vadd.f32 %v62_v13, %v56_v7  ;;  %v117_v18 = vadd.f32 %v66_v16, %v56_v7 }
  0x8b   : > { %95 = vrot.lane.b32.xlu1 %v93_v8, %s269_s24  ;;  %v223_v17 = vmul.f32 -1.442695, %v68_v14  ;;  %v224_v19 = vmul.f32 -1.442695, %v117_v18 }
  0x8d   : > { %246 = vpow2.f32 %v223_v17 }
  0x8e   : > { %248 = vpow2.f32 %v224_v19 }
  0x90   : > { %v58_v10 = vpop.f32.mrf.mxu0 }
  0x93   : > { %142 = vrot.lane.b32.xlu1 %v140_v11, %s269_s24  ;;  %v247_v20 = vpop.eup %246 }
  0x94   : > { %v72_v21 = vadd.f32 1.0, %v247_v20  ;;  %v249_v22 = vpop.eup %248 }
  0x95   : > { %v121_v23 = vadd.f32 1.0, %v249_v22 }
  0x96   : > { %250 = vrcp.f32 %v72_v21  ;;  %v84_v32 = vand.u32 2147483648, %v72_v21  ;;  %vm78_vm3 = vweird.f32 %v72_v21  ;;  %v82_v33 = vand.u32 2147483647, %v72_v21 }
  0x97   : > { %252 = vrcp.f32 %v121_v23  ;;  %v133_v41 = vand.u32 2147483648, %v121_v23  ;;  %vm127_vm7 = vweird.f32 %v121_v23  ;;  %v131_v42 = vand.u32 2147483647, %v121_v23 }
  0x98   : > { %v85_v36 = vor.u32 1.1754944e-38, %v84_v32  ;;  %vm83_vm5 = vcmp.eq.f32.partialorder %v82_v33, 8.507059e+37 }
  0x99   : > { %v134_v44 = vor.u32 1.1754944e-38, %v133_v41  ;;  %vm132_vm9 = vcmp.eq.f32.partialorder %v131_v42, 8.507059e+37 }
  0x9b   : > { %112 = vrot.lane.b32.xlu1 %v314_v4, %s270_s25 }
  0x9c   : > { %v251_v24 = vpop.eup %250 }
  0x9d   : > { %v74_v25 = vmul.f32 %v251_v24, %v72_v21  ;;  %v253_v27 = vpop.eup %252  ;;  %vm79_vm2 = vweird.f32 %v251_v24 }
  0x9e   : > { %v123_v29 = vmul.f32 %v253_v27, %v121_v23  ;;  %vm80_vm4 = vmor %vm78_vm3, %vm79_vm2  ;;  %vm128_vm6 = vweird.f32 %v253_v27 }
  0x9f   : > { %v75_v26 = vsub.f32 1.0, %v74_v25  ;;  %vm129_vm8 = vmor %vm127_vm7, %vm128_vm6 }
  0xa0   : > { %v124_v31 = vsub.f32 1.0, %v123_v29 }
  0xa1   : > { %v76_v28 = vmul.f32 %v251_v24, %v75_v26 }
  0xa2   : > { %v125_v35 = vmul.f32 %v253_v27, %v124_v31 }
  0xa3   : > { %v77_v30 = vadd.f32 %v251_v24, %v76_v28 }
  0xa4   : > { %v126_v40 = vadd.f32 %v253_v27, %v125_v35 }
  0xa5   : > { %v81_v34 = vsel %vm80_vm4, %v251_v24, %v77_v30 }
  0xa6   : > { %v86_v38 = vsel %vm83_vm5, %v85_v36, %v81_v34  ;;  %v130_v43 = vsel %vm129_vm8, %v253_v27, %v126_v40 }
  0xa7   : > { %v135_v46 = vsel %vm132_vm9, %v134_v44, %v130_v43  ;;  %v105_v55 = vsub.f32 1.0, %v86_v38 }
  0xa8   : > { %v152_v61 = vsub.f32 1.0, %v135_v46 }
  0xfd   : > { %v96_v37 = vpop.permute.xlu1 %95 }
  0xfe   : > { %v98_v39 = vmul.f32 %v96_v37, %v86_v38 }
 0x100   : > { %100 = vrot.lane.b32.xlu2 %v98_v39, %s267_s22 }
 0x105   : > { %v143_v45 = vpop.permute.xlu1 %142 }
 0x106   : > { %v145_v47 = vmul.f32 %v143_v45, %v135_v46 }
 0x108   : > { %147 = vrot.lane.b32.xlu2 %v145_v47, %s267_s22 }
 0x10d   : > { %v113_v54 = vpop.permute.xlu1 %112 }
 0x10e   : > { %v115_v57 = vmul.f32 %v113_v54, %v86_v38 }
 0x15a   : > { %v101_v48 = vpop.permute.xlu2 %100 }
 0x15b   : > { %v103_v49 = vadd.f32 %v101_v48, %v62_v13 }
 0x15d   : > { %254 = vtanh.f32 %v103_v49 }
 0x162   : > { %v148_v50 = vpop.permute.xlu2 %147 }
 0x163   : > { %v255_v51 = vpop.eup %254  ;;  %v150_v52 = vadd.f32 %v148_v50, %v66_v16 }
 0x164   : > { %107 = vrot.lane.b32.xlu0 %v255_v51, %s271_s7 }
 0x165   : > { %256 = vtanh.f32 %v150_v52 }
 0x16b   : > { %v257_v53 = vpop.eup %256 }
 0x16c   : > { %158 = vrot.lane.b32.xlu0 %v314_v4, %s272_s8  ;;  %154 = vrot.lane.b32.xlu2 %v257_v53, %s271_s7 }
 0x1c6   : > { %v155_v60 = vpop.permute.xlu2 %154 }
 0x1c7   : > { %v157_v63 = vmul.f32 %v155_v60, %v152_v61 }
 0x1d6   : > { %v108_v56 = vpop.permute.xlu0 %107 }
 0x1d7   : > { %v110_v58 = vmul.f32 %v108_v56, %v105_v55 }
 0x1d9   : > { %v116_v59 = vadd.f32 %v115_v57, %v110_v58 }
 0x1db   : > { %164 = vst [vmem:[#allocation1] ss:$4 sm:$0xff] %v116_v59 }
 0x1de   : > { %v159_v62 = vpop.permute.xlu0 %158 }
 0x1df   : > { %v161_v0 = vmul.f32 %v159_v62, %v135_v46 }
 0x1e1   : > { %v162_v1 = vadd.f32 %v161_v0, %v157_v63 }
 0x1e2   : > { %v165_v2 = vld.sshfl [vmem:[#allocation1] sm:$0xff pattern:$0x73625140] }
 0x1e3   : > { %166 = vrot.lane.b32.xlu0 %v165_v2, %s271_s7  ;;  %174 = vst [vmem:[#allocation1] ss:$4 sm:$0xff] %v162_v1 }
 0x1ea   : > { %v175_v3 = vld.sshfl [vmem:[#allocation1] sm:$0xff pattern:$0x73625140] }
 0x1eb   : > { %182 = vst [vmem:[#allocation1] ss:$4 sm:$0xff] %v116_v59 }
 0x1f2   : > { %v183_v4 = vld.sshfl [vmem:[#allocation1] sm:$0xff pattern:$0x73625140] }
 0x1f3   : > { %184 = vrot.lane.b32.xlu1 %v183_v4, %s271_s7  ;;  %187 = vst [vmem:[#allocation1] ss:$4 sm:$0xff] %v162_v1 }
 0x1fa   : > { %v188_v5 = vld.sshfl [vmem:[#allocation1] sm:$0xff pattern:$0x73625140] }
 0x1fb   : > { %176 = vrot.lane.b32.xlu1 %v175_v3, %s268_s23  ;;  %189 = vrot.lane.b32.xlu2 %v188_v5, %s273_s9 }
 0x255   : > { %v167_v6 = vpop.permute.xlu0 %166  ;;  %v190_v7 = vpop.permute.xlu2 %189 }
 0x256   : > { %172 = vst.msk [vmem:[%s170_s13] sm:$0x3] %vm171_vm10, %v167_v6 }
 0x265   : > { %v185_v8 = vpop.permute.xlu1 %184 }
 0x266   : > { %v193_v9 = vsel %vm192_vm11, %v185_v8, %v190_v7 }
 0x267   : > { %194 = vst.msk [vmem:[#allocation2] sm:$0x3] %vm17_vm0, %v193_v9 }
 0x26a   :  { %23 = sbr.rel (!%p21_p0) target bundleno = 2 (0x2), region = 51 }
 0x26d   : > { %v177_v10 = vpop.permute.xlu1 %176 }
 0x26e   : > { %181 = vst.msk [vmem:[%s180_s18] sm:$0x3] %vm171_vm10, %v177_v10 }

// kernel: freqnet_forward.50
= control target key start
LH: loop header
LB: loop body
LE: loop exit
PB: predicated region body
PF: predicated region fallthrough
CT: control target
= control target key end

     0   :  { %s1173_s18 = smov 0   ;;  %s1175_s19 = smov 0   ;;  %s1285_s0 = inlined_call_operand.vmem [shape: bf16[2,1,32,22], index: 0, kind: input, shape index: {}]   ;;  %s1286_s1 = inlined_call_operand.vmem [shape: bf16[15,16,32], index: 1, kind: input, shape index: {}]   ;;  %s1287_s2 = inlined_call_operand.vmem [shape: f32[16,1], index: 2, kind: input, shape index: {}]   ;;  %s1288_s3 = inlined_call_operand.vmem [shape: f32[16,1], index: 3, kind: input, shape index: {}]   ;;  %s1289_s4 = inlined_call_operand.vmem [shape: bf16[2,16,8], index: 4, kind: input, shape index: {}]   ;;  %s1290_s5 = inlined_call_operand.vmem [shape: bf16[2,16,8], index: 5, kind: output, shape index: {}]  }
   0x1   :  { %s1177_s20 = smov 0  }
   0x2 LB: > { %s27_s21 = sadd.s32 1, %s1122_s19  ;;  %p918_p0 = scmp.ge.s32.totalorder %s1126_s20, 1  ;;  %s1126_s20 = sphi %s1177_s20, %s15_s20   ;;  %s1122_s19 = sphi %s1175_s19, %s1292_s19   ;;  %s1118_s18 = sphi %s1173_s18, %s1291_s18  }
   0x3   : > { %p29_p1 = scmp.ge.s32.totalorder %s27_s21, 2  ;;  %p216_p2 = scmp.lt.s32.totalorder %s1126_s20, 3 }
   0x5   : > { %s1294_s21 = smov (%p29_p1, %s27_s21), 0  ;;  %p217_p3 = pnand %p918_p0, %p216_p2 }
   0x6   : > { %p255_p4 = scmp.lt.s32.totalorder (!%p217_p3), %s1118_s18, 1  ;;  %s1128_s26 = smov (!%p217_p3), 126  }
   0x7   : > { %220 = sbr.rel (%p217_p3) target bundleno = 355 (0x163), region = 40  ;;  %s1129_s27 = smov (!%p217_p3), 125  }
   0x8   : > { %s1130_s28 = smov (!%p217_p3), 127   ;;  %s1131_s29 = smov (!%p217_p3), 122  }
   0x9   : > { %s1132_s30 = smov (!%p217_p3), 124   ;;  %s1133_s6 = smov (!%p217_p3), 123  }
   0xa   : > { %s1134_s7 = smov (!%p217_p3), 121   ;;  %s1135_s8 = smov (!%p217_p3), 118  }
   0xb   : > { %s1136_s9 = smov (!%p217_p3), 120   ;;  %s1137_s10 = smov (!%p217_p3), 119  }
   0xc   : > { %s1296_s18 = smov (!%p255_p4, %s1118_s18), 1  ;;  %s1138_s11 = smov 117   ;;  %v1043_v3 = vld [vmem:[%s1286_s1] sm:$0xff]  ;;  %vm307_vm0 = vcmask 261120   ;;  %v1046_v5 = vld [vmem:[%s1286_s1 + $0x18] sm:$0xff]  ;;  %v1048_v10 = vld [vmem:[%s1286_s1 + $0x28] sm:$0xff] }
   0xd   : > { %s1038_s22 = sshll.u32 %s1296_s18, 4  ;;  %s1139_s12 = smov 114   ;;  %v1045_v11 = vld [vmem:[%s1286_s1 + $0x10] sm:$0xff]  ;;  %v1044_v15 = vld [vmem:[%s1286_s1 + $0x8] sm:$0xff]  ;;  %v1047_v22 = vld [vmem:[%s1286_s1 + $0x20] sm:$0xff]  ;;  %v1142_v33 = vmov 0  }
   0xe   : > { %s259_s25 = scalar_lea.vmem %s1285_s0, %s1038_s22  ;;  %s1140_s13 = smov 116   ;;  %v1049_v21 = vld [vmem:[%s1286_s1 + $0x30] sm:$0xff]  ;;  %v1050_v26 = vld [vmem:[%s1286_s1 + $0x38] sm:$0xff]  ;;  %v778_v31 = vld [vmem:[%s1287_s2] sm:$0xff]  ;;  %1101 = vset.pattern.permute.xlu1 %v1142_v33  ;;  %1103 = vset.pattern.permute.xlu0 %v1142_v33  ;;  %vm816_vm1 = vcmask 60416  }
   0xf   : > { %v1042_v0 = vld [vmem:[%s259_s25 + $0x8] sm:$0xff]  ;;  %v1041_v1 = vld [vmem:[%s259_s25] sm:$0xff]  ;;  %s1141_s14 = smov 115   ;;  %v1053_v29 = vld [vmem:[%s1286_s1 + $0x50] sm:$0xff]  ;;  %1102 = vset.pattern.permute.xlu2 %v1142_v33 }
  0x10   : > { %359 = vrot.lane.b32.xlu0 %v1042_v0, %s1128_s26  ;;  %357 = vrot.lane.b32.xlu1 %v1041_v1, %s1128_s26  ;;  %v792_v32 = vld [vmem:[%s1288_s3] sm:$0xff]  ;;  %v779_v34 = vld [vmem:[%s1287_s2 + $0x8] sm:$0xff] }
  0x11   : > { %392 = vrot.lane.b32.xlu2 %v1042_v0, %s1129_s27  ;;  %341 = vmatpush.bf16.msra.mxu1 %v1042_v0  ;;  %v1051_v37 = vld [vmem:[%s1286_s1 + $0x40] sm:$0xff]  ;;  %v1052_v38 = vld [vmem:[%s1286_s1 + $0x48] sm:$0xff]  ;;  %v1054_v43 = vld [vmem:[%s1286_s1 + $0x58] sm:$0xff] }
  0x12   : > { %v793_v40 = vld [vmem:[%s1288_s3 + $0x8] sm:$0xff]  ;;  %v1055_v46 = vld [vmem:[%s1286_s1 + $0x60] sm:$0xff]  ;;  %v1057_v47 = vld [vmem:[%s1286_s1 + $0x70] sm:$0xff] }
  0x13   : > { %v1056_v49 = vld [vmem:[%s1286_s1 + $0x68] sm:$0xff] }
  0x15   : > { %342 = vmatpush.bf16.msra.mxu1 %v1041_v1 }
  0x18   : > { %303 = vrot.lane.b32.xlu0 %v1042_v0, %s1130_s28  ;;  %301 = vrot.lane.b32.xlu1 %v1041_v1, %s1130_s28 }
  0x19   : > { %390 = vrot.lane.b32.xlu2 %v1041_v1, %s1129_s27  ;;  %944 = vmatmul.msk.bf16.vlgmr.msra.gmra.mxu1 %vm307_vm0, %v1043_v3 }
  0x20   : > { %491 = vrot.lane.b32.xlu0 %v1042_v0, %s1131_s29  ;;  %425 = vrot.lane.b32.xlu1 %v1042_v0, %s1132_s30 }
  0x21   : > { %458 = vrot.lane.b32.xlu2 %v1042_v0, %s1133_s6 }
  0x28   : > { %489 = vrot.lane.b32.xlu0 %v1041_v1, %s1131_s29  ;;  %423 = vrot.lane.b32.xlu1 %v1041_v1, %s1132_s30 }
  0x29   : > { %456 = vrot.lane.b32.xlu2 %v1041_v1, %s1133_s6 }
  0x30   : > { %524 = vrot.lane.b32.xlu0 %v1042_v0, %s1134_s7  ;;  %522 = vrot.lane.b32.xlu1 %v1041_v1, %s1134_s7 }
  0x31   : > { %623 = vrot.lane.b32.xlu2 %v1042_v0, %s1135_s8 }
  0x38   : > { %557 = vrot.lane.b32.xlu0 %v1042_v0, %s1136_s9  ;;  %590 = vrot.lane.b32.xlu1 %v1042_v0, %s1137_s10 }
  0x39   : > { %621 = vrot.lane.b32.xlu2 %v1041_v1, %s1135_s8 }
  0x40   : > { %555 = vrot.lane.b32.xlu0 %v1041_v1, %s1136_s9  ;;  %588 = vrot.lane.b32.xlu1 %v1041_v1, %s1137_s10 }
  0x41   : > { %656 = vrot.lane.b32.xlu2 %v1042_v0, %s1138_s11 }
  0x48   : > { %654 = vrot.lane.b32.xlu0 %v1041_v1, %s1138_s11  ;;  %755 = vrot.lane.b32.xlu1 %v1042_v0, %s1139_s12  ;;  %s1039_s11 = sshll.u32 %s1296_s18, 3 }
  0x49   : > { %689 = vrot.lane.b32.xlu2 %v1042_v0, %s1140_s13  ;;  %s275_s16 = scalar_lea.vmem %s1290_s5, %s1039_s11 }
  0x50   : > { %722 = vrot.lane.b32.xlu0 %v1042_v0, %s1141_s14  ;;  %753 = vrot.lane.b32.xlu1 %v1041_v1, %s1139_s12 }
  0x51   : > { %687 = vrot.lane.b32.xlu2 %v1041_v1, %s1140_s13 }
  0x58   : > { %720 = vrot.lane.b32.xlu0 %v1041_v1, %s1141_s14  ;;  %782 = vperm.xlu1 %1101, %v778_v31   ;;  %s267_s14 = scalar_lea.vmem %s1289_s4, %s1039_s11 }
  0x59   : > { %787 = vperm.xlu2 %1102, %v779_v34  }
  0x60   : > { %796 = vperm.xlu0 %1103, %v792_v32   ;;  %801 = vperm.xlu1 %1101, %v793_v40   ;;  %v1059_v40 = vld [vmem:[%s267_s14] sm:$0xff]  }
  0x6b   : > { %v393_v2 = vpop.permute.xlu2 %392 }
  0x6c   : > { %405 = vmatpush.bf16.msra.mxu3 %v393_v2 }
  0x73   : > { %v391_v4 = vpop.permute.xlu2 %390 }
  0x74   : > { %406 = vmatpush.bf16.msra.mxu3 %v391_v4 }
  0x77   : > { %958 = vmatmul.msk.bf16.vlgmr.msra.gmra.mxu3 %vm307_vm0, %v1046_v5 }
  0x7b   : > { %v459_v6 = vpop.permute.xlu2 %458 }
  0x7c   : > { %471 = vmatpush.bf16.msrb.mxu1 %v459_v6 }
  0x82   : > { %v360_v7 = vpop.permute.xlu0 %359  ;;  %v358_v8 = vpop.permute.xlu1 %357 }
  0x83   : > { %372 = vmatpush.bf16.msra.mxu2 %v360_v7  ;;  %v457_v9 = vpop.permute.xlu2 %456 }
  0x84   : > { %472 = vmatpush.bf16.msrb.mxu1 %v457_v9 }
  0x87   : > { %373 = vmatpush.bf16.msra.mxu2 %v358_v8  ;;  %972 = vmatmul.msk.bf16.vlgmr.msrb.gmra.mxu1 %vm307_vm0, %v1048_v10 }
  0x8a   : > { %v304_v12 = vpop.permute.xlu0 %303  ;;  %v302_v13 = vpop.permute.xlu1 %301  ;;  %951 = vmatmul.msk.bf16.vlgmr.msra.gmra.mxu2 %vm307_vm0, %v1045_v11 }
  0x8b   : > { %317 = vmatpush.bf16.msra.mxu0 %v304_v12  ;;  %v624_v14 = vpop.permute.xlu2 %623 }
  0x8f   : > { %318 = vmatpush.bf16.msra.mxu0 %v302_v13 }
  0x92   : > { %v492_v16 = vpop.permute.xlu0 %491  ;;  %939 = vmatmul.msk.bf16.vlgmr.msra.gmra.mxu0 %vm307_vm0, %v1044_v15  ;;  %v426_v17 = vpop.permute.xlu1 %425 }
  0x93   : > { %504 = vmatpush.bf16.msrb.mxu2 %v492_v16  ;;  %438 = vmatpush.bf16.msrb.mxu0 %v426_v17  ;;  %v622_v18 = vpop.permute.xlu2 %621 }
  0x96   : > { %v344_v52 = vpop.f32.mrf.mxu1 }
  0x9a   : > { %v490_v19 = vpop.permute.xlu0 %489  ;;  %v424_v20 = vpop.permute.xlu1 %423 }
  0x9b   : > { %505 = vmatpush.bf16.msrb.mxu2 %v490_v19  ;;  %439 = vmatpush.bf16.msrb.mxu0 %v424_v20  ;;  %v657_v23 = vpop.permute.xlu2 %656 }
  0x9e   : > { %979 = vmatmul.msk.bf16.vlgmr.msrb.gmra.mxu2 %vm307_vm0, %v1049_v21  ;;  %v346_v55 = vpop.f32.mrf.mxu1 }
  0x9f   : > { %636 = vmatpush.bf16.msra.mxu2 %v624_v14 }
  0xa2   : > { %v525_v24 = vpop.permute.xlu0 %524  ;;  %965 = vmatmul.msk.bf16.vlgmr.msrb.gmra.mxu0 %vm307_vm0, %v1047_v22  ;;  %v523_v25 = vpop.permute.xlu1 %522 }
  0xa3   : > { %637 = vmatpush.bf16.msra.mxu2 %v622_v18  ;;  %537 = vmatpush.bf16.msrb.mxu3 %v525_v24  ;;  %v690_v30 = vpop.permute.xlu2 %689 }
  0xa7   : > { %538 = vmatpush.bf16.msrb.mxu3 %v523_v25 }
  0xaa   : > { %v558_v27 = vpop.permute.xlu0 %557  ;;  %986 = vmatmul.msk.bf16.vlgmr.msrb.gmra.mxu3 %vm307_vm0, %v1050_v26  ;;  %v591_v28 = vpop.permute.xlu1 %590 }
  0xab   : > { %669 = vmatpush.bf16.msra.mxu3 %v657_v23  ;;  %570 = vmatpush.bf16.msra.mxu0 %v558_v27  ;;  %v688_v39 = vpop.permute.xlu2 %687 }
  0xac   : > { %603 = vmatpush.bf16.msra.mxu1 %v591_v28 }
  0xae   : > { %1007 = vmatmul.msk.bf16.vlgmr.msra.gmra.mxu2 %vm307_vm0, %v1053_v29 }
  0xb2   : > { %v556_v35 = vpop.permute.xlu0 %555  ;;  %v589_v36 = vpop.permute.xlu1 %588 }
  0xb3   : > { %571 = vmatpush.bf16.msra.mxu0 %v556_v35  ;;  %604 = vmatpush.bf16.msra.mxu1 %v589_v36 }
  0xb6   : > { %993 = vmatmul.msk.bf16.vlgmr.msra.gmra.mxu0 %vm307_vm0, %v1051_v37  ;;  %1000 = vmatmul.msk.bf16.vlgmr.msra.gmra.mxu1 %vm307_vm0, %v1052_v38 }
  0xb7   : > { %702 = vmatpush.bf16.msrb.mxu0 %v690_v30 }
  0xba   : > { %v655_v41 = vpop.permute.xlu0 %654  ;;  %v756_v42 = vpop.permute.xlu1 %755 }
  0xbb   : > { %703 = vmatpush.bf16.msrb.mxu0 %v688_v39  ;;  %670 = vmatpush.bf16.msra.mxu3 %v655_v41 }
  0xbc   : > { %768 = vmatpush.bf16.msrb.mxu2 %v756_v42 }
  0xbe   : > { %1014 = vmatmul.msk.bf16.vlgmr.msra.gmra.mxu3 %vm307_vm0, %v1054_v43 }
  0xc2   : > { %v723_v44 = vpop.permute.xlu0 %722  ;;  %v754_v45 = vpop.permute.xlu1 %753 }
  0xc3   : > { %735 = vmatpush.bf16.msrb.mxu1 %v723_v44  ;;  %769 = vmatpush.bf16.msrb.mxu2 %v754_v45  ;;  %v1060_v44 = vunpack.c.l.bf16 %v1059_v40 }
  0xc6   : > { %1021 = vmatmul.msk.bf16.vlgmr.msrb.gmra.mxu0 %vm307_vm0, %v1055_v46  ;;  %1035 = vmatmul.msk.bf16.vlgmr.msrb.gmra.mxu2 %vm307_vm0, %v1057_v47 }
  0xca   : > { %v721_v48 = vpop.permute.xlu0 %720  ;;  %v783_v37 = vpop.permute.xlu1 %782 }
  0xcb   : > { %736 = vmatpush.bf16.msrb.mxu1 %v721_v48 }
  0xce   : > { %1028 = vmatmul.msk.bf16.vlgmr.msrb.gmra.mxu1 %vm307_vm0, %v1056_v49 }
  0xd2   : > { %v797_v41 = vpop.permute.xlu0 %796 }
  0xfa   : > { %v408_v56 = vpop.f32.mrf.mxu3 }
 0x102   : > { %v410_v61 = vpop.f32.mrf.mxu3 }
 0x104   : > { %v474_v60 = vpop.f32.mrf.mxu1 }
 0x10c   : > { %v476_v5 = vpop.f32.mrf.mxu1 }
 0x10d   : > { %v375_v51 = vpop.f32.mrf.mxu2 }
 0x10f   : > { %v320_v50 = vpop.f32.mrf.mxu0 }
 0x110   : > { %v345_v58 = vadd.f32 %v344_v52, %v320_v50  ;;  %v788_v50 = vpop.permute.xlu2 %787 }
 0x112   : > { %v380_v62 = vadd.f32 %v375_v51, %v345_v58 }
 0x114   : > { %v413_v0 = vadd.f32 %v408_v56, %v380_v62  ;;  %v1061_v56 = vunpack.c.h.bf16 %v1059_v40 }
 0x115   : > { %v377_v54 = vpop.f32.mrf.mxu2 }
 0x117   : > { %v322_v53 = vpop.f32.mrf.mxu0 }
 0x118   : > { %v347_v1 = vadd.f32 %v346_v55, %v322_v53  ;;  %v802_v55 = vpop.permute.xlu1 %801 }
 0x11a   : > { %v381_v6 = vadd.f32 %v377_v54, %v347_v1 }
 0x11c   : > { %v414_v9 = vadd.f32 %v410_v61, %v381_v6 }
 0x11f   : > { %v441_v57 = vpop.f32.mrf.mxu0 }
 0x120   : > { %v446_v3 = vadd.f32 %v441_v57, %v413_v0 }
 0x121   : > { %v507_v59 = vpop.f32.mrf.mxu2 }
 0x122   : > { %v479_v8 = vadd.f32 %v474_v60, %v446_v3 }
 0x124   : > { %v512_v10 = vadd.f32 %v507_v59, %v479_v8 }
 0x127   : > { %v443_v63 = vpop.f32.mrf.mxu0 }
 0x128   : > { %v447_v11 = vadd.f32 %v443_v63, %v414_v9 }
 0x129   : > { %v509_v4 = vpop.f32.mrf.mxu2 }
 0x12a   : > { %v480_v17 = vadd.f32 %v476_v5, %v447_v11 }
 0x12c   : > { %v513_v19 = vadd.f32 %v509_v4, %v480_v17 }
 0x12d   : > { %v540_v2 = vpop.f32.mrf.mxu3 }
 0x12e   : > { %v545_v15 = vadd.f32 %v540_v2, %v512_v10 }
 0x131   : > { %v639_v12 = vpop.f32.mrf.mxu2 }
 0x133   : > { %v573_v7 = vpop.f32.mrf.mxu0  ;;  %v606_v14 = vpop.f32.mrf.mxu1 }
 0x134   : > { %v578_v18 = vadd.f32 %v573_v7, %v545_v15 }
 0x135   : > { %v542_v13 = vpop.f32.mrf.mxu3 }
 0x136   : > { %v611_v20 = vadd.f32 %v606_v14, %v578_v18  ;;  %v546_v22 = vadd.f32 %v542_v13, %v513_v19 }
 0x138   : > { %v644_v25 = vadd.f32 %v639_v12, %v611_v20 }
 0x139   : > { %v641_v24 = vpop.f32.mrf.mxu2 }
 0x13b   : > { %v575_v16 = vpop.f32.mrf.mxu0  ;;  %v608_v23 = vpop.f32.mrf.mxu1 }
 0x13c   : > { %v579_v26 = vadd.f32 %v575_v16, %v546_v22 }
 0x13e   : > { %v612_v29 = vadd.f32 %v608_v23, %v579_v26 }
 0x140   : > { %v645_v34 = vadd.f32 %v641_v24, %v612_v29 }
 0x141   : > { %v672_v21 = vpop.f32.mrf.mxu3 }
 0x142   : > { %v677_v28 = vadd.f32 %v672_v21, %v644_v25 }
 0x143   : > { %v705_v27 = vpop.f32.mrf.mxu0 }
 0x144   : > { %v710_v30 = vadd.f32 %v705_v27, %v677_v28 }
 0x149   : > { %v674_v31 = vpop.f32.mrf.mxu3  ;;  %v771_v32 = vpop.f32.mrf.mxu2 }
 0x14a   : > { %v678_v36 = vadd.f32 %v674_v31, %v645_v34 }
 0x14b   : > { %v738_v33 = vpop.f32.mrf.mxu1  ;;  %v707_v39 = vpop.f32.mrf.mxu0 }
 0x14c   : > { %v743_v35 = vadd.f32 %v738_v33, %v710_v30  ;;  %v711_v43 = vadd.f32 %v707_v39, %v678_v36 }
 0x14e   : > { %v776_v38 = vadd.f32 %v771_v32, %v743_v35 }
 0x150   : > { %v790_v42 = vmul.f32 %v783_v37, %v776_v38 }
 0x151   : > { %v773_v49 = vpop.f32.mrf.mxu2 }
 0x152   : > { %v804_v45 = vadd.f32 %v797_v41, %v790_v42 }
 0x153   : > { %v740_v46 = vpop.f32.mrf.mxu1 }
 0x154   : > { %v806_v47 = vmax.f32 %v804_v45, 0.0  ;;  %v744_v48 = vadd.f32 %v740_v46, %v711_v43 }
 0x156   : > { %v812_v51 = vadd.f32 %v1060_v44, %v806_v47  ;;  %v777_v52 = vadd.f32 %v773_v49, %v744_v48 }
 0x158   : > { %v814_v53 = vpack.c.bf16 %v812_v51, %v812_v51  ;;  %v791_v54 = vmul.f32 %v788_v50, %v777_v52 }
 0x15a   : > { %817 = vst.msk [vmem:[%s275_s16] sm:$0xf] %vm816_vm1, %v814_v53  ;;  %v805_v57 = vadd.f32 %v802_v55, %v791_v54 }
 0x15c   : > { %v807_v58 = vmax.f32 %v805_v57, 0.0 }
 0x15e   : > { %v813_v59 = vadd.f32 %v1061_v56, %v807_v58 }
 0x160   : > { %v815_v60 = vpack.c.bf16 %v813_v59, %v813_v59 }
 0x162   : > { %818 = vst.msk [vmem:[%s275_s16 + $0x4] sm:$0xf] %vm816_vm1, %v815_v60 }
 0x163 PF: > { %s15_s20 = sadd.s32 1, %s1126_s20   ;;  %s1291_s18 = smov %s1122_s19 }
 0x164   : > { %p12_p5 = scmp.ge.s32.totalorder %s15_s20, 4   ;;  %s1292_s19 = smov %s1294_s21 }
 0x166   :  { %14 = sbr.rel (!%p12_p5) target bundleno = 2 (0x2), region = 87 }

// kernel: freqnet_forward.55
= control target key start
LH: loop header
LB: loop body
LE: loop exit
PB: predicated region body
PF: predicated region fallthrough
CT: control target
= control target key end

     0   :  { %vm42_vm0 = vcmask 261120   ;;  %vm62_vm1 = vcmask 125952   ;;  %s124_s1 = inlined_call_operand.vmem [shape: bf16[32,16], index: 1, kind: input, shape index: {}]   ;;  %s125_s2 = inlined_call_operand.vmem [shape: f32[1,16], index: 2, kind: input, shape index: {}]   ;;  %s126_s0 = inlined_call_operand.vmem [shape: bf16[16,32], index: 0, kind: input, shape index: {}]   ;;  %s127_s3 = inlined_call_operand.vmem [shape: bf16[16,16], index: 3, kind: output, shape index: {}]  }
   0x1   :  { %v84_v0 = vld [vmem:[%s124_s1 + $0x8] sm:$0xff]  ;;  %v83_v1 = vld [vmem:[%s124_s1] sm:$0xff] }
   0x2   :  { %52 = vmatpush.bf16.msra.mxu0 %v84_v0  ;;  %v82_v2 = vld [vmem:[%s126_s0] sm:$0xff] }
   0x3   :  { %v85_v3 = vld [vmem:[%s125_s2] ss:$0 sm:$0xff] }
   0x6   :  { %53 = vmatpush.bf16.msra.mxu0 %v83_v1 }
   0x9   :  { %81 = vmatmul.msk.bf16.vlgmr.msra.gmra.mxu0 %vm42_vm0, %v82_v2 }
  0x86   :  { %v55_v4 = vpop.f32.mrf.mxu0 }
  0x87   :  { %v56_v5 = vadd.f32 %v85_v3, %v55_v4 }
  0x89   :  { %v60_v6 = vpack.c.bf16 %v56_v5, %v56_v5 }
  0x8b   :  { %63 = vst.msk [vmem:[%s127_s3] sm:$0xf] %vm62_vm1, %v60_v6 }
  0x8e   :  { %v57_v7 = vpop.f32.mrf.mxu0 }
  0x8f   :  { %v58_v8 = vadd.f32 %v85_v3, %v57_v7 }
  0x91   :  { %v61_v9 = vpack.c.bf16 %v58_v8, %v58_v8 }
  0x93   :  { %64 = vst.msk [vmem:[%s127_s3 + $0x4] sm:$0xf] %vm62_vm1, %v61_v9 }

// kernel: freqnet_forward.59
= control target key start
LH: loop header
LB: loop body
LE: loop exit
PB: predicated region body
PF: predicated region fallthrough
CT: control target
= control target key end

     0   :  { %s608_s0 = inlined_call_operand.vmem [shape: bf16[2,1,8,16], index: 0, kind: input, shape index: {}]   ;;  %s609_s1 = inlined_call_operand.vmem [shape: bf16[1,1,8], index: 1, kind: input, shape index: {}]   ;;  %s610_s2 = inlined_call_operand.<no memory space> [shape: f32[1,1], index: 2, kind: input, shape index: {}]   ;;  %s611_s4 = inlined_call_operand.hbm [shape: f32[2,1,16], index: 4, kind: output, shape index: {}]   ;;  %s612_s3 = inlined_call_operand.<no memory space> [shape: f32[1,1], index: 3, kind: input, shape index: {}]  }
   0x1   :  { %v9_v0 = vstv %s610_s2  ;;  %v11_v1 = vstv %s612_s3 }
   0x2   :  { %10 = vst [vmem:[#allocation2] sm:$0x1] %v9_v0 }
   0x3   :  { %12 = vst [vmem:[#allocation3] sm:$0x1] %v11_v1 }
   0x4   :  { %13 = vsyncpa [#allocation5], 0 }
   0x5   :  { %15 = vsyncpa [#allocation5 + $0x1], 0  ;;  %s508_s19 = smov 0   ;;  %s510_s20 = smov 0  }
   0x6   :  { %s512_s21 = smov 0   ;;  %s514_s22 = smov 0  }
   0x7   :  { %s516_s23 = smov 0   ;;  %s518_s24 = smov 0  }
   0x8 LB: > { %s330_s2 = sadd.s32 4294967295, %s474_s24   ;;  %s331_s3 = sadd.s32 4294967294, %s474_s24   ;;  %s474_s24 = sphi %s518_s24, %s21_s24   ;;  %s470_s23 = sphi %s516_s23, %s619_s23   ;;  %s466_s22 = sphi %s514_s22, %s618_s22   ;;  %s462_s21 = sphi %s512_s21, %s617_s21   ;;  %s458_s20 = sphi %s510_s20, %s616_s20   ;;  %s454_s19 = sphi %s508_s19, %s615_s19  }
   0x9   : > { %s33_s25 = sadd.s32 1, %s470_s23  ;;  %s131_s26 = sadd.s32 1, %s462_s21 }
   0xa   : > { %p35_p0 = scmp.ge.s32.totalorder %s33_s25, 2  ;;  %p141_p1 = scmp.ne.s32.totalorder %s462_s21, %s458_s20 }
   0xb   : > { %p142_p2 = scmp.eq.s32.totalorder %s330_s2, 1  ;;  %p147_p3 = scmp.ne.s32.totalorder %s458_s20, %s454_s19 }
   0xc   : > { %s621_s25 = smov (%p35_p0, %s33_s25), 0  ;;  %p148_p5 = scmp.eq.s32.totalorder %s331_s3, 1 }
   0xd   : > { %p548_p4 = por %p142_p2, %p141_p1  ;;  %s126_s28 = ssub.s32 %s470_s23, %s621_s25 }
   0xe   : > { %p334_p6 = scmp.ge.s32.totalorder %s474_s24, 1  ;;  %p129_p7 = scmp.eq.s32.totalorder %s126_s28, 0 }
   0xf   : > { %p555_p8 = por %p148_p5, %p147_p3  ;;  %p182_p9 = scmp.lt.s32.totalorder %s474_s24, 3 }
  0x10   : > { %s561_s30 = scalar_select %p129_p7, %s462_s21, %s131_s26  }
  0x11   : > { %p183_p10 = pnand %p334_p6, %p182_p9 }
  0x12   : > { %p206_p11 = scmp.lt.s32.totalorder (!%p183_p10), %s466_s22, 1  ;;  %s204_s12 = sand.u32 (!%p183_p10), 1, %s458_s20  }
  0x13   : > { %186 = sbr.rel (%p183_p10) target bundleno = 167 (0xa7), region = 36  ;;  %s262_s15 = scalar_lea.hbm (!%p183_p10), %s611_s4, %s466_s22 }
  0x14   : > { %s205_s16 = scalar_lea.vmem (!%p183_p10), [#allocation4], %s204_s12  ;;  %s266_s18 = sshll.u32 (!%p183_p10), %s262_s15, 4  ;;  %s267_s18 = int_to_ptr.hbm [resolvable:$true] %s266_s18 }
  0x15   : > { %s264_s17 = sshll.u32 (!%p183_p10), %s205_s16, 4  ;;  %s253_s2 = scalar_lea.sflag (!%p183_p10), [#allocation5], %s204_s12  ;;  %s265_s17 = int_to_ptr.vmem [resolvable:$true] %s264_s17 }
  0x16   : > { %s410_s3 = sshra.s32 (!%p183_p10), %s267_s18, 4  ;;  %s411_s3 = int_to_ptr.hbm [resolvable:$true] %s410_s3 }
  0x17   : > { %s412_s26 = scalar_lea.hbm (!%p183_p10), %s411_s3, 1  ;;  %p417_p1 = scmp.lt.s32.totalorder (!%p183_p10), %s411_s3, %s611_s4 }
  0x18   : > { %v234_v2 = vld [vmem:[#allocation2] sm:$0x1]  ;;  %v476_v3 = vmov 0   ;;  %s207_s5 = scalar_select %p206_p11, %s466_s22, 1  ;;  %vm217_vm0 = vcmask 1043456   ;;  %vm213_vm1 = vcmask 64512  }
  0x19   : > { %395 = vset.pattern.permute.xlu0 %v476_v3  ;;  %v242_v6 = vld [vmem:[#allocation3] sm:$0x1]  ;;  %v212_v7 = vld [vmem:[%s609_s1] sm:$0x1]  ;;  %vm250_vm2 = vcmask 122880   ;;  %p413_p12 = scmp.ne.s32.totalorder %s411_s3, %s412_s26 }
  0x1a   : > { %237 = vperm.xlu0 %395, %v234_v2   ;;  %s335_s6 = sshll.u32 %s207_s5, 2  ;;  %s416_s5 = scalar_lea.hbm %s611_s4, 2 }
  0x1b   : > { %s209_s9 = scalar_lea.vmem %s608_s0, %s335_s6  ;;  %p414_p13 = pnand %p413_p12, %p548_p4 }
  0x1c   : > { %v211_v4 = vld [vmem:[%s209_s9] sm:$0xf]  ;;  %p418_p2 = scmp.lt.s32.totalorder %s416_s5, %s412_s26 }
  0x1d   : > { %v219_v5 = vsel %vm217_vm0, %v211_v4, 0  ;;  %p415_p0 = pneg %p414_p13 }
  0x1e   : > { %228 = vmatpush.bf16.msra.mxu0 %v219_v5  ;;  %p419_p3 = por %p418_p2, %p417_p1 }
  0x20   : > { %p420_p5 = pnand %p419_p3, %p415_p0 }
  0x21   : > { %336 = vmatmul.msk.bf16.vlgmr.msra.gmra.mxu0 %vm213_vm1, %v212_v7 }
  0x22   : > { %245 = vperm.xlu0 %395, %v242_v6  }
  0x8c   : > { %v238_v8 = vpop.permute.xlu0 %237 }
  0x8d   : > { %v240_v10 = vperm.slane %v238_v8, 0 }
  0x94   : > { %v246_v9 = vpop.permute.xlu0 %245 }
  0x95   : > { %v248_v12 = vperm.slane %v246_v9, 0 }
  0x9e   : > { %v230_v11 = vpop.f32.mrf.mxu0 }
  0x9f   : > { %v241_v13 = vmul.f32 %v240_v10, %v230_v11 }
  0xa1   : > { %v249_v14 = vadd.f32 %v248_v12, %v241_v13 }
  0xa3   : > { %251 = vst.msk [vmem:[%s205_s16] sm:$0x1] %vm250_vm2, %v249_v14 }
  0xa4   : > { %423 = shalt.err (!%p420_p5)
}
  0xa5   : > { %339 = dma.vmem_to_hbm [thread:$0]  (%p548_p4), %s265_s17, 16, %s267_s18, %s253_s2  }
  0xa6   : > { %v232_v15 = vpop.f32.mrf.mxu0 }
  0xa7 PF: > { %p345_p6 = scmp.ge.s32.totalorder %s474_s24, 2  ;;  %s278_s8 = sand.u32 1, %s454_s19  }
  0xa8   : > { %s279_s9 = scalar_lea.sflag [#allocation5], %s278_s8 }
  0xa9   : > { %p342_p7 = pnand %p345_p6, %p555_p8 }
  0xab   : > { %p343_p9 = pneg %p342_p7 }
  0xad   : > { %449 = dma.done.wait (%p343_p9), %s279_s9, 16  }
  0xae   : > { %451 = vsyncadd (%p343_p9), %s279_s9, 4294967280  ;;  %s21_s24 = sadd.s32 1, %s474_s24   ;;  %s615_s19 = smov %s458_s20 }
  0xaf   : > { %p18_p10 = scmp.ge.s32.totalorder %s21_s24, 4   ;;  %s616_s20 = smov %s462_s21 }
  0xb0   : > { %s617_s21 = smov %s561_s30  ;;  %s618_s22 = smov %s470_s23 }
  0xb1   : > { %s619_s23 = smov %s621_s25  ;;  %20 = sbr.rel (!%p18_p10) target bundleno = 8 (0x8), region = 71 }
  0xb6   :  { %284 = vsyncpa [#allocation5], 1 }
  0xb7   :  { %286 = vsyncpa [#allocation5 + $0x1], 1 }

// kernel: freqnet_forward.56
= control target key start
LH: loop header
LB: loop body
LE: loop exit
PB: predicated region body
PF: predicated region fallthrough
CT: control target
= control target key end

     0   :  { %s868_s18 = smov 0   ;;  %s870_s19 = smov 0   ;;  %s974_s0 = inlined_call_operand.vmem [shape: bf16[2,1,16,30], index: 0, kind: input, shape index: {}]   ;;  %s975_s1 = inlined_call_operand.vmem [shape: bf16[15,8,16], index: 1, kind: input, shape index: {}]   ;;  %s976_s2 = inlined_call_operand.vmem [shape: f32[8,1], index: 2, kind: input, shape index: {}]   ;;  %s977_s3 = inlined_call_operand.vmem [shape: f32[8,1], index: 3, kind: input, shape index: {}]   ;;  %s978_s4 = inlined_call_operand.vmem [shape: bf16[2,8,16], index: 4, kind: input, shape index: {}]   ;;  %s979_s5 = inlined_call_operand.vmem [shape: bf16[2,8,16], index: 5, kind: output, shape index: {}]  }
   0x1   :  { %s872_s20 = smov 0  }
   0x2 LB: > { %s27_s21 = sadd.s32 1, %s817_s19  ;;  %p716_p0 = scmp.ge.s32.totalorder %s821_s20, 1  ;;  %s821_s20 = sphi %s872_s20, %s15_s20   ;;  %s817_s19 = sphi %s870_s19, %s981_s19   ;;  %s813_s18 = sphi %s868_s18, %s980_s18  }
   0x3   : > { %p29_p1 = scmp.ge.s32.totalorder %s27_s21, 2  ;;  %p215_p2 = scmp.lt.s32.totalorder %s821_s20, 3 }
   0x5   : > { %s983_s21 = smov (%p29_p1, %s27_s21), 0  ;;  %p216_p3 = pnand %p716_p0, %p215_p2 }
   0x6   : > { %p252_p4 = scmp.lt.s32.totalorder (!%p216_p3), %s813_s18, 1  ;;  %s823_s26 = smov (!%p216_p3), 126  }
   0x7   : > { %219 = sbr.rel (%p216_p3) target bundleno = 333 (0x14d), region = 40  ;;  %s824_s27 = smov (!%p216_p3), 125  }
   0x8   : > { %s825_s28 = smov (!%p216_p3), 124   ;;  %s826_s29 = smov (!%p216_p3), 127  }
   0x9   : > { %s827_s30 = smov (!%p216_p3), 122   ;;  %s828_s6 = smov (!%p216_p3), 123  }
   0xa   : > { %s829_s7 = smov (!%p216_p3), 121   ;;  %s830_s8 = smov (!%p216_p3), 118  }
   0xb   : > { %s831_s9 = smov (!%p216_p3), 120   ;;  %s832_s10 = smov (!%p216_p3), 119  }
   0xc   : > { %s985_s18 = smov (!%p252_p4, %s813_s18), 1  ;;  %s833_s11 = smov 117   ;;  %vm285_vm0 = vcmask 130048   ;;  %v274_v1 = vld [vmem:[%s975_s1] sm:$0xf]  ;;  %v837_v24 = vmov 0  }
   0xd   : > { %s756_s22 = sshll.u32 %s985_s18, 3  ;;  %s834_s12 = smov 114   ;;  %v734_v4 = vld [vmem:[%s975_s1 + $0x14] sm:$0xf]  ;;  %v728_v7 = vld [vmem:[%s975_s1 + $0x8] sm:$0xf]  ;;  %798 = vset.pattern.permute.xlu0 %v837_v24  ;;  %797 = vset.pattern.permute.xlu2 %v837_v24 }
   0xe   : > { %s256_s25 = scalar_lea.vmem %s974_s0, %s756_s22  ;;  %s835_s13 = smov 116   ;;  %v730_v8 = vld [vmem:[%s975_s1 + $0xc] sm:$0xf]  ;;  %v721_v12 = vld [vmem:[%s975_s1 + $0x4] sm:$0xf]  ;;  %vm624_vm1 = vcmask 125952  }
   0xf   : > { %v757_v0 = vld [vmem:[%s256_s25] sm:$0xff]  ;;  %s836_s14 = smov 115   ;;  %v736_v15 = vld [vmem:[%s975_s1 + $0x18] sm:$0xf]  ;;  %v738_v16 = vld [vmem:[%s975_s1 + $0x1c] sm:$0xf] }
  0x10   : > { %321 = vrot.lane.b32.xlu0 %v757_v0, %s823_s26  ;;  %343 = vrot.lane.b32.xlu1 %v757_v0, %s824_s27  ;;  %v732_v20 = vld [vmem:[%s975_s1 + $0x10] sm:$0xf]  ;;  %v742_v21 = vld [vmem:[%s975_s1 + $0x24] sm:$0xf] }
  0x11   : > { %365 = vrot.lane.b32.xlu2 %v757_v0, %s825_s28  ;;  %313 = vmatpush.bf16.msra.mxu1 %v757_v0  ;;  %v612_v22 = vld [vmem:[%s977_s3] sm:$0xff]  ;;  %v744_v27 = vld [vmem:[%s975_s1 + $0x28] sm:$0xf]  ;;  %v746_v28 = vld [vmem:[%s975_s1 + $0x2c] sm:$0xf] }
  0x12   : > { %v605_v23 = vld [vmem:[%s976_s2] sm:$0xff]  ;;  %v750_v30 = vld [vmem:[%s975_s1 + $0x34] sm:$0xf]  ;;  %v752_v31 = vld [vmem:[%s975_s1 + $0x38] sm:$0xf] }
  0x13   : > { %v740_v29 = vld [vmem:[%s975_s1 + $0x20] sm:$0xf]  ;;  %v748_v32 = vld [vmem:[%s975_s1 + $0x30] sm:$0xf] }
  0x14   : > { %727 = vmatmul.msk.bf16.vlgmr.msra.gmra.mxu1 %vm285_vm0, %v274_v1 }
  0x18   : > { %282 = vrot.lane.b32.xlu0 %v757_v0, %s826_s29  ;;  %409 = vrot.lane.b32.xlu1 %v757_v0, %s827_s30 }
  0x19   : > { %387 = vrot.lane.b32.xlu2 %v757_v0, %s828_s6 }
  0x20   : > { %431 = vrot.lane.b32.xlu0 %v757_v0, %s829_s7  ;;  %497 = vrot.lane.b32.xlu1 %v757_v0, %s830_s8  ;;  %s719_s7 = sshll.u32 %s985_s18, 2 }
  0x21   : > { %453 = vrot.lane.b32.xlu2 %v757_v0, %s831_s9  ;;  %s270_s18 = scalar_lea.vmem %s979_s5, %s719_s7 }
  0x28   : > { %475 = vrot.lane.b32.xlu0 %v757_v0, %s832_s10  ;;  %519 = vrot.lane.b32.xlu1 %v757_v0, %s833_s11  ;;  %s263_s10 = scalar_lea.vmem %s978_s4, %s719_s7 }
  0x29   : > { %585 = vrot.lane.b32.xlu2 %v757_v0, %s834_s12 }
  0x30   : > { %541 = vrot.lane.b32.xlu0 %v757_v0, %s835_s13  ;;  %563 = vrot.lane.b32.xlu1 %v757_v0, %s836_s14 }
  0x31   : > { %608 = vperm.xlu2 %797, %v605_v23  }
  0x38   : > { %615 = vperm.xlu0 %798, %v612_v22  }
  0x6b   : > { %v366_v2 = vpop.permute.xlu2 %365 }
  0x73   : > { %v388_v3 = vpop.permute.xlu2 %387 }
  0x74   : > { %400 = vmatpush.bf16.msrb.mxu1 %v388_v3 }
  0x77   : > { %735 = vmatmul.msk.bf16.vlgmr.msrb.gmra.mxu1 %vm285_vm0, %v734_v4 }
  0x7b   : > { %v454_v9 = vpop.permute.xlu2 %453 }
  0x82   : > { %v322_v5 = vpop.permute.xlu0 %321  ;;  %v344_v6 = vpop.permute.xlu1 %343 }
  0x83   : > { %334 = vmatpush.bf16.msra.mxu2 %v322_v5  ;;  %356 = vmatpush.bf16.msra.mxu3 %v344_v6  ;;  %v586_v17 = vpop.permute.xlu2 %585 }
  0x86   : > { %729 = vmatmul.msk.bf16.vlgmr.msra.gmra.mxu2 %vm285_vm0, %v728_v7  ;;  %731 = vmatmul.msk.bf16.vlgmr.msra.gmra.mxu3 %vm285_vm0, %v730_v8 }
  0x8a   : > { %v283_v10 = vpop.permute.xlu0 %282  ;;  %v410_v11 = vpop.permute.xlu1 %409 }
  0x8b   : > { %296 = vmatpush.bf16.msra.mxu0 %v283_v10  ;;  %422 = vmatpush.bf16.msrb.mxu2 %v410_v11  ;;  %v609_v10 = vpop.permute.xlu2 %608 }
  0x8e   : > { %726 = vmatmul.msk.bf16.vlgmr.msra.gmra.mxu0 %vm285_vm0, %v721_v12 }
  0x8f   : > { %378 = vmatpush.bf16.msrb.mxu0 %v366_v2 }
  0x91   : > { %v315_v33 = vpop.f32.mrf.mxu1 }
  0x92   : > { %v432_v13 = vpop.permute.xlu0 %431  ;;  %v498_v14 = vpop.permute.xlu1 %497 }
  0x93   : > { %466 = vmatpush.bf16.msra.mxu0 %v454_v9  ;;  %444 = vmatpush.bf16.msrb.mxu3 %v432_v13  ;;  %v620_v13 = vld [vmem:[%s263_s10] sm:$0xf] }
  0x94   : > { %510 = vmatpush.bf16.msra.mxu2 %v498_v14 }
  0x96   : > { %737 = vmatmul.msk.bf16.vlgmr.msrb.gmra.mxu2 %vm285_vm0, %v736_v15  ;;  %739 = vmatmul.msk.bf16.vlgmr.msrb.gmra.mxu3 %vm285_vm0, %v738_v16 }
  0x98   : > { %598 = vmatpush.bf16.msrb.mxu2 %v586_v17  ;;  %v621_v17 = vunpack.c.l.bf16 %v620_v13 }
  0x99   : > { %v317_v34 = vpop.f32.mrf.mxu1 }
  0x9a   : > { %v476_v18 = vpop.permute.xlu0 %475  ;;  %v520_v19 = vpop.permute.xlu1 %519 }
  0x9b   : > { %488 = vmatpush.bf16.msra.mxu1 %v476_v18  ;;  %532 = vmatpush.bf16.msra.mxu3 %v520_v19 }
  0x9e   : > { %733 = vmatmul.msk.bf16.vlgmr.msrb.gmra.mxu0 %vm285_vm0, %v732_v20  ;;  %743 = vmatmul.msk.bf16.vlgmr.msra.gmra.mxu1 %vm285_vm0, %v742_v21 }
  0xa2   : > { %v542_v25 = vpop.permute.xlu0 %541  ;;  %v564_v26 = vpop.permute.xlu1 %563 }
  0xa3   : > { %554 = vmatpush.bf16.msrb.mxu0 %v542_v25  ;;  %576 = vmatpush.bf16.msrb.mxu1 %v564_v26 }
  0xa6   : > { %745 = vmatmul.msk.bf16.vlgmr.msra.gmra.mxu2 %vm285_vm0, %v744_v27  ;;  %747 = vmatmul.msk.bf16.vlgmr.msra.gmra.mxu3 %vm285_vm0, %v746_v28 }
  0xaa   : > { %v616_v14 = vpop.permute.xlu0 %615 }
  0xae   : > { %741 = vmatmul.msk.bf16.vlgmr.msra.gmra.mxu0 %vm285_vm0, %v740_v29  ;;  %751 = vmatmul.msk.bf16.vlgmr.msrb.gmra.mxu1 %vm285_vm0, %v750_v30 }
  0xb6   : > { %753 = vmatmul.msk.bf16.vlgmr.msrb.gmra.mxu2 %vm285_vm0, %v752_v31 }
  0xbe   : > { %749 = vmatmul.msk.bf16.vlgmr.msrb.gmra.mxu0 %vm285_vm0, %v748_v32 }
  0xf4   : > { %v402_v35 = vpop.f32.mrf.mxu1 }
  0xfc   : > { %v404_v36 = vpop.f32.mrf.mxu1 }
 0x109   : > { %v336_v37 = vpop.f32.mrf.mxu2  ;;  %v358_v38 = vpop.f32.mrf.mxu3 }
 0x10b   : > { %v298_v39 = vpop.f32.mrf.mxu0 }
 0x10c   : > { %v316_v43 = vadd.f32 %v315_v33, %v298_v39 }
 0x10e   : > { %v340_v46 = vadd.f32 %v336_v37, %v316_v43 }
 0x110   : > { %v362_v49 = vadd.f32 %v358_v38, %v340_v46 }
 0x111   : > { %v338_v40 = vpop.f32.mrf.mxu2  ;;  %v360_v41 = vpop.f32.mrf.mxu3 }
 0x113   : > { %v300_v42 = vpop.f32.mrf.mxu0 }
 0x119   : > { %v424_v44 = vpop.f32.mrf.mxu2  ;;  %v446_v45 = vpop.f32.mrf.mxu3 }
 0x11b   : > { %v380_v47 = vpop.f32.mrf.mxu0  ;;  %v490_v48 = vpop.f32.mrf.mxu1 }
 0x11c   : > { %v384_v50 = vadd.f32 %v380_v47, %v362_v49 }
 0x11e   : > { %v406_v55 = vadd.f32 %v402_v35, %v384_v50 }
 0x120   : > { %v428_v56 = vadd.f32 %v424_v44, %v406_v55 }
 0x121   : > { %v426_v51 = vpop.f32.mrf.mxu2  ;;  %v448_v52 = vpop.f32.mrf.mxu3 }
 0x122   : > { %v450_v61 = vadd.f32 %v446_v45, %v428_v56 }
 0x123   : > { %v382_v53 = vpop.f32.mrf.mxu0  ;;  %v492_v54 = vpop.f32.mrf.mxu1 }
 0x129   : > { %v512_v57 = vpop.f32.mrf.mxu2  ;;  %v534_v58 = vpop.f32.mrf.mxu3 }
 0x12b   : > { %v468_v59 = vpop.f32.mrf.mxu0  ;;  %v578_v60 = vpop.f32.mrf.mxu1 }
 0x12c   : > { %v472_v62 = vadd.f32 %v468_v59, %v450_v61 }
 0x12e   : > { %v494_v1 = vadd.f32 %v490_v48, %v472_v62 }
 0x130   : > { %v516_v4 = vadd.f32 %v512_v57, %v494_v1 }
 0x131   : > { %v514_v63 = vpop.f32.mrf.mxu2  ;;  %v536_v0 = vpop.f32.mrf.mxu3 }
 0x132   : > { %v538_v6 = vadd.f32 %v534_v58, %v516_v4 }
 0x133   : > { %v470_v2 = vpop.f32.mrf.mxu0  ;;  %v580_v3 = vpop.f32.mrf.mxu1 }
 0x139   : > { %v600_v5 = vpop.f32.mrf.mxu2 }
 0x13b   : > { %v556_v7 = vpop.f32.mrf.mxu0 }
 0x13c   : > { %v560_v8 = vadd.f32 %v556_v7, %v538_v6 }
 0x13e   : > { %v582_v9 = vadd.f32 %v578_v60, %v560_v8 }
 0x140   : > { %v604_v11 = vadd.f32 %v600_v5, %v582_v9 }
 0x141   : > { %v602_v12 = vpop.f32.mrf.mxu2 }
 0x142   : > { %v611_v15 = vmul.f32 %v609_v10, %v604_v11 }
 0x143   : > { %v558_v16 = vpop.f32.mrf.mxu0 }
 0x144   : > { %v618_v18 = vadd.f32 %v616_v14, %v611_v15 }
 0x146   : > { %v619_v19 = vmax.f32 %v618_v18, 0.0 }
 0x148   : > { %v622_v20 = vadd.f32 %v621_v17, %v619_v19 }
 0x14a   : > { %v623_v21 = vpack.c.bf16 %v622_v20, %v622_v20 }
 0x14c   : > { %625 = vst.msk [vmem:[%s270_s18] sm:$0xf] %vm624_vm1, %v623_v21 }
 0x14d PF: > { %s15_s20 = sadd.s32 1, %s821_s20   ;;  %s980_s18 = smov %s817_s19 }
 0x14e   : > { %p12_p5 = scmp.ge.s32.totalorder %s15_s20, 4   ;;  %s981_s19 = smov %s983_s21 }
 0x150   :  { %14 = sbr.rel (!%p12_p5) target bundleno = 2 (0x2), region = 87 }

</bundles_post_ra>
